<compile_context>
chip_gen: v5e
topology: v5e:2x2
jax: 0.10.0
libtpu: 0.0.40
codegen_flags: <defaults>
</compile_context>

<pallas_src>
import jax
import jax.numpy as jnp
from jax.experimental import pallas as pl
from jax.experimental.pallas import tpu as pltpu

BN_EPS = 1e-5


def _round_up(n, m):
    return ((n + m - 1) // m) * m


def _pad_to(a, shape):
    pads = [(0, s - d) for d, s in zip(a.shape, shape)]
    return jnp.pad(a, pads)


# ---------------------------------------------------------------------------
# Kernel: one batch tile per grid step.
# ---------------------------------------------------------------------------
def net_kernel(
    x_ref,            # (Bt, 512, HW)   backbone feature map tile
    meta_ref,         # (Bt, n_meta)
    w_fc_ref, b_fc_ref,          # fc: 512 -> 512 (cols 500: are zero)
    w1_ref, b1_ref,              # meta L1 (BN folded): n_meta -> 512
    w2_ref, b2_ref,              # meta L2 (BN folded): 512 -> 256
    w_out_cnn_ref, w_out_meta_ref, b_out_ref,   # head, pre-split (512,1)/(256,1)
    out_ref,          # (Bt, 1)
):
    f32 = jnp.float32

    # ---- CNN branch: global average pool over spatial, then fc ----
    x = x_ref[...].astype(f32)                    # (Bt, 512, HW)
    pooled = jnp.mean(x, axis=2)                  # (Bt, 512)  lane-dense
    cnn = jnp.dot(pooled, w_fc_ref[...],
                  preferred_element_type=f32) + b_fc_ref[...]        # (Bt, 512)

    # ---- meta branch (BatchNorm folded into weights; Dropout = identity) ----
    m = meta_ref[...].astype(f32)                 # (Bt, n_meta)
    h = jnp.dot(m, w1_ref[...], preferred_element_type=f32) + b1_ref[...]   # (Bt, 512)
    h = jnp.maximum(h, 0.0)
    h = jnp.dot(h, w2_ref[...], preferred_element_type=f32) + b2_ref[...]   # (Bt, 256)
    h = jnp.maximum(h, 0.0)

    # ---- concat + output Linear, as split matmuls on pre-split weights ----
    out = (jnp.dot(cnn, w_out_cnn_ref[...], preferred_element_type=f32)
           + jnp.dot(h, w_out_meta_ref[...], preferred_element_type=f32)
           + b_out_ref[...])                      # (Bt, 1)
    out_ref[...] = out.astype(out_ref.dtype)


# ---------------------------------------------------------------------------
# Wrapper: BN folding, zero-padding to MXU-friendly dims, batch-tiled grid.
# ---------------------------------------------------------------------------
def prepare_params(p):
    """Fold BatchNorm into the Linear weights and zero-pad feature dims."""
    s1 = p["g1"] * jax.lax.rsqrt(p["v1"] + BN_EPS)            # (1, 500)
    w1 = p["w1"] * s1                                         # (n_meta, 500)
    b1 = (p["b1"] - p["m1"]) * s1 + p["be1"]
    s2 = p["g2"] * jax.lax.rsqrt(p["v2"] + BN_EPS)            # (1, 250)
    w2 = p["w2"] * s2                                         # (500, 250)
    b2 = (p["b2"] - p["m2"]) * s2 + p["be2"]

    n_meta = p["w1"].shape[0]
    return dict(
        w_fc=_pad_to(p["w_fc"], (512, 512)),
        b_fc=_pad_to(p["b_fc"], (1, 512)),
        w1=_pad_to(w1, (n_meta, 512)),
        b1=_pad_to(b1, (1, 512)),
        w2=_pad_to(w2, (512, 256)),
        b2=_pad_to(b2, (1, 256)),
        w_out_cnn=_pad_to(p["w_out"][:500, :], (512, 1)),
        w_out_meta=_pad_to(p["w_out"][500:, :], (256, 1)),
        b_out=p["b_out"],
    )


def net_forward(x, meta, params, *, batch_tile=64):
    """x: (B, 512, H, W) backbone feature map (NCHW), meta: (B, n_meta)."""
    pp = prepare_params(params)

    B, C, H, W = x.shape
    assert C == 512, "arch.fc expects 512 input channels"
    HW = H * W
    n_meta = meta.shape[1]

    x3 = x.reshape(B, C, HW)                     # free view: merge trailing dims

    # Batch tile: multiple of 8 sublanes; default 64 keeps 2 x-buffers well
    # inside v7x's 64 MiB VMEM while amortizing per-grid-step overhead.
    Bt = _round_up(max(8, min(batch_tile, _round_up(B, 8))), 8)
    Bp = _round_up(B, Bt)
    if Bp != B:                                   # pad ragged batch with zeros
        x3 = jnp.pad(x3, ((0, Bp - B), (0, 0), (0, 0)))
        meta = jnp.pad(meta, ((0, Bp - B), (0, 0)))

    const2 = lambda i: (0, 0)
    in_specs = [
        pl.BlockSpec((Bt, C, HW), lambda i: (i, 0, 0)),     # x tile (pipelined)
        pl.BlockSpec((Bt, n_meta), lambda i: (i, 0)),       # meta tile
        pl.BlockSpec((512, 512), const2),                   # w_fc (resident)
        pl.BlockSpec((1, 512), const2),                     # b_fc
        pl.BlockSpec((n_meta, 512), const2),                # w1 (BN folded)
        pl.BlockSpec((1, 512), const2),                     # b1
        pl.BlockSpec((512, 256), const2),                   # w2 (BN folded)
        pl.BlockSpec((1, 256), const2),                     # b2
        pl.BlockSpec((512, 1), const2),                     # w_out_cnn
        pl.BlockSpec((256, 1), const2),                     # w_out_meta
        pl.BlockSpec((1, 1), const2),                       # b_out
    ]

    out = pl.pallas_call(
        net_kernel,
        out_shape=jax.ShapeDtypeStruct((Bp, 1), jnp.float32),
        grid=(Bp // Bt,),
        in_specs=in_specs,
        out_specs=pl.BlockSpec((Bt, 1), lambda i: (i, 0)),
        compiler_params=pltpu.CompilerParams(
            dimension_semantics=("parallel",)),
    )(x3, meta,
      pp["w_fc"], pp["b_fc"],
      pp["w1"], pp["b1"],
      pp["w2"], pp["b2"],
      pp["w_out_cnn"], pp["w_out_meta"], pp["b_out"])

    return out[:B]


# ---------------------------------------------------------------------------
# Deterministic parameter init (PyTorch-Linear-like) + pure-JAX reference.
# ---------------------------------------------------------------------------
def init_params(key, n_meta_features: int):
    ks = jax.random.split(key, 8)

    def lin(k, fan_in, fan_out):
        bound = 1.0 / jnp.sqrt(fan_in)
        kw, kb = jax.random.split(k)
        w = jax.random.uniform(kw, (fan_in, fan_out), jnp.float32, -bound, bound)
        b = jax.random.uniform(kb, (1, fan_out), jnp.float32, -bound, bound)
        return w, b

    w_fc, b_fc = lin(ks[0], 512, 500)
    w1, b1 = lin(ks[1], n_meta_features, 500)
    w2, b2 = lin(ks[2], 500, 250)
    w_out, b_out = lin(ks[3], 750, 1)

    return dict(
        w_fc=w_fc, b_fc=b_fc,
        w1=w1, b1=b1,
        g1=jnp.ones((1, 500), jnp.float32), be1=jnp.zeros((1, 500), jnp.float32),
        m1=0.1 * jax.random.normal(ks[4], (1, 500), jnp.float32),
        v1=jnp.ones((1, 500), jnp.float32) + 0.05 * jax.random.uniform(ks[5], (1, 500)),
        w2=w2, b2=b2,
        g2=jnp.ones((1, 250), jnp.float32), be2=jnp.zeros((1, 250), jnp.float32),
        m2=0.1 * jax.random.normal(ks[6], (1, 250), jnp.float32),
        v2=jnp.ones((1, 250), jnp.float32) + 0.05 * jax.random.uniform(ks[7], (1, 250)),
        w_out=w_out, b_out=b_out,
    )


def reference_forward(x, meta, p):
    pooled = jnp.mean(x, axis=(2, 3))
    cnn = pooled @ p["w_fc"] + p["b_fc"]
    h = meta @ p["w1"] + p["b1"]
    h = (h - p["m1"]) / jnp.sqrt(p["v1"] + BN_EPS) * p["g1"] + p["be1"]
    h = jnp.maximum(h, 0.0)
    h = h @ p["w2"] + p["b2"]
    h = (h - p["m2"]) / jnp.sqrt(p["v2"] + BN_EPS) * p["g2"] + p["be2"]
    h = jnp.maximum(h, 0.0)
    feats = jnp.concatenate([cnn, h], axis=1)
    return feats @ p["w_out"] + p["b_out"]


if __name__ == "__main__":
    key = jax.random.PRNGKey(0)
    k_x, k_meta, k_p = jax.random.split(key, 3)

    # Small shapes: B=10 exercises the ragged-batch padding and a 2-step grid
    # (batch_tile=8); C must be 512 to feed the replaced arch.fc.
    B, C, H, W = 10, 512, 8, 8
    n_meta = 16

    x = jax.random.normal(k_x, (B, C, H, W), jnp.float32)
    meta = jax.random.normal(k_meta, (B, n_meta), jnp.float32)
    params = init_params(k_p, n_meta)

    out = net_forward(x, meta, params, batch_tile=8)
    out = jax.block_until_ready(out)

    ref = reference_forward(x, meta, params)
    assert out.shape == (B, 1)
    assert jnp.allclose(out, ref, atol=1e-4, rtol=1e-4), (out, ref)
    print("KERNEL_OK")
</pallas_src>

<mosaic_0001>
module attributes {stable_mosaic.version = 11 : i64} {
  func.func @net_kernel(%arg0: i32, %arg1: memref<8x512x64xf32, #tpu.memory_space<vmem>>, %arg2: memref<8x16xf32, #tpu.memory_space<vmem>>, %arg3: memref<512x512xf32, #tpu.memory_space<vmem>>, %arg4: memref<1x512xf32, #tpu.memory_space<vmem>>, %arg5: memref<16x512xf32, #tpu.memory_space<vmem>>, %arg6: memref<1x512xf32, #tpu.memory_space<vmem>>, %arg7: memref<512x256xf32, #tpu.memory_space<vmem>>, %arg8: memref<1x256xf32, #tpu.memory_space<vmem>>, %arg9: memref<512x1xf32, #tpu.memory_space<vmem>>, %arg10: memref<256x1xf32, #tpu.memory_space<vmem>>, %arg11: memref<1x1xf32, #tpu.memory_space<vmem>>, %arg12: memref<8x1xf32, #tpu.memory_space<vmem>>) attributes {dimension_semantics = [#tpu.dimension_semantics<parallel>], iteration_bounds = array<i64: 2>, scalar_prefetch = 0 : i64, scratch_operands = 0 : i64, tpu.core_type = #tpu.core_type<tc>, window_params = [{transform_indices = @transform_0, window_bounds = array<i64: 8, 512, 64>}, {transform_indices = @transform_1, window_bounds = array<i64: 8, 16>}, {pipeline_mode = #tpu.pipeline_mode<synchronous>, transform_indices = @transform_2, window_bounds = array<i64: 512, 512>}, {pipeline_mode = #tpu.pipeline_mode<synchronous>, transform_indices = @transform_3, window_bounds = array<i64: 1, 512>}, {pipeline_mode = #tpu.pipeline_mode<synchronous>, transform_indices = @transform_4, window_bounds = array<i64: 16, 512>}, {pipeline_mode = #tpu.pipeline_mode<synchronous>, transform_indices = @transform_5, window_bounds = array<i64: 1, 512>}, {pipeline_mode = #tpu.pipeline_mode<synchronous>, transform_indices = @transform_6, window_bounds = array<i64: 512, 256>}, {pipeline_mode = #tpu.pipeline_mode<synchronous>, transform_indices = @transform_7, window_bounds = array<i64: 1, 256>}, {pipeline_mode = #tpu.pipeline_mode<synchronous>, transform_indices = @transform_8, window_bounds = array<i64: 512, 1>}, {pipeline_mode = #tpu.pipeline_mode<synchronous>, transform_indices = @transform_9, window_bounds = array<i64: 256, 1>}, {pipeline_mode = #tpu.pipeline_mode<synchronous>, transform_indices = @transform_10, window_bounds = array<i64: 1, 1>}, {transform_indices = @transform_11, window_bounds = array<i64: 8, 1>}]} {
    %c0 = arith.constant 0 : index
    %c0_0 = arith.constant 0 : index
    %c0_1 = arith.constant 0 : index
    %0 = vector.load %arg1[%c0, %c0_0, %c0_1] : memref<8x512x64xf32, #tpu.memory_space<vmem>>, vector<8x512x64xf32>
    %cst = arith.constant dense<0.000000e+00> : vector<8x512xf32>
    %1 = vector.multi_reduction <add>, %0, %cst [2] : vector<8x512x64xf32> to vector<8x512xf32>
    %cst_2 = arith.constant 6.400000e+01 : f32
    %2 = vector.broadcast %cst_2 : f32 to vector<8x512xf32>
    %3 = arith.divf %1, %2 : vector<8x512xf32>
    %c0_3 = arith.constant 0 : index
    %c0_4 = arith.constant 0 : index
    %4 = vector.load %arg3[%c0_3, %c0_4] : memref<512x512xf32, #tpu.memory_space<vmem>>, vector<512x512xf32>
    %cst_5 = arith.constant dense<0.000000e+00> : vector<8x512xf32>
    %5 = tpu.matmul %3, %4, %cst_5 {dimension_numbers = #tpu.dot_dimension_numbers<[1], [0], [0], [1], [0, 0, 1, 1], [], []>} : vector<8x512xf32>, vector<512x512xf32>, vector<8x512xf32> -> vector<8x512xf32>
    %c0_6 = arith.constant 0 : index
    %c0_7 = arith.constant 0 : index
    %6 = vector.load %arg4[%c0_6, %c0_7] : memref<1x512xf32, #tpu.memory_space<vmem>>, vector<1x512xf32>
    %7 = vector.broadcast %6 : vector<1x512xf32> to vector<8x512xf32>
    %8 = arith.addf %5, %7 : vector<8x512xf32>
    %c0_8 = arith.constant 0 : index
    %c0_9 = arith.constant 0 : index
    %9 = vector.load %arg2[%c0_8, %c0_9] : memref<8x16xf32, #tpu.memory_space<vmem>>, vector<8x16xf32>
    %c0_10 = arith.constant 0 : index
    %c0_11 = arith.constant 0 : index
    %10 = vector.load %arg5[%c0_10, %c0_11] : memref<16x512xf32, #tpu.memory_space<vmem>>, vector<16x512xf32>
    %cst_12 = arith.constant dense<0.000000e+00> : vector<8x512xf32>
    %11 = tpu.matmul %9, %10, %cst_12 {dimension_numbers = #tpu.dot_dimension_numbers<[1], [0], [0], [1], [0, 0, 1, 1], [], []>} : vector<8x16xf32>, vector<16x512xf32>, vector<8x512xf32> -> vector<8x512xf32>
    %c0_13 = arith.constant 0 : index
    %c0_14 = arith.constant 0 : index
    %12 = vector.load %arg6[%c0_13, %c0_14] : memref<1x512xf32, #tpu.memory_space<vmem>>, vector<1x512xf32>
    %13 = vector.broadcast %12 : vector<1x512xf32> to vector<8x512xf32>
    %14 = arith.addf %11, %13 : vector<8x512xf32>
    %cst_15 = arith.constant 0.000000e+00 : f32
    %15 = vector.broadcast %cst_15 : f32 to vector<8x512xf32>
    %16 = arith.maximumf %14, %15 : vector<8x512xf32>
    %c0_16 = arith.constant 0 : index
    %c0_17 = arith.constant 0 : index
    %17 = vector.load %arg7[%c0_16, %c0_17] : memref<512x256xf32, #tpu.memory_space<vmem>>, vector<512x256xf32>
    %cst_18 = arith.constant dense<0.000000e+00> : vector<8x256xf32>
    %18 = tpu.matmul %16, %17, %cst_18 {dimension_numbers = #tpu.dot_dimension_numbers<[1], [0], [0], [1], [0, 0, 1, 1], [], []>} : vector<8x512xf32>, vector<512x256xf32>, vector<8x256xf32> -> vector<8x256xf32>
    %c0_19 = arith.constant 0 : index
    %c0_20 = arith.constant 0 : index
    %19 = vector.load %arg8[%c0_19, %c0_20] : memref<1x256xf32, #tpu.memory_space<vmem>>, vector<1x256xf32>
    %20 = vector.broadcast %19 : vector<1x256xf32> to vector<8x256xf32>
    %21 = arith.addf %18, %20 : vector<8x256xf32>
    %cst_21 = arith.constant 0.000000e+00 : f32
    %22 = vector.broadcast %cst_21 : f32 to vector<8x256xf32>
    %23 = arith.maximumf %21, %22 : vector<8x256xf32>
    %c0_22 = arith.constant 0 : index
    %c0_23 = arith.constant 0 : index
    %24 = vector.load %arg9[%c0_22, %c0_23] : memref<512x1xf32, #tpu.memory_space<vmem>>, vector<512x1xf32>
    %cst_24 = arith.constant dense<0.000000e+00> : vector<8x1xf32>
    %25 = tpu.matmul %8, %24, %cst_24 {dimension_numbers = #tpu.dot_dimension_numbers<[1], [0], [0], [1], [0, 0, 1, 1], [], []>} : vector<8x512xf32>, vector<512x1xf32>, vector<8x1xf32> -> vector<8x1xf32>
    %c0_25 = arith.constant 0 : index
    %c0_26 = arith.constant 0 : index
    %26 = vector.load %arg10[%c0_25, %c0_26] : memref<256x1xf32, #tpu.memory_space<vmem>>, vector<256x1xf32>
    %cst_27 = arith.constant dense<0.000000e+00> : vector<8x1xf32>
    %27 = tpu.matmul %23, %26, %cst_27 {dimension_numbers = #tpu.dot_dimension_numbers<[1], [0], [0], [1], [0, 0, 1, 1], [], []>} : vector<8x256xf32>, vector<256x1xf32>, vector<8x1xf32> -> vector<8x1xf32>
    %28 = arith.addf %25, %27 : vector<8x1xf32>
    %c0_28 = arith.constant 0 : index
    %c0_29 = arith.constant 0 : index
    %29 = vector.load %arg11[%c0_28, %c0_29] : memref<1x1xf32, #tpu.memory_space<vmem>>, vector<1x1xf32>
    %30 = vector.broadcast %29 : vector<1x1xf32> to vector<8x1xf32>
    %31 = arith.addf %28, %30 : vector<8x1xf32>
    %c0_30 = arith.constant 0 : index
    %c0_31 = arith.constant 0 : index
    %32 = vector.load %arg12[%c0_30, %c0_31] : memref<8x1xf32, #tpu.memory_space<vmem>>, vector<8x1xf32>
    tpu.vector_store %arg12[%c0_30, %c0_31], %31 {strides = array<i32>} : memref<8x1xf32, #tpu.memory_space<vmem>>, vector<8x1xf32>,
    return
  }
  func.func @transform_0(%arg0: i32) -> (i32, i32, i32) {
    %c0_i32 = arith.constant 0 : i32
    %c0_i32_0 = arith.constant 0 : i32
    %c0_i32_1 = arith.constant 0 : i32
    return %arg0, %c0_i32, %c0_i32_0 : i32, i32, i32
  }
  func.func @transform_1(%arg0: i32) -> (i32, i32) {
    %c0_i32 = arith.constant 0 : i32
    %c0_i32_0 = arith.constant 0 : i32
    return %arg0, %c0_i32 : i32, i32
  }
  func.func @transform_2(%arg0: i32) -> (i32, i32) {
    %c0_i32 = arith.constant 0 : i32
    %c0_i32_0 = arith.constant 0 : i32
    %c0_i32_1 = arith.constant 0 : i32
    return %c0_i32, %c0_i32_0 : i32, i32
  }
  func.func @transform_3(%arg0: i32) -> (i32, i32) {
    %c0_i32 = arith.constant 0 : i32
    %c0_i32_0 = arith.constant 0 : i32
    %c0_i32_1 = arith.constant 0 : i32
    return %c0_i32, %c0_i32_0 : i32, i32
  }
  func.func @transform_4(%arg0: i32) -> (i32, i32) {
    %c0_i32 = arith.constant 0 : i32
    %c0_i32_0 = arith.constant 0 : i32
    %c0_i32_1 = arith.constant 0 : i32
    return %c0_i32, %c0_i32_0 : i32, i32
  }
  func.func @transform_5(%arg0: i32) -> (i32, i32) {
    %c0_i32 = arith.constant 0 : i32
    %c0_i32_0 = arith.constant 0 : i32
    %c0_i32_1 = arith.constant 0 : i32
    return %c0_i32, %c0_i32_0 : i32, i32
  }
  func.func @transform_6(%arg0: i32) -> (i32, i32) {
    %c0_i32 = arith.constant 0 : i32
    %c0_i32_0 = arith.constant 0 : i32
    %c0_i32_1 = arith.constant 0 : i32
    return %c0_i32, %c0_i32_0 : i32, i32
  }
  func.func @transform_7(%arg0: i32) -> (i32, i32) {
    %c0_i32 = arith.constant 0 : i32
    %c0_i32_0 = arith.constant 0 : i32
    %c0_i32_1 = arith.constant 0 : i32
    return %c0_i32, %c0_i32_0 : i32, i32
  }
  func.func @transform_8(%arg0: i32) -> (i32, i32) {
    %c0_i32 = arith.constant 0 : i32
    %c0_i32_0 = arith.constant 0 : i32
    %c0_i32_1 = arith.constant 0 : i32
    return %c0_i32, %c0_i32_0 : i32, i32
  }
  func.func @transform_9(%arg0: i32) -> (i32, i32) {
    %c0_i32 = arith.constant 0 : i32
    %c0_i32_0 = arith.constant 0 : i32
    %c0_i32_1 = arith.constant 0 : i32
    return %c0_i32, %c0_i32_0 : i32, i32
  }
  func.func @transform_10(%arg0: i32) -> (i32, i32) {
    %c0_i32 = arith.constant 0 : i32
    %c0_i32_0 = arith.constant 0 : i32
    %c0_i32_1 = arith.constant 0 : i32
    return %c0_i32, %c0_i32_0 : i32, i32
  }
  func.func @transform_11(%arg0: i32) -> (i32, i32) {
    %c0_i32 = arith.constant 0 : i32
    %c0_i32_0 = arith.constant 0 : i32
    return %arg0, %c0_i32 : i32, i32
  }
}

</mosaic_0001>

<bundles_post_ra>
// kernel: tpu_custom_call.1
= control target key start
LH: loop header
LB: loop body
LE: loop exit
PB: predicated region body
PF: predicated region fallthrough
CT: control target
= control target key end

     0   :  { %s5930_s19 = smov 0   ;;  %s11981_s0 = inlined_call_operand.vmem [shape: f32[16,512,64], index: 0, kind: input, shape index: {}]   ;;  %s11982_s1 = inlined_call_operand.vmem [shape: f32[16,16], index: 1, kind: input, shape index: {}]   ;;  %s11983_s2 = inlined_call_operand.vmem [shape: f32[512,512], index: 2, kind: input, shape index: {}]   ;;  %s11984_s3 = inlined_call_operand.vmem [shape: f32[1,512], index: 3, kind: input, shape index: {}]   ;;  %s11985_s4 = inlined_call_operand.vmem [shape: f32[16,512], index: 4, kind: input, shape index: {}]   ;;  %s11986_s5 = inlined_call_operand.vmem [shape: f32[1,512], index: 5, kind: input, shape index: {}]   ;;  %s11987_s6 = inlined_call_operand.vmem [shape: f32[512,256], index: 6, kind: input, shape index: {}]   ;;  %s11988_s7 = inlined_call_operand.vmem [shape: f32[1,256], index: 7, kind: input, shape index: {}]   ;;  %s11989_s8 = inlined_call_operand.vmem [shape: f32[512,1], index: 8, kind: input, shape index: {}]   ;;  %s11990_s9 = inlined_call_operand.vmem [shape: f32[256,1], index: 9, kind: input, shape index: {}]   ;;  %s11991_s10 = inlined_call_operand.<no memory space> [shape: f32[1,1], index: 10, kind: input, shape index: {}]   ;;  %s11992_s11 = inlined_call_operand.vmem [shape: f32[16,1], index: 11, kind: output, shape index: {}]  }
   0x1   :  { %v16_v0 = vstv %s11991_s10 }
   0x2   :  { %17 = vst [vmem:[#allocation2] sm:$0x1] %v16_v0 }
   0x3 LB: > { %s5936_s20 = sadd.s32 4294967295, %s5864_s19   ;;  %p5833_p0 = scmp.ge.s32.totalorder %s5864_s19, 1  ;;  %s5864_s19 = sphi %s5930_s19, %s23_s19  }
   0x4   : > { %p350_p1 = scmp.lt.s32.totalorder %s5864_s19, 3 }
   0x6   : > { %p351_p2 = pnand %p5833_p0, %p350_p1 }
   0x8   : > { %354 = sbr.rel (%p351_p2) target bundleno = 1927 (0x787), region = 64 }
   0xd   : > { %s5834_s21 = sshll.u32 %s5936_s20, 3  ;;  %vm921_vm0 = vcmask 523264   ;;  %vm3760_vm2 = vcmask 130112   ;;  %vm12021_vm3 = vcmask 195712   ;;  %vm12020_vm4 = vcmask 261312   ;;  %p401_p4 = scmp.lt.s32.totalorder %s5936_s20, 1 }
   0xe   : > { %p395_p3 = scmp.lt.s32.totalorder %s5834_s21, 15  ;;  %vm12019_vm5 = vcmask 326912   ;;  %vm12007_vm6 = vcmask 392512   ;;  %vm12018_vm7 = vcmask 458112   ;;  %vm12016_vm8 = vcmask 523712  }
   0xf   : > { %vm12017_vm9 = vcmask 589312   ;;  %vm3792_vm10 = vcmask 654912   ;;  %vm3796_vm11 = vcmask 720512   ;;  %vm3800_vm12 = vcmask 786112   ;;  %s12857_s20 = smov (!%p401_p4, %s5936_s20), 1 }
  0x10   : > { %s12855_s21 = smov (!%p395_p3, %s5834_s21), 15  ;;  %vm3804_vm13 = vcmask 851712   ;;  %vm3808_vm14 = vcmask 917312   ;;  %vm3812_vm15 = vcmask 982912  }
  0x11   : > { %s5845_s10 = sshll.u32 %s12855_s21, 9 }
  0x12   : > { %s5944_s24 = scalar_lea.vmem %s11981_s0, %s5845_s10  ;;  %s5837_s10 = sshll.u32 %s12857_s20, 3 }
  0x13   : > { %v413_v1 = vld [vmem:[%s5944_s24 + $0x20] sm:$0xff]  ;;  %v411_v2 = vld [vmem:[%s5944_s24 + $0x10] sm:$0xff]  ;;  %v414_v7 = vld [vmem:[%s5944_s24 + $0x28] sm:$0xff]  ;;  %s404_s17 = scalar_lea.vmem %s11982_s1, %s5837_s10 }
  0x14   : > { %v409_v3 = vld [vmem:[%s5944_s24] sm:$0xff]  ;;  %v934_v4 = vsel %vm921_vm0, %v413_v1, 0.0  ;;  %v928_v5 = vsel %vm921_vm0, %v411_v2, 0.0  ;;  %v412_v8 = vld [vmem:[%s5944_s24 + $0x18] sm:$0xff]  ;;  %v410_v9 = vld [vmem:[%s5944_s24 + $0x8] sm:$0xff]  ;;  %v937_v10 = vsel %vm921_vm0, %v414_v7, 0.0 }
  0x15   : > { %v922_v6 = vsel %vm921_vm0, %v409_v3, 0.0  ;;  %935 = vadd.xlane.f32.xlu2 %v934_v4  ;;  %929 = vadd.xlane.f32.xlu1 %v928_v5  ;;  %v931_v11 = vsel %vm921_vm0, %v412_v8, 0.0  ;;  %v925_v12 = vsel %vm921_vm0, %v410_v9, 0.0  ;;  %v417_v13 = vld [vmem:[%s5944_s24 + $0x40] sm:$0xff]  ;;  %v416_v14 = vld [vmem:[%s5944_s24 + $0x38] sm:$0xff]  ;;  %v415_v15 = vld [vmem:[%s5944_s24 + $0x30] sm:$0xff] }
  0x16   : > { %923 = vadd.xlane.f32.xlu0 %v922_v6  ;;  %v946_v16 = vsel %vm921_vm0, %v417_v13, 0.0  ;;  %v943_v17 = vsel %vm921_vm0, %v416_v14, 0.0  ;;  %v940_v18 = vsel %vm921_vm0, %v415_v15, 0.0  ;;  %v420_v19 = vld [vmem:[%s5944_s24 + $0x58] sm:$0xff]  ;;  %v419_v20 = vld [vmem:[%s5944_s24 + $0x50] sm:$0xff]  ;;  %v418_v21 = vld [vmem:[%s5944_s24 + $0x48] sm:$0xff] }
  0x17   : > { %v955_v22 = vsel %vm921_vm0, %v420_v19, 0.0  ;;  %v952_v23 = vsel %vm921_vm0, %v419_v20, 0.0  ;;  %v949_v24 = vsel %vm921_vm0, %v418_v21, 0.0  ;;  %v423_v25 = vld [vmem:[%s5944_s24 + $0x70] sm:$0xff]  ;;  %v422_v26 = vld [vmem:[%s5944_s24 + $0x68] sm:$0xff]  ;;  %v421_v27 = vld [vmem:[%s5944_s24 + $0x60] sm:$0xff] }
  0x18   : > { %v964_v28 = vsel %vm921_vm0, %v423_v25, 0.0  ;;  %v961_v29 = vsel %vm921_vm0, %v422_v26, 0.0  ;;  %v958_v30 = vsel %vm921_vm0, %v421_v27, 0.0  ;;  %v426_v31 = vld [vmem:[%s5944_s24 + $0x88] sm:$0xff]  ;;  %v425_v32 = vld [vmem:[%s5944_s24 + $0x80] sm:$0xff]  ;;  %v424_v33 = vld [vmem:[%s5944_s24 + $0x78] sm:$0xff] }
  0x19   : > { %v973_v34 = vsel %vm921_vm0, %v426_v31, 0.0  ;;  %v970_v35 = vsel %vm921_vm0, %v425_v32, 0.0  ;;  %v967_v36 = vsel %vm921_vm0, %v424_v33, 0.0  ;;  %v429_v37 = vld [vmem:[%s5944_s24 + $0xa0] sm:$0xff]  ;;  %v428_v38 = vld [vmem:[%s5944_s24 + $0x98] sm:$0xff]  ;;  %v427_v39 = vld [vmem:[%s5944_s24 + $0x90] sm:$0xff] }
  0x1a   : > { %v982_v40 = vsel %vm921_vm0, %v429_v37, 0.0  ;;  %v979_v41 = vsel %vm921_vm0, %v428_v38, 0.0  ;;  %v976_v42 = vsel %vm921_vm0, %v427_v39, 0.0  ;;  %v432_v43 = vld [vmem:[%s5944_s24 + $0xb8] sm:$0xff]  ;;  %v431_v44 = vld [vmem:[%s5944_s24 + $0xb0] sm:$0xff]  ;;  %v430_v45 = vld [vmem:[%s5944_s24 + $0xa8] sm:$0xff] }
  0x1b   : > { %v991_v46 = vsel %vm921_vm0, %v432_v43, 0.0  ;;  %v988_v47 = vsel %vm921_vm0, %v431_v44, 0.0  ;;  %v985_v48 = vsel %vm921_vm0, %v430_v45, 0.0  ;;  %v435_v49 = vld [vmem:[%s5944_s24 + $0xd0] sm:$0xff]  ;;  %v434_v50 = vld [vmem:[%s5944_s24 + $0xc8] sm:$0xff]  ;;  %v433_v51 = vld [vmem:[%s5944_s24 + $0xc0] sm:$0xff] }
  0x1c   : > { %v1000_v52 = vsel %vm921_vm0, %v435_v49, 0.0  ;;  %v997_v53 = vsel %vm921_vm0, %v434_v50, 0.0  ;;  %v994_v54 = vsel %vm921_vm0, %v433_v51, 0.0  ;;  %v438_v55 = vld [vmem:[%s5944_s24 + $0xe8] sm:$0xff]  ;;  %v437_v56 = vld [vmem:[%s5944_s24 + $0xe0] sm:$0xff]  ;;  %v436_v57 = vld [vmem:[%s5944_s24 + $0xd8] sm:$0xff] }
  0x1d   : > { %938 = vadd.xlane.f32.xlu2 %v937_v10  ;;  %932 = vadd.xlane.f32.xlu1 %v931_v11  ;;  %v1009_v58 = vsel %vm921_vm0, %v438_v55, 0.0  ;;  %v1006_v59 = vsel %vm921_vm0, %v437_v56, 0.0  ;;  %v1003_v60 = vsel %vm921_vm0, %v436_v57, 0.0  ;;  %v441_v61 = vld [vmem:[%s5944_s24 + $0x100] sm:$0xff]  ;;  %v440_v62 = vld [vmem:[%s5944_s24 + $0xf8] sm:$0xff]  ;;  %v439_v63 = vld [vmem:[%s5944_s24 + $0xf0] sm:$0xff] }
  0x1e   : > { %926 = vadd.xlane.f32.xlu0 %v925_v12  ;;  %v1018_v0 = vsel %vm921_vm0, %v441_v61, 0.0  ;;  %v1015_v1 = vsel %vm921_vm0, %v440_v62, 0.0  ;;  %v1012_v2 = vsel %vm921_vm0, %v439_v63, 0.0  ;;  %v444_v3 = vld [vmem:[%s5944_s24 + $0x118] sm:$0xff]  ;;  %v443_v4 = vld [vmem:[%s5944_s24 + $0x110] sm:$0xff]  ;;  %v442_v5 = vld [vmem:[%s5944_s24 + $0x108] sm:$0xff] }
  0x1f   : > { %v1027_v6 = vsel %vm921_vm0, %v444_v3, 0.0  ;;  %v1024_v7 = vsel %vm921_vm0, %v443_v4, 0.0  ;;  %v1021_v8 = vsel %vm921_vm0, %v442_v5, 0.0  ;;  %v447_v9 = vld [vmem:[%s5944_s24 + $0x130] sm:$0xff]  ;;  %v446_v10 = vld [vmem:[%s5944_s24 + $0x128] sm:$0xff]  ;;  %v445_v11 = vld [vmem:[%s5944_s24 + $0x120] sm:$0xff] }
  0x20   : > { %v1036_v12 = vsel %vm921_vm0, %v447_v9, 0.0  ;;  %v1033_v13 = vsel %vm921_vm0, %v446_v10, 0.0  ;;  %v1030_v14 = vsel %vm921_vm0, %v445_v11, 0.0  ;;  %v450_v15 = vld [vmem:[%s5944_s24 + $0x148] sm:$0xff]  ;;  %v453_v21 = vld [vmem:[%s5944_s24 + $0x160] sm:$0xff]  ;;  %v456_v27 = vld [vmem:[%s5944_s24 + $0x178] sm:$0xff] }
  0x21   : > { %v454_v31 = vld [vmem:[%s5944_s24 + $0x168] sm:$0xff]  ;;  %v1063_v33 = vsel %vm921_vm0, %v456_v27, 0.0  ;;  %v460_v49 = vld [vmem:[%s5944_s24 + $0x198] sm:$0xff] }
  0x22   : > { %v458_v37 = vld [vmem:[%s5944_s24 + $0x188] sm:$0xff]  ;;  %v464_v55 = vld [vmem:[%s5944_s24 + $0x1b8] sm:$0xff] }
  0x23   : > { %v1069_v43 = vsel %vm921_vm0, %v458_v37, 0.0  ;;  %v462_v45 = vld [vmem:[%s5944_s24 + $0x1a8] sm:$0xff]  ;;  %v1087_v61 = vsel %vm921_vm0, %v464_v55, 0.0  ;;  %v468_v63 = vld [vmem:[%s5944_s24 + $0x1d8] sm:$0xff] }
  0x24   : > { %v1081_v51 = vsel %vm921_vm0, %v462_v45, 0.0  ;;  %v466_v3 = vld [vmem:[%s5944_s24 + $0x1c8] sm:$0xff]  ;;  %v1099_v5 = vsel %vm921_vm0, %v468_v63, 0.0  ;;  %v476_v27 = vld [vmem:[%s5944_s24 + $0x218] sm:$0xff] }
  0x25   : > { %947 = vadd.xlane.f32.xlu2 %v946_v16  ;;  %944 = vadd.xlane.f32.xlu1 %v943_v17  ;;  %v449_v16 = vld [vmem:[%s5944_s24 + $0x140] sm:$0xff]  ;;  %v448_v17 = vld [vmem:[%s5944_s24 + $0x138] sm:$0xff]  ;;  %v470_v9 = vld [vmem:[%s5944_s24 + $0x1e8] sm:$0xff] }
  0x26   : > { %941 = vadd.xlane.f32.xlu0 %v940_v18  ;;  %v1045_v18 = vsel %vm921_vm0, %v450_v15, 0.0  ;;  %v1042_v19 = vsel %vm921_vm0, %v449_v16, 0.0  ;;  %v1039_v20 = vsel %vm921_vm0, %v448_v17, 0.0  ;;  %v1105_v15 = vsel %vm921_vm0, %v470_v9, 0.0  ;;  %v474_v17 = vld [vmem:[%s5944_s24 + $0x208] sm:$0xff] }
  0x27   : > { %v478_v45 = vld [vmem:[%s5944_s24 + $0x228] sm:$0xff] }
  0x2d   : > { %956 = vadd.xlane.f32.xlu2 %v955_v22  ;;  %953 = vadd.xlane.f32.xlu1 %v952_v23  ;;  %v452_v22 = vld [vmem:[%s5944_s24 + $0x158] sm:$0xff]  ;;  %v451_v23 = vld [vmem:[%s5944_s24 + $0x150] sm:$0xff] }
  0x2e   : > { %950 = vadd.xlane.f32.xlu0 %v949_v24  ;;  %v1054_v24 = vsel %vm921_vm0, %v453_v21, 0.0  ;;  %v1051_v25 = vsel %vm921_vm0, %v452_v22, 0.0  ;;  %v1048_v26 = vsel %vm921_vm0, %v451_v23, 0.0  ;;  %v472_v21 = vld [vmem:[%s5944_s24 + $0x1f8] sm:$0xff]  ;;  %v1117_v23 = vsel %vm921_vm0, %v474_v17, 0.0 }
  0x2f   : > { %v488_v17 = vld [vmem:[%s5944_s24 + $0x278] sm:$0xff] }
  0x35   : > { %965 = vadd.xlane.f32.xlu2 %v964_v28  ;;  %962 = vadd.xlane.f32.xlu1 %v961_v29  ;;  %v455_v28 = vld [vmem:[%s5944_s24 + $0x170] sm:$0xff] }
  0x36   : > { %959 = vadd.xlane.f32.xlu0 %v958_v30 }
  0x3d   : > { %974 = vadd.xlane.f32.xlu2 %v973_v34  ;;  %971 = vadd.xlane.f32.xlu1 %v970_v35  ;;  %v1060_v34 = vsel %vm921_vm0, %v455_v28, 0.0  ;;  %v1057_v35 = vsel %vm921_vm0, %v454_v31, 0.0 }
  0x3e   : > { %968 = vadd.xlane.f32.xlu0 %v967_v36  ;;  %v459_v36 = vld [vmem:[%s5944_s24 + $0x190] sm:$0xff] }
  0x45   : > { %983 = vadd.xlane.f32.xlu2 %v982_v40  ;;  %980 = vadd.xlane.f32.xlu1 %v979_v41  ;;  %v457_v40 = vld [vmem:[%s5944_s24 + $0x180] sm:$0xff] }
  0x46   : > { %977 = vadd.xlane.f32.xlu0 %v976_v42  ;;  %v1072_v42 = vsel %vm921_vm0, %v459_v36, 0.0  ;;  %v1066_v44 = vsel %vm921_vm0, %v457_v40, 0.0  ;;  %v1123_v36 = vsel %vm921_vm0, %v476_v27, 0.0  ;;  %v480_v40 = vld [vmem:[%s5944_s24 + $0x238] sm:$0xff] }
  0x4d   : > { %992 = vadd.xlane.f32.xlu2 %v991_v46  ;;  %989 = vadd.xlane.f32.xlu1 %v988_v47  ;;  %v461_v46 = vld [vmem:[%s5944_s24 + $0x1a0] sm:$0xff] }
  0x4e   : > { %986 = vadd.xlane.f32.xlu0 %v985_v48 }
  0x55   : > { %1001 = vadd.xlane.f32.xlu2 %v1000_v52  ;;  %998 = vadd.xlane.f32.xlu1 %v997_v53  ;;  %v1078_v52 = vsel %vm921_vm0, %v461_v46, 0.0  ;;  %v1075_v53 = vsel %vm921_vm0, %v460_v49, 0.0  ;;  %v1135_v49 = vsel %vm921_vm0, %v480_v40, 0.0  ;;  %v490_v40 = vld [vmem:[%s5944_s24 + $0x288] sm:$0xff] }
  0x56   : > { %995 = vadd.xlane.f32.xlu0 %v994_v54  ;;  %v465_v54 = vld [vmem:[%s5944_s24 + $0x1c0] sm:$0xff] }
  0x5d   : > { %1010 = vadd.xlane.f32.xlu2 %v1009_v58  ;;  %1007 = vadd.xlane.f32.xlu1 %v1006_v59  ;;  %v463_v58 = vld [vmem:[%s5944_s24 + $0x1b0] sm:$0xff] }
  0x5e   : > { %1004 = vadd.xlane.f32.xlu0 %v1003_v60  ;;  %v1090_v60 = vsel %vm921_vm0, %v465_v54, 0.0  ;;  %v1084_v62 = vsel %vm921_vm0, %v463_v58, 0.0  ;;  %v482_v54 = vld [vmem:[%s5944_s24 + $0x248] sm:$0xff] }
  0x5f   : > { %v1141_v63 = vsel %vm921_vm0, %v482_v54, 0.0 }
  0x65   : > { %1019 = vadd.xlane.f32.xlu2 %v1018_v0  ;;  %1016 = vadd.xlane.f32.xlu1 %v1015_v1  ;;  %v467_v0 = vld [vmem:[%s5944_s24 + $0x1d0] sm:$0xff] }
  0x66   : > { %1013 = vadd.xlane.f32.xlu0 %v1012_v2 }
  0x6d   : > { %1028 = vadd.xlane.f32.xlu2 %v1027_v6  ;;  %1025 = vadd.xlane.f32.xlu1 %v1024_v7  ;;  %v1096_v6 = vsel %vm921_vm0, %v467_v0, 0.0  ;;  %v1093_v7 = vsel %vm921_vm0, %v466_v3, 0.0  ;;  %v486_v3 = vld [vmem:[%s5944_s24 + $0x268] sm:$0xff] }
  0x6e   : > { %1022 = vadd.xlane.f32.xlu0 %v1021_v8  ;;  %v471_v8 = vld [vmem:[%s5944_s24 + $0x1f0] sm:$0xff] }
  0x75   : > { %1037 = vadd.xlane.f32.xlu2 %v1036_v12  ;;  %1034 = vadd.xlane.f32.xlu1 %v1033_v13  ;;  %v469_v12 = vld [vmem:[%s5944_s24 + $0x1e0] sm:$0xff] }
  0x76   : > { %1031 = vadd.xlane.f32.xlu0 %v1030_v14  ;;  %v1108_v14 = vsel %vm921_vm0, %v471_v8, 0.0  ;;  %v1102_v16 = vsel %vm921_vm0, %v469_v12, 0.0  ;;  %v484_v8 = vld [vmem:[%s5944_s24 + $0x258] sm:$0xff]  ;;  %v1153_v12 = vsel %vm921_vm0, %v486_v3, 0.0 }
  0x7d   : > { %1046 = vadd.xlane.f32.xlu2 %v1045_v18  ;;  %1043 = vadd.xlane.f32.xlu1 %v1042_v19  ;;  %v473_v18 = vld [vmem:[%s5944_s24 + $0x200] sm:$0xff] }
  0x7e   : > { %1040 = vadd.xlane.f32.xlu0 %v1039_v20 }
  0x85   : > { %1055 = vadd.xlane.f32.xlu2 %v1054_v24  ;;  %1052 = vadd.xlane.f32.xlu1 %v1051_v25  ;;  %v1114_v24 = vsel %vm921_vm0, %v473_v18, 0.0  ;;  %v1111_v25 = vsel %vm921_vm0, %v472_v21, 0.0 }
  0x86   : > { %1049 = vadd.xlane.f32.xlu0 %v1048_v26  ;;  %v477_v26 = vld [vmem:[%s5944_s24 + $0x220] sm:$0xff] }
  0x88   : > { %v6038_v29 = vpop.xlane.xlu2 %935  ;;  %v6040_v30 = vpop.xlane.xlu1 %929 }
  0x89   : > { %12025 = vst [vmem:[#allocation3_spill] sm:$0xff] %v6038_v29  ;;  %v6043_v32 = vpop.xlane.xlu0 %923 }
  0x8d   : > { %1064 = vadd.xlane.f32.xlu2 %v1063_v33  ;;  %1061 = vadd.xlane.f32.xlu1 %v1060_v34  ;;  %v475_v33 = vld [vmem:[%s5944_s24 + $0x210] sm:$0xff] }
  0x8e   : > { %1058 = vadd.xlane.f32.xlu0 %v1057_v35  ;;  %v1126_v35 = vsel %vm921_vm0, %v477_v26, 0.0  ;;  %v1120_v37 = vsel %vm921_vm0, %v475_v33, 0.0  ;;  %v1159_v26 = vsel %vm921_vm0, %v488_v17, 0.0  ;;  %v492_v33 = vld [vmem:[%s5944_s24 + $0x298] sm:$0xff] }
  0x90   : > { %v6050_v38 = vpop.xlane.xlu2 %938  ;;  %v6052_v39 = vpop.xlane.xlu1 %932 }
  0x91   : > { %12026 = vst [vmem:[#allocation4_spill] sm:$0xff] %v6050_v38  ;;  %v6055_v41 = vpop.xlane.xlu0 %926 }
  0x92   : > { %12027 = vst [vmem:[#allocation5_spill] sm:$0xff] %v6052_v39  ;;  %v574_v39 = vld [vmem:[%s5944_s24 + $0x528] sm:$0xff] }
  0x93   : > { %12028 = vst [vmem:[#allocation6_spill] sm:$0xff] %v6055_v41  ;;  %v568_v41 = vld [vmem:[%s5944_s24 + $0x4f8] sm:$0xff] }
  0x95   : > { %1073 = vadd.xlane.f32.xlu2 %v1072_v42  ;;  %1070 = vadd.xlane.f32.xlu1 %v1069_v43  ;;  %v479_v42 = vld [vmem:[%s5944_s24 + $0x230] sm:$0xff] }
  0x96   : > { %1067 = vadd.xlane.f32.xlu0 %v1066_v44 }
  0x98   : > { %v6062_v47 = vpop.xlane.xlu2 %947  ;;  %v6064_v48 = vpop.xlane.xlu1 %944 }
  0x99   : > { %12029 = vst [vmem:[#allocation7_spill] sm:$0xff] %v6062_v47  ;;  %v6067_v50 = vpop.xlane.xlu0 %941 }
  0x9a   : > { %12030 = vst [vmem:[#allocation8_spill] sm:$0xff] %v6064_v48 }
  0x9b   : > { %12031 = vst [vmem:[#allocation9_spill] sm:$0xff] %v6067_v50  ;;  %v565_v50 = vld [vmem:[%s5944_s24 + $0x4e0] sm:$0xff] }
  0x9d   : > { %1082 = vadd.xlane.f32.xlu2 %v1081_v51  ;;  %1079 = vadd.xlane.f32.xlu1 %v1078_v52  ;;  %v1132_v51 = vsel %vm921_vm0, %v479_v42, 0.0  ;;  %v1129_v52 = vsel %vm921_vm0, %v478_v45, 0.0  ;;  %v1171_v45 = vsel %vm921_vm0, %v492_v33, 0.0  ;;  %v500_v33 = vld [vmem:[%s5944_s24 + $0x2d8] sm:$0xff] }
  0x9e   : > { %1076 = vadd.xlane.f32.xlu0 %v1075_v53  ;;  %v483_v53 = vld [vmem:[%s5944_s24 + $0x250] sm:$0xff] }
  0xa0   : > { %v6074_v56 = vpop.xlane.xlu2 %956  ;;  %v6076_v57 = vpop.xlane.xlu1 %953 }
  0xa1   : > { %12032 = vst [vmem:[#allocation10_spill] sm:$0xff] %v6074_v56  ;;  %v6079_v59 = vpop.xlane.xlu0 %950 }
  0xa2   : > { %12033 = vst [vmem:[#allocation11_spill] sm:$0xff] %v6076_v57 }
  0xa3   : > { %12034 = vst [vmem:[#allocation12_spill] sm:$0xff] %v6079_v59  ;;  %v562_v59 = vld [vmem:[%s5944_s24 + $0x4c8] sm:$0xff] }
  0xa5   : > { %1091 = vadd.xlane.f32.xlu2 %v1090_v60  ;;  %1088 = vadd.xlane.f32.xlu1 %v1087_v61  ;;  %v481_v60 = vld [vmem:[%s5944_s24 + $0x240] sm:$0xff] }
  0xa6   : > { %1085 = vadd.xlane.f32.xlu0 %v1084_v62  ;;  %v1144_v62 = vsel %vm921_vm0, %v483_v53, 0.0  ;;  %v1138_v0 = vsel %vm921_vm0, %v481_v60, 0.0  ;;  %v494_v53 = vld [vmem:[%s5944_s24 + $0x2a8] sm:$0xff] }
  0xa7   : > { %v1177_v3 = vsel %vm921_vm0, %v494_v53, 0.0 }
  0xa8   : > { %v6086_v1 = vpop.xlane.xlu2 %965  ;;  %v6088_v2 = vpop.xlane.xlu1 %962 }
  0xa9   : > { %12035 = vst [vmem:[#allocation13_spill] sm:$0xff] %v6086_v1  ;;  %v6091_v4 = vpop.xlane.xlu0 %959  ;;  %v553_v1 = vld [vmem:[%s5944_s24 + $0x480] sm:$0xff] }
  0xaa   : > { %12036 = vst [vmem:[#allocation14_spill] sm:$0xff] %v6088_v2 }
  0xab   : > { %12037 = vst [vmem:[#allocation15_spill] sm:$0xff] %v6091_v4  ;;  %v556_v4 = vld [vmem:[%s5944_s24 + $0x498] sm:$0xff] }
  0xad   : > { %1100 = vadd.xlane.f32.xlu2 %v1099_v5  ;;  %1097 = vadd.xlane.f32.xlu1 %v1096_v6  ;;  %v485_v5 = vld [vmem:[%s5944_s24 + $0x260] sm:$0xff] }
  0xae   : > { %1094 = vadd.xlane.f32.xlu0 %v1093_v7 }
  0xb0   : > { %v6098_v10 = vpop.xlane.xlu2 %974  ;;  %v6100_v11 = vpop.xlane.xlu1 %971 }
  0xb1   : > { %12038 = vst [vmem:[#allocation16_spill] sm:$0xff] %v6098_v10  ;;  %v6103_v13 = vpop.xlane.xlu0 %968  ;;  %v559_v10 = vld [vmem:[%s5944_s24 + $0x4b0] sm:$0xff] }
  0xb2   : > { %12039 = vst [vmem:[#allocation17_spill] sm:$0xff] %v6100_v11 }
  0xb3   : > { %12040 = vst [vmem:[#allocation18_spill] sm:$0xff] %v6103_v13  ;;  %v517_v13 = vld [vmem:[%s5944_s24 + $0x360] sm:$0xff] }
  0xb5   : > { %1109 = vadd.xlane.f32.xlu2 %v1108_v14  ;;  %1106 = vadd.xlane.f32.xlu1 %v1105_v15  ;;  %v1150_v14 = vsel %vm921_vm0, %v485_v5, 0.0  ;;  %v1147_v15 = vsel %vm921_vm0, %v484_v8, 0.0  ;;  %v498_v8 = vld [vmem:[%s5944_s24 + $0x2c8] sm:$0xff] }
  0xb6   : > { %1103 = vadd.xlane.f32.xlu0 %v1102_v16  ;;  %v489_v16 = vld [vmem:[%s5944_s24 + $0x280] sm:$0xff] }
  0xb8   : > { %v6110_v19 = vpop.xlane.xlu2 %983  ;;  %v6112_v20 = vpop.xlane.xlu1 %980 }
  0xb9   : > { %12041 = vst [vmem:[#allocation19_spill] sm:$0xff] %v6110_v19  ;;  %v6115_v22 = vpop.xlane.xlu0 %977 }
  0xba   : > { %12042 = vst [vmem:[#allocation20_spill] sm:$0xff] %v6112_v20 }
  0xbb   : > { %12043 = vst [vmem:[#allocation21_spill] sm:$0xff] %v6115_v22 }
  0xbd   : > { %1118 = vadd.xlane.f32.xlu2 %v1117_v23  ;;  %1115 = vadd.xlane.f32.xlu1 %v1114_v24  ;;  %v487_v23 = vld [vmem:[%s5944_s24 + $0x270] sm:$0xff] }
  0xbe   : > { %1112 = vadd.xlane.f32.xlu0 %v1111_v25  ;;  %v1162_v25 = vsel %vm921_vm0, %v489_v16, 0.0  ;;  %v1156_v27 = vsel %vm921_vm0, %v487_v23, 0.0  ;;  %v496_v16 = vld [vmem:[%s5944_s24 + $0x2b8] sm:$0xff]  ;;  %v1189_v23 = vsel %vm921_vm0, %v498_v8, 0.0  ;;  %v502_v8 = vld [vmem:[%s5944_s24 + $0x2e8] sm:$0xff] }
  0xc0   : > { %v6122_v28 = vpop.xlane.xlu2 %992  ;;  %v6124_v31 = vpop.xlane.xlu1 %989 }
  0xc1   : > { %12044 = vst [vmem:[#allocation22_spill] sm:$0xff] %v6122_v28  ;;  %v6127_v34 = vpop.xlane.xlu0 %986 }
  0xc2   : > { %12045 = vst [vmem:[#allocation23_spill] sm:$0xff] %v6124_v31 }
  0xc3   : > { %12046 = vst [vmem:[#allocation24_spill] sm:$0xff] %v6127_v34 }
  0xc5   : > { %1127 = vadd.xlane.f32.xlu2 %v1126_v35  ;;  %1124 = vadd.xlane.f32.xlu1 %v1123_v36  ;;  %v491_v35 = vld [vmem:[%s5944_s24 + $0x290] sm:$0xff] }
  0xc6   : > { %1121 = vadd.xlane.f32.xlu0 %v1120_v37 }
  0xc8   : > { %v6134_v43 = vpop.xlane.xlu2 %1001  ;;  %v6136_v44 = vpop.xlane.xlu1 %998 }
  0xc9   : > { %12047 = vst [vmem:[#allocation25_spill] sm:$0xff] %v6134_v43  ;;  %v6139_v46 = vpop.xlane.xlu0 %995  ;;  %v514_v43 = vld [vmem:[%s5944_s24 + $0x348] sm:$0xff] }
  0xca   : > { %12048 = vst [vmem:[#allocation26_spill] sm:$0xff] %v6136_v44 }
  0xcb   : > { %12049 = vst [vmem:[#allocation27_spill] sm:$0xff] %v6139_v46 }
  0xcd   : > { %1136 = vadd.xlane.f32.xlu2 %v1135_v49  ;;  %1133 = vadd.xlane.f32.xlu1 %v1132_v51  ;;  %v1168_v49 = vsel %vm921_vm0, %v491_v35, 0.0  ;;  %v1165_v51 = vsel %vm921_vm0, %v490_v40, 0.0 }
  0xce   : > { %1130 = vadd.xlane.f32.xlu0 %v1129_v52  ;;  %v495_v52 = vld [vmem:[%s5944_s24 + $0x2b0] sm:$0xff] }
  0xd0   : > { %v6146_v55 = vpop.xlane.xlu2 %1010  ;;  %v6148_v58 = vpop.xlane.xlu1 %1007 }
  0xd1   : > { %12050 = vst [vmem:[#allocation28_spill] sm:$0xff] %v6146_v55  ;;  %v6151_v61 = vpop.xlane.xlu0 %1004 }
  0xd2   : > { %12051 = vst [vmem:[#allocation29_spill] sm:$0xff] %v6148_v58  ;;  %v511_v58 = vld [vmem:[%s5944_s24 + $0x330] sm:$0xff] }
  0xd3   : > { %12052 = vst [vmem:[#allocation30_spill] sm:$0xff] %v6151_v61 }
  0xd5   : > { %1145 = vadd.xlane.f32.xlu2 %v1144_v62  ;;  %1142 = vadd.xlane.f32.xlu1 %v1141_v63  ;;  %v493_v62 = vld [vmem:[%s5944_s24 + $0x2a0] sm:$0xff] }
  0xd6   : > { %1139 = vadd.xlane.f32.xlu0 %v1138_v0  ;;  %v1180_v0 = vsel %vm921_vm0, %v495_v52, 0.0  ;;  %v1174_v5 = vsel %vm921_vm0, %v493_v62, 0.0  ;;  %v1195_v52 = vsel %vm921_vm0, %v500_v33, 0.0  ;;  %v504_v62 = vld [vmem:[%s5944_s24 + $0x2f8] sm:$0xff] }
  0xd8   : > { %v6158_v6 = vpop.xlane.xlu2 %1019  ;;  %v6160_v7 = vpop.xlane.xlu1 %1016 }
  0xd9   : > { %12053 = vst [vmem:[#allocation31_spill] sm:$0xff] %v6160_v7  ;;  %v6163_v9 = vpop.xlane.xlu0 %1013 }
  0xda   : > { %12054 = vst [vmem:[#allocation32_spill] sm:$0xff] %v6163_v9  ;;  %v508_v9 = vld [vmem:[%s5944_s24 + $0x318] sm:$0xff] }
  0xdd   : > { %1154 = vadd.xlane.f32.xlu2 %v1153_v12  ;;  %1151 = vadd.xlane.f32.xlu1 %v1150_v14  ;;  %v497_v12 = vld [vmem:[%s5944_s24 + $0x2c0] sm:$0xff] }
  0xde   : > { %1148 = vadd.xlane.f32.xlu0 %v1147_v15 }
  0xe0   : > { %v6170_v18 = vpop.xlane.xlu2 %1028  ;;  %v6172_v21 = vpop.xlane.xlu1 %1025 }
  0xe1   : > { %v6175_v24 = vpop.xlane.xlu0 %1022 }
  0xe5   : > { %1163 = vadd.xlane.f32.xlu2 %v1162_v25  ;;  %1160 = vadd.xlane.f32.xlu1 %v1159_v26  ;;  %v1186_v25 = vsel %vm921_vm0, %v497_v12, 0.0  ;;  %v1183_v26 = vsel %vm921_vm0, %v496_v16, 0.0  ;;  %v1207_v16 = vsel %vm921_vm0, %v504_v62, 0.0 }
  0xe6   : > { %1157 = vadd.xlane.f32.xlu0 %v1156_v27  ;;  %v501_v27 = vld [vmem:[%s5944_s24 + $0x2e0] sm:$0xff] }
  0xe8   : > { %v6182_v36 = vpop.xlane.xlu2 %1037  ;;  %v6184_v37 = vpop.xlane.xlu1 %1034 }
  0xe9   : > { %v6187_v42 = vpop.xlane.xlu0 %1031 }
  0xed   : > { %1172 = vadd.xlane.f32.xlu2 %v1171_v45  ;;  %1169 = vadd.xlane.f32.xlu1 %v1168_v49  ;;  %v499_v45 = vld [vmem:[%s5944_s24 + $0x2d0] sm:$0xff] }
  0xee   : > { %1166 = vadd.xlane.f32.xlu0 %v1165_v51  ;;  %v1198_v51 = vsel %vm921_vm0, %v501_v27, 0.0  ;;  %v1192_v53 = vsel %vm921_vm0, %v499_v45, 0.0  ;;  %v506_v27 = vld [vmem:[%s5944_s24 + $0x308] sm:$0xff] }
  0xef   : > { %v1213_v62 = vsel %vm921_vm0, %v506_v27, 0.0 }
  0xf0   : > { %v6194_v54 = vpop.xlane.xlu2 %1046  ;;  %v6196_v60 = vpop.xlane.xlu1 %1043 }
  0xf1   : > { %v6199_v63 = vpop.xlane.xlu0 %1040 }
  0xf5   : > { %1181 = vadd.xlane.f32.xlu2 %v1180_v0  ;;  %1178 = vadd.xlane.f32.xlu1 %v1177_v3  ;;  %v503_v0 = vld [vmem:[%s5944_s24 + $0x2f0] sm:$0xff] }
  0xf6   : > { %1175 = vadd.xlane.f32.xlu0 %v1174_v5 }
  0xf8   : > { %v6206_v14 = vpop.xlane.xlu2 %1055  ;;  %v6208_v15 = vpop.xlane.xlu1 %1052 }
  0xf9   : > { %v6211_v17 = vpop.xlane.xlu0 %1049 }
  0xfd   : > { %1190 = vadd.xlane.f32.xlu2 %v1189_v23  ;;  %1187 = vadd.xlane.f32.xlu1 %v1186_v25  ;;  %v1204_v23 = vsel %vm921_vm0, %v503_v0, 0.0  ;;  %v1201_v25 = vsel %vm921_vm0, %v502_v8, 0.0  ;;  %v510_v8 = vld [vmem:[%s5944_s24 + $0x328] sm:$0xff] }
  0xfe   : > { %1184 = vadd.xlane.f32.xlu0 %v1183_v26  ;;  %v507_v26 = vld [vmem:[%s5944_s24 + $0x310] sm:$0xff] }
 0x100   : > { %v6218_v35 = vpop.xlane.xlu2 %1064  ;;  %v6220_v40 = vpop.xlane.xlu1 %1061 }
 0x101   : > { %v6223_v49 = vpop.xlane.xlu0 %1058 }
 0x105   : > { %1199 = vadd.xlane.f32.xlu2 %v1198_v51  ;;  %1196 = vadd.xlane.f32.xlu1 %v1195_v52  ;;  %v505_v51 = vld [vmem:[%s5944_s24 + $0x300] sm:$0xff] }
 0x106   : > { %1193 = vadd.xlane.f32.xlu0 %v1192_v53  ;;  %v1216_v53 = vsel %vm921_vm0, %v507_v26, 0.0  ;;  %v1210_v0 = vsel %vm921_vm0, %v505_v51, 0.0  ;;  %v1225_v26 = vsel %vm921_vm0, %v510_v8, 0.0  ;;  %v1219_v51 = vsel %vm921_vm0, %v508_v9, 0.0 }
 0x107   : > { %v1228_v9 = vsel %vm921_vm0, %v511_v58, 0.0  ;;  %v1237_v58 = vsel %vm921_vm0, %v514_v43, 0.0  ;;  %v1246_v43 = vsel %vm921_vm0, %v517_v13, 0.0 }
 0x108   : > { %v6230_v3 = vpop.xlane.xlu2 %1073  ;;  %v6232_v5 = vpop.xlane.xlu1 %1070 }
 0x109   : > { %v6235_v12 = vpop.xlane.xlu0 %1067 }
 0x10d   : > { %1208 = vadd.xlane.f32.xlu2 %v1207_v16  ;;  %1205 = vadd.xlane.f32.xlu1 %v1204_v23  ;;  %v509_v16 = vld [vmem:[%s5944_s24 + $0x320] sm:$0xff] }
 0x10e   : > { %1202 = vadd.xlane.f32.xlu0 %v1201_v25  ;;  %v1222_v27 = vsel %vm921_vm0, %v509_v16, 0.0 }
 0x110   : > { %v6242_v33 = vpop.xlane.xlu2 %1082  ;;  %v6244_v45 = vpop.xlane.xlu1 %1079 }
 0x111   : > { %v6247_v52 = vpop.xlane.xlu0 %1076 }
 0x115   : > { %1217 = vadd.xlane.f32.xlu2 %v1216_v53  ;;  %1214 = vadd.xlane.f32.xlu1 %v1213_v62  ;;  %v513_v53 = vld [vmem:[%s5944_s24 + $0x340] sm:$0xff]  ;;  %v512_v62 = vld [vmem:[%s5944_s24 + $0x338] sm:$0xff] }
 0x116   : > { %1211 = vadd.xlane.f32.xlu0 %v1210_v0  ;;  %v1234_v8 = vsel %vm921_vm0, %v513_v53, 0.0  ;;  %v1231_v16 = vsel %vm921_vm0, %v512_v62, 0.0 }
 0x118   : > { %v6254_v23 = vpop.xlane.xlu2 %1091  ;;  %v6256_v25 = vpop.xlane.xlu1 %1088 }
 0x119   : > { %v6259_v7 = vpop.xlane.xlu0 %1085 }
 0x11d   : > { %1226 = vadd.xlane.f32.xlu2 %v1225_v26  ;;  %1223 = vadd.xlane.f32.xlu1 %v1222_v27  ;;  %v516_v26 = vld [vmem:[%s5944_s24 + $0x358] sm:$0xff]  ;;  %v515_v27 = vld [vmem:[%s5944_s24 + $0x350] sm:$0xff] }
 0x11e   : > { %1220 = vadd.xlane.f32.xlu0 %v1219_v51  ;;  %v1243_v53 = vsel %vm921_vm0, %v516_v26, 0.0  ;;  %v1240_v62 = vsel %vm921_vm0, %v515_v27, 0.0 }
 0x120   : > { %v6266_v0 = vpop.xlane.xlu2 %1100  ;;  %v6268_v55 = vpop.xlane.xlu1 %1097 }
 0x121   : > { %v6271_v61 = vpop.xlane.xlu0 %1094 }
 0x125   : > { %1235 = vadd.xlane.f32.xlu2 %v1234_v8  ;;  %1232 = vadd.xlane.f32.xlu1 %v1231_v16  ;;  %v519_v8 = vld [vmem:[%s5944_s24 + $0x370] sm:$0xff]  ;;  %v518_v16 = vld [vmem:[%s5944_s24 + $0x368] sm:$0xff] }
 0x126   : > { %1229 = vadd.xlane.f32.xlu0 %v1228_v9  ;;  %v1252_v26 = vsel %vm921_vm0, %v519_v8, 0.0  ;;  %v1249_v27 = vsel %vm921_vm0, %v518_v16, 0.0 }
 0x128   : > { %v6278_v51 = vpop.xlane.xlu2 %1109  ;;  %v6280_v44 = vpop.xlane.xlu1 %1106 }
 0x129   : > { %12055 = vst [vmem:[#allocation33_spill] sm:$0xff] %v6278_v51  ;;  %v6283_v46 = vpop.xlane.xlu0 %1103  ;;  %v785_v51 = vld [vmem:[%s5944_s24 + $0xbc0] sm:$0xff] }
 0x12a   : > { %12056 = vst [vmem:[#allocation34_spill] sm:$0xff] %v6280_v44 }
 0x12d   : > { %1244 = vadd.xlane.f32.xlu2 %v1243_v53  ;;  %1241 = vadd.xlane.f32.xlu1 %v1240_v62  ;;  %v522_v53 = vld [vmem:[%s5944_s24 + $0x388] sm:$0xff]  ;;  %v521_v62 = vld [vmem:[%s5944_s24 + $0x380] sm:$0xff] }
 0x12e   : > { %1238 = vadd.xlane.f32.xlu0 %v1237_v58  ;;  %v1261_v8 = vsel %vm921_vm0, %v522_v53, 0.0  ;;  %v1258_v16 = vsel %vm921_vm0, %v521_v62, 0.0 }
 0x130   : > { %v6290_v9 = vpop.xlane.xlu2 %1118  ;;  %v6292_v28 = vpop.xlane.xlu1 %1115 }
 0x131   : > { %12057 = vst [vmem:[#allocation35_spill] sm:$0xff] %v6290_v9  ;;  %v6295_v31 = vpop.xlane.xlu0 %1112  ;;  %v520_v9 = vld [vmem:[%s5944_s24 + $0x378] sm:$0xff] }
 0x132   : > { %12058 = vst [vmem:[#allocation36_spill] sm:$0xff] %v6292_v28  ;;  %v1255_v13 = vsel %vm921_vm0, %v520_v9, 0.0 }
 0x133   : > { %12059 = vst [vmem:[#allocation37_spill] sm:$0xff] %v6295_v31 }
 0x135   : > { %1253 = vadd.xlane.f32.xlu2 %v1252_v26  ;;  %1250 = vadd.xlane.f32.xlu1 %v1249_v27  ;;  %v525_v26 = vld [vmem:[%s5944_s24 + $0x3a0] sm:$0xff]  ;;  %v524_v27 = vld [vmem:[%s5944_s24 + $0x398] sm:$0xff] }
 0x136   : > { %1247 = vadd.xlane.f32.xlu0 %v1246_v43  ;;  %v1270_v53 = vsel %vm921_vm0, %v525_v26, 0.0  ;;  %v1267_v62 = vsel %vm921_vm0, %v524_v27, 0.0 }
 0x138   : > { %v6302_v58 = vpop.xlane.xlu2 %1127  ;;  %v6304_v28 = vpop.xlane.xlu1 %1124 }
 0x139   : > { %12060 = vst [vmem:[#allocation38_spill] sm:$0xff] %v6302_v58  ;;  %v6307_v34 = vpop.xlane.xlu0 %1121  ;;  %v523_v58 = vld [vmem:[%s5944_s24 + $0x390] sm:$0xff] }
 0x13a   : > { %12061 = vst [vmem:[#allocation39_spill] sm:$0xff] %v6304_v28  ;;  %v1264_v9 = vsel %vm921_vm0, %v523_v58, 0.0 }
 0x13b   : > { %12062 = vst [vmem:[#allocation40_spill] sm:$0xff] %v6307_v34 }
 0x13d   : > { %1262 = vadd.xlane.f32.xlu2 %v1261_v8  ;;  %1259 = vadd.xlane.f32.xlu1 %v1258_v16  ;;  %v528_v8 = vld [vmem:[%s5944_s24 + $0x3b8] sm:$0xff]  ;;  %v527_v16 = vld [vmem:[%s5944_s24 + $0x3b0] sm:$0xff] }
 0x13e   : > { %1256 = vadd.xlane.f32.xlu0 %v1255_v13  ;;  %v1279_v26 = vsel %vm921_vm0, %v528_v8, 0.0  ;;  %v1276_v27 = vsel %vm921_vm0, %v527_v16, 0.0 }
 0x140   : > { %v6314_v43 = vpop.xlane.xlu2 %1136  ;;  %v6316_v28 = vpop.xlane.xlu1 %1133 }
 0x141   : > { %12063 = vst [vmem:[#allocation41_spill] sm:$0xff] %v6314_v43  ;;  %v6319_v34 = vpop.xlane.xlu0 %1130 }
 0x142   : > { %12064 = vst [vmem:[#allocation42_spill] sm:$0xff] %v6316_v28  ;;  %v526_v28 = vld [vmem:[%s5944_s24 + $0x3a8] sm:$0xff] }
 0x143   : > { %12065 = vst [vmem:[#allocation43_spill] sm:$0xff] %v6319_v34  ;;  %v1273_v58 = vsel %vm921_vm0, %v526_v28, 0.0 }
 0x145   : > { %1271 = vadd.xlane.f32.xlu2 %v1270_v53  ;;  %1268 = vadd.xlane.f32.xlu1 %v1267_v62  ;;  %v531_v53 = vld [vmem:[%s5944_s24 + $0x3d0] sm:$0xff]  ;;  %v530_v62 = vld [vmem:[%s5944_s24 + $0x3c8] sm:$0xff] }
 0x146   : > { %1265 = vadd.xlane.f32.xlu0 %v1264_v9  ;;  %v1288_v8 = vsel %vm921_vm0, %v531_v53, 0.0  ;;  %v1285_v16 = vsel %vm921_vm0, %v530_v62, 0.0 }
 0x148   : > { %v6326_v13 = vpop.xlane.xlu2 %1145  ;;  %v6328_v43 = vpop.xlane.xlu1 %1142 }
 0x149   : > { %12066 = vst [vmem:[#allocation44_spill] sm:$0xff] %v6326_v13  ;;  %v6331_v34 = vpop.xlane.xlu0 %1139  ;;  %v529_v13 = vld [vmem:[%s5944_s24 + $0x3c0] sm:$0xff] }
 0x14a   : > { %12067 = vst [vmem:[#allocation45_spill] sm:$0xff] %v6328_v43  ;;  %v1282_v28 = vsel %vm921_vm0, %v529_v13, 0.0 }
 0x14b   : > { %12068 = vst [vmem:[#allocation46_spill] sm:$0xff] %v6331_v34 }
 0x14d   : > { %1280 = vadd.xlane.f32.xlu2 %v1279_v26  ;;  %1277 = vadd.xlane.f32.xlu1 %v1276_v27  ;;  %v534_v26 = vld [vmem:[%s5944_s24 + $0x3e8] sm:$0xff]  ;;  %v533_v27 = vld [vmem:[%s5944_s24 + $0x3e0] sm:$0xff] }
 0x14e   : > { %1274 = vadd.xlane.f32.xlu0 %v1273_v58  ;;  %v1297_v53 = vsel %vm921_vm0, %v534_v26, 0.0  ;;  %v1294_v62 = vsel %vm921_vm0, %v533_v27, 0.0 }
 0x150   : > { %v6338_v9 = vpop.xlane.xlu2 %1154  ;;  %v6340_v43 = vpop.xlane.xlu1 %1151 }
 0x151   : > { %12069 = vst [vmem:[#allocation47_spill] sm:$0xff] %v6338_v9  ;;  %v6343_v34 = vpop.xlane.xlu0 %1148 }
 0x152   : > { %12070 = vst [vmem:[#allocation48_spill] sm:$0xff] %v6340_v43  ;;  %v532_v43 = vld [vmem:[%s5944_s24 + $0x3d8] sm:$0xff] }
 0x153   : > { %12071 = vst [vmem:[#allocation49_spill] sm:$0xff] %v6343_v34  ;;  %v1291_v13 = vsel %vm921_vm0, %v532_v43, 0.0 }
 0x155   : > { %1289 = vadd.xlane.f32.xlu2 %v1288_v8  ;;  %1286 = vadd.xlane.f32.xlu1 %v1285_v16  ;;  %v537_v8 = vld [vmem:[%s5944_s24 + $0x400] sm:$0xff]  ;;  %v536_v16 = vld [vmem:[%s5944_s24 + $0x3f8] sm:$0xff] }
 0x156   : > { %1283 = vadd.xlane.f32.xlu0 %v1282_v28  ;;  %v1306_v26 = vsel %vm921_vm0, %v537_v8, 0.0  ;;  %v1303_v27 = vsel %vm921_vm0, %v536_v16, 0.0 }
 0x158   : > { %v6350_v58 = vpop.xlane.xlu2 %1163  ;;  %v6352_v9 = vpop.xlane.xlu1 %1160 }
 0x159   : > { %12072 = vst [vmem:[#allocation50_spill] sm:$0xff] %v6350_v58  ;;  %v6355_v34 = vpop.xlane.xlu0 %1157  ;;  %v535_v58 = vld [vmem:[%s5944_s24 + $0x3f0] sm:$0xff] }
 0x15a   : > { %12073 = vst [vmem:[#allocation51_spill] sm:$0xff] %v6352_v9  ;;  %v1300_v43 = vsel %vm921_vm0, %v535_v58, 0.0 }
 0x15b   : > { %12074 = vst [vmem:[#allocation52_spill] sm:$0xff] %v6355_v34 }
 0x15d   : > { %1298 = vadd.xlane.f32.xlu2 %v1297_v53  ;;  %1295 = vadd.xlane.f32.xlu1 %v1294_v62  ;;  %v540_v53 = vld [vmem:[%s5944_s24 + $0x418] sm:$0xff]  ;;  %v539_v62 = vld [vmem:[%s5944_s24 + $0x410] sm:$0xff] }
 0x15e   : > { %1292 = vadd.xlane.f32.xlu0 %v1291_v13  ;;  %v1315_v8 = vsel %vm921_vm0, %v540_v53, 0.0  ;;  %v1312_v16 = vsel %vm921_vm0, %v539_v62, 0.0 }
 0x160   : > { %v6362_v28 = vpop.xlane.xlu2 %1172  ;;  %v6364_v9 = vpop.xlane.xlu1 %1169 }
 0x161   : > { %12075 = vst [vmem:[#allocation53_spill] sm:$0xff] %v6362_v28  ;;  %v6367_v34 = vpop.xlane.xlu0 %1166 }
 0x162   : > { %12076 = vst [vmem:[#allocation54_spill] sm:$0xff] %v6364_v9  ;;  %v538_v9 = vld [vmem:[%s5944_s24 + $0x408] sm:$0xff] }
 0x163   : > { %12077 = vst [vmem:[#allocation55_spill] sm:$0xff] %v6367_v34  ;;  %v1309_v58 = vsel %vm921_vm0, %v538_v9, 0.0 }
 0x165   : > { %1307 = vadd.xlane.f32.xlu2 %v1306_v26  ;;  %1304 = vadd.xlane.f32.xlu1 %v1303_v27  ;;  %v543_v26 = vld [vmem:[%s5944_s24 + $0x430] sm:$0xff]  ;;  %v542_v27 = vld [vmem:[%s5944_s24 + $0x428] sm:$0xff] }
 0x166   : > { %1301 = vadd.xlane.f32.xlu0 %v1300_v43  ;;  %v1324_v53 = vsel %vm921_vm0, %v543_v26, 0.0  ;;  %v1321_v62 = vsel %vm921_vm0, %v542_v27, 0.0 }
 0x168   : > { %v6374_v13 = vpop.xlane.xlu2 %1181  ;;  %v6376_v28 = vpop.xlane.xlu1 %1178 }
 0x169   : > { %12078 = vst [vmem:[#allocation56_spill] sm:$0xff] %v6374_v13  ;;  %v6379_v34 = vpop.xlane.xlu0 %1175 }
 0x16a   : > { %12079 = vst [vmem:[#allocation57_spill] sm:$0xff] %v6376_v28  ;;  %v541_v28 = vld [vmem:[%s5944_s24 + $0x420] sm:$0xff] }
 0x16b   : > { %12080 = vst [vmem:[#allocation58_spill] sm:$0xff] %v6379_v34  ;;  %v1318_v9 = vsel %vm921_vm0, %v541_v28, 0.0 }
 0x16d   : > { %1316 = vadd.xlane.f32.xlu2 %v1315_v8  ;;  %1313 = vadd.xlane.f32.xlu1 %v1312_v16  ;;  %v546_v8 = vld [vmem:[%s5944_s24 + $0x448] sm:$0xff]  ;;  %v545_v16 = vld [vmem:[%s5944_s24 + $0x440] sm:$0xff] }
 0x16e   : > { %1310 = vadd.xlane.f32.xlu0 %v1309_v58  ;;  %v1333_v26 = vsel %vm921_vm0, %v546_v8, 0.0  ;;  %v1330_v27 = vsel %vm921_vm0, %v545_v16, 0.0 }
 0x170   : > { %v6386_v43 = vpop.xlane.xlu2 %1190  ;;  %v6388_v13 = vpop.xlane.xlu1 %1187 }
 0x171   : > { %12081 = vst [vmem:[#allocation59_spill] sm:$0xff] %v6386_v43  ;;  %v6391_v34 = vpop.xlane.xlu0 %1184 }
 0x172   : > { %12082 = vst [vmem:[#allocation60_spill] sm:$0xff] %v6388_v13  ;;  %v544_v13 = vld [vmem:[%s5944_s24 + $0x438] sm:$0xff] }
 0x173   : > { %12083 = vst [vmem:[#allocation61_spill] sm:$0xff] %v6391_v34  ;;  %v1327_v28 = vsel %vm921_vm0, %v544_v13, 0.0 }
 0x175   : > { %1325 = vadd.xlane.f32.xlu2 %v1324_v53  ;;  %1322 = vadd.xlane.f32.xlu1 %v1321_v62  ;;  %v549_v53 = vld [vmem:[%s5944_s24 + $0x460] sm:$0xff]  ;;  %v548_v62 = vld [vmem:[%s5944_s24 + $0x458] sm:$0xff] }
 0x176   : > { %1319 = vadd.xlane.f32.xlu0 %v1318_v9  ;;  %v1342_v8 = vsel %vm921_vm0, %v549_v53, 0.0  ;;  %v1339_v16 = vsel %vm921_vm0, %v548_v62, 0.0 }
 0x178   : > { %v6398_v58 = vpop.xlane.xlu2 %1199  ;;  %v6400_v43 = vpop.xlane.xlu1 %1196 }
 0x179   : > { %12084 = vst [vmem:[#allocation62_spill] sm:$0xff] %v6398_v58  ;;  %v6403_v34 = vpop.xlane.xlu0 %1193 }
 0x17a   : > { %12085 = vst [vmem:[#allocation63_spill] sm:$0xff] %v6400_v43  ;;  %v547_v43 = vld [vmem:[%s5944_s24 + $0x450] sm:$0xff] }
 0x17b   : > { %12086 = vst [vmem:[#allocation64_spill] sm:$0xff] %v6403_v34  ;;  %v1336_v13 = vsel %vm921_vm0, %v547_v43, 0.0 }
 0x17d   : > { %1334 = vadd.xlane.f32.xlu2 %v1333_v26  ;;  %1331 = vadd.xlane.f32.xlu1 %v1330_v27  ;;  %v552_v26 = vld [vmem:[%s5944_s24 + $0x478] sm:$0xff]  ;;  %v551_v27 = vld [vmem:[%s5944_s24 + $0x470] sm:$0xff] }
 0x17e   : > { %1328 = vadd.xlane.f32.xlu0 %v1327_v28  ;;  %v1351_v53 = vsel %vm921_vm0, %v552_v26, 0.0  ;;  %v1348_v62 = vsel %vm921_vm0, %v551_v27, 0.0 }
 0x180   : > { %v6410_v9 = vpop.xlane.xlu2 %1208  ;;  %v6412_v58 = vpop.xlane.xlu1 %1205 }
 0x181   : > { %12087 = vst [vmem:[#allocation65_spill] sm:$0xff] %v6410_v9  ;;  %v6415_v34 = vpop.xlane.xlu0 %1202 }
 0x182   : > { %12088 = vst [vmem:[#allocation66_spill] sm:$0xff] %v6412_v58  ;;  %v550_v58 = vld [vmem:[%s5944_s24 + $0x468] sm:$0xff] }
 0x183   : > { %12089 = vst [vmem:[#allocation67_spill] sm:$0xff] %v6415_v34  ;;  %v1345_v43 = vsel %vm921_vm0, %v550_v58, 0.0  ;;  %v1354_v58 = vsel %vm921_vm0, %v553_v1, 0.0  ;;  %v1363_v1 = vsel %vm921_vm0, %v556_v4, 0.0  ;;  %v1372_v4 = vsel %vm921_vm0, %v559_v10, 0.0 }
 0x184   : > { %v1381_v10 = vsel %vm921_vm0, %v562_v59, 0.0  ;;  %v1390_v59 = vsel %vm921_vm0, %v565_v50, 0.0  ;;  %v1399_v50 = vsel %vm921_vm0, %v568_v41, 0.0 }
 0x185   : > { %1343 = vadd.xlane.f32.xlu2 %v1342_v8  ;;  %1340 = vadd.xlane.f32.xlu1 %v1339_v16  ;;  %v555_v8 = vld [vmem:[%s5944_s24 + $0x490] sm:$0xff]  ;;  %v554_v16 = vld [vmem:[%s5944_s24 + $0x488] sm:$0xff] }
 0x186   : > { %1337 = vadd.xlane.f32.xlu0 %v1336_v13  ;;  %v1360_v26 = vsel %vm921_vm0, %v555_v8, 0.0  ;;  %v1357_v27 = vsel %vm921_vm0, %v554_v16, 0.0 }
 0x188   : > { %v6422_v28 = vpop.xlane.xlu2 %1217  ;;  %v6424_v9 = vpop.xlane.xlu1 %1214 }
 0x189   : > { %v6427_v34 = vpop.xlane.xlu0 %1211 }
 0x18d   : > { %1352 = vadd.xlane.f32.xlu2 %v1351_v53  ;;  %1349 = vadd.xlane.f32.xlu1 %v1348_v62  ;;  %v558_v53 = vld [vmem:[%s5944_s24 + $0x4a8] sm:$0xff]  ;;  %v557_v62 = vld [vmem:[%s5944_s24 + $0x4a0] sm:$0xff] }
 0x18e   : > { %1346 = vadd.xlane.f32.xlu0 %v1345_v43  ;;  %v1369_v8 = vsel %vm921_vm0, %v558_v53, 0.0  ;;  %v1366_v16 = vsel %vm921_vm0, %v557_v62, 0.0 }
 0x190   : > { %v6434_v13 = vpop.xlane.xlu2 %1226  ;;  %v6436_v19 = vpop.xlane.xlu1 %1223 }
 0x191   : > { %v6439_v2 = vpop.xlane.xlu0 %1220 }
 0x195   : > { %1361 = vadd.xlane.f32.xlu2 %v1360_v26  ;;  %1358 = vadd.xlane.f32.xlu1 %v1357_v27  ;;  %v561_v26 = vld [vmem:[%s5944_s24 + $0x4c0] sm:$0xff]  ;;  %v560_v27 = vld [vmem:[%s5944_s24 + $0x4b8] sm:$0xff] }
 0x196   : > { %1355 = vadd.xlane.f32.xlu0 %v1354_v58  ;;  %v1378_v53 = vsel %vm921_vm0, %v561_v26, 0.0  ;;  %v1375_v62 = vsel %vm921_vm0, %v560_v27, 0.0 }
 0x198   : > { %v6446_v43 = vpop.xlane.xlu2 %1235  ;;  %v6448_v20 = vpop.xlane.xlu1 %1232 }
 0x199   : > { %v6451_v22 = vpop.xlane.xlu0 %1229 }
 0x19d   : > { %1370 = vadd.xlane.f32.xlu2 %v1369_v8  ;;  %1367 = vadd.xlane.f32.xlu1 %v1366_v16  ;;  %v564_v8 = vld [vmem:[%s5944_s24 + $0x4d8] sm:$0xff]  ;;  %v563_v16 = vld [vmem:[%s5944_s24 + $0x4d0] sm:$0xff] }
 0x19e   : > { %1364 = vadd.xlane.f32.xlu0 %v1363_v1  ;;  %v1387_v26 = vsel %vm921_vm0, %v564_v8, 0.0  ;;  %v1384_v27 = vsel %vm921_vm0, %v563_v16, 0.0 }
 0x1a0   : > { %v6458_v58 = vpop.xlane.xlu2 %1244  ;;  %v6460_v11 = vpop.xlane.xlu1 %1241 }
 0x1a1   : > { %12090 = vst [vmem:[#allocation68_spill] sm:$0xff] %v6458_v58  ;;  %v6463_v56 = vpop.xlane.xlu0 %1238 }
 0x1a5   : > { %1379 = vadd.xlane.f32.xlu2 %v1378_v53  ;;  %1376 = vadd.xlane.f32.xlu1 %v1375_v62  ;;  %v567_v53 = vld [vmem:[%s5944_s24 + $0x4f0] sm:$0xff]  ;;  %v566_v62 = vld [vmem:[%s5944_s24 + $0x4e8] sm:$0xff] }
 0x1a6   : > { %1373 = vadd.xlane.f32.xlu0 %v1372_v4  ;;  %v1396_v8 = vsel %vm921_vm0, %v567_v53, 0.0  ;;  %v1393_v16 = vsel %vm921_vm0, %v566_v62, 0.0 }
 0x1a8   : > { %v6470_v1 = vpop.xlane.xlu2 %1253  ;;  %v6472_v57 = vpop.xlane.xlu1 %1250 }
 0x1a9   : > { %12091 = vst [vmem:[#allocation69_spill] sm:$0xff] %v6470_v1  ;;  %v6475_v47 = vpop.xlane.xlu0 %1247  ;;  %v571_v1 = vld [vmem:[%s5944_s24 + $0x510] sm:$0xff] }
 0x1aa   : > { %12092 = vst [vmem:[#allocation70_spill] sm:$0xff] %v6472_v57  ;;  %v1408_v41 = vsel %vm921_vm0, %v571_v1, 0.0  ;;  %v1417_v1 = vsel %vm921_vm0, %v574_v39, 0.0 }
 0x1ab   : > { %12093 = vst [vmem:[#allocation71_spill] sm:$0xff] %v6475_v47 }
 0x1ad   : > { %1388 = vadd.xlane.f32.xlu2 %v1387_v26  ;;  %1385 = vadd.xlane.f32.xlu1 %v1384_v27  ;;  %v570_v26 = vld [vmem:[%s5944_s24 + $0x508] sm:$0xff]  ;;  %v569_v27 = vld [vmem:[%s5944_s24 + $0x500] sm:$0xff] }
 0x1ae   : > { %1382 = vadd.xlane.f32.xlu0 %v1381_v10  ;;  %v1405_v53 = vsel %vm921_vm0, %v570_v26, 0.0  ;;  %v1402_v62 = vsel %vm921_vm0, %v569_v27, 0.0 }
 0x1b0   : > { %v6482_v4 = vpop.xlane.xlu2 %1262  ;;  %v6484_v48 = vpop.xlane.xlu1 %1259 }
 0x1b1   : > { %v6487_v38 = vpop.xlane.xlu0 %1256 }
 0x1b2   : > { %12094 = vst [vmem:[#allocation72_spill] sm:$0xff] %v6487_v38 }
 0x1b5   : > { %1397 = vadd.xlane.f32.xlu2 %v1396_v8  ;;  %1394 = vadd.xlane.f32.xlu1 %v1393_v16  ;;  %v573_v8 = vld [vmem:[%s5944_s24 + $0x520] sm:$0xff]  ;;  %v572_v16 = vld [vmem:[%s5944_s24 + $0x518] sm:$0xff] }
 0x1b6   : > { %1391 = vadd.xlane.f32.xlu0 %v1390_v59  ;;  %v1414_v26 = vsel %vm921_vm0, %v573_v8, 0.0  ;;  %v1411_v27 = vsel %vm921_vm0, %v572_v16, 0.0 }
 0x1b8   : > { %v6494_v10 = vpop.xlane.xlu2 %1271  ;;  %v6496_v29 = vpop.xlane.xlu1 %1268 }
 0x1b9   : > { %12095 = vst [vmem:[#allocation73_spill] sm:$0xff] %v6494_v10  ;;  %v6499_v31 = vpop.xlane.xlu0 %1265 }
 0x1bd   : > { %1406 = vadd.xlane.f32.xlu2 %v1405_v53  ;;  %1403 = vadd.xlane.f32.xlu1 %v1402_v62  ;;  %v576_v53 = vld [vmem:[%s5944_s24 + $0x538] sm:$0xff]  ;;  %v575_v62 = vld [vmem:[%s5944_s24 + $0x530] sm:$0xff] }
 0x1be   : > { %1400 = vadd.xlane.f32.xlu0 %v1399_v50  ;;  %v1423_v8 = vsel %vm921_vm0, %v576_v53, 0.0  ;;  %v1420_v16 = vsel %vm921_vm0, %v575_v62, 0.0 }
 0x1c0   : > { %v6506_v59 = vpop.xlane.xlu2 %1280  ;;  %v6508_v38 = vpop.xlane.xlu1 %1277 }
 0x1c1   : > { %12096 = vst [vmem:[#allocation74_spill] sm:$0xff] %v6506_v59  ;;  %v6511_v57 = vpop.xlane.xlu0 %1274 }
 0x1c2   : > { %12097 = vst [vmem:[#allocation75_spill] sm:$0xff] %v6508_v38 }
 0x1c3   : > { %12098 = vst [vmem:[#allocation76_spill] sm:$0xff] %v6511_v57 }
 0x1c5   : > { %1415 = vadd.xlane.f32.xlu2 %v1414_v26  ;;  %1412 = vadd.xlane.f32.xlu1 %v1411_v27  ;;  %v579_v26 = vld [vmem:[%s5944_s24 + $0x550] sm:$0xff]  ;;  %v578_v27 = vld [vmem:[%s5944_s24 + $0x548] sm:$0xff] }
 0x1c6   : > { %1409 = vadd.xlane.f32.xlu0 %v1408_v41  ;;  %v1432_v53 = vsel %vm921_vm0, %v579_v26, 0.0  ;;  %v1429_v62 = vsel %vm921_vm0, %v578_v27, 0.0 }
 0x1c8   : > { %v6518_v50 = vpop.xlane.xlu2 %1289  ;;  %v6520_v59 = vpop.xlane.xlu1 %1286 }
 0x1c9   : > { %12099 = vst [vmem:[#allocation77_spill] sm:$0xff] %v6518_v50  ;;  %v6523_v38 = vpop.xlane.xlu0 %1283  ;;  %v577_v50 = vld [vmem:[%s5944_s24 + $0x540] sm:$0xff] }
 0x1ca   : > { %12100 = vst [vmem:[#allocation78_spill] sm:$0xff] %v6520_v59  ;;  %v1426_v39 = vsel %vm921_vm0, %v577_v50, 0.0 }
 0x1cb   : > { %12101 = vst [vmem:[#allocation79_spill] sm:$0xff] %v6523_v38 }
 0x1cd   : > { %1424 = vadd.xlane.f32.xlu2 %v1423_v8  ;;  %1421 = vadd.xlane.f32.xlu1 %v1420_v16  ;;  %v582_v8 = vld [vmem:[%s5944_s24 + $0x568] sm:$0xff]  ;;  %v581_v16 = vld [vmem:[%s5944_s24 + $0x560] sm:$0xff] }
 0x1ce   : > { %1418 = vadd.xlane.f32.xlu0 %v1417_v1  ;;  %v1441_v26 = vsel %vm921_vm0, %v582_v8, 0.0  ;;  %v1438_v27 = vsel %vm921_vm0, %v581_v16, 0.0 }
 0x1d0   : > { %v6530_v41 = vpop.xlane.xlu2 %1298  ;;  %v6532_v59 = vpop.xlane.xlu1 %1295 }
 0x1d1   : > { %12102 = vst [vmem:[#allocation80_spill] sm:$0xff] %v6530_v41  ;;  %v6535_v38 = vpop.xlane.xlu0 %1292  ;;  %v580_v41 = vld [vmem:[%s5944_s24 + $0x558] sm:$0xff] }
 0x1d2   : > { %12103 = vst [vmem:[#allocation81_spill] sm:$0xff] %v6532_v59  ;;  %v1435_v50 = vsel %vm921_vm0, %v580_v41, 0.0 }
 0x1d3   : > { %12104 = vst [vmem:[#allocation82_spill] sm:$0xff] %v6535_v38 }
 0x1d5   : > { %1433 = vadd.xlane.f32.xlu2 %v1432_v53  ;;  %1430 = vadd.xlane.f32.xlu1 %v1429_v62  ;;  %v585_v53 = vld [vmem:[%s5944_s24 + $0x580] sm:$0xff]  ;;  %v584_v62 = vld [vmem:[%s5944_s24 + $0x578] sm:$0xff] }
 0x1d6   : > { %1427 = vadd.xlane.f32.xlu0 %v1426_v39  ;;  %v1450_v8 = vsel %vm921_vm0, %v585_v53, 0.0  ;;  %v1447_v16 = vsel %vm921_vm0, %v584_v62, 0.0 }
 0x1d8   : > { %v6542_v1 = vpop.xlane.xlu2 %1307  ;;  %v6544_v59 = vpop.xlane.xlu1 %1304 }
 0x1d9   : > { %12105 = vst [vmem:[#allocation83_spill] sm:$0xff] %v6542_v1  ;;  %v6547_v38 = vpop.xlane.xlu0 %1301 }
 0x1da   : > { %12106 = vst [vmem:[#allocation84_spill] sm:$0xff] %v6544_v59  ;;  %v583_v59 = vld [vmem:[%s5944_s24 + $0x570] sm:$0xff] }
 0x1db   : > { %12107 = vst [vmem:[#allocation85_spill] sm:$0xff] %v6547_v38  ;;  %v1444_v41 = vsel %vm921_vm0, %v583_v59, 0.0 }
 0x1dd   : > { %1442 = vadd.xlane.f32.xlu2 %v1441_v26  ;;  %1439 = vadd.xlane.f32.xlu1 %v1438_v27  ;;  %v588_v26 = vld [vmem:[%s5944_s24 + $0x598] sm:$0xff]  ;;  %v587_v27 = vld [vmem:[%s5944_s24 + $0x590] sm:$0xff] }
 0x1de   : > { %1436 = vadd.xlane.f32.xlu0 %v1435_v50  ;;  %v1459_v53 = vsel %vm921_vm0, %v588_v26, 0.0  ;;  %v1456_v62 = vsel %vm921_vm0, %v587_v27, 0.0 }
 0x1e0   : > { %v6554_v39 = vpop.xlane.xlu2 %1316  ;;  %v6556_v1 = vpop.xlane.xlu1 %1313 }
 0x1e1   : > { %12108 = vst [vmem:[#allocation86_spill] sm:$0xff] %v6554_v39  ;;  %v6559_v38 = vpop.xlane.xlu0 %1310 }
 0x1e2   : > { %12109 = vst [vmem:[#allocation87_spill] sm:$0xff] %v6556_v1  ;;  %v586_v1 = vld [vmem:[%s5944_s24 + $0x588] sm:$0xff] }
 0x1e3   : > { %12110 = vst [vmem:[#allocation88_spill] sm:$0xff] %v6559_v38  ;;  %v1453_v59 = vsel %vm921_vm0, %v586_v1, 0.0 }
 0x1e5   : > { %1451 = vadd.xlane.f32.xlu2 %v1450_v8  ;;  %1448 = vadd.xlane.f32.xlu1 %v1447_v16  ;;  %v591_v8 = vld [vmem:[%s5944_s24 + $0x5b0] sm:$0xff]  ;;  %v590_v16 = vld [vmem:[%s5944_s24 + $0x5a8] sm:$0xff] }
 0x1e6   : > { %1445 = vadd.xlane.f32.xlu0 %v1444_v41  ;;  %v1468_v26 = vsel %vm921_vm0, %v591_v8, 0.0  ;;  %v1465_v27 = vsel %vm921_vm0, %v590_v16, 0.0 }
 0x1e8   : > { %v6566_v50 = vpop.xlane.xlu2 %1325  ;;  %v6568_v39 = vpop.xlane.xlu1 %1322 }
 0x1e9   : > { %12111 = vst [vmem:[#allocation89_spill] sm:$0xff] %v6566_v50  ;;  %v6571_v38 = vpop.xlane.xlu0 %1319 }
 0x1ea   : > { %12112 = vst [vmem:[#allocation90_spill] sm:$0xff] %v6568_v39  ;;  %v589_v39 = vld [vmem:[%s5944_s24 + $0x5a0] sm:$0xff] }
 0x1eb   : > { %12113 = vst [vmem:[#allocation91_spill] sm:$0xff] %v6571_v38  ;;  %v1462_v1 = vsel %vm921_vm0, %v589_v39, 0.0 }
 0x1ed   : > { %1460 = vadd.xlane.f32.xlu2 %v1459_v53  ;;  %1457 = vadd.xlane.f32.xlu1 %v1456_v62  ;;  %v594_v53 = vld [vmem:[%s5944_s24 + $0x5c8] sm:$0xff]  ;;  %v593_v62 = vld [vmem:[%s5944_s24 + $0x5c0] sm:$0xff] }
 0x1ee   : > { %1454 = vadd.xlane.f32.xlu0 %v1453_v59  ;;  %v1477_v8 = vsel %vm921_vm0, %v594_v53, 0.0  ;;  %v1474_v16 = vsel %vm921_vm0, %v593_v62, 0.0 }
 0x1f0   : > { %v6578_v41 = vpop.xlane.xlu2 %1334  ;;  %v6580_v50 = vpop.xlane.xlu1 %1331 }
 0x1f1   : > { %12114 = vst [vmem:[#allocation92_spill] sm:$0xff] %v6578_v41  ;;  %v6583_v38 = vpop.xlane.xlu0 %1328 }
 0x1f2   : > { %12115 = vst [vmem:[#allocation93_spill] sm:$0xff] %v6580_v50  ;;  %v592_v50 = vld [vmem:[%s5944_s24 + $0x5b8] sm:$0xff] }
 0x1f3   : > { %12116 = vst [vmem:[#allocation94_spill] sm:$0xff] %v6583_v38  ;;  %v1471_v39 = vsel %vm921_vm0, %v592_v50, 0.0 }
 0x1f5   : > { %1469 = vadd.xlane.f32.xlu2 %v1468_v26  ;;  %1466 = vadd.xlane.f32.xlu1 %v1465_v27  ;;  %v597_v26 = vld [vmem:[%s5944_s24 + $0x5e0] sm:$0xff]  ;;  %v596_v27 = vld [vmem:[%s5944_s24 + $0x5d8] sm:$0xff] }
 0x1f6   : > { %1463 = vadd.xlane.f32.xlu0 %v1462_v1  ;;  %v1486_v53 = vsel %vm921_vm0, %v597_v26, 0.0  ;;  %v1483_v62 = vsel %vm921_vm0, %v596_v27, 0.0 }
 0x1f8   : > { %v6590_v59 = vpop.xlane.xlu2 %1343  ;;  %v6592_v41 = vpop.xlane.xlu1 %1340 }
 0x1f9   : > { %12117 = vst [vmem:[#allocation95_spill] sm:$0xff] %v6590_v59  ;;  %v6595_v38 = vpop.xlane.xlu0 %1337 }
 0x1fa   : > { %12118 = vst [vmem:[#allocation96_spill] sm:$0xff] %v6592_v41  ;;  %v595_v41 = vld [vmem:[%s5944_s24 + $0x5d0] sm:$0xff] }
 0x1fb   : > { %12119 = vst [vmem:[#allocation97_spill] sm:$0xff] %v6595_v38  ;;  %v1480_v50 = vsel %vm921_vm0, %v595_v41, 0.0 }
 0x1fd   : > { %1478 = vadd.xlane.f32.xlu2 %v1477_v8  ;;  %1475 = vadd.xlane.f32.xlu1 %v1474_v16  ;;  %v600_v8 = vld [vmem:[%s5944_s24 + $0x5f8] sm:$0xff]  ;;  %v599_v16 = vld [vmem:[%s5944_s24 + $0x5f0] sm:$0xff] }
 0x1fe   : > { %1472 = vadd.xlane.f32.xlu0 %v1471_v39  ;;  %v1495_v26 = vsel %vm921_vm0, %v600_v8, 0.0  ;;  %v1492_v27 = vsel %vm921_vm0, %v599_v16, 0.0 }
 0x200   : > { %v6602_v1 = vpop.xlane.xlu2 %1352  ;;  %v6604_v59 = vpop.xlane.xlu1 %1349 }
 0x201   : > { %12120 = vst [vmem:[#allocation98_spill] sm:$0xff] %v6602_v1  ;;  %v6607_v38 = vpop.xlane.xlu0 %1346  ;;  %v598_v1 = vld [vmem:[%s5944_s24 + $0x5e8] sm:$0xff] }
 0x202   : > { %12121 = vst [vmem:[#allocation99_spill] sm:$0xff] %v6604_v59  ;;  %v1489_v41 = vsel %vm921_vm0, %v598_v1, 0.0 }
 0x203   : > { %12122 = vst [vmem:[#allocation100_spill] sm:$0xff] %v6607_v38 }
 0x205   : > { %1487 = vadd.xlane.f32.xlu2 %v1486_v53  ;;  %1484 = vadd.xlane.f32.xlu1 %v1483_v62  ;;  %v603_v53 = vld [vmem:[%s5944_s24 + $0x610] sm:$0xff]  ;;  %v602_v62 = vld [vmem:[%s5944_s24 + $0x608] sm:$0xff] }
 0x206   : > { %1481 = vadd.xlane.f32.xlu0 %v1480_v50  ;;  %v1504_v8 = vsel %vm921_vm0, %v603_v53, 0.0  ;;  %v1501_v16 = vsel %vm921_vm0, %v602_v62, 0.0 }
 0x208   : > { %v6614_v39 = vpop.xlane.xlu2 %1361  ;;  %v6616_v59 = vpop.xlane.xlu1 %1358 }
 0x209   : > { %12123 = vst [vmem:[#allocation101_spill] sm:$0xff] %v6614_v39  ;;  %v6619_v38 = vpop.xlane.xlu0 %1355 }
 0x20a   : > { %12124 = vst [vmem:[#allocation102_spill] sm:$0xff] %v6616_v59  ;;  %v601_v59 = vld [vmem:[%s5944_s24 + $0x600] sm:$0xff] }
 0x20b   : > { %12125 = vst [vmem:[#allocation103_spill] sm:$0xff] %v6619_v38  ;;  %v1498_v1 = vsel %vm921_vm0, %v601_v59, 0.0 }
 0x20d   : > { %1496 = vadd.xlane.f32.xlu2 %v1495_v26  ;;  %1493 = vadd.xlane.f32.xlu1 %v1492_v27  ;;  %v606_v26 = vld [vmem:[%s5944_s24 + $0x628] sm:$0xff]  ;;  %v605_v27 = vld [vmem:[%s5944_s24 + $0x620] sm:$0xff] }
 0x20e   : > { %1490 = vadd.xlane.f32.xlu0 %v1489_v41  ;;  %v1513_v53 = vsel %vm921_vm0, %v606_v26, 0.0  ;;  %v1510_v62 = vsel %vm921_vm0, %v605_v27, 0.0 }
 0x210   : > { %v6626_v50 = vpop.xlane.xlu2 %1370  ;;  %v6628_v39 = vpop.xlane.xlu1 %1367 }
 0x211   : > { %12126 = vst [vmem:[#allocation104_spill] sm:$0xff] %v6626_v50  ;;  %v6631_v38 = vpop.xlane.xlu0 %1364 }
 0x212   : > { %12127 = vst [vmem:[#allocation105_spill] sm:$0xff] %v6628_v39  ;;  %v604_v39 = vld [vmem:[%s5944_s24 + $0x618] sm:$0xff] }
 0x213   : > { %12128 = vst [vmem:[#allocation106_spill] sm:$0xff] %v6631_v38  ;;  %v1507_v59 = vsel %vm921_vm0, %v604_v39, 0.0 }
 0x215   : > { %1505 = vadd.xlane.f32.xlu2 %v1504_v8  ;;  %1502 = vadd.xlane.f32.xlu1 %v1501_v16  ;;  %v609_v8 = vld [vmem:[%s5944_s24 + $0x640] sm:$0xff]  ;;  %v608_v16 = vld [vmem:[%s5944_s24 + $0x638] sm:$0xff] }
 0x216   : > { %1499 = vadd.xlane.f32.xlu0 %v1498_v1  ;;  %v1522_v26 = vsel %vm921_vm0, %v609_v8, 0.0  ;;  %v1519_v27 = vsel %vm921_vm0, %v608_v16, 0.0 }
 0x218   : > { %v6638_v41 = vpop.xlane.xlu2 %1379  ;;  %v6640_v50 = vpop.xlane.xlu1 %1376 }
 0x219   : > { %12129 = vst [vmem:[#allocation107_spill] sm:$0xff] %v6638_v41  ;;  %v6643_v38 = vpop.xlane.xlu0 %1373 }
 0x21a   : > { %12130 = vst [vmem:[#allocation108_spill] sm:$0xff] %v6640_v50  ;;  %v607_v50 = vld [vmem:[%s5944_s24 + $0x630] sm:$0xff] }
 0x21b   : > { %12131 = vst [vmem:[#allocation109_spill] sm:$0xff] %v6643_v38  ;;  %v1516_v39 = vsel %vm921_vm0, %v607_v50, 0.0 }
 0x21d   : > { %1514 = vadd.xlane.f32.xlu2 %v1513_v53  ;;  %1511 = vadd.xlane.f32.xlu1 %v1510_v62  ;;  %v612_v53 = vld [vmem:[%s5944_s24 + $0x658] sm:$0xff]  ;;  %v611_v62 = vld [vmem:[%s5944_s24 + $0x650] sm:$0xff] }
 0x21e   : > { %1508 = vadd.xlane.f32.xlu0 %v1507_v59  ;;  %v1531_v8 = vsel %vm921_vm0, %v612_v53, 0.0  ;;  %v1528_v16 = vsel %vm921_vm0, %v611_v62, 0.0 }
 0x220   : > { %v6650_v1 = vpop.xlane.xlu2 %1388  ;;  %v6652_v41 = vpop.xlane.xlu1 %1385 }
 0x221   : > { %12132 = vst [vmem:[#allocation110_spill] sm:$0xff] %v6650_v1  ;;  %v6655_v38 = vpop.xlane.xlu0 %1382 }
 0x222   : > { %12133 = vst [vmem:[#allocation111_spill] sm:$0xff] %v6652_v41  ;;  %v610_v41 = vld [vmem:[%s5944_s24 + $0x648] sm:$0xff] }
 0x223   : > { %12134 = vst [vmem:[#allocation112_spill] sm:$0xff] %v6655_v38  ;;  %v1525_v50 = vsel %vm921_vm0, %v610_v41, 0.0 }
 0x225   : > { %1523 = vadd.xlane.f32.xlu2 %v1522_v26  ;;  %1520 = vadd.xlane.f32.xlu1 %v1519_v27  ;;  %v615_v26 = vld [vmem:[%s5944_s24 + $0x670] sm:$0xff]  ;;  %v614_v27 = vld [vmem:[%s5944_s24 + $0x668] sm:$0xff] }
 0x226   : > { %1517 = vadd.xlane.f32.xlu0 %v1516_v39  ;;  %v1540_v53 = vsel %vm921_vm0, %v615_v26, 0.0  ;;  %v1537_v62 = vsel %vm921_vm0, %v614_v27, 0.0 }
 0x228   : > { %v6662_v59 = vpop.xlane.xlu2 %1397  ;;  %v6664_v1 = vpop.xlane.xlu1 %1394 }
 0x229   : > { %12135 = vst [vmem:[#allocation113_spill] sm:$0xff] %v6662_v59  ;;  %v6667_v38 = vpop.xlane.xlu0 %1391 }
 0x22a   : > { %12136 = vst [vmem:[#allocation114_spill] sm:$0xff] %v6664_v1  ;;  %v613_v1 = vld [vmem:[%s5944_s24 + $0x660] sm:$0xff] }
 0x22b   : > { %12137 = vst [vmem:[#allocation115_spill] sm:$0xff] %v6667_v38  ;;  %v1534_v41 = vsel %vm921_vm0, %v613_v1, 0.0 }
 0x22d   : > { %1532 = vadd.xlane.f32.xlu2 %v1531_v8  ;;  %1529 = vadd.xlane.f32.xlu1 %v1528_v16  ;;  %v618_v8 = vld [vmem:[%s5944_s24 + $0x688] sm:$0xff]  ;;  %v617_v16 = vld [vmem:[%s5944_s24 + $0x680] sm:$0xff] }
 0x22e   : > { %1526 = vadd.xlane.f32.xlu0 %v1525_v50  ;;  %v1549_v26 = vsel %vm921_vm0, %v618_v8, 0.0  ;;  %v1546_v27 = vsel %vm921_vm0, %v617_v16, 0.0 }
 0x230   : > { %v6674_v39 = vpop.xlane.xlu2 %1406  ;;  %v6676_v59 = vpop.xlane.xlu1 %1403 }
 0x231   : > { %12138 = vst [vmem:[#allocation116_spill] sm:$0xff] %v6674_v39  ;;  %v6679_v38 = vpop.xlane.xlu0 %1400  ;;  %v616_v39 = vld [vmem:[%s5944_s24 + $0x678] sm:$0xff] }
 0x232   : > { %12139 = vst [vmem:[#allocation117_spill] sm:$0xff] %v6676_v59  ;;  %v1543_v1 = vsel %vm921_vm0, %v616_v39, 0.0 }
 0x233   : > { %12140 = vst [vmem:[#allocation118_spill] sm:$0xff] %v6679_v38 }
 0x235   : > { %1541 = vadd.xlane.f32.xlu2 %v1540_v53  ;;  %1538 = vadd.xlane.f32.xlu1 %v1537_v62  ;;  %v621_v53 = vld [vmem:[%s5944_s24 + $0x6a0] sm:$0xff]  ;;  %v620_v62 = vld [vmem:[%s5944_s24 + $0x698] sm:$0xff] }
 0x236   : > { %1535 = vadd.xlane.f32.xlu0 %v1534_v41  ;;  %v1558_v8 = vsel %vm921_vm0, %v621_v53, 0.0  ;;  %v1555_v16 = vsel %vm921_vm0, %v620_v62, 0.0 }
 0x238   : > { %v6686_v50 = vpop.xlane.xlu2 %1415  ;;  %v6688_v59 = vpop.xlane.xlu1 %1412 }
 0x239   : > { %12141 = vst [vmem:[#allocation119_spill] sm:$0xff] %v6686_v50  ;;  %v6691_v38 = vpop.xlane.xlu0 %1409  ;;  %v619_v50 = vld [vmem:[%s5944_s24 + $0x690] sm:$0xff] }
 0x23a   : > { %12142 = vst [vmem:[#allocation120_spill] sm:$0xff] %v6688_v59  ;;  %v1552_v39 = vsel %vm921_vm0, %v619_v50, 0.0 }
 0x23b   : > { %12143 = vst [vmem:[#allocation121_spill] sm:$0xff] %v6691_v38 }
 0x23d   : > { %1550 = vadd.xlane.f32.xlu2 %v1549_v26  ;;  %1547 = vadd.xlane.f32.xlu1 %v1546_v27  ;;  %v624_v26 = vld [vmem:[%s5944_s24 + $0x6b8] sm:$0xff]  ;;  %v623_v27 = vld [vmem:[%s5944_s24 + $0x6b0] sm:$0xff] }
 0x23e   : > { %1544 = vadd.xlane.f32.xlu0 %v1543_v1  ;;  %v1567_v53 = vsel %vm921_vm0, %v624_v26, 0.0  ;;  %v1564_v62 = vsel %vm921_vm0, %v623_v27, 0.0 }
 0x240   : > { %v6698_v41 = vpop.xlane.xlu2 %1424  ;;  %v6700_v59 = vpop.xlane.xlu1 %1421 }
 0x241   : > { %12144 = vst [vmem:[#allocation122_spill] sm:$0xff] %v6698_v41  ;;  %v6703_v38 = vpop.xlane.xlu0 %1418  ;;  %v622_v41 = vld [vmem:[%s5944_s24 + $0x6a8] sm:$0xff] }
 0x242   : > { %12145 = vst [vmem:[#allocation123_spill] sm:$0xff] %v6700_v59  ;;  %v1561_v50 = vsel %vm921_vm0, %v622_v41, 0.0 }
 0x243   : > { %12146 = vst [vmem:[#allocation124_spill] sm:$0xff] %v6703_v38 }
 0x245   : > { %1559 = vadd.xlane.f32.xlu2 %v1558_v8  ;;  %1556 = vadd.xlane.f32.xlu1 %v1555_v16  ;;  %v627_v8 = vld [vmem:[%s5944_s24 + $0x6d0] sm:$0xff]  ;;  %v626_v16 = vld [vmem:[%s5944_s24 + $0x6c8] sm:$0xff] }
 0x246   : > { %1553 = vadd.xlane.f32.xlu0 %v1552_v39  ;;  %v1576_v26 = vsel %vm921_vm0, %v627_v8, 0.0  ;;  %v1573_v27 = vsel %vm921_vm0, %v626_v16, 0.0 }
 0x248   : > { %v6710_v1 = vpop.xlane.xlu2 %1433  ;;  %v6712_v59 = vpop.xlane.xlu1 %1430 }
 0x249   : > { %12147 = vst [vmem:[#allocation125_spill] sm:$0xff] %v6710_v1  ;;  %v6715_v38 = vpop.xlane.xlu0 %1427  ;;  %v625_v1 = vld [vmem:[%s5944_s24 + $0x6c0] sm:$0xff] }
 0x24a   : > { %12148 = vst [vmem:[#allocation126_spill] sm:$0xff] %v6712_v59  ;;  %v1570_v41 = vsel %vm921_vm0, %v625_v1, 0.0 }
 0x24b   : > { %12149 = vst [vmem:[#allocation127_spill] sm:$0xff] %v6715_v38 }
 0x24d   : > { %1568 = vadd.xlane.f32.xlu2 %v1567_v53  ;;  %1565 = vadd.xlane.f32.xlu1 %v1564_v62  ;;  %v630_v53 = vld [vmem:[%s5944_s24 + $0x6e8] sm:$0xff]  ;;  %v629_v62 = vld [vmem:[%s5944_s24 + $0x6e0] sm:$0xff] }
 0x24e   : > { %1562 = vadd.xlane.f32.xlu0 %v1561_v50  ;;  %v1585_v8 = vsel %vm921_vm0, %v630_v53, 0.0  ;;  %v1582_v16 = vsel %vm921_vm0, %v629_v62, 0.0 }
 0x250   : > { %v6722_v39 = vpop.xlane.xlu2 %1442  ;;  %v6724_v59 = vpop.xlane.xlu1 %1439 }
 0x251   : > { %12150 = vst [vmem:[#allocation128_spill] sm:$0xff] %v6722_v39  ;;  %v6727_v38 = vpop.xlane.xlu0 %1436 }
 0x252   : > { %12151 = vst [vmem:[#allocation129_spill] sm:$0xff] %v6724_v59  ;;  %v628_v59 = vld [vmem:[%s5944_s24 + $0x6d8] sm:$0xff] }
 0x253   : > { %12152 = vst [vmem:[#allocation130_spill] sm:$0xff] %v6727_v38  ;;  %v1579_v1 = vsel %vm921_vm0, %v628_v59, 0.0 }
 0x255   : > { %1577 = vadd.xlane.f32.xlu2 %v1576_v26  ;;  %1574 = vadd.xlane.f32.xlu1 %v1573_v27  ;;  %v633_v26 = vld [vmem:[%s5944_s24 + $0x700] sm:$0xff]  ;;  %v632_v27 = vld [vmem:[%s5944_s24 + $0x6f8] sm:$0xff] }
 0x256   : > { %1571 = vadd.xlane.f32.xlu0 %v1570_v41  ;;  %v1594_v53 = vsel %vm921_vm0, %v633_v26, 0.0  ;;  %v1591_v62 = vsel %vm921_vm0, %v632_v27, 0.0 }
 0x258   : > { %v6734_v50 = vpop.xlane.xlu2 %1451  ;;  %v6736_v39 = vpop.xlane.xlu1 %1448 }
 0x259   : > { %12153 = vst [vmem:[#allocation131_spill] sm:$0xff] %v6734_v50  ;;  %v6739_v38 = vpop.xlane.xlu0 %1445  ;;  %v631_v50 = vld [vmem:[%s5944_s24 + $0x6f0] sm:$0xff] }
 0x25a   : > { %12154 = vst [vmem:[#allocation132_spill] sm:$0xff] %v6736_v39  ;;  %v1588_v59 = vsel %vm921_vm0, %v631_v50, 0.0 }
 0x25b   : > { %12155 = vst [vmem:[#allocation133_spill] sm:$0xff] %v6739_v38 }
 0x25d   : > { %1586 = vadd.xlane.f32.xlu2 %v1585_v8  ;;  %1583 = vadd.xlane.f32.xlu1 %v1582_v16  ;;  %v636_v8 = vld [vmem:[%s5944_s24 + $0x718] sm:$0xff]  ;;  %v635_v16 = vld [vmem:[%s5944_s24 + $0x710] sm:$0xff] }
 0x25e   : > { %1580 = vadd.xlane.f32.xlu0 %v1579_v1  ;;  %v1603_v26 = vsel %vm921_vm0, %v636_v8, 0.0  ;;  %v1600_v27 = vsel %vm921_vm0, %v635_v16, 0.0 }
 0x260   : > { %v6746_v41 = vpop.xlane.xlu2 %1460  ;;  %v6748_v39 = vpop.xlane.xlu1 %1457 }
 0x261   : > { %12156 = vst [vmem:[#allocation134_spill] sm:$0xff] %v6746_v41  ;;  %v6751_v38 = vpop.xlane.xlu0 %1454 }
 0x262   : > { %12157 = vst [vmem:[#allocation135_spill] sm:$0xff] %v6748_v39  ;;  %v634_v39 = vld [vmem:[%s5944_s24 + $0x708] sm:$0xff] }
 0x263   : > { %12158 = vst [vmem:[#allocation136_spill] sm:$0xff] %v6751_v38  ;;  %v1597_v50 = vsel %vm921_vm0, %v634_v39, 0.0 }
 0x265   : > { %1595 = vadd.xlane.f32.xlu2 %v1594_v53  ;;  %1592 = vadd.xlane.f32.xlu1 %v1591_v62  ;;  %v639_v53 = vld [vmem:[%s5944_s24 + $0x730] sm:$0xff]  ;;  %v638_v62 = vld [vmem:[%s5944_s24 + $0x728] sm:$0xff] }
 0x266   : > { %1589 = vadd.xlane.f32.xlu0 %v1588_v59  ;;  %v1612_v8 = vsel %vm921_vm0, %v639_v53, 0.0  ;;  %v1609_v16 = vsel %vm921_vm0, %v638_v62, 0.0 }
 0x268   : > { %v6758_v1 = vpop.xlane.xlu2 %1469  ;;  %v6760_v41 = vpop.xlane.xlu1 %1466 }
 0x269   : > { %12159 = vst [vmem:[#allocation137_spill] sm:$0xff] %v6758_v1  ;;  %v6763_v38 = vpop.xlane.xlu0 %1463 }
 0x26a   : > { %12160 = vst [vmem:[#allocation138_spill] sm:$0xff] %v6760_v41  ;;  %v637_v41 = vld [vmem:[%s5944_s24 + $0x720] sm:$0xff] }
 0x26b   : > { %12161 = vst [vmem:[#allocation139_spill] sm:$0xff] %v6763_v38  ;;  %v1606_v39 = vsel %vm921_vm0, %v637_v41, 0.0 }
 0x26d   : > { %1604 = vadd.xlane.f32.xlu2 %v1603_v26  ;;  %1601 = vadd.xlane.f32.xlu1 %v1600_v27  ;;  %v642_v26 = vld [vmem:[%s5944_s24 + $0x748] sm:$0xff]  ;;  %v641_v27 = vld [vmem:[%s5944_s24 + $0x740] sm:$0xff] }
 0x26e   : > { %1598 = vadd.xlane.f32.xlu0 %v1597_v50  ;;  %v1621_v53 = vsel %vm921_vm0, %v642_v26, 0.0  ;;  %v1618_v62 = vsel %vm921_vm0, %v641_v27, 0.0 }
 0x270   : > { %v6770_v59 = vpop.xlane.xlu2 %1478  ;;  %v6772_v1 = vpop.xlane.xlu1 %1475 }
 0x271   : > { %12162 = vst [vmem:[#allocation140_spill] sm:$0xff] %v6770_v59  ;;  %v6775_v38 = vpop.xlane.xlu0 %1472 }
 0x272   : > { %12163 = vst [vmem:[#allocation141_spill] sm:$0xff] %v6772_v1  ;;  %v640_v1 = vld [vmem:[%s5944_s24 + $0x738] sm:$0xff] }
 0x273   : > { %12164 = vst [vmem:[#allocation142_spill] sm:$0xff] %v6775_v38  ;;  %v1615_v41 = vsel %vm921_vm0, %v640_v1, 0.0 }
 0x275   : > { %1613 = vadd.xlane.f32.xlu2 %v1612_v8  ;;  %1610 = vadd.xlane.f32.xlu1 %v1609_v16  ;;  %v645_v8 = vld [vmem:[%s5944_s24 + $0x760] sm:$0xff]  ;;  %v644_v16 = vld [vmem:[%s5944_s24 + $0x758] sm:$0xff] }
 0x276   : > { %1607 = vadd.xlane.f32.xlu0 %v1606_v39  ;;  %v1630_v26 = vsel %vm921_vm0, %v645_v8, 0.0  ;;  %v1627_v27 = vsel %vm921_vm0, %v644_v16, 0.0 }
 0x278   : > { %v6782_v50 = vpop.xlane.xlu2 %1487  ;;  %v6784_v59 = vpop.xlane.xlu1 %1484 }
 0x279   : > { %12165 = vst [vmem:[#allocation143_spill] sm:$0xff] %v6782_v50  ;;  %v6787_v38 = vpop.xlane.xlu0 %1481 }
 0x27a   : > { %12166 = vst [vmem:[#allocation144_spill] sm:$0xff] %v6784_v59  ;;  %v643_v59 = vld [vmem:[%s5944_s24 + $0x750] sm:$0xff] }
 0x27b   : > { %12167 = vst [vmem:[#allocation145_spill] sm:$0xff] %v6787_v38  ;;  %v1624_v1 = vsel %vm921_vm0, %v643_v59, 0.0 }
 0x27d   : > { %1622 = vadd.xlane.f32.xlu2 %v1621_v53  ;;  %1619 = vadd.xlane.f32.xlu1 %v1618_v62  ;;  %v648_v53 = vld [vmem:[%s5944_s24 + $0x778] sm:$0xff]  ;;  %v647_v62 = vld [vmem:[%s5944_s24 + $0x770] sm:$0xff] }
 0x27e   : > { %1616 = vadd.xlane.f32.xlu0 %v1615_v41  ;;  %v1639_v8 = vsel %vm921_vm0, %v648_v53, 0.0  ;;  %v1636_v16 = vsel %vm921_vm0, %v647_v62, 0.0 }
 0x280   : > { %v6794_v39 = vpop.xlane.xlu2 %1496  ;;  %v6796_v50 = vpop.xlane.xlu1 %1493 }
 0x281   : > { %12168 = vst [vmem:[#allocation146_spill] sm:$0xff] %v6794_v39  ;;  %v6799_v38 = vpop.xlane.xlu0 %1490  ;;  %v646_v39 = vld [vmem:[%s5944_s24 + $0x768] sm:$0xff] }
 0x282   : > { %12169 = vst [vmem:[#allocation147_spill] sm:$0xff] %v6796_v50  ;;  %v1633_v59 = vsel %vm921_vm0, %v646_v39, 0.0 }
 0x283   : > { %12170 = vst [vmem:[#allocation148_spill] sm:$0xff] %v6799_v38 }
 0x285   : > { %1631 = vadd.xlane.f32.xlu2 %v1630_v26  ;;  %1628 = vadd.xlane.f32.xlu1 %v1627_v27  ;;  %v651_v26 = vld [vmem:[%s5944_s24 + $0x790] sm:$0xff]  ;;  %v650_v27 = vld [vmem:[%s5944_s24 + $0x788] sm:$0xff] }
 0x286   : > { %1625 = vadd.xlane.f32.xlu0 %v1624_v1  ;;  %v1648_v53 = vsel %vm921_vm0, %v651_v26, 0.0  ;;  %v1645_v62 = vsel %vm921_vm0, %v650_v27, 0.0 }
 0x288   : > { %v6806_v41 = vpop.xlane.xlu2 %1505  ;;  %v6808_v50 = vpop.xlane.xlu1 %1502 }
 0x289   : > { %12171 = vst [vmem:[#allocation149_spill] sm:$0xff] %v6806_v41  ;;  %v6811_v38 = vpop.xlane.xlu0 %1499 }
 0x28a   : > { %12172 = vst [vmem:[#allocation150_spill] sm:$0xff] %v6808_v50  ;;  %v649_v50 = vld [vmem:[%s5944_s24 + $0x780] sm:$0xff] }
 0x28b   : > { %12173 = vst [vmem:[#allocation151_spill] sm:$0xff] %v6811_v38  ;;  %v1642_v39 = vsel %vm921_vm0, %v649_v50, 0.0 }
 0x28d   : > { %1640 = vadd.xlane.f32.xlu2 %v1639_v8  ;;  %1637 = vadd.xlane.f32.xlu1 %v1636_v16  ;;  %v654_v8 = vld [vmem:[%s5944_s24 + $0x7a8] sm:$0xff]  ;;  %v653_v16 = vld [vmem:[%s5944_s24 + $0x7a0] sm:$0xff] }
 0x28e   : > { %1634 = vadd.xlane.f32.xlu0 %v1633_v59  ;;  %v1657_v26 = vsel %vm921_vm0, %v654_v8, 0.0  ;;  %v1654_v27 = vsel %vm921_vm0, %v653_v16, 0.0 }
 0x290   : > { %v6818_v1 = vpop.xlane.xlu2 %1514  ;;  %v6820_v41 = vpop.xlane.xlu1 %1511 }
 0x291   : > { %12174 = vst [vmem:[#allocation152_spill] sm:$0xff] %v6818_v1  ;;  %v6823_v38 = vpop.xlane.xlu0 %1508 }
 0x292   : > { %12175 = vst [vmem:[#allocation153_spill] sm:$0xff] %v6820_v41  ;;  %v652_v41 = vld [vmem:[%s5944_s24 + $0x798] sm:$0xff] }
 0x293   : > { %12176 = vst [vmem:[#allocation154_spill] sm:$0xff] %v6823_v38  ;;  %v1651_v50 = vsel %vm921_vm0, %v652_v41, 0.0 }
 0x295   : > { %1649 = vadd.xlane.f32.xlu2 %v1648_v53  ;;  %1646 = vadd.xlane.f32.xlu1 %v1645_v62  ;;  %v657_v53 = vld [vmem:[%s5944_s24 + $0x7c0] sm:$0xff]  ;;  %v656_v62 = vld [vmem:[%s5944_s24 + $0x7b8] sm:$0xff] }
 0x296   : > { %1643 = vadd.xlane.f32.xlu0 %v1642_v39  ;;  %v1666_v8 = vsel %vm921_vm0, %v657_v53, 0.0  ;;  %v1663_v16 = vsel %vm921_vm0, %v656_v62, 0.0 }
 0x298   : > { %v6830_v59 = vpop.xlane.xlu2 %1523  ;;  %v6832_v1 = vpop.xlane.xlu1 %1520 }
 0x299   : > { %12177 = vst [vmem:[#allocation155_spill] sm:$0xff] %v6830_v59  ;;  %v6835_v38 = vpop.xlane.xlu0 %1517 }
 0x29a   : > { %12178 = vst [vmem:[#allocation156_spill] sm:$0xff] %v6832_v1  ;;  %v655_v1 = vld [vmem:[%s5944_s24 + $0x7b0] sm:$0xff] }
 0x29b   : > { %12179 = vst [vmem:[#allocation157_spill] sm:$0xff] %v6835_v38  ;;  %v1660_v41 = vsel %vm921_vm0, %v655_v1, 0.0 }
 0x29d   : > { %1658 = vadd.xlane.f32.xlu2 %v1657_v26  ;;  %1655 = vadd.xlane.f32.xlu1 %v1654_v27  ;;  %v660_v26 = vld [vmem:[%s5944_s24 + $0x7d8] sm:$0xff]  ;;  %v659_v27 = vld [vmem:[%s5944_s24 + $0x7d0] sm:$0xff] }
 0x29e   : > { %1652 = vadd.xlane.f32.xlu0 %v1651_v50  ;;  %v1675_v53 = vsel %vm921_vm0, %v660_v26, 0.0  ;;  %v1672_v62 = vsel %vm921_vm0, %v659_v27, 0.0 }
 0x2a0   : > { %v6842_v39 = vpop.xlane.xlu2 %1532  ;;  %v6844_v59 = vpop.xlane.xlu1 %1529 }
 0x2a1   : > { %12180 = vst [vmem:[#allocation158_spill] sm:$0xff] %v6842_v39  ;;  %v6847_v38 = vpop.xlane.xlu0 %1526  ;;  %v658_v39 = vld [vmem:[%s5944_s24 + $0x7c8] sm:$0xff] }
 0x2a2   : > { %12181 = vst [vmem:[#allocation159_spill] sm:$0xff] %v6844_v59  ;;  %v1669_v1 = vsel %vm921_vm0, %v658_v39, 0.0 }
 0x2a3   : > { %12182 = vst [vmem:[#allocation160_spill] sm:$0xff] %v6847_v38 }
 0x2a5   : > { %1667 = vadd.xlane.f32.xlu2 %v1666_v8  ;;  %1664 = vadd.xlane.f32.xlu1 %v1663_v16  ;;  %v663_v8 = vld [vmem:[%s5944_s24 + $0x7f0] sm:$0xff]  ;;  %v662_v16 = vld [vmem:[%s5944_s24 + $0x7e8] sm:$0xff] }
 0x2a6   : > { %1661 = vadd.xlane.f32.xlu0 %v1660_v41  ;;  %v1684_v26 = vsel %vm921_vm0, %v663_v8, 0.0  ;;  %v1681_v27 = vsel %vm921_vm0, %v662_v16, 0.0 }
 0x2a8   : > { %v6854_v50 = vpop.xlane.xlu2 %1541  ;;  %v6856_v59 = vpop.xlane.xlu1 %1538 }
 0x2a9   : > { %12183 = vst [vmem:[#allocation161_spill] sm:$0xff] %v6854_v50  ;;  %v6859_v38 = vpop.xlane.xlu0 %1535 }
 0x2aa   : > { %12184 = vst [vmem:[#allocation162_spill] sm:$0xff] %v6856_v59  ;;  %v661_v59 = vld [vmem:[%s5944_s24 + $0x7e0] sm:$0xff] }
 0x2ab   : > { %12185 = vst [vmem:[#allocation163_spill] sm:$0xff] %v6859_v38  ;;  %v1678_v39 = vsel %vm921_vm0, %v661_v59, 0.0 }
 0x2ad   : > { %1676 = vadd.xlane.f32.xlu2 %v1675_v53  ;;  %1673 = vadd.xlane.f32.xlu1 %v1672_v62  ;;  %v666_v53 = vld [vmem:[%s5944_s24 + $0x808] sm:$0xff]  ;;  %v665_v62 = vld [vmem:[%s5944_s24 + $0x800] sm:$0xff] }
 0x2ae   : > { %1670 = vadd.xlane.f32.xlu0 %v1669_v1  ;;  %v1693_v8 = vsel %vm921_vm0, %v666_v53, 0.0  ;;  %v1690_v16 = vsel %vm921_vm0, %v665_v62, 0.0 }
 0x2b0   : > { %v6866_v41 = vpop.xlane.xlu2 %1550  ;;  %v6868_v50 = vpop.xlane.xlu1 %1547 }
 0x2b1   : > { %12186 = vst [vmem:[#allocation164_spill] sm:$0xff] %v6866_v41  ;;  %v6871_v38 = vpop.xlane.xlu0 %1544  ;;  %v664_v41 = vld [vmem:[%s5944_s24 + $0x7f8] sm:$0xff] }
 0x2b2   : > { %12187 = vst [vmem:[#allocation165_spill] sm:$0xff] %v6868_v50  ;;  %v1687_v59 = vsel %vm921_vm0, %v664_v41, 0.0 }
 0x2b3   : > { %12188 = vst [vmem:[#allocation166_spill] sm:$0xff] %v6871_v38 }
 0x2b5   : > { %1685 = vadd.xlane.f32.xlu2 %v1684_v26  ;;  %1682 = vadd.xlane.f32.xlu1 %v1681_v27  ;;  %v669_v26 = vld [vmem:[%s5944_s24 + $0x820] sm:$0xff]  ;;  %v668_v27 = vld [vmem:[%s5944_s24 + $0x818] sm:$0xff] }
 0x2b6   : > { %1679 = vadd.xlane.f32.xlu0 %v1678_v39  ;;  %v1702_v53 = vsel %vm921_vm0, %v669_v26, 0.0  ;;  %v1699_v62 = vsel %vm921_vm0, %v668_v27, 0.0 }
 0x2b8   : > { %v6878_v1 = vpop.xlane.xlu2 %1559  ;;  %v6880_v50 = vpop.xlane.xlu1 %1556 }
 0x2b9   : > { %12189 = vst [vmem:[#allocation167_spill] sm:$0xff] %v6878_v1  ;;  %v6883_v38 = vpop.xlane.xlu0 %1553 }
 0x2ba   : > { %12190 = vst [vmem:[#allocation168_spill] sm:$0xff] %v6880_v50  ;;  %v667_v50 = vld [vmem:[%s5944_s24 + $0x810] sm:$0xff] }
 0x2bb   : > { %12191 = vst [vmem:[#allocation169_spill] sm:$0xff] %v6883_v38  ;;  %v1696_v41 = vsel %vm921_vm0, %v667_v50, 0.0 }
 0x2bd   : > { %1694 = vadd.xlane.f32.xlu2 %v1693_v8  ;;  %1691 = vadd.xlane.f32.xlu1 %v1690_v16  ;;  %v672_v8 = vld [vmem:[%s5944_s24 + $0x838] sm:$0xff]  ;;  %v671_v16 = vld [vmem:[%s5944_s24 + $0x830] sm:$0xff] }
 0x2be   : > { %1688 = vadd.xlane.f32.xlu0 %v1687_v59  ;;  %v1711_v26 = vsel %vm921_vm0, %v672_v8, 0.0  ;;  %v1708_v27 = vsel %vm921_vm0, %v671_v16, 0.0 }
 0x2c0   : > { %v6890_v39 = vpop.xlane.xlu2 %1568  ;;  %v6892_v1 = vpop.xlane.xlu1 %1565 }
 0x2c1   : > { %12192 = vst [vmem:[#allocation170_spill] sm:$0xff] %v6890_v39  ;;  %v6895_v38 = vpop.xlane.xlu0 %1562 }
 0x2c2   : > { %12193 = vst [vmem:[#allocation171_spill] sm:$0xff] %v6892_v1  ;;  %v670_v1 = vld [vmem:[%s5944_s24 + $0x828] sm:$0xff] }
 0x2c3   : > { %12194 = vst [vmem:[#allocation172_spill] sm:$0xff] %v6895_v38  ;;  %v1705_v50 = vsel %vm921_vm0, %v670_v1, 0.0 }
 0x2c5   : > { %1703 = vadd.xlane.f32.xlu2 %v1702_v53  ;;  %1700 = vadd.xlane.f32.xlu1 %v1699_v62  ;;  %v675_v53 = vld [vmem:[%s5944_s24 + $0x850] sm:$0xff]  ;;  %v674_v62 = vld [vmem:[%s5944_s24 + $0x848] sm:$0xff] }
 0x2c6   : > { %1697 = vadd.xlane.f32.xlu0 %v1696_v41  ;;  %v1720_v8 = vsel %vm921_vm0, %v675_v53, 0.0  ;;  %v1717_v16 = vsel %vm921_vm0, %v674_v62, 0.0 }
 0x2c8   : > { %v6902_v59 = vpop.xlane.xlu2 %1577  ;;  %v6904_v39 = vpop.xlane.xlu1 %1574 }
 0x2c9   : > { %12195 = vst [vmem:[#allocation173_spill] sm:$0xff] %v6902_v59  ;;  %v6907_v38 = vpop.xlane.xlu0 %1571 }
 0x2ca   : > { %12196 = vst [vmem:[#allocation174_spill] sm:$0xff] %v6904_v39  ;;  %v673_v39 = vld [vmem:[%s5944_s24 + $0x840] sm:$0xff] }
 0x2cb   : > { %12197 = vst [vmem:[#allocation175_spill] sm:$0xff] %v6907_v38  ;;  %v1714_v1 = vsel %vm921_vm0, %v673_v39, 0.0 }
 0x2cd   : > { %1712 = vadd.xlane.f32.xlu2 %v1711_v26  ;;  %1709 = vadd.xlane.f32.xlu1 %v1708_v27  ;;  %v678_v26 = vld [vmem:[%s5944_s24 + $0x868] sm:$0xff]  ;;  %v677_v27 = vld [vmem:[%s5944_s24 + $0x860] sm:$0xff] }
 0x2ce   : > { %1706 = vadd.xlane.f32.xlu0 %v1705_v50  ;;  %v1729_v53 = vsel %vm921_vm0, %v678_v26, 0.0  ;;  %v1726_v62 = vsel %vm921_vm0, %v677_v27, 0.0 }
 0x2d0   : > { %v6914_v41 = vpop.xlane.xlu2 %1586  ;;  %v6916_v59 = vpop.xlane.xlu1 %1583 }
 0x2d1   : > { %12198 = vst [vmem:[#allocation176_spill] sm:$0xff] %v6914_v41  ;;  %v6919_v38 = vpop.xlane.xlu0 %1580  ;;  %v676_v41 = vld [vmem:[%s5944_s24 + $0x858] sm:$0xff] }
 0x2d2   : > { %12199 = vst [vmem:[#allocation177_spill] sm:$0xff] %v6916_v59  ;;  %v1723_v39 = vsel %vm921_vm0, %v676_v41, 0.0 }
 0x2d3   : > { %12200 = vst [vmem:[#allocation178_spill] sm:$0xff] %v6919_v38 }
 0x2d5   : > { %1721 = vadd.xlane.f32.xlu2 %v1720_v8  ;;  %1718 = vadd.xlane.f32.xlu1 %v1717_v16  ;;  %v681_v8 = vld [vmem:[%s5944_s24 + $0x880] sm:$0xff]  ;;  %v680_v16 = vld [vmem:[%s5944_s24 + $0x878] sm:$0xff] }
 0x2d6   : > { %1715 = vadd.xlane.f32.xlu0 %v1714_v1  ;;  %v1738_v26 = vsel %vm921_vm0, %v681_v8, 0.0  ;;  %v1735_v27 = vsel %vm921_vm0, %v680_v16, 0.0 }
 0x2d8   : > { %v6926_v50 = vpop.xlane.xlu2 %1595  ;;  %v6928_v59 = vpop.xlane.xlu1 %1592 }
 0x2d9   : > { %12201 = vst [vmem:[#allocation179_spill] sm:$0xff] %v6926_v50  ;;  %v6931_v38 = vpop.xlane.xlu0 %1589  ;;  %v679_v50 = vld [vmem:[%s5944_s24 + $0x870] sm:$0xff] }
 0x2da   : > { %12202 = vst [vmem:[#allocation180_spill] sm:$0xff] %v6928_v59  ;;  %v1732_v41 = vsel %vm921_vm0, %v679_v50, 0.0 }
 0x2db   : > { %12203 = vst [vmem:[#allocation181_spill] sm:$0xff] %v6931_v38 }
 0x2dd   : > { %1730 = vadd.xlane.f32.xlu2 %v1729_v53  ;;  %1727 = vadd.xlane.f32.xlu1 %v1726_v62  ;;  %v684_v53 = vld [vmem:[%s5944_s24 + $0x898] sm:$0xff]  ;;  %v683_v62 = vld [vmem:[%s5944_s24 + $0x890] sm:$0xff] }
 0x2de   : > { %1724 = vadd.xlane.f32.xlu0 %v1723_v39  ;;  %v1747_v8 = vsel %vm921_vm0, %v684_v53, 0.0  ;;  %v1744_v16 = vsel %vm921_vm0, %v683_v62, 0.0 }
 0x2e0   : > { %v6938_v1 = vpop.xlane.xlu2 %1604  ;;  %v6940_v59 = vpop.xlane.xlu1 %1601 }
 0x2e1   : > { %12204 = vst [vmem:[#allocation182_spill] sm:$0xff] %v6938_v1  ;;  %v6943_v38 = vpop.xlane.xlu0 %1598 }
 0x2e2   : > { %12205 = vst [vmem:[#allocation183_spill] sm:$0xff] %v6940_v59  ;;  %v682_v59 = vld [vmem:[%s5944_s24 + $0x888] sm:$0xff] }
 0x2e3   : > { %12206 = vst [vmem:[#allocation184_spill] sm:$0xff] %v6943_v38  ;;  %v1741_v50 = vsel %vm921_vm0, %v682_v59, 0.0 }
 0x2e5   : > { %1739 = vadd.xlane.f32.xlu2 %v1738_v26  ;;  %1736 = vadd.xlane.f32.xlu1 %v1735_v27  ;;  %v687_v26 = vld [vmem:[%s5944_s24 + $0x8b0] sm:$0xff]  ;;  %v686_v27 = vld [vmem:[%s5944_s24 + $0x8a8] sm:$0xff] }
 0x2e6   : > { %1733 = vadd.xlane.f32.xlu0 %v1732_v41  ;;  %v1756_v53 = vsel %vm921_vm0, %v687_v26, 0.0  ;;  %v1753_v62 = vsel %vm921_vm0, %v686_v27, 0.0 }
 0x2e8   : > { %v6950_v39 = vpop.xlane.xlu2 %1613  ;;  %v6952_v1 = vpop.xlane.xlu1 %1610 }
 0x2e9   : > { %12207 = vst [vmem:[#allocation185_spill] sm:$0xff] %v6950_v39  ;;  %v6955_v38 = vpop.xlane.xlu0 %1607 }
 0x2ea   : > { %12208 = vst [vmem:[#allocation186_spill] sm:$0xff] %v6952_v1  ;;  %v685_v1 = vld [vmem:[%s5944_s24 + $0x8a0] sm:$0xff] }
 0x2eb   : > { %12209 = vst [vmem:[#allocation187_spill] sm:$0xff] %v6955_v38  ;;  %v1750_v59 = vsel %vm921_vm0, %v685_v1, 0.0 }
 0x2ed   : > { %1748 = vadd.xlane.f32.xlu2 %v1747_v8  ;;  %1745 = vadd.xlane.f32.xlu1 %v1744_v16  ;;  %v690_v8 = vld [vmem:[%s5944_s24 + $0x8c8] sm:$0xff]  ;;  %v689_v16 = vld [vmem:[%s5944_s24 + $0x8c0] sm:$0xff] }
 0x2ee   : > { %1742 = vadd.xlane.f32.xlu0 %v1741_v50  ;;  %v1765_v26 = vsel %vm921_vm0, %v690_v8, 0.0  ;;  %v1762_v27 = vsel %vm921_vm0, %v689_v16, 0.0 }
 0x2f0   : > { %v6962_v41 = vpop.xlane.xlu2 %1622  ;;  %v6964_v39 = vpop.xlane.xlu1 %1619 }
 0x2f1   : > { %12210 = vst [vmem:[#allocation188_spill] sm:$0xff] %v6962_v41  ;;  %v6967_v38 = vpop.xlane.xlu0 %1616 }
 0x2f2   : > { %12211 = vst [vmem:[#allocation189_spill] sm:$0xff] %v6964_v39  ;;  %v688_v39 = vld [vmem:[%s5944_s24 + $0x8b8] sm:$0xff] }
 0x2f3   : > { %12212 = vst [vmem:[#allocation190_spill] sm:$0xff] %v6967_v38  ;;  %v1759_v1 = vsel %vm921_vm0, %v688_v39, 0.0 }
 0x2f5   : > { %1757 = vadd.xlane.f32.xlu2 %v1756_v53  ;;  %1754 = vadd.xlane.f32.xlu1 %v1753_v62  ;;  %v693_v53 = vld [vmem:[%s5944_s24 + $0x8e0] sm:$0xff]  ;;  %v692_v62 = vld [vmem:[%s5944_s24 + $0x8d8] sm:$0xff] }
 0x2f6   : > { %1751 = vadd.xlane.f32.xlu0 %v1750_v59  ;;  %v1774_v8 = vsel %vm921_vm0, %v693_v53, 0.0  ;;  %v1771_v16 = vsel %vm921_vm0, %v692_v62, 0.0 }
 0x2f8   : > { %v6974_v50 = vpop.xlane.xlu2 %1631  ;;  %v6976_v41 = vpop.xlane.xlu1 %1628 }
 0x2f9   : > { %12213 = vst [vmem:[#allocation191_spill] sm:$0xff] %v6974_v50  ;;  %v6979_v38 = vpop.xlane.xlu0 %1625 }
 0x2fa   : > { %12214 = vst [vmem:[#allocation192_spill] sm:$0xff] %v6976_v41  ;;  %v691_v41 = vld [vmem:[%s5944_s24 + $0x8d0] sm:$0xff] }
 0x2fb   : > { %12215 = vst [vmem:[#allocation193_spill] sm:$0xff] %v6979_v38  ;;  %v1768_v39 = vsel %vm921_vm0, %v691_v41, 0.0 }
 0x2fd   : > { %1766 = vadd.xlane.f32.xlu2 %v1765_v26  ;;  %1763 = vadd.xlane.f32.xlu1 %v1762_v27  ;;  %v696_v26 = vld [vmem:[%s5944_s24 + $0x8f8] sm:$0xff]  ;;  %v695_v27 = vld [vmem:[%s5944_s24 + $0x8f0] sm:$0xff] }
 0x2fe   : > { %1760 = vadd.xlane.f32.xlu0 %v1759_v1  ;;  %v1783_v53 = vsel %vm921_vm0, %v696_v26, 0.0  ;;  %v1780_v62 = vsel %vm921_vm0, %v695_v27, 0.0 }
 0x300   : > { %v6986_v59 = vpop.xlane.xlu2 %1640  ;;  %v6988_v50 = vpop.xlane.xlu1 %1637 }
 0x301   : > { %12216 = vst [vmem:[#allocation194_spill] sm:$0xff] %v6986_v59  ;;  %v6991_v38 = vpop.xlane.xlu0 %1634  ;;  %v694_v59 = vld [vmem:[%s5944_s24 + $0x8e8] sm:$0xff] }
 0x302   : > { %12217 = vst [vmem:[#allocation195_spill] sm:$0xff] %v6988_v50  ;;  %v1777_v41 = vsel %vm921_vm0, %v694_v59, 0.0 }
 0x303   : > { %12218 = vst [vmem:[#allocation196_spill] sm:$0xff] %v6991_v38 }
 0x305   : > { %1775 = vadd.xlane.f32.xlu2 %v1774_v8  ;;  %1772 = vadd.xlane.f32.xlu1 %v1771_v16  ;;  %v699_v8 = vld [vmem:[%s5944_s24 + $0x910] sm:$0xff]  ;;  %v698_v16 = vld [vmem:[%s5944_s24 + $0x908] sm:$0xff] }
 0x306   : > { %1769 = vadd.xlane.f32.xlu0 %v1768_v39  ;;  %v1792_v26 = vsel %vm921_vm0, %v699_v8, 0.0  ;;  %v1789_v27 = vsel %vm921_vm0, %v698_v16, 0.0 }
 0x308   : > { %v6998_v1 = vpop.xlane.xlu2 %1649  ;;  %v7000_v50 = vpop.xlane.xlu1 %1646 }
 0x309   : > { %12219 = vst [vmem:[#allocation197_spill] sm:$0xff] %v6998_v1  ;;  %v7003_v38 = vpop.xlane.xlu0 %1643 }
 0x30a   : > { %12220 = vst [vmem:[#allocation198_spill] sm:$0xff] %v7000_v50  ;;  %v697_v50 = vld [vmem:[%s5944_s24 + $0x900] sm:$0xff] }
 0x30b   : > { %12221 = vst [vmem:[#allocation199_spill] sm:$0xff] %v7003_v38  ;;  %v1786_v59 = vsel %vm921_vm0, %v697_v50, 0.0 }
 0x30d   : > { %1784 = vadd.xlane.f32.xlu2 %v1783_v53  ;;  %1781 = vadd.xlane.f32.xlu1 %v1780_v62  ;;  %v702_v53 = vld [vmem:[%s5944_s24 + $0x928] sm:$0xff]  ;;  %v701_v62 = vld [vmem:[%s5944_s24 + $0x920] sm:$0xff] }
 0x30e   : > { %1778 = vadd.xlane.f32.xlu0 %v1777_v41  ;;  %v1801_v8 = vsel %vm921_vm0, %v702_v53, 0.0  ;;  %v1798_v16 = vsel %vm921_vm0, %v701_v62, 0.0 }
 0x310   : > { %v7010_v39 = vpop.xlane.xlu2 %1658  ;;  %v7012_v1 = vpop.xlane.xlu1 %1655 }
 0x311   : > { %12222 = vst [vmem:[#allocation200_spill] sm:$0xff] %v7010_v39  ;;  %v7015_v38 = vpop.xlane.xlu0 %1652 }
 0x312   : > { %12223 = vst [vmem:[#allocation201_spill] sm:$0xff] %v7012_v1  ;;  %v700_v1 = vld [vmem:[%s5944_s24 + $0x918] sm:$0xff] }
 0x313   : > { %12224 = vst [vmem:[#allocation202_spill] sm:$0xff] %v7015_v38  ;;  %v1795_v50 = vsel %vm921_vm0, %v700_v1, 0.0 }
 0x315   : > { %1793 = vadd.xlane.f32.xlu2 %v1792_v26  ;;  %1790 = vadd.xlane.f32.xlu1 %v1789_v27  ;;  %v705_v26 = vld [vmem:[%s5944_s24 + $0x940] sm:$0xff]  ;;  %v704_v27 = vld [vmem:[%s5944_s24 + $0x938] sm:$0xff] }
 0x316   : > { %1787 = vadd.xlane.f32.xlu0 %v1786_v59  ;;  %v1810_v53 = vsel %vm921_vm0, %v705_v26, 0.0  ;;  %v1807_v62 = vsel %vm921_vm0, %v704_v27, 0.0 }
 0x318   : > { %v7022_v41 = vpop.xlane.xlu2 %1667  ;;  %v7024_v39 = vpop.xlane.xlu1 %1664 }
 0x319   : > { %12225 = vst [vmem:[#allocation203_spill] sm:$0xff] %v7022_v41  ;;  %v7027_v38 = vpop.xlane.xlu0 %1661 }
 0x31a   : > { %12226 = vst [vmem:[#allocation204_spill] sm:$0xff] %v7024_v39  ;;  %v703_v39 = vld [vmem:[%s5944_s24 + $0x930] sm:$0xff] }
 0x31b   : > { %12227 = vst [vmem:[#allocation205_spill] sm:$0xff] %v7027_v38  ;;  %v1804_v1 = vsel %vm921_vm0, %v703_v39, 0.0 }
 0x31d   : > { %1802 = vadd.xlane.f32.xlu2 %v1801_v8  ;;  %1799 = vadd.xlane.f32.xlu1 %v1798_v16  ;;  %v708_v8 = vld [vmem:[%s5944_s24 + $0x958] sm:$0xff]  ;;  %v707_v16 = vld [vmem:[%s5944_s24 + $0x950] sm:$0xff] }
 0x31e   : > { %1796 = vadd.xlane.f32.xlu0 %v1795_v50  ;;  %v1819_v26 = vsel %vm921_vm0, %v708_v8, 0.0  ;;  %v1816_v27 = vsel %vm921_vm0, %v707_v16, 0.0 }
 0x320   : > { %v7034_v59 = vpop.xlane.xlu2 %1676  ;;  %v7036_v41 = vpop.xlane.xlu1 %1673 }
 0x321   : > { %12228 = vst [vmem:[#allocation206_spill] sm:$0xff] %v7034_v59  ;;  %v7039_v38 = vpop.xlane.xlu0 %1670  ;;  %v706_v59 = vld [vmem:[%s5944_s24 + $0x948] sm:$0xff] }
 0x322   : > { %12229 = vst [vmem:[#allocation207_spill] sm:$0xff] %v7036_v41  ;;  %v1813_v39 = vsel %vm921_vm0, %v706_v59, 0.0 }
 0x323   : > { %12230 = vst [vmem:[#allocation208_spill] sm:$0xff] %v7039_v38 }
 0x325   : > { %1811 = vadd.xlane.f32.xlu2 %v1810_v53  ;;  %1808 = vadd.xlane.f32.xlu1 %v1807_v62  ;;  %v711_v53 = vld [vmem:[%s5944_s24 + $0x970] sm:$0xff]  ;;  %v710_v62 = vld [vmem:[%s5944_s24 + $0x968] sm:$0xff] }
 0x326   : > { %1805 = vadd.xlane.f32.xlu0 %v1804_v1  ;;  %v1828_v8 = vsel %vm921_vm0, %v711_v53, 0.0  ;;  %v1825_v16 = vsel %vm921_vm0, %v710_v62, 0.0 }
 0x328   : > { %v7046_v50 = vpop.xlane.xlu2 %1685  ;;  %v7048_v41 = vpop.xlane.xlu1 %1682 }
 0x329   : > { %12231 = vst [vmem:[#allocation209_spill] sm:$0xff] %v7046_v50  ;;  %v7051_v38 = vpop.xlane.xlu0 %1679 }
 0x32a   : > { %12232 = vst [vmem:[#allocation210_spill] sm:$0xff] %v7048_v41  ;;  %v709_v41 = vld [vmem:[%s5944_s24 + $0x960] sm:$0xff] }
 0x32b   : > { %12233 = vst [vmem:[#allocation211_spill] sm:$0xff] %v7051_v38  ;;  %v1822_v59 = vsel %vm921_vm0, %v709_v41, 0.0 }
 0x32d   : > { %1820 = vadd.xlane.f32.xlu2 %v1819_v26  ;;  %1817 = vadd.xlane.f32.xlu1 %v1816_v27  ;;  %v714_v26 = vld [vmem:[%s5944_s24 + $0x988] sm:$0xff]  ;;  %v713_v27 = vld [vmem:[%s5944_s24 + $0x980] sm:$0xff] }
 0x32e   : > { %1814 = vadd.xlane.f32.xlu0 %v1813_v39  ;;  %v1837_v53 = vsel %vm921_vm0, %v714_v26, 0.0  ;;  %v1834_v62 = vsel %vm921_vm0, %v713_v27, 0.0 }
 0x330   : > { %v7058_v1 = vpop.xlane.xlu2 %1694  ;;  %v7060_v50 = vpop.xlane.xlu1 %1691 }
 0x331   : > { %12234 = vst [vmem:[#allocation212_spill] sm:$0xff] %v7058_v1  ;;  %v7063_v38 = vpop.xlane.xlu0 %1688  ;;  %v712_v1 = vld [vmem:[%s5944_s24 + $0x978] sm:$0xff] }
 0x332   : > { %12235 = vst [vmem:[#allocation213_spill] sm:$0xff] %v7060_v50  ;;  %v1831_v41 = vsel %vm921_vm0, %v712_v1, 0.0 }
 0x333   : > { %12236 = vst [vmem:[#allocation214_spill] sm:$0xff] %v7063_v38 }
 0x335   : > { %1829 = vadd.xlane.f32.xlu2 %v1828_v8  ;;  %1826 = vadd.xlane.f32.xlu1 %v1825_v16  ;;  %v717_v8 = vld [vmem:[%s5944_s24 + $0x9a0] sm:$0xff]  ;;  %v716_v16 = vld [vmem:[%s5944_s24 + $0x998] sm:$0xff] }
 0x336   : > { %1823 = vadd.xlane.f32.xlu0 %v1822_v59  ;;  %v1846_v26 = vsel %vm921_vm0, %v717_v8, 0.0  ;;  %v1843_v27 = vsel %vm921_vm0, %v716_v16, 0.0 }
 0x338   : > { %v7070_v39 = vpop.xlane.xlu2 %1703  ;;  %v7072_v50 = vpop.xlane.xlu1 %1700 }
 0x339   : > { %12237 = vst [vmem:[#allocation215_spill] sm:$0xff] %v7070_v39  ;;  %v7075_v38 = vpop.xlane.xlu0 %1697 }
 0x33a   : > { %12238 = vst [vmem:[#allocation216_spill] sm:$0xff] %v7072_v50  ;;  %v715_v50 = vld [vmem:[%s5944_s24 + $0x990] sm:$0xff] }
 0x33b   : > { %12239 = vst [vmem:[#allocation217_spill] sm:$0xff] %v7075_v38  ;;  %v1840_v1 = vsel %vm921_vm0, %v715_v50, 0.0 }
 0x33d   : > { %1838 = vadd.xlane.f32.xlu2 %v1837_v53  ;;  %1835 = vadd.xlane.f32.xlu1 %v1834_v62  ;;  %v720_v53 = vld [vmem:[%s5944_s24 + $0x9b8] sm:$0xff]  ;;  %v719_v62 = vld [vmem:[%s5944_s24 + $0x9b0] sm:$0xff] }
 0x33e   : > { %1832 = vadd.xlane.f32.xlu0 %v1831_v41  ;;  %v1855_v8 = vsel %vm921_vm0, %v720_v53, 0.0  ;;  %v1852_v16 = vsel %vm921_vm0, %v719_v62, 0.0 }
 0x340   : > { %v7082_v59 = vpop.xlane.xlu2 %1712  ;;  %v7084_v39 = vpop.xlane.xlu1 %1709 }
 0x341   : > { %12240 = vst [vmem:[#allocation218_spill] sm:$0xff] %v7082_v59  ;;  %v7087_v38 = vpop.xlane.xlu0 %1706 }
 0x342   : > { %12241 = vst [vmem:[#allocation219_spill] sm:$0xff] %v7084_v39  ;;  %v718_v39 = vld [vmem:[%s5944_s24 + $0x9a8] sm:$0xff] }
 0x343   : > { %12242 = vst [vmem:[#allocation220_spill] sm:$0xff] %v7087_v38  ;;  %v1849_v50 = vsel %vm921_vm0, %v718_v39, 0.0 }
 0x345   : > { %1847 = vadd.xlane.f32.xlu2 %v1846_v26  ;;  %1844 = vadd.xlane.f32.xlu1 %v1843_v27  ;;  %v723_v26 = vld [vmem:[%s5944_s24 + $0x9d0] sm:$0xff]  ;;  %v722_v27 = vld [vmem:[%s5944_s24 + $0x9c8] sm:$0xff] }
 0x346   : > { %1841 = vadd.xlane.f32.xlu0 %v1840_v1  ;;  %v1864_v53 = vsel %vm921_vm0, %v723_v26, 0.0  ;;  %v1861_v62 = vsel %vm921_vm0, %v722_v27, 0.0 }
 0x348   : > { %v7094_v41 = vpop.xlane.xlu2 %1721  ;;  %v7096_v59 = vpop.xlane.xlu1 %1718 }
 0x349   : > { %12243 = vst [vmem:[#allocation221_spill] sm:$0xff] %v7094_v41  ;;  %v7099_v38 = vpop.xlane.xlu0 %1715 }
 0x34a   : > { %12244 = vst [vmem:[#allocation222_spill] sm:$0xff] %v7096_v59  ;;  %v721_v59 = vld [vmem:[%s5944_s24 + $0x9c0] sm:$0xff] }
 0x34b   : > { %12245 = vst [vmem:[#allocation223_spill] sm:$0xff] %v7099_v38  ;;  %v1858_v39 = vsel %vm921_vm0, %v721_v59, 0.0 }
 0x34d   : > { %1856 = vadd.xlane.f32.xlu2 %v1855_v8  ;;  %1853 = vadd.xlane.f32.xlu1 %v1852_v16  ;;  %v726_v8 = vld [vmem:[%s5944_s24 + $0x9e8] sm:$0xff]  ;;  %v725_v16 = vld [vmem:[%s5944_s24 + $0x9e0] sm:$0xff] }
 0x34e   : > { %1850 = vadd.xlane.f32.xlu0 %v1849_v50  ;;  %v1873_v26 = vsel %vm921_vm0, %v726_v8, 0.0  ;;  %v1870_v27 = vsel %vm921_vm0, %v725_v16, 0.0 }
 0x350   : > { %v7106_v1 = vpop.xlane.xlu2 %1730  ;;  %v7108_v41 = vpop.xlane.xlu1 %1727 }
 0x351   : > { %12246 = vst [vmem:[#allocation224_spill] sm:$0xff] %v7106_v1  ;;  %v7111_v38 = vpop.xlane.xlu0 %1724 }
 0x352   : > { %12247 = vst [vmem:[#allocation225_spill] sm:$0xff] %v7108_v41  ;;  %v724_v41 = vld [vmem:[%s5944_s24 + $0x9d8] sm:$0xff] }
 0x353   : > { %12248 = vst [vmem:[#allocation226_spill] sm:$0xff] %v7111_v38  ;;  %v1867_v59 = vsel %vm921_vm0, %v724_v41, 0.0 }
 0x355   : > { %1865 = vadd.xlane.f32.xlu2 %v1864_v53  ;;  %1862 = vadd.xlane.f32.xlu1 %v1861_v62  ;;  %v729_v53 = vld [vmem:[%s5944_s24 + $0xa00] sm:$0xff]  ;;  %v728_v62 = vld [vmem:[%s5944_s24 + $0x9f8] sm:$0xff] }
 0x356   : > { %1859 = vadd.xlane.f32.xlu0 %v1858_v39  ;;  %v1882_v8 = vsel %vm921_vm0, %v729_v53, 0.0  ;;  %v1879_v16 = vsel %vm921_vm0, %v728_v62, 0.0 }
 0x358   : > { %v7118_v50 = vpop.xlane.xlu2 %1739  ;;  %v7120_v1 = vpop.xlane.xlu1 %1736 }
 0x359   : > { %12249 = vst [vmem:[#allocation227_spill] sm:$0xff] %v7118_v50  ;;  %v7123_v38 = vpop.xlane.xlu0 %1733  ;;  %v727_v50 = vld [vmem:[%s5944_s24 + $0x9f0] sm:$0xff] }
 0x35a   : > { %12250 = vst [vmem:[#allocation228_spill] sm:$0xff] %v7120_v1  ;;  %v1876_v41 = vsel %vm921_vm0, %v727_v50, 0.0 }
 0x35b   : > { %12251 = vst [vmem:[#allocation229_spill] sm:$0xff] %v7123_v38 }
 0x35d   : > { %1874 = vadd.xlane.f32.xlu2 %v1873_v26  ;;  %1871 = vadd.xlane.f32.xlu1 %v1870_v27  ;;  %v732_v26 = vld [vmem:[%s5944_s24 + $0xa18] sm:$0xff]  ;;  %v731_v27 = vld [vmem:[%s5944_s24 + $0xa10] sm:$0xff] }
 0x35e   : > { %1868 = vadd.xlane.f32.xlu0 %v1867_v59  ;;  %v1891_v53 = vsel %vm921_vm0, %v732_v26, 0.0  ;;  %v1888_v62 = vsel %vm921_vm0, %v731_v27, 0.0 }
 0x360   : > { %v7130_v39 = vpop.xlane.xlu2 %1748  ;;  %v7132_v1 = vpop.xlane.xlu1 %1745 }
 0x361   : > { %12252 = vst [vmem:[#allocation230_spill] sm:$0xff] %v7130_v39  ;;  %v7135_v38 = vpop.xlane.xlu0 %1742 }
 0x362   : > { %12253 = vst [vmem:[#allocation231_spill] sm:$0xff] %v7132_v1  ;;  %v730_v1 = vld [vmem:[%s5944_s24 + $0xa08] sm:$0xff] }
 0x363   : > { %12254 = vst [vmem:[#allocation232_spill] sm:$0xff] %v7135_v38  ;;  %v1885_v50 = vsel %vm921_vm0, %v730_v1, 0.0 }
 0x365   : > { %1883 = vadd.xlane.f32.xlu2 %v1882_v8  ;;  %1880 = vadd.xlane.f32.xlu1 %v1879_v16  ;;  %v735_v8 = vld [vmem:[%s5944_s24 + $0xa30] sm:$0xff]  ;;  %v734_v16 = vld [vmem:[%s5944_s24 + $0xa28] sm:$0xff] }
 0x366   : > { %1877 = vadd.xlane.f32.xlu0 %v1876_v41  ;;  %v1900_v26 = vsel %vm921_vm0, %v735_v8, 0.0  ;;  %v1897_v27 = vsel %vm921_vm0, %v734_v16, 0.0 }
 0x368   : > { %v7142_v59 = vpop.xlane.xlu2 %1757  ;;  %v7144_v39 = vpop.xlane.xlu1 %1754 }
 0x369   : > { %12255 = vst [vmem:[#allocation233_spill] sm:$0xff] %v7142_v59  ;;  %v7147_v38 = vpop.xlane.xlu0 %1751 }
 0x36a   : > { %12256 = vst [vmem:[#allocation234_spill] sm:$0xff] %v7144_v39  ;;  %v733_v39 = vld [vmem:[%s5944_s24 + $0xa20] sm:$0xff] }
 0x36b   : > { %12257 = vst [vmem:[#allocation235_spill] sm:$0xff] %v7147_v38  ;;  %v1894_v1 = vsel %vm921_vm0, %v733_v39, 0.0 }
 0x36d   : > { %1892 = vadd.xlane.f32.xlu2 %v1891_v53  ;;  %1889 = vadd.xlane.f32.xlu1 %v1888_v62  ;;  %v738_v53 = vld [vmem:[%s5944_s24 + $0xa48] sm:$0xff]  ;;  %v737_v62 = vld [vmem:[%s5944_s24 + $0xa40] sm:$0xff] }
 0x36e   : > { %1886 = vadd.xlane.f32.xlu0 %v1885_v50  ;;  %v1909_v8 = vsel %vm921_vm0, %v738_v53, 0.0  ;;  %v1906_v16 = vsel %vm921_vm0, %v737_v62, 0.0 }
 0x370   : > { %v7154_v41 = vpop.xlane.xlu2 %1766  ;;  %v7156_v59 = vpop.xlane.xlu1 %1763 }
 0x371   : > { %12258 = vst [vmem:[#allocation236_spill] sm:$0xff] %v7154_v41  ;;  %v7159_v38 = vpop.xlane.xlu0 %1760 }
 0x372   : > { %12259 = vst [vmem:[#allocation237_spill] sm:$0xff] %v7156_v59  ;;  %v736_v59 = vld [vmem:[%s5944_s24 + $0xa38] sm:$0xff] }
 0x373   : > { %12260 = vst [vmem:[#allocation238_spill] sm:$0xff] %v7159_v38  ;;  %v1903_v39 = vsel %vm921_vm0, %v736_v59, 0.0 }
 0x375   : > { %1901 = vadd.xlane.f32.xlu2 %v1900_v26  ;;  %1898 = vadd.xlane.f32.xlu1 %v1897_v27  ;;  %v741_v26 = vld [vmem:[%s5944_s24 + $0xa60] sm:$0xff]  ;;  %v740_v27 = vld [vmem:[%s5944_s24 + $0xa58] sm:$0xff] }
 0x376   : > { %1895 = vadd.xlane.f32.xlu0 %v1894_v1  ;;  %v1918_v53 = vsel %vm921_vm0, %v741_v26, 0.0  ;;  %v1915_v62 = vsel %vm921_vm0, %v740_v27, 0.0 }
 0x378   : > { %v7166_v50 = vpop.xlane.xlu2 %1775  ;;  %v7168_v41 = vpop.xlane.xlu1 %1772 }
 0x379   : > { %12261 = vst [vmem:[#allocation239_spill] sm:$0xff] %v7166_v50  ;;  %v7171_v38 = vpop.xlane.xlu0 %1769 }
 0x37a   : > { %12262 = vst [vmem:[#allocation240_spill] sm:$0xff] %v7168_v41  ;;  %v739_v41 = vld [vmem:[%s5944_s24 + $0xa50] sm:$0xff] }
 0x37b   : > { %12263 = vst [vmem:[#allocation241_spill] sm:$0xff] %v7171_v38  ;;  %v1912_v59 = vsel %vm921_vm0, %v739_v41, 0.0 }
 0x37d   : > { %1910 = vadd.xlane.f32.xlu2 %v1909_v8  ;;  %1907 = vadd.xlane.f32.xlu1 %v1906_v16  ;;  %v763_v8 = vld [vmem:[%s5944_s24 + $0xb10] sm:$0xff]  ;;  %v762_v16 = vld [vmem:[%s5944_s24 + $0xb08] sm:$0xff] }
 0x37e   : > { %1904 = vadd.xlane.f32.xlu0 %v1903_v39  ;;  %v1984_v26 = vsel %vm921_vm0, %v763_v8, 0.0  ;;  %v1981_v27 = vsel %vm921_vm0, %v762_v16, 0.0 }
 0x380   : > { %v7178_v1 = vpop.xlane.xlu2 %1784  ;;  %v7180_v50 = vpop.xlane.xlu1 %1781 }
 0x381   : > { %12264 = vst [vmem:[#allocation242_spill] sm:$0xff] %v7178_v1  ;;  %v7183_v38 = vpop.xlane.xlu0 %1778 }
 0x382   : > { %12265 = vst [vmem:[#allocation243_spill] sm:$0xff] %v7180_v50  ;;  %v761_v50 = vld [vmem:[%s5944_s24 + $0xb00] sm:$0xff] }
 0x383   : > { %12266 = vst [vmem:[#allocation244_spill] sm:$0xff] %v7183_v38  ;;  %v1978_v41 = vsel %vm921_vm0, %v761_v50, 0.0 }
 0x385   : > { %1919 = vadd.xlane.f32.xlu2 %v1918_v53  ;;  %1916 = vadd.xlane.f32.xlu1 %v1915_v62  ;;  %v764_v53 = vld [vmem:[%s5944_s24 + $0xb18] sm:$0xff]  ;;  %v826_v62 = vld [vmem:[%s5944_s24 + $0xd08] sm:$0xff] }
 0x386   : > { %1913 = vadd.xlane.f32.xlu0 %v1912_v59  ;;  %v1987_v8 = vsel %vm921_vm0, %v764_v53, 0.0  ;;  %v2173_v16 = vsel %vm921_vm0, %v826_v62, 0.0 }
 0x388   : > { %v7190_v39 = vpop.xlane.xlu2 %1793  ;;  %v7192_v1 = vpop.xlane.xlu1 %1790 }
 0x389   : > { %12267 = vst [vmem:[#allocation245_spill] sm:$0xff] %v7190_v39  ;;  %v7195_v38 = vpop.xlane.xlu0 %1787 }
 0x38a   : > { %12268 = vst [vmem:[#allocation246_spill] sm:$0xff] %v7192_v1  ;;  %v825_v1 = vld [vmem:[%s5944_s24 + $0xd00] sm:$0xff] }
 0x38b   : > { %12269 = vst [vmem:[#allocation247_spill] sm:$0xff] %v7195_v38  ;;  %v2170_v50 = vsel %vm921_vm0, %v825_v1, 0.0 }
 0x38d   : > { %1985 = vadd.xlane.f32.xlu2 %v1984_v26  ;;  %1982 = vadd.xlane.f32.xlu1 %v1981_v27  ;;  %v827_v26 = vld [vmem:[%s5944_s24 + $0xd10] sm:$0xff]  ;;  %v778_v27 = vld [vmem:[%s5944_s24 + $0xb88] sm:$0xff] }
 0x38e   : > { %1979 = vadd.xlane.f32.xlu0 %v1978_v41  ;;  %v2176_v53 = vsel %vm921_vm0, %v827_v26, 0.0  ;;  %v2029_v62 = vsel %vm921_vm0, %v778_v27, 0.0 }
 0x390   : > { %v7202_v59 = vpop.xlane.xlu2 %1802  ;;  %v7204_v39 = vpop.xlane.xlu1 %1799 }
 0x391   : > { %12270 = vst [vmem:[#allocation248_spill] sm:$0xff] %v7202_v59  ;;  %v7207_v38 = vpop.xlane.xlu0 %1796 }
 0x392   : > { %12271 = vst [vmem:[#allocation249_spill] sm:$0xff] %v7204_v39  ;;  %v777_v39 = vld [vmem:[%s5944_s24 + $0xb80] sm:$0xff] }
 0x393   : > { %12272 = vst [vmem:[#allocation250_spill] sm:$0xff] %v7207_v38  ;;  %v2026_v1 = vsel %vm921_vm0, %v777_v39, 0.0 }
 0x395   : > { %1988 = vadd.xlane.f32.xlu2 %v1987_v8  ;;  %2174 = vadd.xlane.f32.xlu1 %v2173_v16  ;;  %v765_v8 = vld [vmem:[%s5944_s24 + $0xb20] sm:$0xff]  ;;  %v890_v16 = vld [vmem:[%s5944_s24 + $0xf08] sm:$0xff] }
 0x396   : > { %2171 = vadd.xlane.f32.xlu0 %v2170_v50  ;;  %v1990_v26 = vsel %vm921_vm0, %v765_v8, 0.0  ;;  %v2365_v27 = vsel %vm921_vm0, %v890_v16, 0.0 }
 0x398   : > { %v7214_v41 = vpop.xlane.xlu2 %1811  ;;  %v7216_v59 = vpop.xlane.xlu1 %1808 }
 0x399   : > { %12273 = vst [vmem:[#allocation251_spill] sm:$0xff] %v7214_v41  ;;  %v7219_v38 = vpop.xlane.xlu0 %1805 }
 0x39a   : > { %12274 = vst [vmem:[#allocation252_spill] sm:$0xff] %v7216_v59  ;;  %v889_v59 = vld [vmem:[%s5944_s24 + $0xf00] sm:$0xff] }
 0x39b   : > { %12275 = vst [vmem:[#allocation253_spill] sm:$0xff] %v7219_v38  ;;  %v2362_v39 = vsel %vm921_vm0, %v889_v59, 0.0 }
 0x39d   : > { %2177 = vadd.xlane.f32.xlu2 %v2176_v53  ;;  %2030 = vadd.xlane.f32.xlu1 %v2029_v62  ;;  %v841_v53 = vld [vmem:[%s5944_s24 + $0xd80] sm:$0xff]  ;;  %v828_v62 = vld [vmem:[%s5944_s24 + $0xd18] sm:$0xff] }
 0x39e   : > { %2027 = vadd.xlane.f32.xlu0 %v2026_v1  ;;  %v2218_v8 = vsel %vm921_vm0, %v841_v53, 0.0  ;;  %v2179_v16 = vsel %vm921_vm0, %v828_v62, 0.0 }
 0x3a0   : > { %v7226_v50 = vpop.xlane.xlu2 %1820  ;;  %v7228_v41 = vpop.xlane.xlu1 %1817 }
 0x3a1   : > { %12276 = vst [vmem:[#allocation254_spill] sm:$0xff] %v7226_v50  ;;  %v7231_v38 = vpop.xlane.xlu0 %1814 }
 0x3a2   : > { %12277 = vst [vmem:[#allocation255_spill] sm:$0xff] %v7228_v41  ;;  %v779_v41 = vld [vmem:[%s5944_s24 + $0xb90] sm:$0xff] }
 0x3a3   : > { %12278 = vst [vmem:[#allocation256_spill] sm:$0xff] %v7231_v38  ;;  %v2032_v59 = vsel %vm921_vm0, %v779_v41, 0.0 }
 0x3a5   : > { %1991 = vadd.xlane.f32.xlu2 %v1990_v26  ;;  %2366 = vadd.xlane.f32.xlu1 %v2365_v27  ;;  %v766_v26 = vld [vmem:[%s5944_s24 + $0xb28] sm:$0xff]  ;;  %v891_v27 = vld [vmem:[%s5944_s24 + $0xf10] sm:$0xff] }
 0x3a6   : > { %2363 = vadd.xlane.f32.xlu0 %v2362_v39  ;;  %v1993_v53 = vsel %vm921_vm0, %v766_v26, 0.0  ;;  %v2368_v62 = vsel %vm921_vm0, %v891_v27, 0.0 }
 0x3a8   : > { %v7238_v1 = vpop.xlane.xlu2 %1829  ;;  %v7240_v50 = vpop.xlane.xlu1 %1826 }
 0x3a9   : > { %12279 = vst [vmem:[#allocation257_spill] sm:$0xff] %v7238_v1  ;;  %v7243_v38 = vpop.xlane.xlu0 %1823 }
 0x3aa   : > { %12280 = vst [vmem:[#allocation258_spill] sm:$0xff] %v7240_v50  ;;  %v842_v50 = vld [vmem:[%s5944_s24 + $0xd88] sm:$0xff] }
 0x3ab   : > { %12281 = vst [vmem:[#allocation259_spill] sm:$0xff] %v7243_v38  ;;  %v2221_v41 = vsel %vm921_vm0, %v842_v50, 0.0 }
 0x3ad   : > { %2219 = vadd.xlane.f32.xlu2 %v2218_v8  ;;  %2180 = vadd.xlane.f32.xlu1 %v2179_v16  ;;  %v843_v8 = vld [vmem:[%s5944_s24 + $0xd90] sm:$0xff]  ;;  %v829_v16 = vld [vmem:[%s5944_s24 + $0xd20] sm:$0xff] }
 0x3ae   : > { %2033 = vadd.xlane.f32.xlu0 %v2032_v59  ;;  %v2224_v26 = vsel %vm921_vm0, %v843_v8, 0.0  ;;  %v2182_v27 = vsel %vm921_vm0, %v829_v16, 0.0 }
 0x3b0   : > { %v7250_v39 = vpop.xlane.xlu2 %1838  ;;  %v7252_v1 = vpop.xlane.xlu1 %1835 }
 0x3b1   : > { %12282 = vst [vmem:[#allocation260_spill] sm:$0xff] %v7250_v39  ;;  %v7255_v38 = vpop.xlane.xlu0 %1832  ;;  %v780_v39 = vld [vmem:[%s5944_s24 + $0xb98] sm:$0xff] }
 0x3b2   : > { %12283 = vst [vmem:[#allocation261_spill] sm:$0xff] %v7252_v1  ;;  %v2035_v50 = vsel %vm921_vm0, %v780_v39, 0.0 }
 0x3b3   : > { %12284 = vst [vmem:[#allocation262_spill] sm:$0xff] %v7255_v38 }
 0x3b5   : > { %1994 = vadd.xlane.f32.xlu2 %v1993_v53  ;;  %2369 = vadd.xlane.f32.xlu1 %v2368_v62  ;;  %v906_v53 = vld [vmem:[%s5944_s24 + $0xf88] sm:$0xff]  ;;  %v905_v62 = vld [vmem:[%s5944_s24 + $0xf80] sm:$0xff] }
 0x3b6   : > { %2222 = vadd.xlane.f32.xlu0 %v2221_v41  ;;  %v2413_v8 = vsel %vm921_vm0, %v906_v53, 0.0  ;;  %v2410_v16 = vsel %vm921_vm0, %v905_v62, 0.0 }
 0x3b8   : > { %v7262_v59 = vpop.xlane.xlu2 %1847  ;;  %v7264_v1 = vpop.xlane.xlu1 %1844 }
 0x3b9   : > { %12285 = vst [vmem:[#allocation263_spill] sm:$0xff] %v7262_v59  ;;  %v7267_v38 = vpop.xlane.xlu0 %1841 }
 0x3ba   : > { %12286 = vst [vmem:[#allocation264_spill] sm:$0xff] %v7264_v1  ;;  %v892_v1 = vld [vmem:[%s5944_s24 + $0xf18] sm:$0xff] }
 0x3bb   : > { %12287 = vst [vmem:[#allocation265_spill] sm:$0xff] %v7267_v38  ;;  %v2371_v39 = vsel %vm921_vm0, %v892_v1, 0.0 }
 0x3bd   : > { %2225 = vadd.xlane.f32.xlu2 %v2224_v26  ;;  %2183 = vadd.xlane.f32.xlu1 %v2182_v27  ;;  %v830_v26 = vld [vmem:[%s5944_s24 + $0xd28] sm:$0xff]  ;;  %v781_v27 = vld [vmem:[%s5944_s24 + $0xba0] sm:$0xff] }
 0x3be   : > { %2036 = vadd.xlane.f32.xlu0 %v2035_v50  ;;  %v2185_v53 = vsel %vm921_vm0, %v830_v26, 0.0  ;;  %v2038_v62 = vsel %vm921_vm0, %v781_v27, 0.0 }
 0x3c0   : > { %v7274_v41 = vpop.xlane.xlu2 %1856  ;;  %v7276_v59 = vpop.xlane.xlu1 %1853 }
 0x3c1   : > { %12288 = vst [vmem:[#allocation266_spill] sm:$0xff] %v7274_v41  ;;  %v7279_v38 = vpop.xlane.xlu0 %1850 }
 0x3c2   : > { %12289 = vst [vmem:[#allocation267_spill] sm:$0xff] %v7276_v59  ;;  %v767_v59 = vld [vmem:[%s5944_s24 + $0xb30] sm:$0xff] }
 0x3c3   : > { %12290 = vst [vmem:[#allocation268_spill] sm:$0xff] %v7279_v38  ;;  %v1996_v1 = vsel %vm921_vm0, %v767_v59, 0.0 }
 0x3c5   : > { %2414 = vadd.xlane.f32.xlu2 %v2413_v8  ;;  %2411 = vadd.xlane.f32.xlu1 %v2410_v16  ;;  %v907_v8 = vld [vmem:[%s5944_s24 + $0xf90] sm:$0xff]  ;;  %v893_v16 = vld [vmem:[%s5944_s24 + $0xf20] sm:$0xff] }
 0x3c6   : > { %2372 = vadd.xlane.f32.xlu0 %v2371_v39  ;;  %v2416_v26 = vsel %vm921_vm0, %v907_v8, 0.0  ;;  %v2374_v27 = vsel %vm921_vm0, %v893_v16, 0.0 }
 0x3c8   : > { %v7286_v50 = vpop.xlane.xlu2 %1865  ;;  %v7288_v41 = vpop.xlane.xlu1 %1862 }
 0x3c9   : > { %12291 = vst [vmem:[#allocation269_spill] sm:$0xff] %v7286_v50  ;;  %v7291_v38 = vpop.xlane.xlu0 %1859 }
 0x3ca   : > { %12292 = vst [vmem:[#allocation270_spill] sm:$0xff] %v7288_v41  ;;  %v844_v41 = vld [vmem:[%s5944_s24 + $0xd98] sm:$0xff] }
 0x3cb   : > { %12293 = vst [vmem:[#allocation271_spill] sm:$0xff] %v7291_v38  ;;  %v2227_v59 = vsel %vm921_vm0, %v844_v41, 0.0 }
 0x3cd   : > { %2186 = vadd.xlane.f32.xlu2 %v2185_v53  ;;  %2039 = vadd.xlane.f32.xlu1 %v2038_v62  ;;  %v831_v53 = vld [vmem:[%s5944_s24 + $0xd30] sm:$0xff]  ;;  %v782_v62 = vld [vmem:[%s5944_s24 + $0xba8] sm:$0xff] }
 0x3ce   : > { %1997 = vadd.xlane.f32.xlu0 %v1996_v1  ;;  %v2188_v8 = vsel %vm921_vm0, %v831_v53, 0.0  ;;  %v2041_v16 = vsel %vm921_vm0, %v782_v62, 0.0 }
 0x3d0   : > { %v7298_v39 = vpop.xlane.xlu2 %1874  ;;  %v7300_v50 = vpop.xlane.xlu1 %1871 }
 0x3d1   : > { %12294 = vst [vmem:[#allocation272_spill] sm:$0xff] %v7298_v39  ;;  %v7303_v38 = vpop.xlane.xlu0 %1868  ;;  %v768_v39 = vld [vmem:[%s5944_s24 + $0xb38] sm:$0xff] }
 0x3d2   : > { %12295 = vst [vmem:[#allocation273_spill] sm:$0xff] %v7300_v50  ;;  %v1999_v41 = vsel %vm921_vm0, %v768_v39, 0.0 }
 0x3d3   : > { %12296 = vst [vmem:[#allocation274_spill] sm:$0xff] %v7303_v38 }
 0x3d5   : > { %2417 = vadd.xlane.f32.xlu2 %v2416_v26  ;;  %2375 = vadd.xlane.f32.xlu1 %v2374_v27  ;;  %v908_v26 = vld [vmem:[%s5944_s24 + $0xf98] sm:$0xff]  ;;  %v894_v27 = vld [vmem:[%s5944_s24 + $0xf28] sm:$0xff] }
 0x3d6   : > { %2228 = vadd.xlane.f32.xlu0 %v2227_v59  ;;  %v2419_v53 = vsel %vm921_vm0, %v908_v26, 0.0  ;;  %v2377_v62 = vsel %vm921_vm0, %v894_v27, 0.0 }
 0x3d8   : > { %v7310_v1 = vpop.xlane.xlu2 %1883  ;;  %v7312_v50 = vpop.xlane.xlu1 %1880 }
 0x3d9   : > { %12297 = vst [vmem:[#allocation275_spill] sm:$0xff] %v7310_v1  ;;  %v7315_v38 = vpop.xlane.xlu0 %1877 }
 0x3da   : > { %12298 = vst [vmem:[#allocation276_spill] sm:$0xff] %v7312_v50  ;;  %v845_v50 = vld [vmem:[%s5944_s24 + $0xda0] sm:$0xff] }
 0x3db   : > { %12299 = vst [vmem:[#allocation277_spill] sm:$0xff] %v7315_v38  ;;  %v2230_v39 = vsel %vm921_vm0, %v845_v50, 0.0 }
 0x3dd   : > { %2189 = vadd.xlane.f32.xlu2 %v2188_v8  ;;  %2042 = vadd.xlane.f32.xlu1 %v2041_v16  ;;  %v832_v8 = vld [vmem:[%s5944_s24 + $0xd38] sm:$0xff]  ;;  %v783_v16 = vld [vmem:[%s5944_s24 + $0xbb0] sm:$0xff] }
 0x3de   : > { %2000 = vadd.xlane.f32.xlu0 %v1999_v41  ;;  %v2191_v26 = vsel %vm921_vm0, %v832_v8, 0.0  ;;  %v2044_v27 = vsel %vm921_vm0, %v783_v16, 0.0 }
 0x3e0   : > { %v7322_v59 = vpop.xlane.xlu2 %1892  ;;  %v7324_v1 = vpop.xlane.xlu1 %1889 }
 0x3e1   : > { %12300 = vst [vmem:[#allocation278_spill] sm:$0xff] %v7322_v59  ;;  %v7327_v38 = vpop.xlane.xlu0 %1886 }
 0x3e2   : > { %12301 = vst [vmem:[#allocation279_spill] sm:$0xff] %v7324_v1  ;;  %v769_v1 = vld [vmem:[%s5944_s24 + $0xb40] sm:$0xff] }
 0x3e3   : > { %12302 = vst [vmem:[#allocation280_spill] sm:$0xff] %v7327_v38  ;;  %v2002_v50 = vsel %vm921_vm0, %v769_v1, 0.0 }
 0x3e5   : > { %2420 = vadd.xlane.f32.xlu2 %v2419_v53  ;;  %2378 = vadd.xlane.f32.xlu1 %v2377_v62  ;;  %v909_v53 = vld [vmem:[%s5944_s24 + $0xfa0] sm:$0xff]  ;;  %v895_v62 = vld [vmem:[%s5944_s24 + $0xf30] sm:$0xff] }
 0x3e6   : > { %2231 = vadd.xlane.f32.xlu0 %v2230_v39  ;;  %v2422_v8 = vsel %vm921_vm0, %v909_v53, 0.0  ;;  %v2380_v16 = vsel %vm921_vm0, %v895_v62, 0.0 }
 0x3e8   : > { %v7334_v41 = vpop.xlane.xlu2 %1901  ;;  %v7336_v59 = vpop.xlane.xlu1 %1898 }
 0x3e9   : > { %12303 = vst [vmem:[#allocation281_spill] sm:$0xff] %v7334_v41  ;;  %v7339_v38 = vpop.xlane.xlu0 %1895 }
 0x3ea   : > { %12304 = vst [vmem:[#allocation282_spill] sm:$0xff] %v7336_v59  ;;  %v846_v59 = vld [vmem:[%s5944_s24 + $0xda8] sm:$0xff] }
 0x3eb   : > { %12305 = vst [vmem:[#allocation283_spill] sm:$0xff] %v7339_v38  ;;  %v2233_v1 = vsel %vm921_vm0, %v846_v59, 0.0 }
 0x3ed   : > { %2192 = vadd.xlane.f32.xlu2 %v2191_v26  ;;  %2045 = vadd.xlane.f32.xlu1 %v2044_v27  ;;  %v5866_v26 = vmov 64.0   ;;  %v833_v27 = vld [vmem:[%s5944_s24 + $0xd40] sm:$0xff] }
 0x3ee   : > { %2003 = vadd.xlane.f32.xlu0 %v2002_v50  ;;  %5856 = vrcp.f32 %v5866_v26  ;;  %v784_v50 = vld [vmem:[%s5944_s24 + $0xbb8] sm:$0xff]  ;;  %v2194_v62 = vsel %vm921_vm0, %v833_v27, 0.0 }
 0x3ef   : > { %v2047_v59 = vsel %vm921_vm0, %v784_v50, 0.0  ;;  %v896_v26 = vld [vmem:[%s5944_s24 + $0xf38] sm:$0xff] }
 0x3f0   : > { %v7346_v39 = vpop.xlane.xlu2 %1910  ;;  %v7348_v41 = vpop.xlane.xlu1 %1907 }
 0x3f1   : > { %12306 = vst [vmem:[#allocation284_spill] sm:$0xff] %v7346_v39  ;;  %v7351_v38 = vpop.xlane.xlu0 %1904 }
 0x3f2   : > { %12307 = vst [vmem:[#allocation285_spill] sm:$0xff] %v7348_v41 }
 0x3f3   : > { %12308 = vst [vmem:[#allocation286_spill] sm:$0xff] %v7351_v38  ;;  %v770_v38 = vld [vmem:[%s5944_s24 + $0xb48] sm:$0xff] }
 0x3f5   : > { %2423 = vadd.xlane.f32.xlu2 %v2422_v8  ;;  %2381 = vadd.xlane.f32.xlu1 %v2380_v16  ;;  %v2005_v8 = vsel %vm921_vm0, %v770_v38, 0.0  ;;  %v5857_v16 = vpop.eup %5856  ;;  %v2383_v38 = vsel %vm921_vm0, %v896_v26, 0.0 }
 0x3f6   : > { %2234 = vadd.xlane.f32.xlu0 %v2233_v1  ;;  %v910_v1 = vld [vmem:[%s5944_s24 + $0xfa8] sm:$0xff]  ;;  %vm2463_vm1 = vweird.f32 %v5857_v16 }
 0x3f7   : > { %v2425_v50 = vsel %vm921_vm0, %v910_v1, 0.0 }
 0x3f8   : > { %v7358_v39 = vpop.xlane.xlu2 %1919  ;;  %v7360_v41 = vpop.xlane.xlu1 %1916 }
 0x3f9   : > { %12309 = vst [vmem:[#allocation287_spill] sm:$0xff] %v7358_v39  ;;  %v7363_v53 = vpop.xlane.xlu0 %1913  ;;  %v2459_v39 = vmul.f32 64.0, %v5857_v16 }
 0x3fa   : > { %12310 = vst [vmem:[#allocation288_spill] sm:$0xff] %v7360_v41 }
 0x3fb   : > { %12311 = vst [vmem:[#allocation289_spill] sm:$0xff] %v7363_v53  ;;  %v847_v53 = vld [vmem:[%s5944_s24 + $0xdb0] sm:$0xff] }
 0x3fd   : > { %2195 = vadd.xlane.f32.xlu2 %v2194_v62  ;;  %2048 = vadd.xlane.f32.xlu1 %v2047_v59  ;;  %v2236_v62 = vsel %vm921_vm0, %v847_v53, 0.0  ;;  %v2460_v59 = vsub.f32 1.0, %v2459_v39  ;;  %v2050_v39 = vsel %vm921_vm0, %v785_v51, 0.0 }
 0x3fe   : > { %2006 = vadd.xlane.f32.xlu0 %v2005_v8  ;;  %v834_v8 = vld [vmem:[%s5944_s24 + $0xd48] sm:$0xff] }
 0x3ff   : > { %v2197_v26 = vsel %vm921_vm0, %v834_v8, 0.0 }
 0x400   : > { %v7370_v47 = vpop.xlane.xlu2 %1985  ;;  %v7372_v41 = vpop.xlane.xlu1 %1982 }
 0x401   : > { %12312 = vst [vmem:[#allocation290_spill] sm:$0xff] %v7370_v47  ;;  %v7375_v27 = vpop.xlane.xlu0 %1979  ;;  %v2461_v47 = vmul.f32 %v5857_v16, %v2460_v59  ;;  %v897_v59 = vld [vmem:[%s5944_s24 + $0xf40] sm:$0xff] }
 0x402   : > { %12313 = vst [vmem:[#allocation291_spill] sm:$0xff] %v7372_v41 }
 0x403   : > { %12314 = vst [vmem:[#allocation292_spill] sm:$0xff] %v7375_v27  ;;  %v771_v27 = vld [vmem:[%s5944_s24 + $0xb50] sm:$0xff] }
 0x404   : > { %v2008_v53 = vsel %vm921_vm0, %v771_v27, 0.0 }
 0x405   : > { %2426 = vadd.xlane.f32.xlu2 %v2425_v50  ;;  %2384 = vadd.xlane.f32.xlu1 %v2383_v38  ;;  %v2462_v50 = vadd.f32 %v5857_v16, %v2461_v47  ;;  %v3755_v38 = vlaneseq }
 0x406   : > { %2237 = vadd.xlane.f32.xlu0 %v2236_v62  ;;  %v911_v62 = vld [vmem:[%s5944_s24 + $0xfb0] sm:$0xff] }
 0x407   : > { %v7401_v8 = vand.u32 127, %v3755_v38 }
 0x408   : > { %v7382_v57 = vpop.xlane.xlu2 %1988  ;;  %v7384_v41 = vpop.xlane.xlu1 %2174 }
 0x409   : > { %12315 = vst [vmem:[#allocation293_spill] sm:$0xff] %v7382_v57  ;;  %v7387_v1 = vpop.xlane.xlu0 %2171  ;;  %v7394_v57 = vsel %vm2463_vm1, %v5857_v16, %v2462_v50  ;;  %v2428_v16 = vsel %vm921_vm0, %v911_v62, 0.0  ;;  %vm12006_vm1 = vcmask 1048512  }
 0x40a   : > { %12316 = vst [vmem:[#allocation294_spill] sm:$0xff] %v7384_v41  ;;  %v2497_v47 = vmul.f32 %v7394_v57, %v6158_v6  ;;  %v2498_v51 = vmul.f32 %v7394_v57, %v6175_v24  ;;  %v2499_v50 = vmul.f32 %v7394_v57, %v6172_v21  ;;  %v7420_v24 = vadd.s32 4294967280, %v7401_v8 }
 0x40b   : > { %12317 = vst [vmem:[#allocation295_spill] sm:$0xff] %v7387_v1  ;;  %v848_v1 = vld [vmem:[%s5944_s24 + $0xdb8] sm:$0xff]  ;;  %v2500_v62 = vmul.f32 %v7394_v57, %v6170_v18  ;;  %v2501_v21 = vmul.f32 %v7394_v57, %v6187_v42  ;;  %v7441_v18 = vadd.s32 4294967264, %v7401_v8  ;;  %v2517_v44 = vmul.f32 %v7394_v57, %v6244_v45 }
 0x40c   : > { %12320 = vst [vmem:[#allocation298_spill] sm:$0xff] %v7401_v8  ;;  %v3849_v6 = vperm.slane %v2497_v47, %v7401_v8  ;;  %v7511_v45 = vadd.s32 4294967224, %v7401_v8 }
 0x40d   : > { %2198 = vadd.xlane.f32.xlu2 %v2197_v26  ;;  %2051 = vadd.xlane.f32.xlu1 %v2050_v39  ;;  %v2386_v26 = vsel %vm921_vm0, %v897_v59, 0.0  ;;  %v7412_v39 = vadd.s32 4294967288, %v7401_v8  ;;  %12322 = vst [vmem:[#allocation300_spill] sm:$0xff] %v7420_v24  ;;  %v835_v59 = vld [vmem:[%s5944_s24 + $0xd50] sm:$0xff] }
 0x40e   : > { %2009 = vadd.xlane.f32.xlu0 %v2008_v53  ;;  %v2239_v53 = vsel %vm921_vm0, %v848_v1, 0.0  ;;  %v3852_v1 = vperm.slane %v2499_v50, %v7420_v24  ;;  %v2200_v50 = vsel %vm921_vm0, %v835_v59, 0.0  ;;  %v2503_v59 = vmul.f32 %v7394_v57, %v6182_v36  ;;  %v849_v36 = vld [vmem:[%s5944_s24 + $0xdc0] sm:$0xff] }
 0x40f   : > { %v3850_v38 = vperm.slane %v2498_v51, %v7412_v39 }
 0x410   : > { %v7396_v41 = vpop.xlane.xlu2 %2177  ;;  %v7398_v58 = vpop.xlane.xlu1 %2030 }
 0x411   : > { %12318 = vst [vmem:[#allocation296_spill] sm:$0xff] %v7396_v41  ;;  %v7407_v27 = vpop.xlane.xlu0 %2027 }
 0x412   : > { %12319 = vst [vmem:[#allocation297_spill] sm:$0xff] %v7398_v58 }
 0x413   : > { %12321 = vst [vmem:[#allocation299_spill] sm:$0xff] %v7407_v27  ;;  %v786_v27 = vld [vmem:[%s5944_s24 + $0xbc8] sm:$0xff] }
 0x414   : > { %v2053_v41 = vsel %vm921_vm0, %v786_v27, 0.0  ;;  %v2514_v27 = vmul.f32 %v7394_v57, %v6232_v5  ;;  %v912_v5 = vld [vmem:[%s5944_s24 + $0xfb8] sm:$0xff] }
 0x415   : > { %2429 = vadd.xlane.f32.xlu2 %v2428_v16  ;;  %2387 = vadd.xlane.f32.xlu1 %v2386_v26  ;;  %v772_v16 = vld [vmem:[%s5944_s24 + $0xb58] sm:$0xff]  ;;  %v7435_v26 = vadd.s32 4294967272, %v7401_v8 }
 0x416   : > { %2240 = vadd.xlane.f32.xlu0 %v2239_v53  ;;  %v3851_v53 = vsel %vm3760_vm2, %v3850_v38, %v3849_v6  ;;  %v3856_v38 = vperm.slane %v2501_v21, %v7441_v18 }
 0x417   : > { %v3854_v42 = vperm.slane %v2500_v62, %v7435_v26  ;;  %v3853_v6 = vsel %vm12021_vm3, %v3852_v1, %v3851_v53  ;;  %v2513_v62 = vmul.f32 %v7394_v57, %v6235_v12  ;;  %v2515_v53 = vmul.f32 %v7394_v57, %v6230_v3 }
 0x418   : > { %v7429_v47 = vpop.xlane.xlu2 %1991  ;;  %v7431_v51 = vpop.xlane.xlu1 %2366  ;;  %v2431_v3 = vsel %vm921_vm0, %v912_v5, 0.0  ;;  %v7501_v5 = vadd.s32 4294967208, %v7401_v8 }
 0x419   : > { %12323 = vst [vmem:[#allocation301_spill] sm:$0xff] %v7429_v47  ;;  %v7438_v58 = vpop.xlane.xlu0 %2363  ;;  %v2502_v47 = vmul.f32 %v7394_v57, %v6184_v37  ;;  %v7459_v37 = vadd.s32 4294967232, %v7401_v8  ;;  %v3855_v21 = vsel %vm12020_vm4, %v3854_v42, %v3853_v6  ;;  %v3881_v42 = vperm.slane %v2514_v27, %v7412_v39 }
 0x41a   : > { %12324 = vst [vmem:[#allocation302_spill] sm:$0xff] %v7431_v51  ;;  %v2011_v51 = vsel %vm921_vm0, %v772_v16, 0.0  ;;  %v898_v16 = vld [vmem:[%s5944_s24 + $0xf48] sm:$0xff]  ;;  %v3857_v12 = vsel %vm12019_vm5, %v3856_v38, %v3855_v21  ;;  %v3880_v6 = vperm.slane %v2513_v62, %v7401_v8  ;;  %v2516_v38 = vmul.f32 %v7394_v57, %v6247_v52 }
 0x41b   : > { %12325 = vst [vmem:[#allocation303_spill] sm:$0xff] %v7438_v58  ;;  %v7452_v58 = vadd.s32 4294967256, %v7401_v8  ;;  %v2242_v62 = vsel %vm921_vm0, %v849_v36, 0.0  ;;  %v2505_v52 = vmul.f32 %v7394_v57, %v6196_v60  ;;  %v3883_v10 = vperm.slane %v2515_v53, %v7420_v24  ;;  %v787_v36 = vld [vmem:[%s5944_s24 + $0xbd0] sm:$0xff] }
 0x41c   : > { %12330 = vst [vmem:[#allocation308_spill] sm:$0xff] %v7501_v5  ;;  %v7508_v60 = vadd.s32 4294967216, %v7401_v8  ;;  %v2518_v53 = vmul.f32 %v7394_v57, %v6242_v33 }
 0x41d   : > { %2201 = vadd.xlane.f32.xlu2 %v2200_v50  ;;  %2054 = vadd.xlane.f32.xlu1 %v2053_v41  ;;  %v3858_v1 = vperm.slane %v2502_v47, %v7452_v58  ;;  %v2504_v41 = vmul.f32 %v7394_v57, %v6199_v63  ;;  %v7478_v47 = vadd.s32 4294967248, %v7401_v8  ;;  %v7487_v63 = vadd.s32 4294967240, %v7401_v8 }
 0x41e   : > { %2012 = vadd.xlane.f32.xlu0 %v2011_v51  ;;  %12331 = vst [vmem:[#allocation309_spill] sm:$0xff] %v7508_v60 }
 0x41f   : > { %12328 = vst [vmem:[#allocation306_spill] sm:$0xff] %v7478_v47  ;;  %v3859_v27 = vsel %vm12007_vm6, %v3858_v1, %v3857_v12  ;;  %v3885_v1 = vperm.slane %v2516_v38, %v7435_v26  ;;  %v2561_v12 = vmul.f32 %v7394_v57, %v6427_v34  ;;  %v2519_v34 = vmul.f32 %v7394_v57, %v6259_v7 }
 0x420   : > { %v7472_v51 = vpop.xlane.xlu2 %2219  ;;  %v7474_v50 = vpop.xlane.xlu1 %2180  ;;  %v2564_v7 = vmul.f32 %v7394_v57, %v6439_v2  ;;  %v2520_v2 = vmul.f32 %v7394_v57, %v6256_v25  ;;  %v7569_v25 = vadd.s32 4294967200, %v7401_v8 }
 0x421   : > { %12326 = vst [vmem:[#allocation304_spill] sm:$0xff] %v7472_v51  ;;  %v7484_v21 = vpop.xlane.xlu0 %2033  ;;  %v2389_v51 = vsel %vm921_vm0, %v898_v16, 0.0  ;;  %v2562_v16 = vmul.f32 %v7394_v57, %v6424_v9 }
 0x422   : > { %12327 = vst [vmem:[#allocation305_spill] sm:$0xff] %v7474_v50  ;;  %v3860_v50 = vperm.slane %v2503_v59, %v7478_v47  ;;  %v3882_v59 = vsel %vm3760_vm2, %v3881_v42, %v3880_v6  ;;  %v3864_v42 = vperm.slane %v2505_v52, %v7459_v37  ;;  %v3887_v6 = vperm.slane %v2517_v44, %v7441_v18 }
 0x423   : > { %12329 = vst [vmem:[#allocation307_spill] sm:$0xff] %v7484_v21  ;;  %v3862_v21 = vperm.slane %v2504_v41, %v7487_v63  ;;  %v2506_v41 = vmul.f32 %v7394_v57, %v6194_v54  ;;  %v3884_v38 = vsel %vm12021_vm3, %v3883_v10, %v3882_v59  ;;  %v773_v54 = vld [vmem:[%s5944_s24 + $0xb60] sm:$0xff]  ;;  %v3974_v52 = vperm.slane %v2562_v16, %v7412_v39 }
 0x424   : > { %v3861_v9 = vsel %vm12018_vm7, %v3860_v50, %v3859_v27  ;;  %v3886_v33 = vsel %vm12020_vm4, %v3885_v1, %v3884_v38  ;;  %v2563_v27 = vmul.f32 %v7394_v57, %v6422_v28  ;;  %v3973_v10 = vperm.slane %v2561_v12, %v7401_v8  ;;  %12335 = vst [vmem:[#allocation313_spill] sm:$0xff] %v7569_v25 }
 0x425   : > { %2432 = vadd.xlane.f32.xlu2 %v2431_v3  ;;  %2390 = vadd.xlane.f32.xlu1 %v2389_v51  ;;  %v836_v51 = vld [vmem:[%s5944_s24 + $0xd58] sm:$0xff]  ;;  %v3863_v50 = vsel %vm12016_vm8, %v3862_v21, %v3861_v9  ;;  %v7546_v21 = vmul.f32 %v7394_v57, %v6040_v30  ;;  %v2507_v28 = vmul.f32 %v7394_v57, %v6211_v17  ;;  %v2014_v16 = vsel %vm921_vm0, %v773_v54, 0.0  ;;  %v899_v54 = vld [vmem:[%s5944_s24 + $0xf50] sm:$0xff] }
 0x426   : > { %2243 = vadd.xlane.f32.xlu0 %v2242_v62  ;;  %v2203_v59 = vsel %vm921_vm0, %v836_v51, 0.0  ;;  %v3889_v1 = vperm.slane %v2518_v53, %v7452_v58  ;;  %v3866_v12 = vperm.slane %v2506_v41, %v7511_v45  ;;  %v3888_v9 = vsel %vm12019_vm5, %v3887_v6, %v3886_v33 }
 0x427   : > { %12333 = vst [vmem:[#allocation311_spill] sm:$0xff] %v7546_v21  ;;  %v3891_v51 = vperm.slane %v2519_v34, %v7478_v47  ;;  %v3865_v30 = vsel %vm12017_vm9, %v3864_v42, %v3863_v50  ;;  %v3976_v17 = vperm.slane %v2563_v27, %v7420_v24  ;;  %v2565_v53 = vmul.f32 %v7394_v57, %v6436_v19 }
 0x428   : > { %v7527_v3 = vpop.xlane.xlu2 %1994  ;;  %v7529_v62 = vpop.xlane.xlu1 %2369  ;;  %v7566_v41 = vmul.f32 %v7394_v57, %v6043_v32  ;;  %v3975_v6 = vsel %vm3760_vm2, %v3974_v52, %v3973_v10  ;;  %v3978_v42 = vperm.slane %v2564_v7, %v7435_v26  ;;  %v2508_v38 = vmul.f32 %v7394_v57, %v6208_v15  ;;  %v850_v7 = vld [vmem:[%s5944_s24 + $0xdc8] sm:$0xff] }
 0x429   : > { %12332 = vst [vmem:[#allocation310_spill] sm:$0xff] %v7529_v62  ;;  %v7537_v44 = vpop.xlane.xlu0 %2222  ;;  %v2056_v62 = vsel %vm921_vm0, %v787_v36, 0.0  ;;  %v7558_v36 = vadd.s32 4294967184, %v7401_v8  ;;  %v3868_v19 = vperm.slane %v2507_v28, %v7508_v60  ;;  %v2521_v34 = vmul.f32 %v7394_v57, %v6254_v23 }
 0x42a   : > { %12334 = vst [vmem:[#allocation312_spill] sm:$0xff] %v7566_v41  ;;  %v3890_v32 = vsel %vm12007_vm6, %v3889_v1, %v3888_v9  ;;  %v3867_v50 = vsel %vm3792_vm10, %v3866_v12, %v3865_v30  ;;  %v3893_v33 = vperm.slane %v2520_v2, %v7487_v63  ;;  %v2566_v52 = vmul.f32 %v7394_v57, %v6434_v13 }
 0x42b   : > { %v3892_v27 = vsel %vm12018_vm7, %v3891_v51, %v3890_v32  ;;  %v2522_v23 = vmul.f32 %v7394_v57, %v6271_v61  ;;  %v3977_v28 = vsel %vm12021_vm3, %v3976_v17, %v3975_v6  ;;  %v2567_v1 = vmul.f32 %v7394_v57, %v6451_v22 }
 0x42c   : > { %v2509_v13 = vmul.f32 %v7394_v57, %v6206_v14  ;;  %v3979_v12 = vsel %vm12020_vm4, %v3978_v42, %v3977_v28  ;;  %v2392_v2 = vsel %vm921_vm0, %v899_v54, 0.0  ;;  %v3870_v61 = vperm.slane %v2508_v38, %v7501_v5 }
 0x42d   : > { %2204 = vadd.xlane.f32.xlu2 %v2203_v59  ;;  %2057 = vadd.xlane.f32.xlu1 %v2056_v62  ;;  %v913_v62 = vld [vmem:[%s5944_s24 + $0xfc0] sm:$0xff]  ;;  %v3980_v59 = vperm.slane %v2565_v53, %v7441_v18  ;;  %v3869_v51 = vsel %vm3796_vm11, %v3868_v19, %v3867_v50  ;;  %v3895_v30 = vperm.slane %v2521_v34, %v7459_v37  ;;  %v2245_v17 = vsel %vm921_vm0, %v850_v7, 0.0 }
 0x42e   : > { %2015 = vadd.xlane.f32.xlu0 %v2014_v16  ;;  %v2434_v9 = vsel %vm921_vm0, %v913_v62, 0.0  ;;  %v3894_v22 = vsel %vm12016_vm8, %v3893_v33, %v3892_v27  ;;  %v2523_v53 = vmul.f32 %v7394_v57, %v6268_v55  ;;  %v3982_v14 = vperm.slane %v2566_v52, %v7452_v58  ;;  %v837_v33 = vld [vmem:[%s5944_s24 + $0xd60] sm:$0xff]  ;;  %v788_v27 = vld [vmem:[%s5944_s24 + $0xbd8] sm:$0xff] }
 0x42f   : > { %v2568_v6 = vmul.f32 %v7394_v57, %v6448_v20  ;;  %v7615_v42 = vadd.s32 4294967192, %v7401_v8  ;;  %v3897_v38 = vperm.slane %v2522_v23, %v7511_v45  ;;  %v3981_v19 = vsel %vm12019_vm5, %v3980_v59, %v3979_v12  ;;  %v12356_v55 = vld [vmem:[#allocation78_spill] sm:$0xff] }
 0x430   : > { %v7586_v10 = vpop.xlane.xlu2 %2225  ;;  %v7588_v15 = vpop.xlane.xlu1 %2183  ;;  %v3984_v34 = vperm.slane %v2567_v1, %v7478_v47  ;;  %v3872_v20 = vperm.slane %v2509_v13, %v7569_v25  ;;  %v3871_v32 = vsel %vm3800_vm12, %v3870_v61, %v3869_v51  ;;  %v2510_v62 = vmul.f32 %v7394_v57, %v6223_v49  ;;  %v774_v49 = vld [vmem:[%s5944_s24 + $0xb68] sm:$0xff] }
 0x431   : > { %v7597_v16 = vpop.xlane.xlu0 %2036  ;;  %12336 = vst [vmem:[#allocation314_spill] sm:$0xff] %v7615_v42  ;;  %v2524_v54 = vmul.f32 %v7394_v57, %v6266_v0  ;;  %v3896_v50 = vsel %vm12017_vm9, %v3895_v30, %v3894_v22  ;;  %v3899_v52 = vperm.slane %v2523_v53, %v7508_v60  ;;  %v2569_v7 = vmul.f32 %v7394_v57, %v6446_v43 }
 0x432   : > { %v3986_v23 = vperm.slane %v2568_v6, %v7487_v63  ;;  %v3983_v59 = vsel %vm12007_vm6, %v3982_v14, %v3981_v19  ;;  %v3898_v0 = vsel %vm3792_vm10, %v3897_v38, %v3896_v50  ;;  %v2578_v12 = vmul.f32 %v7394_v57, %v6482_v4 }
 0x433   : > { %v3985_v13 = vsel %vm12018_vm7, %v3984_v34, %v3983_v59  ;;  %v2579_v61 = vmul.f32 %v7394_v57, %v6499_v31  ;;  %v2206_v51 = vsel %vm921_vm0, %v837_v33, 0.0  ;;  %v2059_v30 = vsel %vm921_vm0, %v788_v27, 0.0  ;;  %v12337_v33 = vld [vmem:[#allocation34_spill] sm:$0xff] }
 0x434   : > { %v3901_v4 = vperm.slane %v2524_v54, %v7501_v5  ;;  %v2017_v22 = vsel %vm921_vm0, %v774_v49, 0.0  ;;  %v3900_v53 = vsel %vm3796_vm11, %v3899_v52, %v3898_v0  ;;  %v3988_v31 = vperm.slane %v2569_v7, %v7459_v37  ;;  %v914_v52 = vld [vmem:[%s5944_s24 + $0xfc8] sm:$0xff]  ;;  %v900_v7 = vld [vmem:[%s5944_s24 + $0xf58] sm:$0xff] }
 0x435   : > { %2435 = vadd.xlane.f32.xlu2 %v2434_v9  ;;  %2393 = vadd.xlane.f32.xlu1 %v2392_v2  ;;  %v2577_v9 = vmul.f32 %v7394_v57, %v6484_v48  ;;  %v7651_v2 = vmul.f32 %v7394_v57, %v6220_v40  ;;  %v2570_v48 = vmul.f32 %v7394_v57, %v6463_v56  ;;  %v7668_v6 = vadd.s32 4294967176, %v7401_v8 }
 0x436   : > { %2246 = vadd.xlane.f32.xlu0 %v2245_v17  ;;  %v3874_v17 = vperm.slane %v2510_v62, %v7615_v42  ;;  %v2525_v40 = vmul.f32 %v7394_v57, %v6283_v46  ;;  %v3987_v14 = vsel %vm12016_vm8, %v3986_v23, %v3985_v13  ;;  %v4005_v38 = vperm.slane %v2578_v12, %v7412_v39  ;;  %v12338_v23 = vld [vmem:[#allocation73_spill] sm:$0xff]  ;;  %v12339_v12 = vld [vmem:[#allocation68_spill] sm:$0xff] }
 0x437   : > { %v4004_v56 = vperm.slane %v2577_v9, %v7401_v8  ;;  %v2580_v19 = vmul.f32 %v7394_v57, %v6496_v29  ;;  %v7676_v46 = vmul.f32 %v7394_v57, %v6218_v35  ;;  %v3873_v34 = vsel %vm3804_vm13, %v3872_v20, %v3871_v32  ;;  %v851_v13 = vld [vmem:[%s5944_s24 + $0xdd0] sm:$0xff] }
 0x438   : > { %v7636_v28 = vpop.xlane.xlu2 %2414  ;;  %v7638_v1 = vpop.xlane.xlu1 %2411  ;;  %v2571_v62 = vmul.f32 %v7394_v57, %v6460_v11  ;;  %v4007_v54 = vperm.slane %v2579_v61, %v7420_v24  ;;  %v3876_v50 = vperm.slane %v7651_v2, %v7558_v36  ;;  %v3875_v29 = vsel %vm3808_vm14, %v3874_v17, %v3873_v34  ;;  %v12342_v34 = vld [vmem:[#allocation71_spill] sm:$0xff] }
 0x439   : > { %v7647_v43 = vpop.xlane.xlu0 %2372  ;;  %v2526_v27 = vmul.f32 %v7394_v57, %v12337_v33  ;;  %v3990_v35 = vperm.slane %v2570_v48, %v7511_v45  ;;  %v3902_v20 = vsel %vm3800_vm12, %v3901_v4, %v3900_v53  ;;  %v3903_v32 = vperm.slane %v2525_v40, %v7569_v25  ;;  %v12341_v40 = vld [vmem:[#allocation33_spill] sm:$0xff]  ;;  %v12343_v33 = vld [vmem:[#allocation75_spill] sm:$0xff] }
 0x43a   : > { %v3989_v11 = vsel %vm12017_vm9, %v3988_v31, %v3987_v14  ;;  %v2581_v59 = vmul.f32 %v7394_v57, %v12338_v23  ;;  %v2572_v9 = vmul.f32 %v7394_v57, %v12339_v12  ;;  %v4006_v2 = vsel %vm3760_vm2, %v4005_v38, %v4004_v56 }
 0x43b   : > { %v4009_v61 = vperm.slane %v2580_v19, %v7435_v26  ;;  %v3992_v4 = vperm.slane %v2571_v62, %v7508_v60  ;;  %v4008_v48 = vsel %vm12021_vm3, %v4007_v54, %v4006_v2  ;;  %v2395_v53 = vsel %vm921_vm0, %v900_v7, 0.0 }
 0x43c   : > { %v7714_v31 = vmul.f32 %v7394_v57, %v12341_v40  ;;  %v3905_v14 = vperm.slane %v2526_v27, %v7615_v42  ;;  %v3991_v38 = vsel %vm3792_vm10, %v3990_v35, %v3989_v11  ;;  %v2248_v56 = vsel %vm921_vm0, %v851_v13, 0.0  ;;  %v12348_v40 = vld [vmem:[#allocation79_spill] sm:$0xff]  ;;  %v12361_v11 = vld [vmem:[#allocation116_spill] sm:$0xff] }
 0x43d   : > { %2207 = vadd.xlane.f32.xlu2 %v2206_v51  ;;  %2060 = vadd.xlane.f32.xlu1 %v2059_v30  ;;  %v12340_v51 = vld [vmem:[#allocation76_spill] sm:$0xff]  ;;  %v3904_v19 = vsel %vm3804_vm13, %v3903_v32, %v3902_v20  ;;  %v2573_v62 = vmul.f32 %v7394_v57, %v12342_v34  ;;  %v4011_v54 = vperm.slane %v2581_v59, %v7441_v18  ;;  %v12344_v20 = vld [vmem:[#allocation5_spill] sm:$0xff]  ;;  %v12346_v59 = vld [vmem:[#allocation70_spill] sm:$0xff] }
 0x43e   : > { %2018 = vadd.xlane.f32.xlu0 %v2017_v22  ;;  %v2582_v30 = vmul.f32 %v7394_v57, %v12340_v51  ;;  %v2437_v22 = vsel %vm921_vm0, %v914_v52, 0.0  ;;  %v2583_v52 = vmul.f32 %v7394_v57, %v12343_v33  ;;  %v3994_v7 = vperm.slane %v2572_v9, %v7501_v5  ;;  %v12349_v34 = vld [vmem:[#allocation291_spill] sm:$0xff] }
 0x43f   : > { %v4010_v27 = vsel %vm12020_vm4, %v4009_v61, %v4008_v48  ;;  %v7730_v32 = vmul.f32 %v7394_v57, %v12344_v20  ;;  %v3993_v23 = vsel %vm3796_vm11, %v3992_v4, %v3991_v38  ;;  %v2574_v13 = vmul.f32 %v7394_v57, %v12346_v59  ;;  %v12347_v61 = vld [vmem:[#allocation74_spill] sm:$0xff] }
 0x440   : > { %v7695_v49 = vpop.xlane.xlu2 %2186  ;;  %v7697_v0 = vpop.xlane.xlu1 %2039  ;;  %v4013_v35 = vperm.slane %v2582_v30, %v7452_v58  ;;  %v7738_v12 = vsel %vm3812_vm15, %v3876_v50, %v3875_v29  ;;  %v7743_v2 = vsel %vm3808_vm14, %v3905_v14, %v3904_v19  ;;  %v2584_v51 = vmul.f32 %v7394_v57, %v12347_v61  ;;  %v838_v30 = vld [vmem:[%s5944_s24 + $0xd68] sm:$0xff]  ;;  %v789_v48 = vld [vmem:[%s5944_s24 + $0xbe0] sm:$0xff]  ;;  %v775_v14 = vld [vmem:[%s5944_s24 + $0xb70] sm:$0xff] }
 0x441   : > { %v7706_v17 = vpop.xlane.xlu0 %1997  ;;  %12345 = vst [vmem:[#allocation34_spill] sm:$0xff] %v7730_v32  ;;  %v3996_v4 = vperm.slane %v2573_v62, %v7569_v25  ;;  %v2585_v50 = vmul.f32 %v7394_v57, %v12348_v40  ;;  %v2818_v33 = vmul.f32 %v7394_v57, %v12349_v34  ;;  %v12350_v62 = vld [vmem:[#allocation292_spill] sm:$0xff]  ;;  %v3998_v59 = vperm.slane %v2574_v13, %v7615_v42  ;;  %v12354_v40 = vld [vmem:[#allocation77_spill] sm:$0xff] }
 0x442   : > { %v2209_v61 = vsel %vm921_vm0, %v838_v30, 0.0  ;;  %v7781_v34 = vmul.f32 %v7394_v57, %v12354_v40  ;;  %v2586_v30 = vmul.f32 %v7394_v57, %v12356_v55  ;;  %v852_v32 = vld [vmem:[%s5944_s24 + $0xdd8] sm:$0xff]  ;;  %v2886_v60 = vmul.f32 %v7394_v57, %v7695_v49 }
 0x443   : > { %v4470_v9 = vperm.slane %v2818_v33, %v7412_v39  ;;  %v2251_v25 = vsel %vm921_vm0, %v852_v32, 0.0  ;;  %v2962_v49 = vmul.f32 %v7394_v57, %v7636_v28 }
 0x444   : > { %12355 = vst [vmem:[#allocation68_spill] sm:$0xff] %v7781_v34  ;;  %v4021_v55 = vperm.slane %v2586_v30, %v7511_v45 }
 0x445   : > { %2438 = vadd.xlane.f32.xlu2 %v2437_v22  ;;  %2396 = vadd.xlane.f32.xlu1 %v2395_v53  ;;  %v4015_v22 = vperm.slane %v2583_v52, %v7478_v47  ;;  %v4012_v53 = vsel %vm12019_vm5, %v4011_v54, %v4010_v27  ;;  %v2817_v52 = vmul.f32 %v7394_v57, %v12350_v62  ;;  %v12351_v54 = vld [vmem:[#allocation69_spill] sm:$0xff]  ;;  %v2020_v62 = vsel %vm921_vm0, %v775_v14, 0.0 }
 0x446   : > { %2249 = vadd.xlane.f32.xlu0 %v2248_v56  ;;  %v3995_v56 = vsel %vm3800_vm12, %v3994_v7, %v3993_v23  ;;  %v4014_v19 = vsel %vm12007_vm6, %v4013_v35, %v4012_v53  ;;  %v7769_v27 = vmul.f32 %v7394_v57, %v12351_v54  ;;  %v2062_v7 = vsel %vm921_vm0, %v789_v48, 0.0  ;;  %v12352_v23 = vld [vmem:[#allocation72_spill] sm:$0xff]  ;;  %v12358_v14 = vld [vmem:[#allocation37_spill] sm:$0xff] }
 0x447   : > { %v7776_v35 = vmul.f32 %v7394_v57, %v12352_v23  ;;  %v4017_v53 = vperm.slane %v2584_v51, %v7487_v63  ;;  %v3997_v54 = vsel %vm3804_vm13, %v3996_v4, %v3995_v56  ;;  %v4016_v13 = vsel %vm12018_vm7, %v4015_v22, %v4014_v19  ;;  %v12357_v23 = vld [vmem:[#allocation290_spill] sm:$0xff]  ;;  %v12360_v56 = vld [vmem:[#allocation295_spill] sm:$0xff] }
 0x448   : > { %v7754_v29 = vpop.xlane.xlu2 %2417  ;;  %v7756_v38 = vpop.xlane.xlu1 %2375  ;;  %v4019_v48 = vperm.slane %v2585_v50, %v7459_v37  ;;  %v2819_v51 = vmul.f32 %v7394_v57, %v12357_v23  ;;  %v4469_v40 = vperm.slane %v2817_v52, %v7401_v8  ;;  %v7795_v4 = vmul.f32 %v7394_v57, %v12358_v14  ;;  %v12359_v22 = vld [vmem:[#allocation294_spill] sm:$0xff]  ;;  %v915_v23 = vld [vmem:[%s5944_s24 + $0xfd0] sm:$0xff] }
 0x449   : > { %v7765_v20 = vpop.xlane.xlu0 %2228  ;;  %12353 = vst [vmem:[#allocation73_spill] sm:$0xff] %v7776_v35  ;;  %v2882_v50 = vmul.f32 %v7394_v57, %v12359_v22  ;;  %v2881_v19 = vmul.f32 %v7394_v57, %v12360_v56  ;;  %v7804_v33 = vsel %vm3808_vm14, %v3998_v59, %v3997_v54  ;;  %v901_v14 = vld [vmem:[%s5944_s24 + $0xf60] sm:$0xff]  ;;  %v12363_v59 = vld [vmem:[#allocation296_spill] sm:$0xff]  ;;  %v2440_v41 = vsel %vm921_vm0, %v915_v23, 0.0 }
 0x44a   : > { %v2883_v54 = vmul.f32 %v7394_v57, %v12363_v59  ;;  %v4471_v30 = vsel %vm3760_vm2, %v4470_v9, %v4469_v40  ;;  %v2398_v42 = vsel %vm921_vm0, %v901_v14, 0.0  ;;  %v12369_v40 = vld [vmem:[#allocation303_spill] sm:$0xff] }
 0x44b   : > { %v4594_v59 = vperm.slane %v2882_v50, %v7412_v39  ;;  %v4593_v21 = vperm.slane %v2881_v19, %v7401_v8  ;;  %v12371_v14 = vld [vmem:[#allocation299_spill] sm:$0xff] }
 0x44c   : > { %v4596_v23 = vperm.slane %v2883_v54, %v7420_v24  ;;  %v12374_v19 = vld [vmem:[#allocation119_spill] sm:$0xff] }
 0x44d   : > { %2210 = vadd.xlane.f32.xlu2 %v2209_v61  ;;  %2063 = vadd.xlane.f32.xlu1 %v2062_v7  ;;  %v4018_v7 = vsel %vm12016_vm8, %v4017_v53, %v4016_v13  ;;  %v12364_v61 = vld [vmem:[#allocation117_spill] sm:$0xff]  ;;  %v4472_v13 = vperm.slane %v2819_v51, %v7420_v24  ;;  %v12368_v51 = vld [vmem:[#allocation302_spill] sm:$0xff]  ;;  %v7869_v54 = vmul.f32 %v7394_v57, %v12374_v19 }
 0x44e   : > { %2021 = vadd.xlane.f32.xlu0 %v2020_v62  ;;  %v4020_v22 = vsel %vm12017_vm9, %v4019_v48, %v4018_v7  ;;  %v7817_v62 = vmul.f32 %v7394_v57, %v12361_v11  ;;  %v7826_v53 = vmul.f32 %v7394_v57, %v12364_v61  ;;  %v12366_v48 = vld [vmem:[#allocation293_spill] sm:$0xff]  ;;  %v2946_v9 = vmul.f32 %v7394_v57, %v12368_v51 }
 0x44f   : > { %v7832_v7 = vmul.f32 %v7394_v57, %v12366_v48  ;;  %v12367_v61 = vld [vmem:[#allocation297_spill] sm:$0xff]  ;;  %v2945_v48 = vmul.f32 %v7394_v57, %v12369_v40  ;;  %v7850_v50 = vsel %vm3792_vm10, %v4021_v55, %v4020_v22  ;;  %12375 = vst [vmem:[#allocation75_spill] sm:$0xff] %v7869_v54  ;;  %v7876_v51 = vsel %vm12021_vm3, %v4472_v13, %v4471_v30  ;;  %v12378_v30 = vld [vmem:[#allocation304_spill] sm:$0xff]  ;;  %v12380_v13 = vld [vmem:[#allocation310_spill] sm:$0xff] }
 0x450   : > { %12362 = vst [vmem:[#allocation76_spill] sm:$0xff] %v7817_v62  ;;  %v2190_v56 = vpop.xlane.xlu2 %2189  ;;  %v7821_v52 = vpop.xlane.xlu1 %2042  ;;  %v7842_v5 = vmul.f32 %v7394_v57, %v12367_v61  ;;  %v7857_v61 = vmul.f32 %v7394_v57, %v12371_v14  ;;  %v12372_v40 = vld [vmem:[#allocation301_spill] sm:$0xff]  ;;  %v12376_v62 = vld [vmem:[#allocation120_spill] sm:$0xff] }
 0x451   : > { %12365 = vst [vmem:[#allocation33_spill] sm:$0xff] %v7826_v53  ;;  %v7834_v11 = vpop.xlane.xlu0 %2000  ;;  %v7863_v32 = vmul.f32 %v7394_v57, %v12372_v40  ;;  %v12373_v55 = vld [vmem:[#allocation305_spill] sm:$0xff]  ;;  %v7873_v14 = vmul.f32 %v7394_v57, %v12376_v62  ;;  %v4717_v19 = vperm.slane %v2945_v48, %v7401_v8  ;;  %v790_v62 = vld [vmem:[%s5944_s24 + $0xbe8] sm:$0xff]  ;;  %v7892_v40 = vmul.f32 %v7394_v57, %v12378_v30 }
 0x452   : > { %12370 = vst [vmem:[#allocation71_spill] sm:$0xff] %v7850_v50  ;;  %v2884_v22 = vmul.f32 %v7394_v57, %v12373_v55  ;;  %v4595_v55 = vsel %vm3760_vm2, %v4594_v59, %v4593_v21  ;;  %v839_v54 = vld [vmem:[%s5944_s24 + $0xd70] sm:$0xff]  ;;  %v2885_v21 = vmul.f32 %v7394_v57, %v7588_v15  ;;  %v12379_v53 = vld [vmem:[#allocation307_spill] sm:$0xff]  ;;  %v2947_v15 = vmul.f32 %v7394_v57, %v12380_v13 }
 0x453   : > { %12377 = vst [vmem:[#allocation5_spill] sm:$0xff] %v7873_v14  ;;  %v4597_v14 = vsel %vm12021_vm3, %v4596_v23, %v4595_v55  ;;  %v7902_v23 = vmul.f32 %v7394_v57, %v12379_v53  ;;  %v7906_v55 = vmul.f32 %v7394_v57, %v7527_v3  ;;  %v2212_v34 = vsel %vm921_vm0, %v839_v54, 0.0 }
 0x454   : > { %v4598_v48 = vperm.slane %v2884_v22, %v7435_v26  ;;  %v2898_v53 = vmul.f32 %v7394_v57, %v7537_v44  ;;  %v2899_v3 = vmul.f32 %v7394_v57, %v7586_v10  ;;  %v4624_v13 = vperm.slane %v7892_v40, %v7401_v8 }
 0x455   : > { %2441 = vadd.xlane.f32.xlu2 %v2440_v41  ;;  %2399 = vadd.xlane.f32.xlu1 %v2398_v42  ;;  %v4718_v42 = vperm.slane %v2946_v9, %v7412_v39  ;;  %v776_v41 = vld [vmem:[%s5944_s24 + $0xb78] sm:$0xff]  ;;  %v2065_v9 = vsel %vm921_vm0, %v790_v62, 0.0  ;;  %v4600_v35 = vperm.slane %v2885_v21, %v7441_v18  ;;  %v2887_v54 = vmul.f32 %v7394_v57, %v2190_v56  ;;  %v902_v62 = vld [vmem:[%s5944_s24 + $0xf68] sm:$0xff] }
 0x456   : > { %2252 = vadd.xlane.f32.xlu0 %v2251_v25  ;;  %v2023_v50 = vsel %vm921_vm0, %v776_v41, 0.0  ;;  %v2961_v10 = vmul.f32 %v7394_v57, %v7638_v1  ;;  %v2948_v41 = vmul.f32 %v7394_v57, %v7647_v43  ;;  %v4599_v40 = vsel %vm12020_vm4, %v4598_v48, %v4597_v14  ;;  %v916_v14 = vld [vmem:[%s5944_s24 + $0xfd8] sm:$0xff] }
 0x457   : > { %v4719_v22 = vsel %vm3760_vm2, %v4718_v42, %v4717_v19  ;;  %v4720_v56 = vperm.slane %v2947_v15, %v7420_v24  ;;  %v4602_v42 = vperm.slane %v2886_v60, %v7452_v58  ;;  %v4625_v19 = vperm.slane %v2898_v53, %v7412_v39  ;;  %v853_v53 = vld [vmem:[%s5944_s24 + $0xde0] sm:$0xff] }
 0x458   : > { %v2421_v25 = vpop.xlane.xlu2 %2420  ;;  %v2379_v59 = vpop.xlane.xlu1 %2378  ;;  %v4627_v1 = vperm.slane %v2899_v3, %v7420_v24  ;;  %v7941_v43 = vmul.f32 %v7394_v57, %v7597_v16  ;;  %v4601_v21 = vsel %vm12019_vm5, %v4600_v35, %v4599_v40  ;;  %v2949_v60 = vmul.f32 %v7394_v57, %v7756_v38 }
 0x459   : > { %v2232_v30 = vpop.xlane.xlu0 %2231  ;;  %v4748_v16 = vperm.slane %v2961_v10, %v7401_v8  ;;  %v4722_v3 = vperm.slane %v2948_v41, %v7435_v26  ;;  %v2900_v38 = vmul.f32 %v7394_v57, %v7765_v20  ;;  %v2401_v28 = vsel %vm921_vm0, %v902_v62, 0.0 }
 0x45a   : > { %v2964_v41 = vmul.f32 %v7394_v57, %v2421_v25  ;;  %v2950_v20 = vmul.f32 %v7394_v57, %v2379_v59  ;;  %v4721_v62 = vsel %vm12021_vm3, %v4720_v56, %v4719_v22  ;;  %v840_v22 = vld [vmem:[%s5944_s24 + $0xd78] sm:$0xff] }
 0x45b   : > { %v4629_v59 = vperm.slane %v2900_v38, %v7435_v26  ;;  %v4723_v56 = vsel %vm12020_vm4, %v4722_v3, %v4721_v62  ;;  %v2215_v38 = vsel %vm921_vm0, %v840_v22, 0.0  ;;  %v12382_v22 = vperm.slane %v7857_v61, %v7401_v8 }
 0x45d   : > { %2213 = vadd.xlane.f32.xlu2 %v2212_v34  ;;  %2066 = vadd.xlane.f32.xlu1 %v2065_v9  ;;  %v2963_v34 = vmul.f32 %v7394_v57, %v7754_v29  ;;  %v4749_v9 = vperm.slane %v2962_v49, %v7412_v39  ;;  %v7957_v29 = vmul.f32 %v7394_v57, %v7697_v0  ;;  %v2254_v0 = vsel %vm921_vm0, %v853_v53, 0.0 }
 0x45e   : > { %2024 = vadd.xlane.f32.xlu0 %v2023_v50  ;;  %v4604_v50 = vperm.slane %v2887_v54, %v7478_v47  ;;  %v4603_v49 = vsel %vm12007_vm6, %v4602_v42, %v4601_v21  ;;  %v2443_v54 = vsel %vm921_vm0, %v916_v14, 0.0  ;;  %v2901_v14 = vmul.f32 %v7394_v57, %v2232_v30  ;;  %v854_v30 = vld [vmem:[%s5944_s24 + $0xde8] sm:$0xff] }
 0x45f   : > { %v4751_v10 = vperm.slane %v2963_v34, %v7420_v24  ;;  %v4626_v34 = vsel %vm3760_vm2, %v4625_v19, %v4624_v13  ;;  %v4507_v13 = vperm.slane %v7957_v29, %v7441_v18  ;;  %v791_v19 = vld [vmem:[%s5944_s24 + $0xbf0] sm:$0xff] }
 0x460   : > { %v2193_v48 = vpop.xlane.xlu2 %2192  ;;  %v2046_v15 = vpop.xlane.xlu1 %2045  ;;  %v4605_v42 = vsel %vm12018_vm7, %v4604_v50, %v4603_v49  ;;  %v4628_v21 = vsel %vm12021_vm3, %v4627_v1, %v4626_v34  ;;  %v4750_v50 = vsel %vm3760_vm2, %v4749_v9, %v4748_v16  ;;  %v4726_v9 = vperm.slane %v2950_v20, %v7452_v58 }
 0x461   : > { %v2888_v35 = vmul.f32 %v7394_v57, %v2193_v48  ;;  %v2004_v40 = vpop.xlane.xlu0 %2003  ;;  %v4724_v48 = vperm.slane %v2949_v60, %v7441_v18  ;;  %v4505_v60 = vperm.slane %v7941_v43, %v7435_v26  ;;  %v4752_v1 = vsel %vm12021_vm3, %v4751_v10, %v4750_v50 }
 0x462   : > { %v4631_v53 = vperm.slane %v2901_v14, %v7441_v18  ;;  %v2838_v10 = vmul.f32 %v7394_v57, %v7821_v52  ;;  %v2825_v50 = vmul.f32 %v7394_v57, %v2004_v40  ;;  %v12383_v40 = vperm.slane %v7842_v5, %v7412_v39 }
 0x463   : > { %v4606_v44 = vperm.slane %v2888_v35, %v7487_v63  ;;  %v4725_v43 = vsel %vm12019_vm5, %v4724_v48, %v4723_v56  ;;  %v2824_v48 = vmul.f32 %v7394_v57, %v7834_v11  ;;  %v12386_v5 = vperm.slane %v7902_v23, %v7420_v24  ;;  %v903_v23 = vld [vmem:[%s5944_s24 + $0xf70] sm:$0xff] }
 0x464   : > { %v4727_v62 = vsel %vm12007_vm6, %v4726_v9, %v4725_v43  ;;  %v4502_v56 = vsel %vm3760_vm2, %v12383_v40, %v12382_v22  ;;  %v4509_v9 = vperm.slane %v2838_v10, %v7452_v58  ;;  %v12388_v40 = vld [vmem:[#allocation6_spill] sm:$0xff] }
 0x465   : > { %v7976_v25 = vsel %vm12016_vm8, %v4606_v44, %v4605_v42  ;;  %2444 = vadd.xlane.f32.xlu2 %v2443_v54  ;;  %2402 = vadd.xlane.f32.xlu1 %v2401_v28  ;;  %v2823_v44 = vmul.f32 %v7394_v57, %v7706_v17  ;;  %v4753_v28 = vperm.slane %v2964_v41, %v7435_v26  ;;  %v2257_v17 = vsel %vm921_vm0, %v854_v30, 0.0 }
 0x466   : > { %2255 = vadd.xlane.f32.xlu0 %v2254_v0  ;;  %v4630_v54 = vsel %vm12020_vm4, %v4629_v59, %v4628_v21  ;;  %v2068_v0 = vsel %vm921_vm0, %v791_v19, 0.0  ;;  %v2839_v21 = vmul.f32 %v7394_v57, %v2046_v15  ;;  %v12381_v30 = vperm.slane %v7832_v7, %v7435_v26 }
 0x467   : > { %v4754_v42 = vsel %vm12020_vm4, %v4753_v28, %v4752_v1  ;;  %v4632_v34 = vsel %vm12019_vm5, %v4631_v53, %v4630_v54  ;;  %v4480_v28 = vperm.slane %v2823_v44, %v7478_v47  ;;  %v12384_v1 = vld [vmem:[#allocation121_spill] sm:$0xff]  ;;  %v4504_v43 = vsel %vm12021_vm3, %v12386_v5, %v4502_v56  ;;  %v917_v53 = vld [vmem:[%s5944_s24 + $0xfe0] sm:$0xff] }
 0x468   : > { %v2424_v16 = vpop.xlane.xlu2 %2423  ;;  %v2382_v35 = vpop.xlane.xlu1 %2381  ;;  %v4475_v15 = vsel %vm12020_vm4, %v12381_v30, %v7876_v51  ;;  %v2627_v7 = vmul.f32 %v7394_v57, %v12384_v1  ;;  %v12385_v51 = vperm.slane %v7863_v32, %v7441_v18  ;;  %v792_v44 = vld [vmem:[%s5944_s24 + $0xbf8] sm:$0xff]  ;;  %v4482_v32 = vperm.slane %v2824_v48, %v7487_v63 }
 0x469   : > { %v2965_v3 = vmul.f32 %v7394_v57, %v2424_v16  ;;  %v2951_v29 = vmul.f32 %v7394_v57, %v2382_v35  ;;  %v2235_v49 = vpop.xlane.xlu0 %2234  ;;  %v12387_v16 = vperm.slane %v7906_v55, %v7452_v58  ;;  %v4484_v54 = vperm.slane %v2825_v50, %v7459_v37  ;;  %v12392_v5 = vld [vmem:[#allocation73_spill] sm:$0xff] }
 0x46a   : > { %v2902_v41 = vmul.f32 %v7394_v57, %v2235_v49  ;;  %v4477_v61 = vsel %vm12019_vm5, %v12385_v51, %v4475_v15  ;;  %v2071_v48 = vsel %vm921_vm0, %v792_v44, 0.0  ;;  %v8084_v56 = vmul.f32 %v7394_v57, %v12388_v40  ;;  %v12396_v44 = vld [vmem:[#allocation309_spill] sm:$0xff] }
 0x46b   : > { %v4755_v20 = vperm.slane %v2965_v3, %v7441_v18  ;;  %v4728_v14 = vperm.slane %v2951_v29, %v7478_v47  ;;  %v4479_v35 = vsel %vm12007_vm6, %v12387_v16, %v4477_v61  ;;  %v4506_v3 = vsel %vm12020_vm4, %v4505_v60, %v4504_v43 }
 0x46c   : > { %v4633_v52 = vperm.slane %v2902_v41, %v7452_v58  ;;  %v4511_v29 = vperm.slane %v2839_v21, %v7478_v47  ;;  %v12391_v61 = vperm.slane %v7714_v31, %v7558_v36  ;;  %v918_v31 = vld [vmem:[%s5944_s24 + $0xfe8] sm:$0xff] }
 0x46d   : > { %v8016_v11 = vsel %vm12019_vm5, %v4755_v20, %v4754_v42  ;;  %v8019_v59 = vsel %vm12018_vm7, %v4728_v14, %v4727_v62  ;;  %2258 = vadd.xlane.f32.xlu2 %v2257_v17  ;;  %2216 = vadd.xlane.f32.xlu1 %v2215_v38  ;;  %v4508_v38 = vsel %vm12019_vm5, %v4507_v13, %v4506_v3  ;;  %v2446_v42 = vsel %vm921_vm0, %v917_v53, 0.0 }
 0x46e   : > { %v8035_v19 = vsel %vm12007_vm6, %v4633_v52, %v4632_v34  ;;  %2069 = vadd.xlane.f32.xlu0 %v2068_v0  ;;  %v4481_v0 = vsel %vm12018_vm7, %v4480_v28, %v4479_v35  ;;  %v4510_v20 = vsel %vm12007_vm6, %v4509_v9, %v4508_v38  ;;  %v2404_v62 = vsel %vm921_vm0, %v903_v23, 0.0  ;;  %v12395_v9 = vld [vmem:[#allocation68_spill] sm:$0xff]  ;;  %v904_v35 = vld [vmem:[%s5944_s24 + $0xf78] sm:$0xff] }
 0x46f   : > { %v4100_v34 = vperm.slane %v2627_v7, %v7420_v24  ;;  %v4483_v21 = vsel %vm12016_vm8, %v4482_v32, %v4481_v0  ;;  %v4512_v52 = vsel %vm12018_vm7, %v4511_v29, %v4510_v20  ;;  %v12389_v28 = vperm.slane %v7676_v46, %v7668_v6  ;;  %v12400_v32 = vld [vmem:[#allocation76_spill] sm:$0xff]  ;;  %v12403_v38 = vld [vmem:[#allocation5_spill] sm:$0xff] }
 0x470   : > { %v2196_v49 = vpop.xlane.xlu2 %2195  ;;  %v2049_v17 = vpop.xlane.xlu1 %2048  ;;  %v4485_v30 = vsel %vm12017_vm9, %v4484_v54, %v4483_v21  ;;  %v8106_v46 = vsel %vm3812_vm15, %v12391_v61, %v7743_v2  ;;  %v12397_v53 = vperm.slane %v12395_v9, %v12396_v44  ;;  %v12398_v2 = vld [vmem:[#allocation33_spill] sm:$0xff]  ;;  %v12401_v29 = vperm.slane %v12400_v32, %v7412_v39  ;;  %v12406_v21 = vld [vmem:[#allocation136_spill] sm:$0xff] }
 0x471   : > { %v2889_v10 = vmul.f32 %v7394_v57, %v2196_v49  ;;  %v2840_v41 = vmul.f32 %v7394_v57, %v2049_v17  ;;  %v2007_v55 = vpop.xlane.xlu0 %2006  ;;  %v8091_v1 = vsel %vm12006_vm1, %v12389_v28, %v7738_v12  ;;  %v12399_v3 = vperm.slane %v12398_v2, %v7401_v8  ;;  %v12402_v17 = vld [vmem:[#allocation75_spill] sm:$0xff]  ;;  %v12407_v28 = vld [vmem:[#allocation122_spill] sm:$0xff]  ;;  %v12410_v32 = vld [vmem:[#allocation80_spill] sm:$0xff] }
 0x472   : > { %v2826_v60 = vmul.f32 %v7394_v57, %v2007_v55  ;;  %v4104_v23 = vperm.slane %v12402_v17, %v7441_v18  ;;  %v4102_v54 = vperm.slane %v12403_v38, %v7435_v26  ;;  %v2407_v40 = vsel %vm921_vm0, %v904_v35, 0.0  ;;  %v12469_v12 = vld [vmem:[#allocation200_spill] sm:$0xff] }
 0x473   : > { %v4608_v14 = vperm.slane %v2889_v10, %v7459_v37  ;;  %v4513_v13 = vperm.slane %v2840_v41, %v7487_v63  ;;  %v4099_v49 = vsel %vm3760_vm2, %v12401_v29, %v12399_v3  ;;  %v12404_v10 = vld [vmem:[#allocation124_spill] sm:$0xff]  ;;  %v8171_v29 = vmul.f32 %v7394_v57, %v12410_v32  ;;  %v12417_v32 = vld [vmem:[#allocation126_spill] sm:$0xff] }
 0x474   : > { %v4486_v50 = vperm.slane %v2826_v60, %v7511_v45  ;;  %v2630_v41 = vmul.f32 %v7394_v57, %v12404_v10  ;;  %v855_v60 = vld [vmem:[%s5944_s24 + $0xdf0] sm:$0xff] }
 0x475   : > { %v8077_v15 = vsel %vm12017_vm9, %v4608_v14, %v7976_v25  ;;  %v8080_v22 = vsel %vm12016_vm8, %v4513_v13, %v4512_v52  ;;  %2072 = vadd.xlane.f32.xlu2 %v2071_v48  ;;  %2447 = vadd.xlane.f32.xlu1 %v2446_v42  ;;  %v12390_v25 = vperm.slane %v7769_v27, %v7558_v36  ;;  %v12405_v42 = vld [vmem:[#allocation131_spill] sm:$0xff]  ;;  %v2260_v61 = vsel %vm921_vm0, %v855_v60, 0.0  ;;  %v919_v60 = vld [vmem:[%s5944_s24 + $0xff0] sm:$0xff] }
 0x476   : > { %v8099_v51 = vsel %vm3792_vm10, %v4486_v50, %v4485_v30  ;;  %2405 = vadd.xlane.f32.xlu0 %v2404_v62  ;;  %v12393_v27 = vperm.slane %v12392_v5, %v7668_v6  ;;  %v4101_v48 = vsel %vm12021_vm3, %v4100_v34, %v4099_v49  ;;  %v2641_v20 = vmul.f32 %v7394_v57, %v12405_v42  ;;  %v12413_v42 = vld [vmem:[#allocation125_spill] sm:$0xff] }
 0x477   : > { %v4001_v7 = vsel %vm3812_vm15, %v12390_v25, %v7804_v33  ;;  %v12394_v33 = vld [vmem:[#allocation71_spill] sm:$0xff]  ;;  %v2642_v52 = vmul.f32 %v7394_v57, %v12406_v21  ;;  %v2449_v30 = vsel %vm921_vm0, %v918_v31, 0.0  ;;  %v2632_v34 = vmul.f32 %v7394_v57, %v12407_v28 }
 0x478   : > { %v8114_v43 = vsel %vm12006_vm1, %v12393_v27, %v4001_v7  ;;  %v8121_v16 = vsel %vm3796_vm11, %v12397_v53, %v12394_v33  ;;  %v2427_v55 = vpop.xlane.xlu2 %2426  ;;  %v2385_v0 = vpop.xlane.xlu1 %2384  ;;  %v4103_v5 = vsel %vm12020_vm4, %v4102_v54, %v4101_v48  ;;  %v12408_v27 = vld [vmem:[#allocation123_spill] sm:$0xff]  ;;  %v4106_v9 = vperm.slane %v2630_v41, %v7452_v58  ;;  %v12412_v54 = vld [vmem:[#allocation82_spill] sm:$0xff] }
 0x479   : > { %v2966_v14 = vmul.f32 %v7394_v57, %v2427_v55  ;;  %v2952_v13 = vmul.f32 %v7394_v57, %v2385_v0  ;;  %v2238_v62 = vpop.xlane.xlu0 %2237  ;;  %v2631_v33 = vmul.f32 %v7394_v57, %v12408_v27  ;;  %v12409_v31 = vld [vmem:[#allocation135_spill] sm:$0xff]  ;;  %v4128_v49 = vperm.slane %v2641_v20, %v7401_v8  ;;  %v920_v0 = vld [vmem:[%s5944_s24 + $0xff8] sm:$0xff] }
 0x47a   : > { %v2903_v50 = vmul.f32 %v7394_v57, %v2238_v62  ;;  %v2643_v35 = vmul.f32 %v7394_v57, %v12409_v31  ;;  %v4129_v17 = vperm.slane %v2642_v52, %v7412_v39  ;;  %v8185_v10 = vmul.f32 %v7394_v57, %v12412_v54  ;;  %v856_v52 = vld [vmem:[%s5944_s24 + $0xdf8] sm:$0xff]  ;;  %v12416_v27 = vld [vmem:[#allocation139_spill] sm:$0xff] }
 0x47b   : > { %v4757_v25 = vperm.slane %v2966_v14, %v7452_v58  ;;  %v4730_v7 = vperm.slane %v2952_v13, %v7487_v63  ;;  %v4110_v41 = vperm.slane %v2632_v34, %v7487_v63  ;;  %v4105_v55 = vsel %vm12019_vm5, %v4104_v23, %v4103_v5  ;;  %v12414_v14 = vld [vmem:[#allocation127_spill] sm:$0xff] }
 0x47c   : > { %v4635_v53 = vperm.slane %v2903_v50, %v7478_v47  ;;  %v4108_v48 = vperm.slane %v2631_v33, %v7478_v47  ;;  %v8195_v20 = vmul.f32 %v7394_v57, %v12413_v42  ;;  %v2633_v13 = vmul.f32 %v7394_v57, %v12414_v14  ;;  %v12415_v50 = vld [vmem:[#allocation134_spill] sm:$0xff] }
 0x47d   : > { %v8163_v2 = vsel %vm12007_vm6, %v4757_v25, %v8016_v11  ;;  %v8167_v3 = vsel %vm12016_vm8, %v4730_v7, %v8019_v59  ;;  %2450 = vadd.xlane.f32.xlu2 %v2449_v30  ;;  %2408 = vadd.xlane.f32.xlu1 %v2407_v40  ;;  %v12411_v11 = vld [vmem:[#allocation81_spill] sm:$0xff]  ;;  %v2644_v30 = vmul.f32 %v7394_v57, %v12415_v50  ;;  %v2452_v5 = vsel %vm921_vm0, %v919_v60, 0.0  ;;  %v12419_v42 = vld [vmem:[#allocation138_spill] sm:$0xff]  ;;  %v794_v50 = vld [vmem:[%s5944_s24 + $0xc08] sm:$0xff] }
 0x47e   : > { %v8177_v38 = vsel %vm12018_vm7, %v4635_v53, %v8035_v19  ;;  %2261 = vadd.xlane.f32.xlu0 %v2260_v61  ;;  %v8181_v59 = vmul.f32 %v7394_v57, %v12411_v11  ;;  %v4107_v19 = vsel %vm12007_vm6, %v4106_v9, %v4105_v55  ;;  %v4131_v23 = vperm.slane %v2643_v35, %v7420_v24  ;;  %v12418_v60 = vld [vmem:[#allocation313_spill] sm:$0xff] }
 0x47f   : > { %v4130_v25 = vsel %vm3760_vm2, %v4129_v17, %v4128_v49  ;;  %v2455_v61 = vsel %vm921_vm0, %v920_v0, 0.0  ;;  %v2645_v33 = vmul.f32 %v7394_v57, %v12416_v27  ;;  %v2263_v31 = vsel %vm921_vm0, %v856_v52, 0.0  ;;  %v745_v52 = vld [vmem:[%s5944_s24 + $0xa80] sm:$0xff] }
 0x480   : > { %v2199_v62 = vpop.xlane.xlu2 %2198  ;;  %v2052_v21 = vpop.xlane.xlu1 %2051  ;;  %v4109_v35 = vsel %vm12018_vm7, %v4108_v48, %v4107_v19  ;;  %v2634_v49 = vmul.f32 %v7394_v57, %v12417_v32  ;;  %v4112_v17 = vperm.slane %v2633_v13, %v7459_v37  ;;  %v4133_v54 = vperm.slane %v2644_v30, %v7435_v26 }
 0x481   : > { %v2890_v40 = vmul.f32 %v7394_v57, %v2199_v62  ;;  %v2841_v28 = vmul.f32 %v7394_v57, %v2052_v21  ;;  %v2010_v34 = vpop.xlane.xlu0 %2009  ;;  %v4027_v48 = vperm.slane %v8181_v59, %v12418_v60  ;;  %v4132_v19 = vsel %vm12021_vm3, %v4131_v23, %v4130_v25 }
 0x482   : > { %v2827_v7 = vmul.f32 %v7394_v57, %v2010_v34  ;;  %v2646_v14 = vmul.f32 %v7394_v57, %v12419_v42  ;;  %v4116_v62 = vperm.slane %v8195_v20, %v12396_v44  ;;  %v4111_v21 = vsel %vm12016_vm8, %v4110_v41, %v4109_v35  ;;  %v793_v20 = vld [vmem:[%s5944_s24 + $0xc00] sm:$0xff] }
 0x483   : > { %v4610_v9 = vperm.slane %v2890_v40, %v7511_v45  ;;  %v4515_v53 = vperm.slane %v2841_v28, %v7459_v37  ;;  %v4135_v59 = vperm.slane %v2645_v33, %v7441_v18  ;;  %v4114_v30 = vperm.slane %v2634_v49, %v7511_v45  ;;  %v12421_v40 = vld [vmem:[#allocation129_spill] sm:$0xff]  ;;  %v12422_v28 = vld [vmem:[#allocation130_spill] sm:$0xff] }
 0x484   : > { %v4488_v11 = vperm.slane %v2827_v7, %v12396_v44  ;;  %v4113_v23 = vsel %vm12017_vm9, %v4112_v17, %v4111_v21  ;;  %v12423_v7 = vld [vmem:[#allocation137_spill] sm:$0xff]  ;;  %v2077_v35 = vsel %vm921_vm0, %v794_v50, 0.0 }
 0x485   : > { %v8222_v55 = vsel %vm3792_vm10, %v4610_v9, %v8077_v15  ;;  %v8226_v0 = vsel %vm12017_vm9, %v4515_v53, %v8080_v22  ;;  %2456 = vadd.xlane.f32.xlu2 %v2455_v61  ;;  %2453 = vadd.xlane.f32.xlu1 %v2452_v5  ;;  %v12420_v15 = vld [vmem:[#allocation308_spill] sm:$0xff]  ;;  %v2647_v41 = vmul.f32 %v7394_v57, %v12423_v7 }
 0x486   : > { %v8235_v13 = vsel %vm3796_vm11, %v4488_v11, %v8099_v51  ;;  %2264 = vadd.xlane.f32.xlu0 %v2263_v31  ;;  %v4025_v22 = vperm.slane %v8185_v10, %v12420_v15  ;;  %v8249_v51 = vmul.f32 %v7394_v57, %v12421_v40  ;;  %v2636_v10 = vmul.f32 %v7394_v57, %v12422_v28 }
 0x487   : > { %v4134_v61 = vsel %vm12020_vm4, %v4133_v54, %v4132_v19  ;;  %v4137_v9 = vperm.slane %v2646_v14, %v7452_v58  ;;  %v1930_v31 = vsel %vm921_vm0, %v745_v52, 0.0  ;;  %v2074_v11 = vsel %vm921_vm0, %v793_v20, 0.0  ;;  %v795_v20 = vld [vmem:[%s5944_s24 + $0xc10] sm:$0xff] }
 0x488   : > { %v2430_v34 = vpop.xlane.xlu2 %2429  ;;  %v2388_v25 = vpop.xlane.xlu1 %2387  ;;  %v4136_v32 = vsel %vm12019_vm5, %v4135_v59, %v4134_v61  ;;  %v4026_v54 = vsel %vm3800_vm12, %v4025_v22, %v8121_v16  ;;  %v4115_v19 = vsel %vm3792_vm10, %v4114_v30, %v4113_v23  ;;  %v4118_v42 = vperm.slane %v2636_v10, %v12420_v15  ;;  %v12424_v16 = vld [vmem:[#allocation314_spill] sm:$0xff]  ;;  %v12428_v61 = vld [vmem:[#allocation141_spill] sm:$0xff] }
 0x489   : > { %v2967_v5 = vmul.f32 %v7394_v57, %v2430_v34  ;;  %v2953_v27 = vmul.f32 %v7394_v57, %v2388_v25  ;;  %v2241_v33 = vpop.xlane.xlu0 %2240  ;;  %v4139_v21 = vperm.slane %v2647_v41, %v7478_v47  ;;  %v4029_v22 = vperm.slane %v8171_v29, %v12424_v16  ;;  %v12425_v30 = vld [vmem:[#allocation142_spill] sm:$0xff]  ;;  %v12427_v41 = vld [vmem:[#allocation133_spill] sm:$0xff] }
 0x48a   : > { %v2904_v53 = vmul.f32 %v7394_v57, %v2241_v33  ;;  %v4138_v50 = vsel %vm12007_vm6, %v4137_v9, %v4136_v32  ;;  %v2648_v23 = vmul.f32 %v7394_v57, %v12425_v30  ;;  %v4120_v10 = vperm.slane %v8249_v51, %v12418_v60  ;;  %v857_v25 = vld [vmem:[%s5944_s24 + $0xe00] sm:$0xff] }
 0x48b   : > { %v4759_v49 = vperm.slane %v2967_v5, %v7478_v47  ;;  %v4732_v17 = vperm.slane %v2953_v27, %v7459_v37  ;;  %v4117_v34 = vsel %vm3796_vm11, %v4116_v62, %v4115_v19  ;;  %v12429_v5 = vld [vmem:[#allocation179_spill] sm:$0xff]  ;;  %v4140_v51 = vsel %vm12018_vm7, %v4139_v21, %v4138_v50  ;;  %v12430_v62 = vld [vmem:[#allocation184_spill] sm:$0xff] }
 0x48c   : > { %v4637_v14 = vperm.slane %v2904_v53, %v7487_v63  ;;  %v4119_v7 = vsel %vm3800_vm12, %v4118_v42, %v4117_v34  ;;  %v2689_v27 = vmul.f32 %v7394_v57, %v12429_v5  ;;  %v746_v53 = vld [vmem:[%s5944_s24 + $0xa88] sm:$0xff]  ;;  %v2080_v19 = vsel %vm921_vm0, %v795_v20, 0.0 }
 0x48d   : > { %v8275_v59 = vsel %vm12018_vm7, %v4759_v49, %v8163_v2  ;;  %v8279_v52 = vsel %vm12017_vm9, %v4732_v17, %v8167_v3  ;;  %1931 = vadd.xlane.f32.xlu2 %v1930_v31  ;;  %2078 = vadd.xlane.f32.xlu1 %v2077_v35  ;;  %v8291_v2 = vsel %vm3804_vm13, %v4027_v48, %v4026_v54  ;;  %v12426_v3 = vld [vmem:[#allocation128_spill] sm:$0xff]  ;;  %v2266_v54 = vsel %vm921_vm0, %v857_v25, 0.0  ;;  %v12432_v34 = vld [vmem:[#allocation183_spill] sm:$0xff] }
 0x48e   : > { %v8288_v40 = vsel %vm12016_vm8, %v4637_v14, %v8177_v38  ;;  %2075 = vadd.xlane.f32.xlu0 %v2074_v11  ;;  %v8295_v28 = vmul.f32 %v7394_v57, %v12426_v3  ;;  %v8305_v38 = vmul.f32 %v7394_v57, %v12427_v41  ;;  %v2649_v48 = vmul.f32 %v7394_v57, %v12428_v61  ;;  %v12431_v42 = vld [vmem:[#allocation140_spill] sm:$0xff] }
 0x48f   : > { %v2690_v31 = vmul.f32 %v7394_v57, %v12430_v62  ;;  %v4141_v17 = vperm.slane %v2648_v23, %v7487_v63  ;;  %v8323_v14 = vmul.f32 %v7394_v57, %v12431_v42  ;;  %v1933_v30 = vsel %vm921_vm0, %v746_v53, 0.0  ;;  %v858_v42 = vld [vmem:[%s5944_s24 + $0xe08] sm:$0xff] }
 0x490   : > { %v2202_v33 = vpop.xlane.xlu2 %2201  ;;  %v2055_v9 = vpop.xlane.xlu1 %2054  ;;  %v4143_v3 = vperm.slane %v2649_v48, %v7459_v37  ;;  %v4221_v23 = vperm.slane %v2689_v27, %v7401_v8  ;;  %v2691_v41 = vmul.f32 %v7394_v57, %v12432_v34  ;;  %v12433_v48 = vld [vmem:[#allocation84_spill] sm:$0xff]  ;;  %v4121_v62 = vsel %vm3804_vm13, %v4120_v10, %v4119_v7  ;;  %v3165_v34 = vld [vmem:[%s11983_s2 + $0x5e0] sm:$0xff] }
 0x491   : > { %v2891_v35 = vmul.f32 %v7394_v57, %v2202_v33  ;;  %v2842_v32 = vmul.f32 %v7394_v57, %v2055_v9  ;;  %v2013_v49 = vpop.xlane.xlu0 %2012  ;;  %v4222_v20 = vperm.slane %v2690_v31, %v7412_v39  ;;  %v8344_v27 = vmul.f32 %v7394_v57, %v12433_v48  ;;  %v12434_v33 = vld [vmem:[#allocation85_spill] sm:$0xff]  ;;  %v12435_v31 = vld [vmem:[#allocation132_spill] sm:$0xff]  ;;  %4858 = vmatpush.msra.mxu2 %v3165_v34 }
 0x492   : > { %v2828_v11 = vmul.f32 %v7394_v57, %v2013_v49  ;;  %v8348_v9 = vmul.f32 %v7394_v57, %v12434_v33  ;;  %v4142_v53 = vsel %vm12016_vm8, %v4141_v17, %v4140_v51  ;;  %v796_v49 = vld [vmem:[%s5944_s24 + $0xc18] sm:$0xff]  ;;  %v4145_v51 = vperm.slane %v8323_v14, %v7511_v45 }
 0x493   : > { %v4612_v21 = vperm.slane %v2891_v35, %v12396_v44  ;;  %v4517_v50 = vperm.slane %v2842_v32, %v7511_v45  ;;  %v8360_v35 = vmul.f32 %v7394_v57, %v12435_v31  ;;  %v4124_v32 = vperm.slane %v8305_v38, %v7558_v36 }
 0x494   : > { %v4490_v25 = vperm.slane %v2828_v11, %v12420_v15  ;;  %v747_v11 = vld [vmem:[%s5944_s24 + $0xa90] sm:$0xff]  ;;  %v4224_v10 = vperm.slane %v2691_v41, %v7420_v24  ;;  %v4223_v38 = vsel %vm3760_vm2, %v4222_v20, %v4221_v23  ;;  %v2083_v33 = vsel %vm921_vm0, %v796_v49, 0.0 }
 0x495   : > { %v8336_v61 = vsel %vm3796_vm11, %v4612_v21, %v8222_v55  ;;  %v8340_v5 = vsel %vm3792_vm10, %v4517_v50, %v8226_v0  ;;  %2267 = vadd.xlane.f32.xlu2 %v2266_v54  ;;  %2081 = vadd.xlane.f32.xlu1 %v2080_v19  ;;  %v4122_v0 = vperm.slane %v8295_v28, %v12424_v16  ;;  %v12437_v54 = vld [vmem:[#allocation182_spill] sm:$0xff]  ;;  %v12439_v23 = vld [vmem:[#allocation144_spill] sm:$0xff] }
 0x496   : > { %v8353_v55 = vsel %vm3800_vm12, %v4490_v25, %v8235_v13  ;;  %1934 = vadd.xlane.f32.xlu0 %v1933_v30  ;;  %v12436_v13 = vld [vmem:[#allocation145_spill] sm:$0xff]  ;;  %v2692_v28 = vmul.f32 %v7394_v57, %v12437_v54  ;;  %v4144_v21 = vsel %vm12017_vm9, %v4143_v3, %v4142_v53  ;;  %v12438_v25 = vld [vmem:[#allocation187_spill] sm:$0xff]  ;;  %v1936_v3 = vsel %vm921_vm0, %v747_v11, 0.0 }
 0x497   : > { %v2651_v17 = vmul.f32 %v7394_v57, %v12436_v13  ;;  %v2693_v48 = vmul.f32 %v7394_v57, %v12438_v25  ;;  %v2652_v20 = vmul.f32 %v7394_v57, %v12439_v23  ;;  %v2269_v13 = vsel %vm921_vm0, %v858_v42, 0.0  ;;  %v3161_v54 = vld [vmem:[%s11983_s2 + $0x5c0] sm:$0xff]  ;;  %v859_v25 = vld [vmem:[%s5944_s24 + $0xe10] sm:$0xff] }
 0x498   : > { %v2433_v7 = vpop.xlane.xlu2 %2432  ;;  %v2391_v19 = vpop.xlane.xlu1 %2390  ;;  %v4226_v49 = vperm.slane %v2692_v28, %v7435_v26  ;;  %v4225_v11 = vsel %vm12021_vm3, %v4224_v10, %v4223_v38  ;;  %4859 = vmatpush.msra.mxu2 %v3161_v54  ;;  %v4123_v28 = vsel %vm3808_vm14, %v4122_v0, %v4121_v62  ;;  %v4126_v34 = vperm.slane %v8360_v35, %v7668_v6  ;;  %v12442_v35 = vld [vmem:[#allocation185_spill] sm:$0xff] }
 0x499   : > { %v2968_v50 = vmul.f32 %v7394_v57, %v2433_v7  ;;  %v2954_v30 = vmul.f32 %v7394_v57, %v2391_v19  ;;  %v2244_v14 = vpop.xlane.xlu0 %2243  ;;  %v4147_v7 = vperm.slane %v2651_v17, %v12396_v44  ;;  %v3157_v17 = vld [vmem:[%s11983_s2 + $0x5a0] sm:$0xff]  ;;  %v4228_v10 = vperm.slane %v2693_v48, %v7441_v18 }
 0x49a   : > { %v2905_v41 = vmul.f32 %v7394_v57, %v2244_v14  ;;  %v12440_v14 = vld [vmem:[#allocation186_spill] sm:$0xff]  ;;  %4860 = vmatpush.msra.mxu2 %v3157_v17  ;;  %v4125_v0 = vsel %vm3812_vm15, %v4124_v32, %v4123_v28  ;;  %v4146_v62 = vsel %vm3792_vm10, %v4145_v51, %v4144_v21  ;;  %v12441_v48 = vld [vmem:[#allocation143_spill] sm:$0xff]  ;;  %v4227_v23 = vsel %vm12020_vm4, %v4226_v49, %v4225_v11 }
 0x49b   : > { %v4761_v53 = vperm.slane %v2968_v50, %v7487_v63  ;;  %v4734_v31 = vperm.slane %v2954_v30, %v7511_v45  ;;  %v2694_v50 = vmul.f32 %v7394_v57, %v12440_v14  ;;  %v2695_v32 = vmul.f32 %v7394_v57, %v12442_v35  ;;  %v3229_v14 = vld [vmem:[%s11983_s2 + $0x7e0] sm:$0xff] }
 0x49c   : > { %v4639_v19 = vperm.slane %v2905_v41, %v7459_v37  ;;  %v2653_v41 = vmul.f32 %v7394_v57, %v12441_v48  ;;  %v2272_v11 = vsel %vm921_vm0, %v859_v25, 0.0  ;;  %4878 = vmatpush.msra.mxu3 %v3229_v14  ;;  %v4127_v25 = vsel %vm12006_vm1, %v4126_v34, %v4125_v0  ;;  %v3141_v0 = vld [vmem:[%s11983_s2 + $0x520] sm:$0xff] }
 0x49d   : > { %v8402_v42 = vsel %vm12016_vm8, %v4761_v53, %v8275_v59  ;;  %v8406_v30 = vsel %vm3792_vm10, %v4734_v31, %v8279_v52  ;;  %2084 = vadd.xlane.f32.xlu2 %v2083_v33  ;;  %1937 = vadd.xlane.f32.xlu1 %v1936_v3  ;;  %v3153_v59 = vld [vmem:[%s11983_s2 + $0x580] sm:$0xff]  ;;  %v4031_v52 = vperm.slane %v8348_v9, %v7558_v36  ;;  %vm4779_vm1 = vcmask 1041409  }
 0x49e   : > { %v8415_v38 = vsel %vm12017_vm9, %v4639_v19, %v8288_v40  ;;  %2270 = vadd.xlane.f32.xlu0 %v2269_v13  ;;  %v810_v40 = vld [vmem:[%s5944_s24 + $0xc88] sm:$0xff]  ;;  %v4149_v33 = vperm.slane %v2652_v20, %v12420_v15  ;;  %v4148_v3 = vsel %vm3796_vm11, %v4147_v7, %v4146_v62  ;;  %v809_v31 = vld [vmem:[%s5944_s24 + $0xc80] sm:$0xff]  ;;  %4861 = vmatpush.msra.mxu2 %v3153_v59 }
 0x49f   : > { %v4230_v51 = vperm.slane %v2694_v50, %v7452_v58  ;;  %v3149_v20 = vld [vmem:[%s11983_s2 + $0x560] sm:$0xff]  ;;  %v4229_v7 = vsel %vm12019_vm5, %v4228_v10, %v4227_v23  ;;  %v2125_v19 = vsel %vm921_vm0, %v810_v40, 0.0  ;;  %v2122_v10 = vsel %vm921_vm0, %v809_v31, 0.0 }
 0x4a0   : > { %v2205_v53 = vpop.xlane.xlu2 %2204  ;;  %v2058_v9 = vpop.xlane.xlu1 %2057  ;;  %4862 = vmatpush.msra.mxu2 %v3149_v20  ;;  %v12443_v50 = vld [vmem:[#allocation190_spill] sm:$0xff]  ;;  %v4151_v40 = vperm.slane %v2653_v41, %v12418_v60  ;;  %v4150_v48 = vsel %vm3800_vm12, %v4149_v33, %v4148_v3  ;;  %v12444_v33 = vld [vmem:[#allocation189_spill] sm:$0xff]  ;;  %v3166_v20 = vld [vmem:[%s11983_s2 + $0x5e8] sm:$0xff] }
 0x4a1   : > { %v2892_v21 = vmul.f32 %v7394_v57, %v2205_v53  ;;  %v2843_v13 = vmul.f32 %v7394_v57, %v2058_v9  ;;  %v2016_v54 = vpop.xlane.xlu0 %2015  ;;  %v2696_v17 = vmul.f32 %v7394_v57, %v12443_v50  ;;  %v3145_v62 = vld [vmem:[%s11983_s2 + $0x540] sm:$0xff]  ;;  %v4232_v9 = vperm.slane %v2695_v32, %v7478_v47 }
 0x4a2   : > { %v2829_v49 = vmul.f32 %v7394_v57, %v2016_v54  ;;  %4863 = vmatpush.msra.mxu2 %v3145_v62  ;;  %v3225_v53 = vld [vmem:[%s11983_s2 + $0x7c0] sm:$0xff]  ;;  %v4231_v41 = vsel %vm12007_vm6, %v4230_v51, %v4229_v7  ;;  %v8479_v3 = vmul.f32 %v7394_v57, %v12444_v33  ;;  %v4800_v32 = vsel %vm4779_vm1, %v8114_v43, %v8091_v1  ;;  %v748_v7 = vld [vmem:[%s5944_s24 + $0xa98] sm:$0xff] }
 0x4a3   : > { %v4614_v28 = vperm.slane %v2892_v21, %v12420_v15  ;;  %v4519_v59 = vperm.slane %v2843_v13, %v12396_v44  ;;  %4879 = vmatpush.msra.mxu3 %v3225_v53  ;;  %v3137_v35 = vld [vmem:[%s11983_s2 + $0x500] sm:$0xff]  ;;  %vm12008_vm6 = vcmask 1042434   ;;  %v4234_v51 = vperm.slane %v2696_v17, %v7487_v63  ;;  %v811_v21 = vld [vmem:[%s5944_s24 + $0xc90] sm:$0xff] }
 0x4a4   : > { %v4492_v23 = vperm.slane %v2829_v49, %v12418_v60  ;;  %v797_v13 = vld [vmem:[%s5944_s24 + $0xc20] sm:$0xff]  ;;  %4864 = vmatpush.msra.mxu2 %v3141_v0  ;;  %v8511_v43 = vsel %vm12008_vm6, %v4127_v25, %v4800_v32  ;;  %v8514_v29 = vsel %vm3804_vm13, %v4151_v40, %v4150_v48  ;;  %v12445_v49 = vld [vmem:[#allocation188_spill] sm:$0xff]  ;;  %v1939_v53 = vsel %vm921_vm0, %v748_v7, 0.0  ;;  %v12446_v0 = vld [vmem:[#allocation193_spill] sm:$0xff] }
 0x4a5   : > { %v8467_v31 = vsel %vm3800_vm12, %v4614_v28, %v8336_v61  ;;  %v8471_v34 = vsel %vm3796_vm11, %v4519_v59, %v8340_v5  ;;  %2273 = vadd.xlane.f32.xlu2 %v2272_v11  ;;  %2126 = vadd.xlane.f32.xlu1 %v2125_v19  ;;  %v3221_v5 = vld [vmem:[%s11983_s2 + $0x7a0] sm:$0xff]  ;;  %v8519_v11 = vmul.f32 %v7394_v57, %v12445_v49  ;;  %v2086_v62 = vsel %vm921_vm0, %v797_v13, 0.0 }
 0x4a6   : > { %v8483_v61 = vsel %vm3804_vm13, %v4492_v23, %v8353_v55  ;;  %2123 = vadd.xlane.f32.xlu0 %v2122_v10  ;;  %v4030_v55 = vsel %vm3808_vm14, %v4029_v22, %v8291_v2  ;;  %v3217_v54 = vld [vmem:[%s11983_s2 + $0x780] sm:$0xff]  ;;  %4880 = vmatpush.msra.mxu3 %v3221_v5  ;;  %v4233_v19 = vsel %vm12018_vm7, %v4232_v9, %v4231_v41  ;;  %v2128_v10 = vsel %vm921_vm0, %v811_v21, 0.0 }
 0x4a7   : > { %v8508_v1 = vsel %vm3812_vm15, %v4031_v52, %v4030_v55  ;;  %4865 = vmatpush.msra.mxu2 %v3137_v35  ;;  %v3133_v17 = vld [vmem:[%s11983_s2 + $0x4e0] sm:$0xff]  ;;  %v4236_v28 = vperm.slane %v8479_v3, %v7459_v37  ;;  %v4235_v40 = vsel %vm12016_vm8, %v4234_v51, %v4233_v19  ;;  %v2699_v41 = vmul.f32 %v7394_v57, %v12446_v0 }
 0x4a8   : > { %v2436_v22 = vpop.xlane.xlu2 %2435  ;;  %v2394_v2 = vpop.xlane.xlu1 %2393  ;;  %4881 = vmatpush.msra.mxu3 %v3217_v54  ;;  %v3213_v25 = vld [vmem:[%s11983_s2 + $0x760] sm:$0xff]  ;;  %vm12477_vm6 = vcmask 392512  }
 0x4a9   : > { %v2969_v14 = vmul.f32 %v7394_v57, %v2436_v22  ;;  %v2955_v52 = vmul.f32 %v7394_v57, %v2394_v2  ;;  %v2247_v50 = vpop.xlane.xlu0 %2246  ;;  %4866 = vmatpush.msra.mxu2 %v3133_v17  ;;  %v3129_v9 = vld [vmem:[%s11983_s2 + $0x4c0] sm:$0xff] }
 0x4aa   : > { %v2906_v59 = vmul.f32 %v7394_v57, %v2247_v50  ;;  %v12447_v33 = vld [vmem:[#allocation198_spill] sm:$0xff]  ;;  %v12448_v5 = vld [vmem:[#allocation199_spill] sm:$0xff]  ;;  %4882 = vmatpush.msra.mxu3 %v3213_v25  ;;  %v12457_v50 = vld [vmem:[#allocation148_spill] sm:$0xff] }
 0x4ab   : > { %v4763_v48 = vperm.slane %v2969_v14, %v7459_v37  ;;  %v4736_v23 = vperm.slane %v2955_v52, %v12396_v44  ;;  %v8546_v3 = vmul.f32 %v7394_v57, %v12447_v33  ;;  %v8550_v35 = vmul.f32 %v7394_v57, %v12448_v5  ;;  %v3209_v55 = vld [vmem:[%s11983_s2 + $0x740] sm:$0xff]  ;;  %4867 = vmatpush.msra.mxu2 %v3129_v9  ;;  %v12459_v9 = vld [vmem:[#allocation197_spill] sm:$0xff] }
 0x4ac   : > { %v4641_v32 = vperm.slane %v2906_v59, %v7511_v45  ;;  %v12449_v51 = vld [vmem:[#allocation246_spill] sm:$0xff]  ;;  %v12454_v49 = vld [vmem:[#allocation247_spill] sm:$0xff]  ;;  %v8588_v17 = vmul.f32 %v7394_v57, %v12457_v50  ;;  %v4238_v59 = vperm.slane %v8519_v11, %v7511_v45  ;;  %4883 = vmatpush.msra.mxu3 %v3209_v55  ;;  %v2707_v0 = vmul.f32 %v7394_v57, %v12459_v9  ;;  %v12460_v55 = vld [vmem:[#allocation245_spill] sm:$0xff] }
 0x4ad   : > { %v2754_v21 = vmul.f32 %v7394_v57, %v12449_v51  ;;  %v8560_v13 = vsel %vm12017_vm9, %v4763_v48, %v8402_v42  ;;  %v8564_v54 = vsel %vm3796_vm11, %v4736_v23, %v8406_v30  ;;  %2129 = vadd.xlane.f32.xlu2 %v2128_v10  ;;  %2087 = vadd.xlane.f32.xlu1 %v2086_v62  ;;  %v3125_v22 = vld [vmem:[%s11983_s2 + $0x4a0] sm:$0xff]  ;;  %v874_v10 = vld [vmem:[%s5944_s24 + $0xe88] sm:$0xff] }
 0x4ae   : > { %12450 = vst [vmem:[#allocation70_spill] sm:$0xff] %v8560_v13  ;;  %v12452_v2 = vld [vmem:[#allocation146_spill] sm:$0xff]  ;;  %v2753_v19 = vmul.f32 %v7394_v57, %v12454_v49  ;;  %v8577_v42 = vsel %vm3792_vm10, %v4641_v32, %v8415_v38  ;;  %1940 = vadd.xlane.f32.xlu0 %v1939_v53  ;;  %v12456_v14 = vld [vmem:[#allocation147_spill] sm:$0xff]  ;;  %v4237_v38 = vsel %vm12017_vm9, %v4236_v28, %v4235_v40  ;;  %v12458_v48 = vld [vmem:[#allocation192_spill] sm:$0xff] }
 0x4af   : > { %12451 = vst [vmem:[#allocation74_spill] sm:$0xff] %v8564_v54  ;;  %v8571_v7 = vmul.f32 %v7394_v57, %v12452_v2  ;;  %v3205_v30 = vld [vmem:[%s11983_s2 + $0x720] sm:$0xff]  ;;  %v8584_v52 = vmul.f32 %v7394_v57, %v12456_v14  ;;  %v2700_v23 = vmul.f32 %v7394_v57, %v12458_v48  ;;  %v4240_v53 = vperm.slane %v2699_v41, %v12396_v44  ;;  %v860_v40 = vld [vmem:[%s5944_s24 + $0xe18] sm:$0xff] }
 0x4b0   : > { %12455 = vst [vmem:[#allocation291_spill] sm:$0xff] %v8577_v42  ;;  %v873_v62 = vld [vmem:[%s5944_s24 + $0xe80] sm:$0xff]  ;;  %v4253_v11 = vperm.slane %v8546_v3, %v7412_v39  ;;  %v8605_v33 = vpop.xlane.xlu2 %2207  ;;  %v2061_v28 = vpop.xlane.xlu1 %2060  ;;  %4868 = vmatpush.msra.mxu2 %v3125_v22  ;;  %v4252_v32 = vperm.slane %v8550_v35, %v7401_v8  ;;  %v2755_v41 = vmul.f32 %v7394_v57, %v12460_v55  ;;  %v2317_v35 = vsel %vm921_vm0, %v874_v10, 0.0  ;;  %v12481_v42 = vld [vmem:[#allocation261_spill] sm:$0xff] }
 0x4b1   : > { %12453 = vst [vmem:[#allocation79_spill] sm:$0xff] %v8571_v7  ;;  %v3121_v25 = vld [vmem:[%s11983_s2 + $0x480] sm:$0xff]  ;;  %v4346_v51 = vperm.slane %v2754_v21, %v7412_v39  ;;  %v2844_v2 = vmul.f32 %v7394_v57, %v2061_v28  ;;  %v8617_v3 = vpop.xlane.xlu0 %2018  ;;  %4884 = vmatpush.msra.mxu3 %v3205_v30  ;;  %v4345_v49 = vperm.slane %v2753_v19, %v7401_v8  ;;  %v2314_v48 = vsel %vm921_vm0, %v873_v62, 0.0 }
 0x4b2   : > { %v3201_v5 = vld [vmem:[%s11983_s2 + $0x700] sm:$0xff]  ;;  %4869 = vmatpush.msra.mxu2 %v3121_v25  ;;  %v4239_v21 = vsel %vm3792_vm10, %v4238_v59, %v4237_v38  ;;  %v2275_v55 = vsel %vm921_vm0, %v860_v40, 0.0  ;;  %v4242_v62 = vperm.slane %v2700_v23, %v12420_v15  ;;  %v4255_v38 = vperm.slane %v2707_v0, %v7420_v24 }
 0x4b3   : > { %v3117_v22 = vld [vmem:[%s11983_s2 + $0x460] sm:$0xff]  ;;  %v4521_v30 = vperm.slane %v2844_v2, %v12420_v15  ;;  %4885 = vmatpush.msra.mxu3 %v3201_v5  ;;  %v4241_v59 = vsel %vm3796_vm11, %v4240_v53, %v4239_v21  ;;  %v4348_v40 = vperm.slane %v2755_v41, %v7420_v24  ;;  %v12464_v5 = vld [vmem:[#allocation249_spill] sm:$0xff]  ;;  %v4254_v53 = vsel %vm3760_vm2, %v4253_v11, %v4252_v32 }
 0x4b4   : > { %v12461_v14 = vld [vmem:[#allocation250_spill] sm:$0xff]  ;;  %4870 = vmatpush.msra.mxu2 %v3117_v22  ;;  %v2757_v2 = vmul.f32 %v7394_v57, %v12464_v5  ;;  %v4347_v0 = vsel %vm3760_vm2, %v4346_v51, %v4345_v49  ;;  %v798_v49 = vld [vmem:[%s5944_s24 + $0xc28] sm:$0xff]  ;;  %v4153_v21 = vperm.slane %v8588_v17, %v12424_v16  ;;  %v4256_v17 = vsel %vm12021_vm3, %v4255_v38, %v4254_v53 }
 0x4b5   : > { %v2756_v50 = vmul.f32 %v7394_v57, %v12461_v14  ;;  %v12462_v9 = vld [vmem:[#allocation202_spill] sm:$0xff]  ;;  %v12463_v14 = vld [vmem:[#allocation191_spill] sm:$0xff]  ;;  %2318 = vadd.xlane.f32.xlu2 %v2317_v35  ;;  %2315 = vadd.xlane.f32.xlu1 %v2314_v48  ;;  %v12466_v48 = vld [vmem:[#allocation201_spill] sm:$0xff]  ;;  %v2710_v38 = vmul.f32 %v7394_v57, %v12469_v12  ;;  %v2089_v53 = vsel %vm921_vm0, %v798_v49, 0.0 }
 0x4b6   : > { %v2708_v28 = vmul.f32 %v7394_v57, %v12462_v9  ;;  %v3197_v19 = vld [vmem:[%s11983_s2 + $0x6e0] sm:$0xff]  ;;  %v8637_v10 = vmul.f32 %v7394_v57, %v12463_v14  ;;  %v8650_v9 = vsel %vm3800_vm12, %v4521_v30, %v8471_v34  ;;  %2276 = vadd.xlane.f32.xlu0 %v2275_v55  ;;  %v2709_v11 = vmul.f32 %v7394_v57, %v12466_v48  ;;  %v812_v51 = vld [vmem:[%s5944_s24 + $0xc98] sm:$0xff] }
 0x4b7   : > { %v3113_v25 = vld [vmem:[%s11983_s2 + $0x440] sm:$0xff]  ;;  %12465 = vst [vmem:[#allocation292_spill] sm:$0xff] %v8650_v9  ;;  %v4350_v41 = vperm.slane %v2756_v50, %v7435_v26  ;;  %4886 = vmatpush.msra.mxu3 %v3197_v19  ;;  %v4243_v55 = vsel %vm3800_vm12, %v4242_v62, %v4241_v59  ;;  %v12467_v19 = vld [vmem:[#allocation248_spill] sm:$0xff]  ;;  %v4352_v22 = vperm.slane %v2757_v2, %v7441_v18  ;;  %v12468_v62 = vld [vmem:[#allocation253_spill] sm:$0xff] }
 0x4b8   : > { %v3193_v23 = vld [vmem:[%s11983_s2 + $0x6c0] sm:$0xff]  ;;  %v4257_v32 = vperm.slane %v2708_v28, %v7435_v26  ;;  %4871 = vmatpush.msra.mxu2 %v3113_v25  ;;  %v4244_v30 = vperm.slane %v8637_v10, %v12418_v60  ;;  %v2758_v14 = vmul.f32 %v7394_v57, %v12467_v19  ;;  %v8680_v5 = vpop.xlane.xlu2 %2438  ;;  %v8682_v28 = vpop.xlane.xlu1 %2396  ;;  %v4349_v10 = vsel %vm12021_vm3, %v4348_v40, %v4347_v0 }
 0x4b9   : > { %v3109_v34 = vld [vmem:[%s11983_s2 + $0x420] sm:$0xff]  ;;  %4887 = vmatpush.msra.mxu3 %v3193_v23  ;;  %v2759_v59 = vmul.f32 %v7394_v57, %v12468_v62  ;;  %v8693_v19 = vpop.xlane.xlu0 %2249  ;;  %v4351_v2 = vsel %vm12020_vm4, %v4350_v41, %v4349_v10  ;;  %v2131_v40 = vsel %vm921_vm0, %v812_v51, 0.0  ;;  %v4259_v62 = vperm.slane %v2709_v11, %v7441_v18  ;;  %v12471_v41 = vld [vmem:[#allocation205_spill] sm:$0xff]  ;;  %v3162_v11 = vld [vmem:[%s11983_s2 + $0x5c8] sm:$0xff] }
 0x4ba   : > { %v3189_v50 = vld [vmem:[%s11983_s2 + $0x6a0] sm:$0xff]  ;;  %4872 = vmatpush.msra.mxu2 %v3109_v34  ;;  %v4258_v35 = vsel %vm12020_vm4, %v4257_v32, %v4256_v17  ;;  %v2711_v51 = vmul.f32 %v7394_v57, %v12471_v41  ;;  %v4354_v49 = vperm.slane %v2758_v14, %v7452_v58  ;;  %v8726_v32 = vsel %vm3808_vm14, %v4153_v21, %v8514_v29  ;;  %v12473_v17 = vld [vmem:[#allocation196_spill] sm:$0xff] }
 0x4bb   : > { %v749_v25 = vld [vmem:[%s5944_s24 + $0xaa0] sm:$0xff]  ;;  %4888 = vmatpush.msra.mxu3 %v3189_v50  ;;  %v12472_v50 = vld [vmem:[#allocation252_spill] sm:$0xff]  ;;  %v4245_v14 = vsel %vm3804_vm13, %v4244_v30, %v4243_v55  ;;  %v4261_v29 = vperm.slane %v2710_v38, %v7452_v58  ;;  %v4260_v30 = vsel %vm12019_vm5, %v4259_v62, %v4258_v35 }
 0x4bc   : > { %v3105_v48 = vld [vmem:[%s11983_s2 + $0x400] sm:$0xff]  ;;  %v1942_v9 = vsel %vm921_vm0, %v749_v25, 0.0  ;;  %v2760_v10 = vmul.f32 %v7394_v57, %v12472_v50  ;;  %v4353_v25 = vsel %vm12019_vm5, %v4352_v22, %v4351_v2  ;;  %v3158_v22 = vld [vmem:[%s11983_s2 + $0x5a8] sm:$0xff] }
 0x4bd   : > { %v3185_v23 = vld [vmem:[%s11983_s2 + $0x680] sm:$0xff]  ;;  %4873 = vmatpush.msra.mxu2 %v3105_v48  ;;  %v4356_v48 = vperm.slane %v2759_v59, %v7478_v47  ;;  %2132 = vadd.xlane.f32.xlu2 %v2131_v40  ;;  %v12475_v55 = vld [vmem:[#allocation204_spill] sm:$0xff] }
 0x4be   : > { %v12470_v0 = vld [vmem:[#allocation194_spill] sm:$0xff]  ;;  %4889 = vmatpush.msra.mxu3 %v3185_v23  ;;  %2090 = vadd.xlane.f32.xlu1 %v2089_v53  ;;  %v2702_v23 = vmul.f32 %v7394_v57, %v12473_v17  ;;  %v12474_v59 = vld [vmem:[#allocation195_spill] sm:$0xff]  ;;  %v2712_v40 = vmul.f32 %v7394_v57, %v12475_v55  ;;  %v4358_v50 = vperm.slane %v2760_v10, %v7487_v63 }
 0x4bf   : > { %v8708_v34 = vmul.f32 %v7394_v57, %v12470_v0  ;;  %v3181_v12 = vld [vmem:[%s11983_s2 + $0x660] sm:$0xff]  ;;  %4938 = vmatpush.msrb.mxu2 %v3166_v20  ;;  %1943 = vadd.xlane.f32.xlu0 %v1942_v9  ;;  %v8744_v2 = vmul.f32 %v7394_v57, %v12474_v59  ;;  %v750_v38 = vld [vmem:[%s5944_s24 + $0xaa8] sm:$0xff]  ;;  %v875_v9 = vld [vmem:[%s5944_s24 + $0xe90] sm:$0xff]  ;;  %v4263_v0 = vperm.slane %v2711_v51, %v7478_v47 }
 0x4c0   : > { %v3177_v20 = vld [vmem:[%s11983_s2 + $0x640] sm:$0xff]  ;;  %4890 = vmatpush.msra.mxu3 %v3181_v12  ;;  %v4355_v17 = vsel %vm12477_vm6, %v4354_v49, %v4353_v25  ;;  %v8759_v35 = vpop.xlane.xlu2 %2210  ;;  %v8761_v62 = vpop.xlane.xlu1 %2063  ;;  %v12479_v51 = vld [vmem:[#allocation256_spill] sm:$0xff]  ;;  %v2769_v49 = vmul.f32 %v7394_v57, %v12481_v42  ;;  %v4246_v54 = vperm.slane %v2702_v23, %v12424_v16  ;;  %v4265_v42 = vperm.slane %v2712_v40, %v7487_v63 }
 0x4c1   : > { %4939 = vmatpush.msrb.mxu2 %v3162_v11  ;;  %v3173_v53 = vld [vmem:[%s11983_s2 + $0x620] sm:$0xff]  ;;  %12478 = vst [vmem:[#allocation69_spill] sm:$0xff] %v8761_v62  ;;  %v3154_v11 = vld [vmem:[%s11983_s2 + $0x588] sm:$0xff]  ;;  %v4357_v55 = vsel %vm12018_vm7, %v4356_v48, %v4355_v17  ;;  %v2762_v21 = vmul.f32 %v7394_v57, %v12479_v51  ;;  %v8774_v25 = vpop.xlane.xlu0 %2021  ;;  %v4262_v48 = vsel %vm12477_vm6, %v4261_v29, %v4260_v30  ;;  %v1945_v17 = vsel %vm921_vm0, %v750_v38, 0.0 }
 0x4c2   : > { %v12476_v12 = vld [vmem:[#allocation251_spill] sm:$0xff]  ;;  %4891 = vmatpush.msra.mxu3 %v3177_v20  ;;  %v2320_v51 = vsel %vm921_vm0, %v875_v9, 0.0  ;;  %v4264_v29 = vsel %vm12018_vm7, %v4263_v0, %v4262_v48  ;;  %v4359_v38 = vsel %vm12016_vm8, %v4358_v50, %v4357_v55  ;;  %v4376_v0 = vperm.slane %v2769_v49, %v7401_v8 }
 0x4c3   : > { %v2761_v41 = vmul.f32 %v7394_v57, %v12476_v12  ;;  %v861_v59 = vld [vmem:[%s5944_s24 + $0xe20] sm:$0xff]  ;;  %v12480_v12 = vld [vmem:[#allocation260_spill] sm:$0xff]  ;;  %4940 = vmatpush.msrb.mxu2 %v3158_v22  ;;  %v12483_v22 = vld [vmem:[#allocation265_spill] sm:$0xff]  ;;  %v4248_v50 = vperm.slane %v8744_v2, %v7558_v36  ;;  %v4247_v55 = vsel %vm3808_vm14, %v4246_v54, %v4245_v14  ;;  %v4266_v48 = vsel %vm12016_vm8, %v4265_v42, %v4264_v29 }
 0x4c4   : > { %v2770_v10 = vmul.f32 %v7394_v57, %v12480_v12  ;;  %v3169_v20 = vld [vmem:[%s11983_s2 + $0x600] sm:$0xff]  ;;  %4892 = vmatpush.msra.mxu3 %v3173_v53  ;;  %v2771_v62 = vmul.f32 %v7394_v57, %v12483_v22  ;;  %v2278_v7 = vsel %vm921_vm0, %v861_v59, 0.0  ;;  %v3150_v23 = vld [vmem:[%s11983_s2 + $0x568] sm:$0xff]  ;;  %v4362_v59 = vperm.slane %v2762_v21, %v7511_v45 }
 0x4c5   : > { %v12482_v12 = vld [vmem:[#allocation203_spill] sm:$0xff]  ;;  %4941 = vmatpush.msrb.mxu2 %v3154_v11  ;;  %v4360_v30 = vperm.slane %v2761_v41, %v7459_v37  ;;  %1946 = vadd.xlane.f32.xlu2 %v1945_v17  ;;  %v12486_v17 = vld [vmem:[#allocation208_spill] sm:$0xff]  ;;  %vm12498_vm6 = vcmask 1048512  }
 0x4c6   : > { %v8785_v13 = vmul.f32 %v7394_v57, %v12482_v12  ;;  %v12484_v9 = vld [vmem:[#allocation255_spill] sm:$0xff]  ;;  %4893 = vmatpush.msra.mxu3 %v3169_v20  ;;  %v4377_v11 = vperm.slane %v2770_v10, %v7412_v39  ;;  %2321 = vadd.xlane.f32.xlu1 %v2320_v51  ;;  %v12485_v20 = vld [vmem:[#allocation264_spill] sm:$0xff]  ;;  %v2714_v2 = vmul.f32 %v7394_v57, %v12486_v17  ;;  %v12487_v12 = vld [vmem:[#allocation206_spill] sm:$0xff] }
 0x4c7   : > { %v2763_v53 = vmul.f32 %v7394_v57, %v12484_v9  ;;  %v3230_v40 = vld [vmem:[%s11983_s2 + $0x7e8] sm:$0xff]  ;;  %v2772_v21 = vmul.f32 %v7394_v57, %v12485_v20  ;;  %2279 = vadd.xlane.f32.xlu0 %v2278_v7  ;;  %4942 = vmatpush.msrb.mxu2 %v3150_v23  ;;  %v4379_v54 = vperm.slane %v2771_v62, %v7420_v24  ;;  %v813_v51 = vld [vmem:[%s5944_s24 + $0xca0] sm:$0xff] }
 0x4c8   : > { %v3146_v41 = vld [vmem:[%s11983_s2 + $0x548] sm:$0xff]  ;;  %v4267_v49 = vperm.slane %v8785_v13, %v7459_v37  ;;  %4958 = vmatpush.msrb.mxu3 %v3230_v40  ;;  %v8829_v22 = vmul.f32 %v7394_v57, %v12487_v12  ;;  %v12488_v23 = vld [vmem:[#allocation254_spill] sm:$0xff]  ;;  %v4361_v29 = vsel %vm12017_vm9, %v4360_v30, %v4359_v38  ;;  %v8835_v9 = vpop.xlane.xlu2 %2441  ;;  %v8837_v62 = vpop.xlane.xlu1 %2399  ;;  %v799_v40 = vld [vmem:[%s5944_s24 + $0xc30] sm:$0xff] }
 0x4c9   : > { %v3226_v10 = vld [vmem:[%s11983_s2 + $0x7c8] sm:$0xff]  ;;  %v2764_v13 = vmul.f32 %v7394_v57, %v12488_v23  ;;  %v4364_v42 = vperm.slane %v2763_v53, %v12396_v44  ;;  %12489 = vst [vmem:[#allocation72_spill] sm:$0xff] %v8835_v9  ;;  %4943 = vmatpush.msrb.mxu2 %v3146_v41  ;;  %v4363_v17 = vsel %vm3792_vm10, %v4362_v59, %v4361_v29  ;;  %v8849_v38 = vpop.xlane.xlu0 %2252 }
 0x4ca   : > { %v862_v14 = vld [vmem:[%s5944_s24 + $0xe28] sm:$0xff]  ;;  %v4378_v23 = vsel %vm3760_vm2, %v4377_v11, %v4376_v0  ;;  %12492 = vst [vmem:[#allocation77_spill] sm:$0xff] %v8849_v38  ;;  %4959 = vmatpush.msrb.mxu3 %v3226_v10  ;;  %v4381_v8 = vperm.slane %v2772_v21, %v7435_v26  ;;  %v2092_v38 = vsel %vm921_vm0, %v799_v40, 0.0 }
 0x4cb   : > { %v3142_v7 = vld [vmem:[%s11983_s2 + $0x528] sm:$0xff]  ;;  %v2281_v29 = vsel %vm921_vm0, %v862_v14, 0.0  ;;  %v4380_v10 = vsel %vm12021_vm3, %v4379_v54, %v4378_v23  ;;  %v4366_v14 = vperm.slane %v2764_v13, %v12420_v15  ;;  %v4268_v13 = vsel %vm12017_vm9, %v4267_v49, %v4266_v48  ;;  %v800_v48 = vld [vmem:[%s5944_s24 + $0xc38] sm:$0xff] }
 0x4cc   : > { %v3222_v20 = vld [vmem:[%s11983_s2 + $0x7a8] sm:$0xff]  ;;  %4944 = vmatpush.msrb.mxu2 %v3142_v7  ;;  %v12495_v7 = vld [vmem:[#allocation258_spill] sm:$0xff]  ;;  %v12497_v23 = vperm.slane %v8708_v34, %v7668_v6 }
 0x4cd   : > { %v12490_v12 = vld [vmem:[#allocation259_spill] sm:$0xff]  ;;  %v12493_v9 = vld [vmem:[#allocation268_spill] sm:$0xff]  ;;  %4960 = vmatpush.msrb.mxu3 %v3222_v20  ;;  %2282 = vadd.xlane.f32.xlu2 %v2281_v29  ;;  %v12499_v29 = vld [vmem:[#allocation257_spill] sm:$0xff] }
 0x4ce   : > { %v2765_v24 = vmul.f32 %v7394_v57, %v12490_v12  ;;  %v12491_v53 = vld [vmem:[#allocation263_spill] sm:$0xff]  ;;  %v2774_v59 = vmul.f32 %v7394_v57, %v12493_v9  ;;  %v2134_v12 = vsel %vm921_vm0, %v813_v51, 0.0  ;;  %v4249_v9 = vsel %vm3812_vm15, %v4248_v50, %v4247_v55 }
 0x4cf   : > { %v2773_v30 = vmul.f32 %v7394_v57, %v12491_v53  ;;  %v3138_v41 = vld [vmem:[%s11983_s2 + $0x508] sm:$0xff]  ;;  %v4269_v53 = vperm.slane %v2714_v2, %v7511_v45  ;;  %v4365_v51 = vsel %vm3796_vm11, %v4364_v42, %v4363_v17  ;;  %2135 = vadd.xlane.f32.xlu1 %v2134_v12  ;;  %v4382_v42 = vsel %vm12020_vm4, %v4381_v8, %v4380_v10 }
 0x4d0   : > { %v12494_v11 = vld [vmem:[#allocation207_spill] sm:$0xff]  ;;  %4945 = vmatpush.msrb.mxu2 %v3138_v41  ;;  %v4368_v54 = vperm.slane %v2765_v24, %v12418_v60  ;;  %v4385_v17 = vperm.slane %v2774_v59, %v7452_v58  ;;  %2093 = vadd.xlane.f32.xlu0 %v2092_v38  ;;  %v4273_v41 = vperm.slane %v8829_v22, %v12420_v15  ;;  %v751_v38 = vld [vmem:[%s5944_s24 + $0xab0] sm:$0xff] }
 0x4d1   : > { %v2715_v0 = vmul.f32 %v7394_v57, %v12494_v11  ;;  %v3218_v21 = vld [vmem:[%s11983_s2 + $0x788] sm:$0xff]  ;;  %v2766_v11 = vmul.f32 %v7394_v57, %v12495_v7  ;;  %v4383_v40 = vperm.slane %v2773_v30, %v7441_v18  ;;  %v4251_v30 = vsel %vm12498_vm6, %v12497_v23, %v4249_v9  ;;  %v876_v9 = vld [vmem:[%s5944_s24 + $0xe98] sm:$0xff] }
 0x4d2   : > { %v3134_v2 = vld [vmem:[%s11983_s2 + $0x4e8] sm:$0xff]  ;;  %4961 = vmatpush.msrb.mxu3 %v3218_v21  ;;  %v4270_v8 = vsel %vm3792_vm10, %v4269_v53, %v4268_v13  ;;  %v2767_v12 = vmul.f32 %v7394_v57, %v12499_v29  ;;  %v4367_v10 = vsel %vm3800_vm12, %v4366_v14, %v4365_v51  ;;  %v12500_v21 = vld [vmem:[#allocation266_spill] sm:$0xff]  ;;  %v8909_v53 = vpop.xlane.xlu1 %2066  ;;  %v2025_v13 = vpop.xlane.xlu0 %2024  ;;  %vm12503_vm6 = vcmask 392512  }
 0x4d3   : > { %v12496_v20 = vld [vmem:[#allocation267_spill] sm:$0xff]  ;;  %v4271_v49 = vperm.slane %v2715_v0, %v12396_v44  ;;  %4946 = vmatpush.msrb.mxu2 %v3134_v2  ;;  %v4370_v34 = vperm.slane %v2766_v11, %v12424_v16  ;;  %v2776_v22 = vmul.f32 %v7394_v57, %v12500_v21  ;;  %v8907_v0 = vpop.xlane.xlu2 %2213  ;;  %v4369_v2 = vsel %vm3804_vm13, %v4368_v54, %v4367_v10 }
 0x4d4   : > { %v2775_v50 = vmul.f32 %v7394_v57, %v12496_v20  ;;  %v3214_v55 = vld [vmem:[%s11983_s2 + $0x768] sm:$0xff]  ;;  %v4384_v11 = vsel %vm12019_vm5, %v4383_v40, %v4382_v42  ;;  %v2095_v54 = vsel %vm921_vm0, %v800_v48, 0.0  ;;  %v12504_v42 = vld [vmem:[#allocation210_spill] sm:$0xff]  ;;  %v12506_v48 = vperm.slane %v8584_v52, %v7558_v36 }
 0x4d5   : > { %v3130_v24 = vld [vmem:[%s11983_s2 + $0x4c8] sm:$0xff]  ;;  %4962 = vmatpush.msrb.mxu3 %v3214_v55  ;;  %v12502_v55 = vld [vmem:[#allocation262_spill] sm:$0xff]  ;;  %v4386_v21 = vsel %vm12503_vm6, %v4385_v17, %v4384_v11  ;;  %v4272_v40 = vsel %vm3796_vm11, %v4271_v49, %v4270_v8  ;;  %v8931_v10 = vmul.f32 %v7394_v57, %v12504_v42  ;;  %v4372_v8 = vperm.slane %v2767_v12, %v7558_v36 }
 0x4d6   : > { %v3210_v59 = vld [vmem:[%s11983_s2 + $0x748] sm:$0xff]  ;;  %v4387_v20 = vperm.slane %v2775_v50, %v7478_v47  ;;  %4947 = vmatpush.msrb.mxu2 %v3130_v24  ;;  %v2768_v29 = vmul.f32 %v7394_v57, %v12502_v55  ;;  %v1948_v50 = vsel %vm921_vm0, %v751_v38, 0.0  ;;  %v2323_v47 = vsel %vm921_vm0, %v876_v9, 0.0  ;;  %2096 = vadd.xlane.f32.xlu2 %v2095_v54  ;;  %v863_v54 = vld [vmem:[%s5944_s24 + $0xe30] sm:$0xff] }
 0x4d7   : > { %v3126_v7 = vld [vmem:[%s11983_s2 + $0x4a8] sm:$0xff]  ;;  %4963 = vmatpush.msrb.mxu3 %v3210_v59  ;;  %v8946_v49 = vsel %vm3812_vm15, %v12506_v48, %v8726_v32  ;;  %v4389_v38 = vperm.slane %v2776_v22, %v7487_v63  ;;  %v12507_v59 = vld [vmem:[#allocation270_spill] sm:$0xff]  ;;  %vm4783_vm6 = vcmask 1043459   ;;  %1949 = vadd.xlane.f32.xlu1 %v1948_v50  ;;  %v4274_v22 = vsel %vm3800_vm12, %v4273_v41, %v4272_v40 }
 0x4d8   : > { %v12501_v14 = vld [vmem:[#allocation271_spill] sm:$0xff]  ;;  %4948 = vmatpush.msrb.mxu2 %v3126_v7  ;;  %v2778_v11 = vmul.f32 %v7394_v57, %v12507_v59  ;;  %v4371_v7 = vsel %vm3808_vm14, %v4370_v34, %v4369_v2  ;;  %v4388_v52 = vsel %vm12018_vm7, %v4387_v20, %v4386_v21  ;;  %2324 = vadd.xlane.f32.xlu0 %v2323_v47  ;;  %v12508_v20 = vld [vmem:[#allocation209_spill] sm:$0xff]  ;;  %vm12024_vm7 = vcmask 1045509  }
 0x4d9   : > { %v2777_v51 = vmul.f32 %v7394_v57, %v12501_v14  ;;  %v3206_v23 = vld [vmem:[%s11983_s2 + $0x728] sm:$0xff]  ;;  %v4802_v2 = vsel %vm4783_vm6, %v4251_v30, %v8511_v43  ;;  %v4277_v55 = vperm.slane %v8931_v10, %v12424_v16  ;;  %v12509_v47 = vld [vmem:[#allocation269_spill] sm:$0xff]  ;;  %v877_v21 = vld [vmem:[%s5944_s24 + $0xea0] sm:$0xff]  ;;  %v4373_v30 = vsel %vm3812_vm15, %v4372_v8, %v4371_v7 }
 0x4da   : > { %v12505_v24 = vld [vmem:[#allocation211_spill] sm:$0xff]  ;;  %4964 = vmatpush.msrb.mxu3 %v3206_v23  ;;  %v4374_v23 = vperm.slane %v2768_v29, %v7668_v6  ;;  %v2779_v29 = vmul.f32 %v7394_v57, %v12509_v47  ;;  %v4393_v50 = vperm.slane %v2778_v11, %v7511_v45  ;;  %v4390_v40 = vsel %vm12016_vm8, %v4389_v38, %v4388_v52  ;;  %v12510_v8 = vld [vmem:[#allocation274_spill] sm:$0xff]  ;;  %v12512_v47 = vld [vmem:[#allocation272_spill] sm:$0xff] }
 0x4db   : > { %v8935_v14 = vmul.f32 %v7394_v57, %v12505_v24  ;;  %v3122_v17 = vld [vmem:[%s11983_s2 + $0x488] sm:$0xff]  ;;  %v4391_v32 = vperm.slane %v2777_v51, %v7459_v37  ;;  %v8970_v51 = vmul.f32 %v7394_v57, %v12508_v20  ;;  %v2830_v42 = vmul.f32 %v7394_v57, %v8617_v3  ;;  %v8988_v24 = vpop.xlane.xlu2 %2444 }
 0x4dc   : > { %v3202_v9 = vld [vmem:[%s11983_s2 + $0x708] sm:$0xff]  ;;  %4949 = vmatpush.msrb.mxu2 %v3122_v17  ;;  %v2780_v11 = vmul.f32 %v7394_v57, %v12510_v8  ;;  %v2893_v38 = vmul.f32 %v7394_v57, %v8605_v33  ;;  %v2831_v3 = vmul.f32 %v7394_v57, %v8774_v25  ;;  %vm12511_vm8 = vcmask 1048512  }
 0x4dd   : > { %v3118_v12 = vld [vmem:[%s11983_s2 + $0x468] sm:$0xff]  ;;  %v4275_v41 = vperm.slane %v8935_v14, %v12418_v60  ;;  %4965 = vmatpush.msrb.mxu3 %v3202_v9  ;;  %v8990_v14 = vpop.xlane.xlu1 %2402  ;;  %v4392_v59 = vsel %vm12017_vm9, %v4391_v32, %v4390_v40  ;;  %v9003_v9 = vpop.xlane.xlu0 %2255  ;;  %v4375_v52 = vsel %vm12511_vm8, %v4374_v23, %v4373_v30  ;;  %v2832_v32 = vmul.f32 %v7394_v57, %v2025_v13 }
 0x4de   : > { %v3198_v34 = vld [vmem:[%s11983_s2 + $0x6e8] sm:$0xff]  ;;  %4950 = vmatpush.msrb.mxu2 %v3118_v12  ;;  %v2326_v12 = vsel %vm921_vm0, %v877_v21, 0.0  ;;  %v2284_v20 = vsel %vm921_vm0, %v863_v54, 0.0  ;;  %v4395_v33 = vperm.slane %v2779_v29, %v12396_v44  ;;  %v9015_v25 = vmul.f32 %v7394_v57, %v12512_v47  ;;  %v12513_v21 = vld [vmem:[#allocation273_spill] sm:$0xff] }
 0x4df   : > { %v3114_v43 = vld [vmem:[%s11983_s2 + $0x448] sm:$0xff]  ;;  %4966 = vmatpush.msrb.mxu3 %v3198_v34  ;;  %v2894_v34 = vmul.f32 %v7394_v57, %v8759_v35  ;;  %v4394_v23 = vsel %vm3792_vm10, %v4393_v50, %v4392_v59  ;;  %v2781_v54 = vmul.f32 %v7394_v57, %v12513_v21  ;;  %v4494_v29 = vperm.slane %v2830_v42, %v12424_v16 }
 0x4e0   : > { %v814_v17 = vld [vmem:[%s5944_s24 + $0xca8] sm:$0xff]  ;;  %4951 = vmatpush.msrb.mxu2 %v3114_v43  ;;  %v2895_v43 = vmul.f32 %v7394_v57, %v8907_v0  ;;  %v4397_v30 = vperm.slane %v2780_v11, %v12420_v15  ;;  %v4496_v50 = vperm.slane %v2831_v3, %v7558_v36  ;;  %2327 = vadd.xlane.f32.xlu2 %v2326_v12  ;;  %vm4785_vm8 = vcmask 1044484   ;;  %v801_v12 = vld [vmem:[%s5944_s24 + $0xc40] sm:$0xff] }
 0x4e1   : > { %v3194_v48 = vld [vmem:[%s11983_s2 + $0x6c8] sm:$0xff]  ;;  %v2137_v40 = vsel %vm921_vm0, %v814_v17, 0.0  ;;  %v4616_v17 = vperm.slane %v2893_v38, %v12418_v60  ;;  %2285 = vadd.xlane.f32.xlu1 %v2284_v20  ;;  %v4276_v0 = vsel %vm3804_vm13, %v4275_v41, %v4274_v22  ;;  %v4498_v8 = vperm.slane %v2832_v32, %v7668_v6  ;;  %v12515_v20 = vld [vmem:[#allocation277_spill] sm:$0xff] }
 0x4e2   : > { %v3110_v7 = vld [vmem:[%s11983_s2 + $0x428] sm:$0xff]  ;;  %4967 = vmatpush.msrb.mxu3 %v3194_v48  ;;  %v12514_v48 = vld [vmem:[#allocation214_spill] sm:$0xff]  ;;  %2138 = vadd.xlane.f32.xlu0 %v2137_v40  ;;  %v4401_v11 = vperm.slane %v9015_v25, %v12424_v16  ;;  %v4396_v38 = vsel %vm3796_vm11, %v4395_v33, %v4394_v23  ;;  %v4618_v3 = vperm.slane %v2894_v34, %v12424_v16  ;;  %vm12516_vm9 = vcmask 1048512  }
 0x4e3   : > { %v3190_v13 = vld [vmem:[%s11983_s2 + $0x6a8] sm:$0xff]  ;;  %4952 = vmatpush.msrb.mxu2 %v3110_v7  ;;  %v9041_v59 = vmul.f32 %v7394_v57, %v12514_v48  ;;  %v815_v7 = vld [vmem:[%s5944_s24 + $0xcb0] sm:$0xff]  ;;  %v4803_v22 = vsel %vm4785_vm8, %v4375_v52, %v4802_v2  ;;  %v4399_v32 = vperm.slane %v2781_v54, %v12418_v60  ;;  %v2783_v47 = vmul.f32 %v7394_v57, %v12515_v20  ;;  %v9060_v34 = vpop.xlane.xlu2 %2258  ;;  %vm12520_vm4 = vmmov %vm12516_vm9 }
 0x4e4   : > { %v3106_v35 = vld [vmem:[%s11983_s2 + $0x408] sm:$0xff]  ;;  %4968 = vmatpush.msrb.mxu3 %v3190_v13  ;;  %v4495_v25 = vsel %vm3808_vm14, %v4494_v29, %v8483_v61  ;;  %v4620_v33 = vperm.slane %v2895_v43, %v7558_v36  ;;  %v752_v13 = vld [vmem:[%s5944_s24 + $0xab8] sm:$0xff]  ;;  %v4398_v2 = vsel %vm3800_vm12, %v4397_v30, %v4396_v38  ;;  %v4617_v52 = vsel %vm3804_vm13, %v4616_v17, %v8467_v31  ;;  %vm12523_vm3 = vmmov %vm12520_vm4 }
 0x4e5   : > { %v3186_v42 = vld [vmem:[%s11983_s2 + $0x688] sm:$0xff]  ;;  %4953 = vmatpush.msrb.mxu2 %v3106_v35  ;;  %v2217_v40 = vpop.xlane.xlu1 %2216  ;;  %v4497_v23 = vsel %vm3812_vm15, %v4496_v50, %v4495_v25  ;;  %v9068_v54 = vpop.xlane.xlu0 %2069  ;;  %v2140_v43 = vsel %vm921_vm0, %v815_v7, 0.0  ;;  %v2098_v35 = vsel %vm921_vm0, %v801_v12, 0.0  ;;  %v4619_v31 = vsel %vm3808_vm14, %v4618_v3, %v4617_v52  ;;  %v753_v52 = vld [vmem:[%s5944_s24 + $0xac0] sm:$0xff] }
 0x4e6   : > { %v3182_v41 = vld [vmem:[%s11983_s2 + $0x668] sm:$0xff]  ;;  %4969 = vmatpush.msrb.mxu3 %v3186_v42  ;;  %v2896_v21 = vmul.f32 %v7394_v57, %v2217_v40  ;;  %v4499_v29 = vsel %vm12516_vm9, %v4498_v8, %v4497_v23  ;;  %v1951_v17 = vsel %vm921_vm0, %v752_v13, 0.0  ;;  %vm12023_vm5 = vcmask 1046534  }
 0x4e7   : > { %v3178_v61 = vld [vmem:[%s11983_s2 + $0x648] sm:$0xff]  ;;  %v4400_v42 = vsel %vm3804_vm13, %v4399_v32, %v4398_v2  ;;  %v4403_v38 = vperm.slane %v2783_v47, %v7558_v36  ;;  %v4621_v7 = vsel %vm3812_vm15, %v4620_v33, %v4619_v31  ;;  %v2970_v3 = vmul.f32 %v7394_v57, %v8680_v5  ;;  %v12524_v31 = vld [vmem:[#allocation69_spill] sm:$0xff] }
 0x4e8   : > { %4970 = vmatpush.msrb.mxu3 %v3182_v41  ;;  %v4622_v30 = vperm.slane %v2896_v21, %v7668_v6  ;;  %v3174_v50 = vld [vmem:[%s11983_s2 + $0x628] sm:$0xff]  ;;  %2141 = vadd.xlane.f32.xlu2 %v2140_v43  ;;  %v4804_v41 = vsel %vm12024_vm7, %v4499_v29, %v4803_v22  ;;  %v2956_v20 = vmul.f32 %v7394_v57, %v8682_v28  ;;  %v864_v29 = vld [vmem:[%s5944_s24 + $0xe38] sm:$0xff] }
 0x4e9   : > { %v12517_v48 = vld [vmem:[#allocation276_spill] sm:$0xff]  ;;  %2099 = vadd.xlane.f32.xlu1 %v2098_v35  ;;  %v2907_v47 = vmul.f32 %v7394_v57, %v8693_v19  ;;  %v3759_v25 = vperm.slane %v8084_v56, %v7412_v39  ;;  %v12518_v22 = vperm.slane %v7795_v4, %v7668_v6  ;;  %v12519_v28 = vperm.slane %v8344_v27, %v7668_v6  ;;  %v12521_v40 = vld [vmem:[#allocation79_spill] sm:$0xff] }
 0x4ea   : > { %v2784_v8 = vmul.f32 %v7394_v57, %v12517_v48  ;;  %4971 = vmatpush.msrb.mxu3 %v3178_v61  ;;  %v4623_v12 = vsel %vm12516_vm9, %v4622_v30, %v4621_v7  ;;  %v3170_v32 = vld [vmem:[%s11983_s2 + $0x608] sm:$0xff]  ;;  %1952 = vadd.xlane.f32.xlu0 %v1951_v17  ;;  %v12522_v13 = vperm.slane %v12521_v40, %v7668_v6  ;;  %v816_v40 = vld [vmem:[%s5944_s24 + $0xcb8] sm:$0xff] }
 0x4eb   : > { %v9099_v5 = vsel %vm12023_vm5, %v4623_v12, %v4804_v41  ;;  %v3910_v33 = vsel %vm12516_vm9, %v12518_v22, %v8106_v46  ;;  %v4034_v19 = vsel %vm12520_vm4, %v12519_v28, %v8508_v1  ;;  %v878_v23 = vld [vmem:[%s5944_s24 + $0xea8] sm:$0xff]  ;;  %v4279_v21 = vperm.slane %v8970_v51, %v7558_v36  ;;  %v2073_v1 = vpop.xlane.xlu2 %2072  ;;  %vm12528_vm9 = vmmov %vm12520_vm4 }
 0x4ec   : > { %4972 = vmatpush.msrb.mxu3 %v3174_v50  ;;  %v4158_v2 = vsel %vm12523_vm3, %v12522_v13, %v8946_v49  ;;  %v4278_v4 = vsel %vm3808_vm14, %v4277_v55, %v4276_v0  ;;  %v4402_v46 = vsel %vm3808_vm14, %v4401_v11, %v4400_v42  ;;  %v2957_v27 = vmul.f32 %v7394_v57, %v8837_v62  ;;  %v12525_v17 = vld [vmem:[#allocation72_spill] sm:$0xff]  ;;  %v12531_v13 = vld [vmem:[#allocation291_spill] sm:$0xff] }
 0x4ed   : > { %v2448_v61 = vpop.xlane.xlu1 %2447  ;;  %v4281_v49 = vperm.slane %v9041_v59, %v7668_v6  ;;  %v4405_v43 = vperm.slane %v2784_v8, %v7668_v6  ;;  %v4404_v51 = vsel %vm3812_vm15, %v4403_v38, %v4402_v46  ;;  %v4765_v10 = vperm.slane %v2970_v3, %v7511_v45  ;;  %v2406_v35 = vpop.xlane.xlu0 %2405  ;;  %v12526_v38 = vld [vmem:[#allocation77_spill] sm:$0xff] }
 0x4ee   : > { %4973 = vmatpush.msrb.mxu3 %v3170_v32  ;;  %v4738_v55 = vperm.slane %v2956_v20, %v12420_v15  ;;  %v4643_v0 = vperm.slane %v2907_v47, %v12396_v44  ;;  %v1954_v62 = vsel %vm921_vm0, %v753_v52, 0.0  ;;  %v2329_v11 = vsel %vm921_vm0, %v878_v23, 0.0  ;;  %v12529_v47 = vld [vmem:[#allocation70_spill] sm:$0xff] }
 0x4ef   : > { %v2845_v30 = vmul.f32 %v7394_v57, %v12524_v31  ;;  %v2971_v59 = vmul.f32 %v7394_v57, %v12525_v17  ;;  %v2958_v50 = vmul.f32 %v7394_v57, %v8990_v14  ;;  %v2287_v42 = vsel %vm921_vm0, %v864_v29, 0.0 }
 0x4f0   : > { %v4807_v48 = vsel %vm4779_vm1, %v4034_v19, %v3910_v33  ;;  %v4740_v8 = vperm.slane %v2957_v27, %v12418_v60  ;;  %v2908_v7 = vmul.f32 %v7394_v57, %v12526_v38  ;;  %v2959_v3 = vmul.f32 %v7394_v57, %v2406_v35  ;;  %1955 = vadd.xlane.f32.xlu2 %v1954_v62  ;;  %v12530_v33 = vld [vmem:[#allocation74_spill] sm:$0xff] }
 0x4f1   : > { %v4280_v12 = vsel %vm3812_vm15, %v4279_v21, %v4278_v4  ;;  %vm12527_vm3 = vcmask 1042434   ;;  %v2846_v14 = vmul.f32 %v7394_v57, %v8909_v53  ;;  %2330 = vadd.xlane.f32.xlu1 %v2329_v11  ;;  %v9161_v20 = vsel %vm12528_vm9, %v4405_v43, %v4404_v51  ;;  %v865_v19 = vld [vmem:[%s5944_s24 + $0xe40] sm:$0xff]  ;;  %v802_v21 = vld [vmem:[%s5944_s24 + $0xc48] sm:$0xff]  ;;  %vm12533_vm9 = vmmov %vm12520_vm4 }
 0x4f2   : > { %v9153_v41 = vsel %vm12527_vm3, %v4158_v2, %v4807_v48  ;;  %v9158_v32 = vsel %vm12520_vm4, %v4281_v49, %v4280_v12  ;;  %v4766_v22 = vsel %vm3792_vm10, %v4765_v10, %v12529_v47  ;;  %v4739_v28 = vsel %vm3800_vm12, %v4738_v55, %v12530_v33  ;;  %2288 = vadd.xlane.f32.xlu0 %v2287_v42  ;;  %v12532_v48 = vld [vmem:[#allocation292_spill] sm:$0xff] }
 0x4f3   : > { %v4644_v53 = vsel %vm3796_vm11, %v4643_v0, %v12531_v13  ;;  %v4523_v2 = vperm.slane %v2845_v30, %v12418_v60  ;;  %v4767_v52 = vperm.slane %v2971_v59, %v12396_v44  ;;  %v4742_v23 = vperm.slane %v2958_v50, %v12424_v16  ;;  %v2451_v49 = vpop.xlane.xlu2 %2450  ;;  %v754_v47 = vld [vmem:[%s5944_s24 + $0xac8] sm:$0xff]  ;;  %v879_v13 = vld [vmem:[%s5944_s24 + $0xeb0] sm:$0xff] }
 0x4f4   : > { %v4741_v4 = vsel %vm3804_vm13, %v4740_v8, %v4739_v28  ;;  %v4645_v46 = vperm.slane %v2908_v7, %v12420_v15  ;;  %v2972_v27 = vmul.f32 %v7394_v57, %v8988_v24  ;;  %v4744_v29 = vperm.slane %v2959_v3, %v7558_v36  ;;  %v803_v7 = vld [vmem:[%s5944_s24 + $0xc50] sm:$0xff] }
 0x4f5   : > { %v2409_v43 = vpop.xlane.xlu1 %2408  ;;  %v4525_v51 = vperm.slane %v2846_v14, %v12424_v16  ;;  %v2262_v35 = vpop.xlane.xlu0 %2261  ;;  %v2290_v55 = vsel %vm921_vm0, %v865_v19, 0.0  ;;  %v2143_v0 = vsel %vm921_vm0, %v816_v40, 0.0  ;;  %v2909_v62 = vmul.f32 %v7394_v57, %v9003_v9 }
 0x4f6   : > { %v2960_v10 = vmul.f32 %v7394_v57, %v2409_v43  ;;  %v2847_v11 = vmul.f32 %v7394_v57, %v9068_v54  ;;  %v2101_v24 = vsel %vm921_vm0, %v802_v21, 0.0  ;;  %vm12022_vm3 = vcmask 1047559  }
 0x4f7   : > { %v4743_v31 = vsel %vm3808_vm14, %v4742_v23, %v4741_v4  ;;  %v2848_v30 = vmul.f32 %v7394_v57, %v2073_v1  ;;  %v2973_v17 = vmul.f32 %v7394_v57, %v2448_v61  ;;  %v4769_v50 = vperm.slane %v2972_v27, %v12420_v15  ;;  %v3167_v61 = vld [vmem:[%s11983_s2 + $0x5f0] sm:$0xff] }
 0x4f8   : > { %v4746_v59 = vperm.slane %v2960_v10, %v7668_v6  ;;  %v2910_v9 = vmul.f32 %v7394_v57, %v9060_v34  ;;  %v4745_v54 = vsel %vm3812_vm15, %v4744_v29, %v4743_v31  ;;  %v2974_v42 = vmul.f32 %v7394_v57, %v2451_v49  ;;  %2291 = vadd.xlane.f32.xlu2 %v2290_v55  ;;  %v3159_v49 = vld [vmem:[%s11983_s2 + $0x5b0] sm:$0xff] }
 0x4f9   : > { %v4524_v8 = vsel %vm3804_vm13, %v4523_v2, %v12532_v48  ;;  %v2911_v38 = vmul.f32 %v7394_v57, %v2262_v35  ;;  %2144 = vadd.xlane.f32.xlu1 %v2143_v0  ;;  %v4768_v34 = vsel %vm3796_vm11, %v4767_v52, %v4766_v22  ;;  %v4647_v3 = vperm.slane %v2909_v62, %v12418_v60  ;;  %v3163_v22 = vld [vmem:[%s11983_s2 + $0x5d0] sm:$0xff] }
 0x4fa   : > { %v4747_v1 = vsel %vm12520_vm4, %v4746_v59, %v4745_v54  ;;  %v4527_v12 = vperm.slane %v2847_v11, %v7558_v36  ;;  %2102 = vadd.xlane.f32.xlu0 %v2101_v24  ;;  %v4646_v33 = vsel %vm3800_vm12, %v4645_v46, %v4644_v53  ;;  %v4526_v28 = vsel %vm3808_vm14, %v4525_v51, %v4524_v8  ;;  %v3155_v31 = vld [vmem:[%s11983_s2 + $0x590] sm:$0xff] }
 0x4fb   : > { %v9211_v14 = vsel %vm12022_vm3, %v4747_v1, %v9099_v5  ;;  %v4529_v19 = vperm.slane %v2848_v30, %v7668_v6  ;;  %v4771_v40 = vperm.slane %v2973_v17, %v12418_v60  ;;  %v4770_v2 = vsel %vm3800_vm12, %v4769_v50, %v4768_v34  ;;  %v2457_v53 = vpop.xlane.xlu2 %2456  ;;  %v12535_v1 = vld [vmem:[#allocation312_spill] sm:$0xff] }
 0x4fc   : > { %4874 = vmatmul.f32.vlgmr.msra.gmra.mxu2 %v9211_v14  ;;  %v4649_v5 = vperm.slane %v2910_v9, %v12424_v16  ;;  %v4773_v52 = vperm.slane %v2974_v42, %v12424_v16  ;;  %v2104_v21 = vsel %vm921_vm0, %v803_v7, 0.0  ;;  %v4651_v4 = vperm.slane %v2911_v38, %v7558_v36  ;;  %v3151_v42 = vld [vmem:[%s11983_s2 + $0x570] sm:$0xff] }
 0x4fd   : > { %5018 = vmatpush.msra.mxu2 %v3167_v61  ;;  %v2454_v23 = vpop.xlane.xlu1 %2453  ;;  %v2976_v46 = vmul.f32 %v7394_v57, %v2457_v53  ;;  %v2265_v29 = vpop.xlane.xlu0 %2264  ;;  %v1957_v43 = vsel %vm921_vm0, %v754_v47, 0.0  ;;  %v4648_v51 = vsel %vm3804_vm13, %v4647_v3, %v4646_v33  ;;  %v4528_v10 = vsel %vm3812_vm15, %v4527_v12, %v4526_v28  ;;  %v3231_v38 = vld [vmem:[%s11983_s2 + $0x7f0] sm:$0xff]  ;;  %v12536_v61 = vld [vmem:[#allocation298_spill] sm:$0xff]  ;;  %v866_v47 = vld [vmem:[%s5944_s24 + $0xe48] sm:$0xff] }
 0x4fe   : > { %v2975_v27 = vmul.f32 %v7394_v57, %v2454_v23  ;;  %v2912_v35 = vmul.f32 %v7394_v57, %v2265_v29  ;;  %v2332_v55 = vsel %vm921_vm0, %v879_v13, 0.0  ;;  %v4530_v0 = vsel %vm12533_vm9, %v4529_v19, %v4528_v10  ;;  %vm12534_vm9 = vmmov %vm12520_vm4  ;;  %v3147_v3 = vld [vmem:[%s11983_s2 + $0x550] sm:$0xff]  ;;  %v880_v12 = vld [vmem:[%s5944_s24 + $0xeb8] sm:$0xff] }
 0x4ff   : > { %5019 = vmatpush.msra.mxu2 %v3163_v22  ;;  %v4772_v62 = vsel %vm3804_vm13, %v4771_v40, %v4770_v2  ;;  %v4777_v11 = vperm.slane %v2976_v46, %v7668_v6  ;;  %v4809_v30 = vsel %vm4783_vm6, %v9158_v32, %v9153_v41  ;;  %v4650_v17 = vsel %vm3808_vm14, %v4649_v5, %v4648_v51  ;;  %v12538_v33 = vld [vmem:[#allocation300_spill] sm:$0xff]  ;;  %v12539_v28 = vld [vmem:[#allocation311_spill] sm:$0xff]  ;;  %v12540_v13 = vld [vmem:[#allocation34_spill] sm:$0xff] }
 0x500   : > { %v4775_v24 = vperm.slane %v2975_v27, %v7558_v36  ;;  %v4774_v59 = vsel %vm3808_vm14, %v4773_v52, %v4772_v62  ;;  %v4653_v50 = vperm.slane %v2912_v35, %v7668_v6  ;;  %v4652_v9 = vsel %vm3812_vm15, %v4651_v4, %v4650_v17  ;;  %2105 = vadd.xlane.f32.xlu2 %v2104_v21  ;;  %v3227_v53 = vld [vmem:[%s11983_s2 + $0x7d0] sm:$0xff]  ;;  %v12542_v29 = vld [vmem:[#allocation3_spill] sm:$0xff] }
 0x501   : > { %5020 = vmatpush.msra.mxu2 %v3159_v49  ;;  %1958 = vadd.xlane.f32.xlu1 %v1957_v43  ;;  %v4810_v41 = vsel %vm4785_vm8, %v9161_v20, %v4809_v30  ;;  %v12537_v7 = vperm.slane %v12535_v1, %v12536_v61  ;;  %v3763_v19 = vperm.slane %v12539_v28, %v12538_v33  ;;  %v3143_v23 = vld [vmem:[%s11983_s2 + $0x530] sm:$0xff]  ;;  %v2335_v46 = vsel %vm921_vm0, %v880_v12, 0.0  ;;  %v12548_v28 = vld [vmem:[#allocation306_spill] sm:$0xff] }
 0x502   : > { %v4776_v54 = vsel %vm3812_vm15, %v4775_v24, %v4774_v59  ;;  %v4654_v32 = vsel %vm12520_vm4, %v4653_v50, %v4652_v9  ;;  %2333 = vadd.xlane.f32.xlu0 %v2332_v55  ;;  %v4811_v8 = vsel %vm12024_vm7, %v4530_v0, %v4810_v41  ;;  %v3767_v2 = vperm.slane %v12540_v13, %v7435_v26  ;;  %v3223_v51 = vld [vmem:[%s11983_s2 + $0x7b0] sm:$0xff] }
 0x503   : > { %5021 = vmatpush.msra.mxu2 %v3155_v31  ;;  %v4778_v48 = vsel %vm12534_vm9, %v4777_v11, %v4776_v54  ;;  %v3761_v20 = vsel %vm3760_vm2, %v3759_v25, %v12537_v7  ;;  %v4812_v34 = vsel %vm12023_vm5, %v4654_v32, %v4811_v8  ;;  %v1932_v40 = vpop.xlane.xlu2 %1931  ;;  %v817_v25 = vld [vmem:[%s5944_s24 + $0xcc0] sm:$0xff]  ;;  %vm12541_vm4 = vcmask 195712   ;;  %v12543_v35 = vld [vmem:[#allocation4_spill] sm:$0xff]  ;;  %v12545_v31 = vld [vmem:[#allocation9_spill] sm:$0xff] }
 0x504   : > { %4954 = vmatmul.f32.vlgmr.msrb.gmra.mxu2 %v9211_v14  ;;  %v9281_v56 = vsel %vm12022_vm3, %v4778_v48, %v4812_v34  ;;  %v3765_v21 = vsel %vm12541_vm4, %v3763_v19, %v3761_v20  ;;  %v2293_v27 = vsel %vm921_vm0, %v866_v47, 0.0  ;;  %v2469_v49 = vmul.f32 %v7394_v57, %v12542_v29  ;;  %v3139_v62 = vld [vmem:[%s11983_s2 + $0x510] sm:$0xff] }
 0x505   : > { %5022 = vmatpush.msra.mxu2 %v3151_v42  ;;  %v2079_v22 = vpop.xlane.xlu1 %2078  ;;  %4894 = vmatmul.f32.vlgmr.msra.gmra.mxu3 %v9281_v56  ;;  %v2076_v52 = vpop.xlane.xlu0 %2075  ;;  %v2146_v10 = vsel %vm921_vm0, %v817_v25, 0.0  ;;  %v2470_v55 = vmul.f32 %v7394_v57, %v12543_v35  ;;  %vm12544_vm9 = vcmask 261312   ;;  %v3219_v24 = vld [vmem:[%s11983_s2 + $0x790] sm:$0xff]  ;;  %v2471_v30 = vmul.f32 %v7394_v57, %v12545_v31  ;;  %v818_v42 = vld [vmem:[%s5944_s24 + $0xcc8] sm:$0xff] }
 0x506   : > { %v2850_v5 = vmul.f32 %v7394_v57, %v2079_v22  ;;  %5038 = vmatpush.msra.mxu3 %v3231_v38  ;;  %v2849_v4 = vmul.f32 %v7394_v57, %v2076_v52  ;;  %v3769_v11 = vsel %vm12544_vm9, %v3767_v2, %v3765_v21  ;;  %v2801_v17 = vmul.f32 %v7394_v57, %v1932_v40  ;;  %v3135_v50 = vld [vmem:[%s11983_s2 + $0x4f0] sm:$0xff]  ;;  %v804_v38 = vld [vmem:[%s5944_s24 + $0xc58] sm:$0xff] }
 0x507   : > { %5023 = vmatpush.msra.mxu2 %v3147_v3  ;;  %v3771_v9 = vperm.slane %v2469_v49, %v7441_v18  ;;  %v3215_v54 = vld [vmem:[%s11983_s2 + $0x770] sm:$0xff]  ;;  %v3775_v41 = vperm.slane %v2470_v55, %v7452_v58  ;;  %vm12547_vm4 = vcmask 326912   ;;  %v3779_v19 = vperm.slane %v2471_v30, %v12548_v28 }
 0x508   : > { %v4532_v43 = vperm.slane %v2850_v5, %v7412_v39  ;;  %v4531_v0 = vperm.slane %v2849_v4, %v12536_v61  ;;  %5039 = vmatpush.msra.mxu3 %v3227_v53  ;;  %2336 = vadd.xlane.f32.xlu2 %v2335_v46  ;;  %v3131_v8 = vld [vmem:[%s11983_s2 + $0x4d0] sm:$0xff]  ;;  %v4438_v40 = vperm.slane %v2801_v17, %v12536_v61  ;;  %v2149_v13 = vsel %vm921_vm0, %v818_v42, 0.0  ;;  %v12549_v53 = vld [vmem:[#allocation7_spill] sm:$0xff] }
 0x509   : > { %5024 = vmatpush.msra.mxu2 %v3143_v23  ;;  %2294 = vadd.xlane.f32.xlu1 %v2293_v27  ;;  %v12546_v1 = vld [vmem:[#allocation8_spill] sm:$0xff]  ;;  %v3773_v20 = vsel %vm12547_vm4, %v3771_v9, %v3769_v11  ;;  %v2107_v52 = vsel %vm921_vm0, %v804_v38, 0.0  ;;  %v2473_v23 = vmul.f32 %v7394_v57, %v12549_v53  ;;  %vm12550_vm9 = vcmask 392512  }
 0x50a   : > { %v4533_v59 = vsel %vm3760_vm2, %v4532_v43, %v4531_v0  ;;  %5040 = vmatpush.msra.mxu3 %v3223_v51  ;;  %2147 = vadd.xlane.f32.xlu0 %v2146_v10  ;;  %v2472_v7 = vmul.f32 %v7394_v57, %v12546_v1  ;;  %v3211_v12 = vld [vmem:[%s11983_s2 + $0x750] sm:$0xff]  ;;  %v3777_v29 = vsel %vm12550_vm9, %v3775_v41, %v3773_v20  ;;  %vm12551_vm4 = vcmask 195712  }
 0x50b   : > { %5025 = vmatpush.msra.mxu2 %v3139_v62  ;;  %v2268_v32 = vpop.xlane.xlu2 %2267  ;;  %v755_v47 = vld [vmem:[%s5944_s24 + $0xad0] sm:$0xff]  ;;  %vm12552_vm3 = vcmask 458112   ;;  %vm12557_vm9 = vcmask 261312   ;;  %vm12617_vm5 = vcmask 458112   ;;  %vm12633_vm7 = vcmask 261312  }
 0x50c   : > { %5041 = vmatpush.msra.mxu3 %v3219_v24  ;;  %v3127_v25 = vld [vmem:[%s11983_s2 + $0x4b0] sm:$0xff]  ;;  %v1960_v4 = vsel %vm921_vm0, %v755_v47, 0.0  ;;  %v3783_v27 = vperm.slane %v2472_v7, %v7487_v63  ;;  %v3781_v51 = vsel %vm12552_vm3, %v3779_v19, %v3777_v29  ;;  %v2913_v10 = vmul.f32 %v7394_v57, %v2268_v32  ;;  %v742_v24 = vld [vmem:[%s5944_s24 + $0xa68] sm:$0xff] }
 0x50d   : > { %v2082_v48 = vpop.xlane.xlu1 %2081  ;;  %5026 = vmatpush.msra.mxu2 %v3135_v50  ;;  %4974 = vmatmul.f32.vlgmr.msrb.gmra.mxu3 %v9281_v56  ;;  %v1935_v3 = vpop.xlane.xlu0 %1934  ;;  %v3207_v5 = vld [vmem:[%s11983_s2 + $0x730] sm:$0xff]  ;;  %v3787_v50 = vperm.slane %v2473_v23, %v7459_v37  ;;  %vm12554_vm3 = vcmask 523712  }
 0x50e   : > { %v2851_v34 = vmul.f32 %v7394_v57, %v2082_v48  ;;  %5042 = vmatpush.msra.mxu3 %v3215_v54  ;;  %v2802_v22 = vmul.f32 %v7394_v57, %v1935_v3  ;;  %v3123_v46 = vld [vmem:[%s11983_s2 + $0x490] sm:$0xff]  ;;  %v3785_v9 = vsel %vm12554_vm3, %v3783_v27, %v3781_v51  ;;  %v4655_v1 = vperm.slane %v2913_v10, %v12536_v61  ;;  %v3168_v27 = vld [vmem:[%s11983_s2 + $0x5f8] sm:$0xff] }
 0x50f   : > { %5027 = vmatpush.msra.mxu2 %v3131_v8  ;;  %v3203_v43 = vld [vmem:[%s11983_s2 + $0x710] sm:$0xff]  ;;  %v12555_v8 = vld [vmem:[#allocation11_spill] sm:$0xff]  ;;  %vm12558_vm3 = vcmask 589312  }
 0x510   : > { %v4534_v2 = vperm.slane %v2851_v34, %v12538_v33  ;;  %v4439_v21 = vperm.slane %v2802_v22, %v7412_v39  ;;  %5043 = vmatpush.msra.mxu3 %v3211_v12  ;;  %2150 = vadd.xlane.f32.xlu2 %v2149_v13  ;;  %v3119_v55 = vld [vmem:[%s11983_s2 + $0x470] sm:$0xff]  ;;  %v2475_v38 = vmul.f32 %v7394_v57, %v12555_v8  ;;  %v1921_v34 = vsel %vm921_vm0, %v742_v24, 0.0  ;;  %v805_v24 = vld [vmem:[%s5944_s24 + $0xc60] sm:$0xff] }
 0x511   : > { %5028 = vmatpush.msra.mxu2 %v3127_v25  ;;  %2108 = vadd.xlane.f32.xlu1 %v2107_v52  ;;  %v12553_v0 = vld [vmem:[#allocation12_spill] sm:$0xff] }
 0x512   : > { %v4535_v49 = vsel %vm12551_vm4, %v4534_v2, %v4533_v59  ;;  %v4440_v35 = vsel %vm3760_vm2, %v4439_v21, %v4438_v40  ;;  %5044 = vmatpush.msra.mxu3 %v3207_v5  ;;  %v2474_v62 = vmul.f32 %v7394_v57, %v12553_v0  ;;  %1961 = vadd.xlane.f32.xlu0 %v1960_v4  ;;  %v3199_v11 = vld [vmem:[%s11983_s2 + $0x6f0] sm:$0xff]  ;;  %v881_v59 = vld [vmem:[%s5944_s24 + $0xec0] sm:$0xff] }
 0x513   : > { %5029 = vmatpush.msra.mxu2 %v3123_v46  ;;  %v2085_v31 = vpop.xlane.xlu2 %2084  ;;  %v3115_v17 = vld [vmem:[%s11983_s2 + $0x450] sm:$0xff]  ;;  %v2338_v40 = vsel %vm921_vm0, %v881_v59, 0.0  ;;  %v12556_v2 = vld [vmem:[#allocation10_spill] sm:$0xff]  ;;  %v3795_v21 = vperm.slane %v2475_v38, %v12396_v44  ;;  %v3789_v4 = vsel %vm12558_vm3, %v3787_v50, %v3785_v9  ;;  %vm12569_vm3 = vcmask 261312  }
 0x514   : > { %5045 = vmatpush.msra.mxu3 %v3203_v43  ;;  %v2852_v54 = vmul.f32 %v7394_v57, %v2085_v31  ;;  %v3195_v32 = vld [vmem:[%s11983_s2 + $0x6d0] sm:$0xff]  ;;  %v3791_v3 = vperm.slane %v2474_v62, %v7511_v45  ;;  %v9412_v5 = vmul.f32 %v7394_v57, %v12556_v2  ;;  %v3160_v38 = vld [vmem:[%s11983_s2 + $0x5b8] sm:$0xff] }
 0x515   : > { %v1938_v30 = vpop.xlane.xlu1 %1937  ;;  %5030 = vmatpush.msra.mxu2 %v3119_v55  ;;  %v2271_v41 = vpop.xlane.xlu0 %2270  ;;  %v867_v48 = vld [vmem:[%s5944_s24 + $0xe50] sm:$0xff] }
 0x516   : > { %v2803_v42 = vmul.f32 %v7394_v57, %v1938_v30  ;;  %5046 = vmatpush.msra.mxu3 %v3199_v11  ;;  %v2914_v7 = vmul.f32 %v7394_v57, %v2271_v41  ;;  %v3111_v20 = vld [vmem:[%s11983_s2 + $0x430] sm:$0xff]  ;;  %v4536_v12 = vperm.slane %v2852_v54, %v7435_v26  ;;  %v2296_v25 = vsel %vm921_vm0, %v867_v48, 0.0  ;;  %v3164_v11 = vld [vmem:[%s11983_s2 + $0x5d8] sm:$0xff] }
 0x517   : > { %5031 = vmatpush.msra.mxu2 %v3115_v17  ;;  %v3191_v19 = vld [vmem:[%s11983_s2 + $0x6b0] sm:$0xff]  ;;  %v3793_v29 = vsel %vm3792_vm10, %v3791_v3, %v3789_v4  ;;  %v3799_v31 = vperm.slane %v9412_v5, %v12420_v15 }
 0x518   : > { %v4441_v47 = vperm.slane %v2803_v42, %v12538_v33  ;;  %v4656_v22 = vperm.slane %v2914_v7, %v7412_v39  ;;  %5047 = vmatpush.msra.mxu3 %v3195_v32  ;;  %v3107_v13 = vld [vmem:[%s11983_s2 + $0x410] sm:$0xff]  ;;  %v9415_v52 = vsel %vm12557_vm9, %v4536_v12, %v4535_v49  ;;  %1922 = vadd.xlane.f32.xlu2 %v1921_v34  ;;  %v756_v42 = vld [vmem:[%s5944_s24 + $0xad8] sm:$0xff]  ;;  %v12562_v32 = vld [vmem:[#allocation15_spill] sm:$0xff]  ;;  %v2110_v12 = vsel %vm921_vm0, %v805_v24, 0.0 }
 0x519   : > { %5032 = vmatpush.msra.mxu2 %v3111_v20  ;;  %v3187_v23 = vld [vmem:[%s11983_s2 + $0x690] sm:$0xff]  ;;  %2339 = vadd.xlane.f32.xlu1 %v2338_v40  ;;  %v3797_v41 = vsel %vm3796_vm11, %v3795_v21, %v3793_v29  ;;  %v2477_v48 = vmul.f32 %v7394_v57, %v12562_v32  ;;  %vm12564_vm9 = vmmov %vm12551_vm4  ;;  %v12565_v21 = vld [vmem:[#allocation14_spill] sm:$0xff] }
 0x51a   : > { %v9418_v53 = vsel %vm12551_vm4, %v4441_v47, %v4440_v35  ;;  %v4657_v46 = vsel %vm3760_vm2, %v4656_v22, %v4655_v1  ;;  %5048 = vmatpush.msra.mxu3 %v3191_v19  ;;  %v12559_v49 = vld [vmem:[#allocation16_spill] sm:$0xff]  ;;  %2297 = vadd.xlane.f32.xlu0 %v2296_v25  ;;  %v12560_v35 = vld [vmem:[#allocation17_spill] sm:$0xff]  ;;  %v9485_v4 = vmul.f32 %v7394_v57, %v12565_v21 }
 0x51b   : > { %v2482_v43 = vmul.f32 %v7394_v57, %v12559_v49  ;;  %5033 = vmatpush.msra.mxu2 %v3107_v13  ;;  %v3183_v51 = vld [vmem:[%s11983_s2 + $0x670] sm:$0xff]  ;;  %v2481_v55 = vmul.f32 %v7394_v57, %v12560_v35  ;;  %v2274_v0 = vpop.xlane.xlu2 %2273  ;;  %v3156_v25 = vld [vmem:[%s11983_s2 + $0x598] sm:$0xff]  ;;  %v1963_v13 = vsel %vm921_vm0, %v756_v42, 0.0  ;;  %v3801_v29 = vsel %vm3800_vm12, %v3799_v31, %v3797_v41 }
 0x51c   : > { %v819_v10 = vld [vmem:[%s5944_s24 + $0xcd0] sm:$0xff]  ;;  %5034 = vmatmul.f32.vlgmr.msra.gmra.mxu2 %v9211_v14  ;;  %5049 = vmatpush.msra.mxu3 %v3187_v23  ;;  %v2915_v59 = vmul.f32 %v7394_v57, %v2274_v0  ;;  %v3803_v49 = vperm.slane %v2477_v48, %v12418_v60  ;;  %v12567_v0 = vld [vmem:[#allocation19_spill] sm:$0xff]  ;;  %v3228_v42 = vld [vmem:[%s11983_s2 + $0x7d8] sm:$0xff]  ;;  %v3807_v32 = vperm.slane %v9485_v4, %v12424_v16 }
 0x51d   : > { %v2127_v62 = vpop.xlane.xlu1 %2126  ;;  %v12561_v30 = vld [vmem:[#allocation21_spill] sm:$0xff]  ;;  %5098 = vmatpush.msrb.mxu2 %v3168_v27  ;;  %v2124_v9 = vpop.xlane.xlu0 %2123  ;;  %v2152_v1 = vsel %vm921_vm0, %v819_v10, 0.0  ;;  %v3819_v7 = vperm.slane %v2482_v43, %v7412_v39  ;;  %v3818_v47 = vperm.slane %v2481_v55, %v12536_v61  ;;  %v12563_v19 = vld [vmem:[#allocation20_spill] sm:$0xff] }
 0x51e   : > { %v2483_v17 = vmul.f32 %v7394_v57, %v12561_v30  ;;  %v2866_v50 = vmul.f32 %v7394_v57, %v2127_v62  ;;  %v3179_v54 = vld [vmem:[%s11983_s2 + $0x650] sm:$0xff]  ;;  %5050 = vmatpush.msra.mxu3 %v3183_v51  ;;  %v2865_v8 = vmul.f32 %v7394_v57, %v2124_v9  ;;  %v4658_v20 = vperm.slane %v2915_v59, %v12538_v33  ;;  %v3232_v43 = vld [vmem:[%s11983_s2 + $0x7f8] sm:$0xff] }
 0x51f   : > { %5099 = vmatpush.msrb.mxu2 %v3164_v11  ;;  %v3175_v3 = vld [vmem:[%s11983_s2 + $0x630] sm:$0xff]  ;;  %v2484_v40 = vmul.f32 %v7394_v57, %v12563_v19  ;;  %v3820_v55 = vsel %vm3760_vm2, %v3819_v7, %v3818_v47  ;;  %v2485_v62 = vmul.f32 %v7394_v57, %v12567_v0  ;;  %v3148_v30 = vld [vmem:[%s11983_s2 + $0x558] sm:$0xff] }
 0x520   : > { %v4563_v34 = vperm.slane %v2866_v50, %v7412_v39  ;;  %v4562_v22 = vperm.slane %v2865_v8, %v12536_v61  ;;  %5051 = vmatpush.msra.mxu3 %v3179_v54  ;;  %v3821_v2 = vperm.slane %v2483_v17, %v12538_v33  ;;  %v9478_v5 = vsel %vm12564_vm9, %v4658_v20, %v4657_v46  ;;  %v3171_v23 = vld [vmem:[%s11983_s2 + $0x610] sm:$0xff]  ;;  %v3152_v46 = vld [vmem:[%s11983_s2 + $0x578] sm:$0xff]  ;;  %v882_v17 = vld [vmem:[%s5944_s24 + $0xec8] sm:$0xff] }
 0x521   : > { %5100 = vmatpush.msrb.mxu2 %v3160_v38  ;;  %2153 = vadd.xlane.f32.xlu2 %v2152_v1  ;;  %v743_v51 = vld [vmem:[%s5944_s24 + $0xa70] sm:$0xff]  ;;  %v3823_v11 = vperm.slane %v2484_v40, %v7435_v26  ;;  %v868_v41 = vld [vmem:[%s5944_s24 + $0xe58] sm:$0xff]  ;;  %v3805_v20 = vsel %vm3804_vm13, %v3803_v49, %v3801_v29  ;;  %v2341_v47 = vsel %vm921_vm0, %v882_v17, 0.0  ;;  %v3825_v19 = vperm.slane %v2485_v62, %v7441_v18  ;;  %vm12571_vm9 = vmmov %vm12551_vm4 }
 0x522   : > { %v4564_v27 = vsel %vm3760_vm2, %v4563_v34, %v4562_v22  ;;  %5052 = vmatpush.msra.mxu3 %v3175_v3  ;;  %2111 = vadd.xlane.f32.xlu1 %v2110_v12  ;;  %v12566_v10 = vld [vmem:[#allocation13_spill] sm:$0xff]  ;;  %v3822_v59 = vsel %vm12551_vm4, %v3821_v2, %v3820_v55  ;;  %v12568_v48 = vld [vmem:[#allocation24_spill] sm:$0xff]  ;;  %v1924_v7 = vsel %vm921_vm0, %v743_v51, 0.0  ;;  %v12570_v2 = vld [vmem:[#allocation23_spill] sm:$0xff]  ;;  %vm12572_vm4 = vcmask 326912  }
 0x523   : > { %5101 = vmatpush.msrb.mxu2 %v3156_v25  ;;  %1964 = vadd.xlane.f32.xlu0 %v1963_v13  ;;  %v9499_v35 = vmul.f32 %v7394_v57, %v12566_v10  ;;  %v2130_v24 = vpop.xlane.xlu2 %2129  ;;  %v2486_v8 = vmul.f32 %v7394_v57, %v12568_v48  ;;  %v3144_v1 = vld [vmem:[%s11983_s2 + $0x538] sm:$0xff]  ;;  %v3824_v40 = vsel %vm12569_vm3, %v3823_v11, %v3822_v59  ;;  %v2299_v13 = vsel %vm921_vm0, %v868_v41, 0.0  ;;  %v806_v17 = vld [vmem:[%s5944_s24 + $0xc68] sm:$0xff] }
 0x524   : > { %5053 = vmatpush.msra.mxu3 %v3171_v23  ;;  %v2867_v50 = vmul.f32 %v7394_v57, %v2130_v24  ;;  %v3224_v12 = vld [vmem:[%s11983_s2 + $0x7b8] sm:$0xff]  ;;  %v2487_v23 = vmul.f32 %v7394_v57, %v12570_v2  ;;  %v3809_v62 = vsel %vm3808_vm14, %v3807_v32, %v3805_v20  ;;  %v757_v32 = vld [vmem:[%s5944_s24 + $0xae0] sm:$0xff] }
 0x525   : > { %v2088_v31 = vpop.xlane.xlu1 %2087  ;;  %5102 = vmatpush.msrb.mxu2 %v3152_v46  ;;  %5054 = vmatmul.f32.vlgmr.msra.gmra.mxu3 %v9281_v56  ;;  %v1941_v54 = vpop.xlane.xlu0 %1940  ;;  %v3140_v25 = vld [vmem:[%s11983_s2 + $0x518] sm:$0xff] }
 0x526   : > { %v2853_v9 = vmul.f32 %v7394_v57, %v2088_v31  ;;  %5118 = vmatpush.msrb.mxu3 %v3232_v43  ;;  %v2804_v38 = vmul.f32 %v7394_v57, %v1941_v54  ;;  %v4565_v34 = vperm.slane %v2867_v50, %v12538_v33  ;;  %v3220_v46 = vld [vmem:[%s11983_s2 + $0x798] sm:$0xff]  ;;  %v3827_v43 = vperm.slane %v2486_v8, %v7452_v58  ;;  %v12576_v50 = vld [vmem:[#allocation27_spill] sm:$0xff] }
 0x527   : > { %5103 = vmatpush.msrb.mxu2 %v3148_v30  ;;  %v12573_v29 = vld [vmem:[#allocation18_spill] sm:$0xff]  ;;  %v3829_v59 = vperm.slane %v2487_v23, %v12548_v28  ;;  %v1966_v23 = vsel %vm921_vm0, %v757_v32, 0.0 }
 0x528   : > { %v4538_v3 = vperm.slane %v2853_v9, %v7441_v18  ;;  %v4443_v22 = vperm.slane %v2804_v38, %v7435_v26  ;;  %5119 = vmatpush.msrb.mxu3 %v3228_v42  ;;  %v9543_v21 = vsel %vm12571_vm9, %v4565_v34, %v4564_v27  ;;  %v9554_v49 = vmul.f32 %v7394_v57, %v12573_v29  ;;  %v12574_v51 = vld [vmem:[#allocation22_spill] sm:$0xff]  ;;  %vm12575_vm9 = vmmov %vm12572_vm4 }
 0x529   : > { %5104 = vmatpush.msrb.mxu2 %v3144_v1  ;;  %1925 = vadd.xlane.f32.xlu2 %v1924_v7  ;;  %v2488_v10 = vmul.f32 %v7394_v57, %v12574_v51  ;;  %v3216_v55 = vld [vmem:[%s11983_s2 + $0x778] sm:$0xff]  ;;  %v3826_v11 = vsel %vm12575_vm9, %v3825_v19, %v3824_v40  ;;  %v2489_v9 = vmul.f32 %v7394_v57, %v12576_v50  ;;  %vm12582_vm9 = vcmask 261312  }
 0x52a   : > { %v9547_v4 = vsel %vm12572_vm4, %v4538_v3, %v9415_v52  ;;  %v9559_v27 = vsel %vm12569_vm3, %v4443_v22, %v9418_v53  ;;  %5120 = vmatpush.msrb.mxu3 %v3224_v12  ;;  %2342 = vadd.xlane.f32.xlu1 %v2341_v47  ;;  %v3136_v52 = vld [vmem:[%s11983_s2 + $0x4f8] sm:$0xff]  ;;  %v3811_v53 = vperm.slane %v9499_v35, %v7558_v36  ;;  %vm12577_vm4 = vcmask 392512  }
 0x52b   : > { %5105 = vmatpush.msrb.mxu2 %v3140_v25  ;;  %2300 = vadd.xlane.f32.xlu0 %v2299_v13  ;;  %v820_v0 = vld [vmem:[%s5944_s24 + $0xcd8] sm:$0xff]  ;;  %v2319_v24 = vpop.xlane.xlu2 %2318  ;;  %v3815_v48 = vperm.slane %v9554_v49, %v7668_v6  ;;  %v3828_v8 = vsel %vm12577_vm4, %v3827_v43, %v3826_v11  ;;  %v3831_v20 = vperm.slane %v2488_v10, %v7487_v63  ;;  %v2113_v47 = vsel %vm921_vm0, %v806_v17, 0.0  ;;  %v12583_v11 = vld [vmem:[#allocation36_spill] sm:$0xff] }
 0x52c   : > { %5121 = vmatpush.msrb.mxu3 %v3220_v46  ;;  %v3132_v30 = vld [vmem:[%s11983_s2 + $0x4d8] sm:$0xff]  ;;  %v2930_v35 = vmul.f32 %v7394_v57, %v2319_v24  ;;  %v2155_v7 = vsel %vm921_vm0, %v820_v0, 0.0  ;;  %vm12580_vm3 = vcmask 458112   ;;  %v3833_v29 = vperm.slane %v2489_v9, %v7459_v37 }
 0x52d   : > { %v2316_v31 = vpop.xlane.xlu1 %2315  ;;  %5106 = vmatpush.msrb.mxu2 %v3136_v52  ;;  %v2277_v42 = vpop.xlane.xlu0 %2276  ;;  %v3212_v41 = vld [vmem:[%s11983_s2 + $0x758] sm:$0xff]  ;;  %v3830_v46 = vsel %vm12580_vm3, %v3829_v59, %v3828_v8  ;;  %v12581_v52 = vld [vmem:[#allocation35_spill] sm:$0xff]  ;;  %v3813_v0 = vsel %vm3812_vm15, %v3811_v53, %v3809_v62  ;;  %v2529_v24 = vmul.f32 %v7394_v57, %v12583_v11  ;;  %vm12584_vm4 = vcmask 1048512  }
 0x52e   : > { %v2929_v54 = vmul.f32 %v7394_v57, %v2316_v31  ;;  %5122 = vmatpush.msrb.mxu3 %v3216_v55  ;;  %v2916_v38 = vmul.f32 %v7394_v57, %v2277_v42  ;;  %v3128_v1 = vld [vmem:[%s11983_s2 + $0x4b8] sm:$0xff]  ;;  %v4687_v34 = vperm.slane %v2930_v35, %v7412_v39  ;;  %v9625_v51 = vmul.f32 %v7394_v57, %v12581_v52  ;;  %v883_v35 = vld [vmem:[%s5944_s24 + $0xed0] sm:$0xff] }
 0x52f   : > { %5107 = vmatpush.msrb.mxu2 %v3132_v30  ;;  %v3208_v12 = vld [vmem:[%s11983_s2 + $0x738] sm:$0xff]  ;;  %v9642_v30 = vsel %vm12584_vm4, %v3815_v48, %v3813_v0  ;;  %vm12585_vm3 = vcmask 523712   ;;  %v12587_v42 = vld [vmem:[#allocation40_spill] sm:$0xff]  ;;  %vm12591_vm4 = vcmask 261312  }
 0x530   : > { %v4686_v3 = vperm.slane %v2929_v54, %v12536_v61  ;;  %v12578_v19 = vld [vmem:[#allocation25_spill] sm:$0xff]  ;;  %v12579_v22 = vld [vmem:[#allocation26_spill] sm:$0xff]  ;;  %v4660_v13 = vperm.slane %v2916_v38, %v7435_v26  ;;  %5123 = vmatpush.msrb.mxu3 %v3212_v41  ;;  %v3832_v62 = vsel %vm12585_vm3, %v3831_v20, %v3830_v46  ;;  %v2531_v41 = vmul.f32 %v7394_v57, %v12587_v42 }
 0x531   : > { %v9604_v40 = vmul.f32 %v7394_v57, %v12578_v19  ;;  %v9608_v25 = vmul.f32 %v7394_v57, %v12579_v22  ;;  %v3124_v2 = vld [vmem:[%s11983_s2 + $0x498] sm:$0xff]  ;;  %5108 = vmatpush.msrb.mxu2 %v3128_v1  ;;  %2156 = vadd.xlane.f32.xlu2 %v2155_v7  ;;  %v869_v1 = vld [vmem:[%s5944_s24 + $0xe60] sm:$0xff]  ;;  %v3911_v19 = vperm.slane %v2529_v24, %v12536_v61  ;;  %vm12592_vm3 = vcmask 392512  }
 0x532   : > { %v9618_v49 = vsel %vm3760_vm2, %v4687_v34, %v4686_v3  ;;  %v3204_v43 = vld [vmem:[%s11983_s2 + $0x718] sm:$0xff]  ;;  %v9629_v10 = vsel %vm12582_vm9, %v4660_v13, %v9478_v5  ;;  %5124 = vmatpush.msrb.mxu3 %v3208_v12  ;;  %2114 = vadd.xlane.f32.xlu1 %v2113_v47  ;;  %vm12586_vm9 = vcmask 589312   ;;  %v3912_v34 = vperm.slane %v9625_v51, %v7412_v39 }
 0x533   : > { %v3120_v55 = vld [vmem:[%s11983_s2 + $0x478] sm:$0xff]  ;;  %5109 = vmatpush.msrb.mxu2 %v3124_v2  ;;  %1967 = vadd.xlane.f32.xlu0 %v1966_v23  ;;  %v3837_v17 = vperm.slane %v9604_v40, %v12396_v44  ;;  %v3835_v53 = vperm.slane %v9608_v25, %v7511_v45  ;;  %v2133_v59 = vpop.xlane.xlu2 %2132  ;;  %v3834_v54 = vsel %vm12586_vm9, %v3833_v29, %v3832_v62  ;;  %v2344_v2 = vsel %vm921_vm0, %v883_v35, 0.0  ;;  %v12590_v29 = vld [vmem:[#allocation39_spill] sm:$0xff] }
 0x534   : > { %v3200_v31 = vld [vmem:[%s11983_s2 + $0x6f8] sm:$0xff]  ;;  %5125 = vmatpush.msrb.mxu3 %v3204_v43  ;;  %v2868_v32 = vmul.f32 %v7394_v57, %v2133_v59  ;;  %v2532_v43 = vmul.f32 %v7394_v57, %v12590_v29  ;;  %v3914_v0 = vperm.slane %v2531_v41, %v12538_v33  ;;  %vm12594_vm9 = vcmask 326912   ;;  %v12596_v35 = vld [vmem:[#allocation55_spill] sm:$0xff] }
 0x535   : > { %v744_v5 = vld [vmem:[%s5944_s24 + $0xa78] sm:$0xff]  ;;  %v2091_v50 = vpop.xlane.xlu1 %2090  ;;  %5110 = vmatpush.msrb.mxu2 %v3120_v55  ;;  %v1944_v8 = vpop.xlane.xlu0 %1943  ;;  %v2302_v55 = vsel %vm921_vm0, %v869_v1, 0.0  ;;  %v2546_v42 = vmul.f32 %v7394_v57, %v12596_v35 }
 0x536   : > { %v3116_v9 = vld [vmem:[%s11983_s2 + $0x458] sm:$0xff]  ;;  %v2854_v48 = vmul.f32 %v7394_v57, %v2091_v50  ;;  %5126 = vmatpush.msrb.mxu3 %v3200_v31  ;;  %v2805_v3 = vmul.f32 %v7394_v57, %v1944_v8  ;;  %v1927_v47 = vsel %vm921_vm0, %v744_v5, 0.0  ;;  %v4567_v22 = vperm.slane %v2868_v32, %v7435_v26 }
 0x537   : > { %v3196_v38 = vld [vmem:[%s11983_s2 + $0x6d8] sm:$0xff]  ;;  %5111 = vmatpush.msrb.mxu2 %v3116_v9  ;;  %v3836_v5 = vsel %vm3792_vm10, %v3835_v53, %v3834_v54  ;;  %v3913_v54 = vsel %vm3760_vm2, %v3912_v34, %v3911_v19  ;;  %v3916_v32 = vperm.slane %v2532_v43, %v7435_v26  ;;  %v758_v19 = vld [vmem:[%s5944_s24 + $0xae8] sm:$0xff] }
 0x538   : > { %v12588_v7 = vld [vmem:[#allocation30_spill] sm:$0xff]  ;;  %v4540_v25 = vperm.slane %v2854_v48, %v7452_v58  ;;  %v4445_v52 = vperm.slane %v2805_v3, %v7441_v18  ;;  %5127 = vmatpush.msrb.mxu3 %v3196_v38  ;;  %v9694_v11 = vsel %vm12591_vm4, %v4567_v22, %v9543_v21  ;;  %v12595_v50 = vld [vmem:[#allocation29_spill] sm:$0xff]  ;;  %vm12597_vm4 = vcmask 195712  }
 0x539   : > { %v9664_v20 = vmul.f32 %v7394_v57, %v12588_v7  ;;  %v3112_v12 = vld [vmem:[%s11983_s2 + $0x438] sm:$0xff]  ;;  %1928 = vadd.xlane.f32.xlu2 %v1927_v47  ;;  %v807_v38 = vld [vmem:[%s5944_s24 + $0xc70] sm:$0xff]  ;;  %v3915_v1 = vsel %vm12597_vm4, %v3914_v0, %v3913_v54  ;;  %v12598_v7 = vld [vmem:[#allocation43_spill] sm:$0xff]  ;;  %v3838_v54 = vsel %vm3796_vm11, %v3837_v17, %v3836_v5 }
 0x53a   : > { %v3192_v13 = vld [vmem:[%s11983_s2 + $0x6b8] sm:$0xff]  ;;  %v9698_v24 = vsel %vm12592_vm3, %v4540_v25, %v9547_v4  ;;  %5112 = vmatpush.msrb.mxu2 %v3112_v12  ;;  %v4446_v21 = vsel %vm12594_vm9, %v4445_v52, %v9559_v27  ;;  %2345 = vadd.xlane.f32.xlu1 %v2344_v2  ;;  %v9710_v4 = vmul.f32 %v7394_v57, %v12595_v50  ;;  %v821_v27 = vld [vmem:[%s5944_s24 + $0xce0] sm:$0xff]  ;;  %v2116_v52 = vsel %vm921_vm0, %v807_v38, 0.0  ;;  %v759_v5 = vld [vmem:[%s5944_s24 + $0xaf0] sm:$0xff] }
 0x53b   : > { %v12589_v23 = vld [vmem:[#allocation38_spill] sm:$0xff]  ;;  %5128 = vmatpush.msrb.mxu3 %v3192_v13  ;;  %v3839_v9 = vperm.slane %v9664_v20, %v12420_v15  ;;  %2303 = vadd.xlane.f32.xlu0 %v2302_v55  ;;  %v1947_v48 = vpop.xlane.xlu2 %1946  ;;  %v2534_v20 = vmul.f32 %v7394_v57, %v12598_v7  ;;  %v2158_v2 = vsel %vm921_vm0, %v821_v27, 0.0  ;;  %vm12600_vm3 = vcmask 261312   ;;  %v12602_v50 = vld [vmem:[#allocation53_spill] sm:$0xff] }
 0x53c   : > { %v9682_v46 = vmul.f32 %v7394_v57, %v12589_v23  ;;  %v3108_v51 = vld [vmem:[%s11983_s2 + $0x418] sm:$0xff]  ;;  %v2806_v3 = vmul.f32 %v7394_v57, %v1947_v48  ;;  %v3943_v23 = vperm.slane %v2546_v42, %v7412_v39  ;;  %v2548_v35 = vmul.f32 %v7394_v57, %v12602_v50  ;;  %v12614_v50 = vld [vmem:[#allocation56_spill] sm:$0xff] }
 0x53d   : > { %v3188_v31 = vld [vmem:[%s11983_s2 + $0x698] sm:$0xff]  ;;  %5113 = vmatpush.msrb.mxu2 %v3108_v51  ;;  %v2322_v8 = vpop.xlane.xlu1 %2321  ;;  %v2280_v12 = vpop.xlane.xlu0 %2279  ;;  %v3917_v51 = vsel %vm12600_vm3, %v3916_v32, %v3915_v1  ;;  %vm12603_vm9 = vcmask 392512   ;;  %vm12604_vm3 = vcmask 326912  }
 0x53e   : > { %v12593_v62 = vld [vmem:[#allocation50_spill] sm:$0xff]  ;;  %v3918_v41 = vperm.slane %v9682_v46, %v7441_v18  ;;  %5114 = vmatmul.f32.vlgmr.msrb.gmra.mxu2 %v9211_v14  ;;  %5129 = vmatpush.msrb.mxu3 %v3188_v31  ;;  %v2931_v34 = vmul.f32 %v7394_v57, %v2322_v8  ;;  %v2917_v13 = vmul.f32 %v7394_v57, %v2280_v12  ;;  %v12607_v1 = vld [vmem:[#allocation41_spill] sm:$0xff] }
 0x53f   : > { %v2545_v59 = vmul.f32 %v7394_v57, %v12593_v62  ;;  %v3184_v53 = vld [vmem:[%s11983_s2 + $0x678] sm:$0xff]  ;;  %v4447_v46 = vperm.slane %v2806_v3, %v7452_v58  ;;  %v1969_v62 = vsel %vm921_vm0, %v758_v19, 0.0  ;;  %v3841_v8 = vperm.slane %v9710_v4, %v12418_v60 }
 0x540   : > { %v3180_v47 = vld [vmem:[%s11983_s2 + $0x658] sm:$0xff]  ;;  %5130 = vmatpush.msrb.mxu3 %v3184_v53  ;;  %v4689_v29 = vperm.slane %v2931_v34, %v12538_v33  ;;  %v4662_v31 = vperm.slane %v2917_v13, %v7441_v18  ;;  %v2536_v7 = vmul.f32 %v7394_v57, %v12607_v1  ;;  %v3947_v19 = vperm.slane %v2548_v35, %v7435_v26 }
 0x541   : > { %v3942_v14 = vperm.slane %v2545_v59, %v12536_v61  ;;  %v12599_v22 = vld [vmem:[#allocation54_spill] sm:$0xff]  ;;  %v3920_v59 = vperm.slane %v2534_v20, %v7452_v58  ;;  %v9756_v42 = vsel %vm12603_vm9, %v4447_v46, %v4446_v21  ;;  %2159 = vadd.xlane.f32.xlu2 %v2158_v2  ;;  %vm12608_vm9 = vmmov %vm12604_vm3  ;;  %v12611_v2 = vld [vmem:[#allocation57_spill] sm:$0xff]  ;;  %v1972_v46 = vsel %vm921_vm0, %v759_v5, 0.0 }
 0x542   : > { %v2547_v25 = vmul.f32 %v7394_v57, %v12599_v22  ;;  %v3176_v43 = vld [vmem:[%s11983_s2 + $0x638] sm:$0xff]  ;;  %5131 = vmatpush.msrb.mxu3 %v3180_v47  ;;  %v9760_v53 = vsel %vm12597_vm4, %v4689_v29, %v9618_v49  ;;  %v4663_v21 = vsel %vm12604_vm3, %v4662_v31, %v9629_v10  ;;  %2117 = vadd.xlane.f32.xlu1 %v2116_v52  ;;  %v12605_v49 = vld [vmem:[#allocation28_spill] sm:$0xff]  ;;  %vm12609_vm4 = vcmask 392512  }
 0x543   : > { %v12601_v55 = vld [vmem:[#allocation42_spill] sm:$0xff]  ;;  %v9774_v48 = vmul.f32 %v7394_v57, %v12605_v49  ;;  %v3944_v38 = vsel %vm3760_vm2, %v3943_v23, %v3942_v14  ;;  %1970 = vadd.xlane.f32.xlu0 %v1969_v62  ;;  %v3840_v10 = vsel %vm3800_vm12, %v3839_v9, %v3838_v54  ;;  %v3919_v3 = vsel %vm12608_vm9, %v3918_v41, %v3917_v51  ;;  %v2283_v34 = vpop.xlane.xlu2 %2282  ;;  %v12620_v1 = vld [vmem:[#allocation61_spill] sm:$0xff] }
 0x544   : > { %v2535_v0 = vmul.f32 %v7394_v57, %v12601_v55  ;;  %v3172_v27 = vld [vmem:[%s11983_s2 + $0x618] sm:$0xff]  ;;  %v3945_v32 = vperm.slane %v2547_v25, %v12538_v33  ;;  %5132 = vmatpush.msrb.mxu3 %v3176_v43  ;;  %v3921_v47 = vsel %vm12609_vm4, %v3920_v59, %v3919_v3  ;;  %v2918_v14 = vmul.f32 %v7394_v57, %v2283_v34  ;;  %v870_v25 = vld [vmem:[%s5944_s24 + $0xe68] sm:$0xff] }
 0x545   : > { %v12606_v40 = vld [vmem:[#allocation58_spill] sm:$0xff]  ;;  %v2136_v4 = vpop.xlane.xlu1 %2135  ;;  %v2094_v22 = vpop.xlane.xlu0 %2093  ;;  %vm12610_vm3 = vcmask 195712   ;;  %v2550_v41 = vmul.f32 %v7394_v57, %v12611_v2  ;;  %v3924_v51 = vperm.slane %v2536_v7, %v7487_v63  ;;  %vm12612_vm9 = vcmask 458112   ;;  %v871_v7 = vld [vmem:[%s5944_s24 + $0xe70] sm:$0xff] }
 0x546   : > { %v2549_v17 = vmul.f32 %v7394_v57, %v12606_v40  ;;  %v3922_v20 = vperm.slane %v2535_v0, %v12548_v28  ;;  %5133 = vmatpush.msrb.mxu3 %v3172_v27  ;;  %v884_v12 = vld [vmem:[%s5944_s24 + $0xed8] sm:$0xff]  ;;  %v2869_v9 = vmul.f32 %v7394_v57, %v2136_v4  ;;  %v3946_v13 = vsel %vm12610_vm3, %v3945_v32, %v3944_v38 }
 0x547   : > { %5134 = vmatmul.f32.vlgmr.msrb.gmra.mxu3 %v9281_v56  ;;  %v2855_v23 = vmul.f32 %v7394_v57, %v2094_v22  ;;  %v4664_v43 = vperm.slane %v2918_v14, %v7452_v58  ;;  %v2347_v52 = vsel %vm921_vm0, %v884_v12, 0.0  ;;  %v2305_v31 = vsel %vm921_vm0, %v870_v25, 0.0  ;;  %v12613_v62 = vld [vmem:[#allocation46_spill] sm:$0xff] }
 0x548   : > { %v3949_v29 = vperm.slane %v2549_v17, %v7441_v18  ;;  %v4569_v56 = vperm.slane %v2869_v9, %v7441_v18  ;;  %v3923_v55 = vsel %vm12612_vm9, %v3922_v20, %v3921_v47  ;;  %v2537_v59 = vmul.f32 %v7394_v57, %v12613_v62  ;;  %v12618_v17 = vld [vmem:[#allocation31_spill] sm:$0xff]  ;;  %v12621_v20 = vld [vmem:[#allocation32_spill] sm:$0xff]  ;;  %v808_v2 = vld [vmem:[%s5944_s24 + $0xc78] sm:$0xff] }
 0x549   : > { %v4542_v0 = vperm.slane %v2855_v23, %v12548_v28  ;;  %v2551_v35 = vmul.f32 %v7394_v57, %v12614_v50  ;;  %v9812_v27 = vsel %vm12609_vm4, %v4664_v43, %v4663_v21  ;;  %vm12615_vm3 = vcmask 326912   ;;  %1973 = vadd.xlane.f32.xlu2 %v1972_v46  ;;  %v12626_v23 = vld [vmem:[#allocation60_spill] sm:$0xff] }
 0x54a   : > { %v9816_v54 = vsel %vm12615_vm3, %v4569_v56, %v9694_v11  ;;  %v3843_v32 = vperm.slane %v9774_v48, %v12424_v16  ;;  %v3951_v49 = vperm.slane %v2550_v41, %v7452_v58  ;;  %vm12616_vm9 = vcmask 261312   ;;  %2348 = vadd.xlane.f32.xlu1 %v2347_v52  ;;  %vm12619_vm4 = vmmov %vm12615_vm3 }
 0x54b   : > { %v3948_v38 = vsel %vm12616_vm9, %v3947_v19, %v3946_v13  ;;  %v4543_v40 = vsel %vm12617_vm5, %v4542_v0, %v9698_v24  ;;  %v3842_v21 = vsel %vm3804_vm13, %v3841_v8, %v3840_v10  ;;  %v9827_v5 = vmul.f32 %v7394_v57, %v12618_v17  ;;  %2306 = vadd.xlane.f32.xlu0 %v2305_v31  ;;  %v12622_v24 = vld [vmem:[#allocation44_spill] sm:$0xff]  ;;  %v12623_v8 = vld [vmem:[#allocation45_spill] sm:$0xff]  ;;  %v2097_v12 = vpop.xlane.xlu2 %2096 }
 0x54c   : > { %v3950_v11 = vsel %vm12619_vm4, %v3949_v29, %v3948_v38  ;;  %v2552_v48 = vmul.f32 %v7394_v57, %v12620_v1  ;;  %v9835_v3 = vmul.f32 %v7394_v57, %v12621_v20  ;;  %v9839_v34 = vmul.f32 %v7394_v57, %v12622_v24  ;;  %v822_v19 = vld [vmem:[%s5944_s24 + $0xce8] sm:$0xff]  ;;  %v12627_v31 = vld [vmem:[#allocation49_spill] sm:$0xff] }
 0x54d   : > { %v2538_v10 = vmul.f32 %v7394_v57, %v12623_v8  ;;  %vm12624_vm5 = vcmask 523712   ;;  %v1950_v47 = vpop.xlane.xlu1 %1949  ;;  %v3926_v14 = vperm.slane %v2537_v59, %v7459_v37  ;;  %v3953_v9 = vperm.slane %v2551_v35, %v12548_v28  ;;  %v2325_v13 = vpop.xlane.xlu0 %2324  ;;  %v823_v24 = vld [vmem:[%s5944_s24 + $0xcf0] sm:$0xff] }
 0x54e   : > { %v3925_v4 = vsel %vm12624_vm5, %v3924_v51, %v3923_v55  ;;  %v2856_v22 = vmul.f32 %v7394_v57, %v2097_v12  ;;  %v2807_v25 = vmul.f32 %v7394_v57, %v1950_v47  ;;  %vm12625_vm3 = vcmask 392512   ;;  %vm12629_vm4 = vmmov %vm12624_vm5  ;;  %v12636_v12 = vld [vmem:[#allocation64_spill] sm:$0xff] }
 0x54f   : > { %v3952_v41 = vsel %vm12625_vm3, %v3951_v49, %v3950_v11  ;;  %v2553_v46 = vmul.f32 %v7394_v57, %v12626_v23  ;;  %v2932_v29 = vmul.f32 %v7394_v57, %v2325_v13  ;;  %v2308_v43 = vsel %vm921_vm0, %v871_v7, 0.0  ;;  %v12631_v11 = vld [vmem:[#allocation59_spill] sm:$0xff] }
 0x550   : > { %v3955_v56 = vperm.slane %v2552_v48, %v7487_v63  ;;  %v4544_v52 = vperm.slane %v2856_v22, %v7487_v63  ;;  %v4449_v51 = vperm.slane %v2807_v25, %v12548_v28  ;;  %v2161_v55 = vsel %vm921_vm0, %v822_v19, 0.0  ;;  %v12638_v25 = vld [vmem:[#allocation88_spill] sm:$0xff] }
 0x551   : > { %v3928_v0 = vperm.slane %v2538_v10, %v7511_v45  ;;  %v2540_v62 = vmul.f32 %v7394_v57, %v12627_v31  ;;  %v4691_v59 = vperm.slane %v2932_v29, %v7435_v26  ;;  %v2119_v50 = vsel %vm921_vm0, %v808_v2, 0.0  ;;  %2309 = vadd.xlane.f32.xlu2 %v2308_v43  ;;  %v12635_v10 = vld [vmem:[#allocation48_spill] sm:$0xff] }
 0x552   : > { %v9865_v35 = vsel %vm3808_vm14, %v3843_v32, %v3842_v21  ;;  %vm12628_vm9 = vcmask 589312   ;;  %v9869_v38 = vsel %vm12629_vm4, %v4544_v52, %v4543_v40  ;;  %vm12630_vm5 = vcmask 458112   ;;  %2162 = vadd.xlane.f32.xlu1 %v2161_v55 }
 0x553   : > { %v3927_v49 = vsel %vm12628_vm9, %v3926_v14, %v3925_v4  ;;  %v9873_v17 = vsel %vm12630_vm5, %v4449_v51, %v9756_v42  ;;  %v2554_v1 = vmul.f32 %v7394_v57, %v12631_v11  ;;  %v3957_v48 = vperm.slane %v2553_v46, %v7459_v37  ;;  %vm12632_vm3 = vmmov %vm12630_vm5  ;;  %2120 = vadd.xlane.f32.xlu0 %v2119_v50  ;;  %v2328_v19 = vpop.xlane.xlu2 %2327  ;;  %v885_v46 = vld [vmem:[%s5944_s24 + $0xee0] sm:$0xff] }
 0x554   : > { %v3954_v7 = vsel %vm12632_vm3, %v3953_v9, %v3952_v41  ;;  %v4692_v32 = vsel %vm12633_vm7, %v4691_v59, %v9760_v53  ;;  %v3847_v40 = vperm.slane %v9827_v5, %v7668_v6  ;;  %v3845_v42 = vperm.slane %v9835_v3, %v7558_v36  ;;  %vm12634_vm9 = vmmov %vm12629_vm4  ;;  %v760_v9 = vld [vmem:[%s5944_s24 + $0xaf8] sm:$0xff]  ;;  %v12640_v51 = vld [vmem:[#allocation63_spill] sm:$0xff] }
 0x555   : > { %v3930_v21 = vperm.slane %v9839_v34, %v12396_v44  ;;  %v3956_v20 = vsel %vm12634_vm9, %v3955_v56, %v3954_v7  ;;  %v3929_v8 = vsel %vm3792_vm10, %v3928_v0, %v3927_v49  ;;  %v9892_v53 = vmul.f32 %v7394_v57, %v12635_v10  ;;  %v2286_v14 = vpop.xlane.xlu1 %2285  ;;  %v12637_v34 = vld [vmem:[#allocation83_spill] sm:$0xff]  ;;  %v2139_v23 = vpop.xlane.xlu0 %2138  ;;  %vm12643_vm5 = vmmov %vm12632_vm3  ;;  %v12670_v3 = vld [vmem:[#allocation92_spill] sm:$0xff] }
 0x556   : > { %v3932_v4 = vperm.slane %v2540_v62, %v12420_v15  ;;  %v2555_v47 = vmul.f32 %v7394_v57, %v12636_v12  ;;  %v2593_v22 = vmul.f32 %v7394_v57, %v12637_v34  ;;  %v2594_v13 = vmul.f32 %v7394_v57, %v12638_v25  ;;  %v12641_v50 = vld [vmem:[#allocation87_spill] sm:$0xff]  ;;  %v12647_v34 = vld [vmem:[#allocation52_spill] sm:$0xff]  ;;  %v12648_v25 = vld [vmem:[#allocation62_spill] sm:$0xff] }
 0x557   : > { %v2933_v2 = vmul.f32 %v7394_v57, %v2328_v19  ;;  %v2919_v41 = vmul.f32 %v7394_v57, %v2286_v14  ;;  %v3959_v29 = vperm.slane %v2554_v1, %v7511_v45  ;;  %vm12639_vm7 = vcmask 589312   ;;  %v12644_v10 = vld [vmem:[#allocation47_spill] sm:$0xff]  ;;  %v12645_v19 = vld [vmem:[#allocation86_spill] sm:$0xff] }
 0x558   : > { %v3958_v43 = vsel %vm12639_vm7, %v3957_v48, %v3956_v20  ;;  %v2870_v56 = vmul.f32 %v7394_v57, %v2139_v23  ;;  %v2164_v52 = vsel %vm921_vm0, %v823_v24, 0.0  ;;  %v2556_v55 = vmul.f32 %v7394_v57, %v12640_v51  ;;  %vm12653_vm7 = vmmov %vm12643_vm5 }
 0x559   : > { %v4693_v0 = vperm.slane %v2933_v2, %v7441_v18  ;;  %v4666_v31 = vperm.slane %v2919_v41, %v12548_v28  ;;  %v1975_v62 = vsel %vm921_vm0, %v760_v9, 0.0  ;;  %v3961_v59 = vperm.slane %v2555_v47, %v12396_v44  ;;  %2165 = vadd.xlane.f32.xlu2 %v2164_v52  ;;  %v12649_v41 = vld [vmem:[#allocation91_spill] sm:$0xff] }
 0x55a   : > { %v2595_v49 = vmul.f32 %v7394_v57, %v12641_v50  ;;  %v4571_v11 = vperm.slane %v2870_v56, %v7452_v58  ;;  %v2350_v1 = vsel %vm921_vm0, %v885_v46, 0.0  ;;  %v4035_v48 = vperm.slane %v2593_v22, %v12536_v61  ;;  %1976 = vadd.xlane.f32.xlu1 %v1975_v62  ;;  %v886_v46 = vld [vmem:[%s5944_s24 + $0xee8] sm:$0xff] }
 0x55b   : > { %v4036_v7 = vperm.slane %v2594_v13, %v7412_v39  ;;  %vm12642_vm4 = vcmask 326912   ;;  %v9926_v24 = vsel %vm12643_vm5, %v4666_v31, %v9812_v27  ;;  %v9930_v12 = vmul.f32 %v7394_v57, %v12644_v10  ;;  %2351 = vadd.xlane.f32.xlu0 %v2350_v1  ;;  %v12650_v31 = vld [vmem:[#allocation67_spill] sm:$0xff] }
 0x55c   : > { %v9922_v20 = vsel %vm12642_vm4, %v4693_v0, %v4692_v32  ;;  %v3931_v47 = vsel %vm3796_vm11, %v3930_v21, %v3929_v8  ;;  %v2596_v14 = vmul.f32 %v7394_v57, %v12645_v19  ;;  %vm12646_vm3 = vcmask 392512   ;;  %v824_v8 = vld [vmem:[%s5944_s24 + $0xcf8] sm:$0xff] }
 0x55d   : > { %v4572_v9 = vsel %vm12646_vm3, %v4571_v11, %v9816_v54  ;;  %v3934_v32 = vperm.slane %v9892_v53, %v12418_v60  ;;  %v3933_v27 = vsel %vm3800_vm12, %v3932_v4, %v3931_v47  ;;  %v9942_v22 = vmul.f32 %v7394_v57, %v12647_v34  ;;  %v2142_v4 = vpop.xlane.xlu2 %2141  ;;  %v2100_v23 = vpop.xlane.xlu1 %2099  ;;  %v872_v0 = vld [vmem:[%s5944_s24 + $0xe78] sm:$0xff] }
 0x55e   : > { %v3960_v21 = vsel %vm3792_vm10, %v3959_v29, %v3958_v43  ;;  %v2557_v13 = vmul.f32 %v7394_v57, %v12648_v25  ;;  %v3963_v54 = vperm.slane %v2556_v55, %v12420_v15  ;;  %v4038_v2 = vperm.slane %v2595_v49, %v12538_v33  ;;  %v1953_v51 = vpop.xlane.xlu0 %1952  ;;  %v12651_v11 = vld [vmem:[#allocation90_spill] sm:$0xff] }
 0x55f   : > { %v2597_v53 = vmul.f32 %v7394_v57, %v12649_v41  ;;  %v3962_v56 = vsel %vm3796_vm11, %v3961_v59, %v3960_v21  ;;  %v4037_v52 = vsel %vm3760_vm2, %v4036_v7, %v4035_v48  ;;  %v2871_v29 = vmul.f32 %v7394_v57, %v2142_v4  ;;  %v12655_v41 = vld [vmem:[#allocation66_spill] sm:$0xff]  ;;  %v12656_v4 = vld [vmem:[#allocation89_spill] sm:$0xff] }
 0x560   : > { %v2857_v43 = vmul.f32 %v7394_v57, %v2100_v23  ;;  %v2558_v55 = vmul.f32 %v7394_v57, %v12650_v31  ;;  %v4040_v62 = vperm.slane %v2596_v14, %v7435_v26  ;;  %v2808_v50 = vmul.f32 %v7394_v57, %v1953_v51 }
 0x561   : > { %v2167_v49 = vsel %vm921_vm0, %v824_v8, 0.0  ;;  %v2598_v59 = vmul.f32 %v7394_v57, %v12651_v11  ;;  %v4573_v1 = vperm.slane %v2871_v29, %v12548_v28  ;;  %v2353_v7 = vsel %vm921_vm0, %v886_v46, 0.0  ;;  %v887_v11 = vld [vmem:[%s5944_s24 + $0xef0] sm:$0xff] }
 0x562   : > { %v4546_v48 = vperm.slane %v2857_v43, %v7459_v37  ;;  %vm12652_vm9 = vcmask 195712   ;;  %v4042_v47 = vperm.slane %v2597_v53, %v7441_v18  ;;  %v4451_v19 = vperm.slane %v2808_v50, %v7487_v63  ;;  %2168 = vadd.xlane.f32.xlu2 %v2167_v49  ;;  %2354 = vadd.xlane.f32.xlu1 %v2353_v7  ;;  %v12661_v43 = vld [vmem:[#allocation94_spill] sm:$0xff] }
 0x563   : > { %v4039_v10 = vsel %vm12652_vm9, %v4038_v2, %v4037_v52  ;;  %v2311_v14 = vsel %vm921_vm0, %v872_v0, 0.0  ;;  %v3965_v34 = vperm.slane %v2557_v13, %v12418_v60  ;;  %v3964_v21 = vsel %vm3800_vm12, %v3963_v54, %v3962_v56  ;;  %v12659_v56 = vld [vmem:[#allocation51_spill] sm:$0xff] }
 0x564   : > { %v9975_v8 = vsel %vm12653_vm7, %v4573_v1, %v4572_v9  ;;  %vm12654_vm4 = vcmask 589312   ;;  %v2559_v2 = vmul.f32 %v7394_v57, %v12655_v41  ;;  %v3967_v53 = vperm.slane %v2558_v55, %v12424_v16  ;;  %2312 = vadd.xlane.f32.xlu0 %v2311_v14  ;;  %v12664_v14 = vld [vmem:[#allocation93_spill] sm:$0xff] }
 0x565   : > { %v9979_v25 = vsel %vm12654_vm4, %v4546_v48, %v9869_v38  ;;  %v2599_v23 = vmul.f32 %v7394_v57, %v12656_v4  ;;  %vm12657_vm5 = vcmask 523712   ;;  %v3936_v9 = vperm.slane %v9930_v12, %v12424_v16  ;;  %v1956_v12 = vpop.xlane.xlu2 %1955  ;;  %v2331_v0 = vpop.xlane.xlu1 %2330 }
 0x566   : > { %v4452_v13 = vsel %vm12657_vm5, %v4451_v19, %v9873_v17  ;;  %v3935_v38 = vsel %vm3804_vm13, %v3934_v32, %v3933_v27  ;;  %v4044_v54 = vperm.slane %v2598_v59, %v7452_v58  ;;  %vm12658_vm3 = vcmask 261312   ;;  %v888_v32 = vld [vmem:[%s5944_s24 + $0xef8] sm:$0xff]  ;;  %v2289_v49 = vpop.xlane.xlu0 %2288  ;;  %s408_s24 = scalar_lea.vmem %s11992_s11, %s5837_s10 }
 0x567   : > { %v4041_v46 = vsel %vm12658_vm3, %v4040_v62, %v4039_v10  ;;  %v2544_v52 = vmul.f32 %v7394_v57, %v12659_v56  ;;  %v3938_v29 = vperm.slane %v9942_v22, %v7558_v36  ;;  %vm12660_vm9 = vcmask 326912   ;;  %v12662_v27 = vld [vmem:[#allocation65_spill] sm:$0xff] }
 0x568   : > { %v4043_v17 = vsel %vm12660_vm9, %v4042_v47, %v4041_v46  ;;  %v2600_v51 = vmul.f32 %v7394_v57, %v12661_v43  ;;  %v2560_v31 = vmul.f32 %v7394_v57, %v12662_v27  ;;  %v3966_v55 = vsel %vm3804_vm13, %v3965_v34, %v3964_v21 }
 0x569   : > { %v2809_v62 = vmul.f32 %v7394_v57, %v1956_v12  ;;  %v2934_v50 = vmul.f32 %v7394_v57, %v2331_v0  ;;  %v3969_v22 = vperm.slane %v2559_v2, %v7558_v36  ;;  %v3968_v59 = vsel %vm3808_vm14, %v3967_v53, %v3966_v55  ;;  %v12665_v53 = vld [vmem:[#allocation102_spill] sm:$0xff] }
 0x56a   : > { %v4046_v1 = vperm.slane %v2599_v23, %v12548_v28  ;;  %v2920_v48 = vmul.f32 %v7394_v57, %v2289_v49  ;;  %vm12663_vm7 = vcmask 392512   ;;  %v2359_v19 = vsel %vm921_vm0, %v888_v32, 0.0  ;;  %v12666_v23 = vld [vmem:[#allocation103_spill] sm:$0xff] }
 0x56b   : > { %v4045_v7 = vsel %vm12663_vm7, %v4044_v54, %v4043_v17  ;;  %v4453_v10 = vperm.slane %v2809_v62, %v7459_v37  ;;  %v4695_v47 = vperm.slane %v2934_v50, %v7452_v58  ;;  %v2601_v34 = vmul.f32 %v7394_v57, %v12664_v14  ;;  %vm12667_vm5 = vmmov %vm12663_vm7  ;;  %2360 = vadd.xlane.f32.xlu1 %v2359_v19 }
 0x56c   : > { %v4048_v21 = vperm.slane %v2600_v51, %v7487_v63  ;;  %v4668_v41 = vperm.slane %v2920_v48, %v7487_v63  ;;  %v2356_v2 = vsel %vm921_vm0, %v887_v11, 0.0  ;;  %v2610_v4 = vmul.f32 %v7394_v57, %v12665_v53  ;;  %v12674_v11 = vld [vmem:[#allocation97_spill] sm:$0xff] }
 0x56d   : > { %v2609_v54 = vmul.f32 %v7394_v57, %v12666_v23  ;;  %v10025_v46 = vsel %vm12654_vm4, %v4453_v10, %v4452_v13  ;;  %v10029_v56 = vsel %vm12667_vm5, %v4695_v47, %v9922_v20  ;;  %v3846_v17 = vsel %vm3812_vm15, %v3845_v42, %v9865_v35  ;;  %2357 = vadd.xlane.f32.xlu0 %v2356_v2  ;;  %v2145_v27 = vpop.xlane.xlu1 %2144  ;;  %v12681_v23 = vld [vmem:[#allocation96_spill] sm:$0xff] }
 0x56e   : > { %v3940_v43 = vperm.slane %v2544_v52, %v7668_v6  ;;  %v3937_v51 = vsel %vm3808_vm14, %v3936_v9, %v3935_v38  ;;  %vm12668_vm0 = vcmask 523712   ;;  %v3971_v0 = vperm.slane %v2560_v31, %v7668_v6  ;;  %v12672_v38 = vld [vmem:[#allocation101_spill] sm:$0xff]  ;;  %v2292_v52 = vpop.xlane.xlu2 %2291  ;;  %v2103_v50 = vpop.xlane.xlu0 %2102 }
 0x56f   : > { %v4669_v12 = vsel %vm12668_vm0, %v4668_v41, %v9926_v24  ;;  %v3939_v13 = vsel %vm3812_vm15, %v3938_v29, %v3937_v51  ;;  %v3970_v20 = vsel %vm3812_vm15, %v3969_v22, %v3968_v59  ;;  %vm12669_vm3 = vcmask 458112   ;;  %vm12671_vm9 = vmmov %vm12668_vm0  ;;  %v12675_v59 = vld [vmem:[#allocation106_spill] sm:$0xff]  ;;  %v12679_v41 = vld [vmem:[#allocation105_spill] sm:$0xff] }
 0x570   : > { %v4047_v32 = vsel %vm12669_vm3, %v4046_v1, %v4045_v7  ;;  %v2602_v35 = vmul.f32 %v7394_v57, %v12670_v3  ;;  %v4050_v42 = vperm.slane %v2601_v34, %v7459_v37  ;;  %v2611_v24 = vmul.f32 %v7394_v57, %v12672_v38 }
 0x571   : > { %v4049_v9 = vsel %vm12671_vm9, %v4048_v21, %v4047_v32  ;;  %v4067_v29 = vperm.slane %v2610_v4, %v7412_v39  ;;  %v4066_v31 = vperm.slane %v2609_v54, %v12536_v61  ;;  %v2921_v55 = vmul.f32 %v7394_v57, %v2292_v52  ;;  %v12683_v32 = vld [vmem:[#allocation104_spill] sm:$0xff] }
 0x572   : > { %v2872_v62 = vmul.f32 %v7394_v57, %v2145_v27  ;;  %vm12673_vm7 = vcmask 1048512   ;;  %v2603_v22 = vmul.f32 %v7394_v57, %v12674_v11  ;;  %v2612_v1 = vmul.f32 %v7394_v57, %v12675_v59  ;;  %v12688_v11 = vld [vmem:[#allocation151_spill] sm:$0xff] }
 0x573   : > { %v3848_v49 = vsel %vm12673_vm7, %v3847_v40, %v3846_v17  ;;  %v2858_v48 = vmul.f32 %v7394_v57, %v2103_v50  ;;  %vm12676_vm4 = vmmov %vm12673_vm7  ;;  %v4670_v47 = vperm.slane %v2921_v55, %v7459_v37  ;;  %v4052_v5 = vperm.slane %v2602_v35, %v7511_v45  ;;  %v12687_v50 = vld [vmem:[#allocation150_spill] sm:$0xff] }
 0x574   : > { %v3941_v7 = vsel %vm12676_vm4, %v3940_v43, %v3939_v13  ;;  %vm12677_vm5 = vmmov %vm12676_vm4  ;;  %v4575_v19 = vperm.slane %v2872_v62, %v7487_v63  ;;  %vm12678_vm0 = vcmask 589312   ;;  %v4069_v14 = vperm.slane %v2611_v24, %v12538_v33 }
 0x575   : > { %v3972_v10 = vsel %vm12677_vm5, %v3971_v0, %v3970_v20  ;;  %v4051_v40 = vsel %vm12678_vm0, %v4050_v42, %v4049_v9  ;;  %v4548_v34 = vperm.slane %v2858_v48, %v7511_v45  ;;  %v4068_v21 = vsel %vm3760_vm2, %v4067_v29, %v4066_v31  ;;  %vm12680_vm3 = vmmov %vm12678_vm0  ;;  %v12682_v0 = vld [vmem:[#allocation95_spill] sm:$0xff] }
 0x576   : > { %v2613_v2 = vmul.f32 %v7394_v57, %v12679_v41  ;;  %v10075_v53 = vsel %vm12680_vm3, %v4670_v47, %v4669_v12  ;;  %v10079_v4 = vsel %vm12671_vm9, %v4575_v19, %v9975_v8  ;;  %v2604_v54 = vmul.f32 %v7394_v57, %v12681_v23  ;;  %v2106_v42 = vpop.xlane.xlu2 %2105  ;;  %v2334_v27 = vpop.xlane.xlu0 %2333  ;;  %v12691_v41 = vld [vmem:[#allocation100_spill] sm:$0xff]  ;;  %v12692_v23 = vld [vmem:[#allocation149_spill] sm:$0xff] }
 0x577   : > { %v4054_v17 = vperm.slane %v2603_v22, %v12396_v44  ;;  %v4071_v43 = vperm.slane %v2612_v1, %v7435_v26  ;;  %v4549_v51 = vsel %vm3792_vm10, %v4548_v34, %v9979_v25  ;;  %v10089_v13 = vsel %vm4779_vm1, %v3941_v7, %v9642_v30  ;;  %v1959_v25 = vpop.xlane.xlu1 %1958  ;;  %v12685_v30 = vld [vmem:[#allocation109_spill] sm:$0xff] }
 0x578   : > { %v10092_v12 = vsel %vm4779_vm1, %v3972_v10, %v3848_v49  ;;  %v10096_v8 = vmul.f32 %v7394_v57, %v12682_v0  ;;  %v4053_v20 = vsel %vm3792_vm10, %v4052_v5, %v4051_v40  ;;  %v2614_v3 = vmul.f32 %v7394_v57, %v12683_v32  ;;  %v12689_v10 = vld [vmem:[#allocation108_spill] sm:$0xff]  ;;  %v12696_v32 = vld [vmem:[#allocation99_spill] sm:$0xff] }
 0x579   : > { %vm12684_vm7 = vcmask 195712   ;;  %v4073_v9 = vperm.slane %v2613_v2, %v7441_v18  ;;  %v2615_v38 = vmul.f32 %v7394_v57, %v12685_v30  ;;  %v2859_v24 = vmul.f32 %v7394_v57, %v2106_v42 }
 0x57a   : > { %v4070_v35 = vsel %vm12684_vm7, %v4069_v14, %v4068_v21  ;;  %v2810_v52 = vmul.f32 %v7394_v57, %v1959_v25  ;;  %v4056_v29 = vperm.slane %v2604_v54, %v12420_v15  ;;  %v4055_v31 = vsel %vm3796_vm11, %v4054_v17, %v4053_v20  ;;  %vm12704_vm7 = vmmov %vm12671_vm9 }
 0x57b   : > { %vm12686_vm1 = vcmask 261312   ;;  %v2935_v62 = vmul.f32 %v7394_v57, %v2334_v27  ;;  %v2658_v49 = vmul.f32 %v7394_v57, %v12687_v50  ;;  %v2657_v22 = vmul.f32 %v7394_v57, %v12688_v11  ;;  %v12701_v50 = vld [vmem:[#allocation153_spill] sm:$0xff] }
 0x57c   : > { %v4072_v55 = vsel %vm12686_vm1, %v4071_v43, %v4070_v35  ;;  %v4550_v59 = vperm.slane %v2859_v24, %v12396_v44  ;;  %v4455_v1 = vperm.slane %v2810_v52, %v7511_v45  ;;  %v4058_v48 = vperm.slane %v10096_v8, %v12418_v60  ;;  %v12694_v43 = vld [vmem:[#allocation98_spill] sm:$0xff]  ;;  %v12697_v35 = vld [vmem:[#allocation107_spill] sm:$0xff]  ;;  %v12700_v24 = vld [vmem:[#allocation112_spill] sm:$0xff] }
 0x57d   : > { %v4075_v7 = vperm.slane %v2614_v3, %v7452_v58  ;;  %v2616_v47 = vmul.f32 %v7394_v57, %v12689_v10  ;;  %v4697_v19 = vperm.slane %v2935_v62, %v12548_v28  ;;  %vm12690_vm4 = vcmask 326912   ;;  %v12695_v8 = vld [vmem:[#allocation154_spill] sm:$0xff] }
 0x57e   : > { %v4074_v5 = vsel %vm12690_vm4, %v4073_v9, %v4072_v55  ;;  %v4077_v40 = vperm.slane %v2615_v38, %v12548_v28  ;;  %v10126_v14 = vsel %vm3796_vm11, %v4550_v59, %v4549_v51  ;;  %v10130_v34 = vsel %vm3792_vm10, %v4455_v1, %v10025_v46  ;;  %v2337_v9 = vpop.xlane.xlu2 %2336  ;;  %v3037_v10 = vld [vmem:[%s11983_s2 + $0x1e0] sm:$0xff] }
 0x57f   : > { %v4057_v21 = vsel %vm3800_vm12, %v4056_v29, %v4055_v31  ;;  %v2606_v2 = vmul.f32 %v7394_v57, %v12691_v41  ;;  %v2659_v54 = vmul.f32 %v7394_v57, %v12692_v23  ;;  %vm12693_vm5 = vcmask 458112   ;;  %v2295_v30 = vpop.xlane.xlu1 %2294  ;;  %v2148_v31 = vpop.xlane.xlu0 %2147  ;;  %4818 = vmatpush.msra.mxu0 %v3037_v10  ;;  %v12703_v23 = vld [vmem:[#allocation152_spill] sm:$0xff] }
 0x580   : > { %v4698_v17 = vsel %vm12693_vm5, %v4697_v19, %v10029_v56  ;;  %v10141_v0 = vmul.f32 %v7394_v57, %v12694_v43  ;;  %v4160_v51 = vperm.slane %v2658_v49, %v7412_v39  ;;  %v4159_v46 = vperm.slane %v2657_v22, %v12536_v61  ;;  %vm12699_vm3 = vmmov %vm12693_vm5 }
 0x581   : > { %v2660_v20 = vmul.f32 %v7394_v57, %v12695_v8  ;;  %v10149_v3 = vmul.f32 %v7394_v57, %v12696_v32  ;;  %v2617_v42 = vmul.f32 %v7394_v57, %v12697_v35  ;;  %v4079_v56 = vperm.slane %v2616_v47, %v7487_v63  ;;  %v12706_v32 = vld [vmem:[#allocation157_spill] sm:$0xff] }
 0x582   : > { %vm12698_vm0 = vcmask 392512   ;;  %v2618_v52 = vmul.f32 %v7394_v57, %v12700_v24  ;;  %v2936_v27 = vmul.f32 %v7394_v57, %v2337_v9  ;;  %v2922_v29 = vmul.f32 %v7394_v57, %v2295_v30  ;;  %v3029_v9 = vld [vmem:[%s11983_s2 + $0x1a0] sm:$0xff] }
 0x583   : > { %v4076_v25 = vsel %vm12698_vm0, %v4075_v7, %v4074_v5  ;;  %v4060_v55 = vperm.slane %v2606_v2, %v12424_v16  ;;  %v4162_v62 = vperm.slane %v2659_v54, %v12538_v33  ;;  %v2661_v49 = vmul.f32 %v7394_v57, %v12701_v50  ;;  %v12702_v5 = vld [vmem:[#allocation111_spill] sm:$0xff] }
 0x584   : > { %v4078_v38 = vsel %vm12699_vm3, %v4077_v40, %v4076_v25  ;;  %v2873_v11 = vmul.f32 %v7394_v57, %v2148_v31  ;;  %v4161_v22 = vsel %vm3760_vm2, %v4160_v51, %v4159_v46  ;;  %v4164_v59 = vperm.slane %v2660_v20, %v7435_v26  ;;  %v3033_v46 = vld [vmem:[%s11983_s2 + $0x1c0] sm:$0xff] }
 0x585   : > { %v4699_v1 = vperm.slane %v2936_v27, %v7487_v63  ;;  %v4672_v7 = vperm.slane %v2922_v29, %v7511_v45  ;;  %v4081_v47 = vperm.slane %v2617_v42, %v7459_v37  ;;  %v4080_v19 = vsel %vm12671_vm9, %v4079_v56, %v4078_v38  ;;  %4819 = vmatpush.msra.mxu0 %v3033_v46  ;;  %v12709_v38 = vld [vmem:[#allocation110_spill] sm:$0xff]  ;;  %v12711_v27 = vld [vmem:[#allocation115_spill] sm:$0xff] }
 0x586   : > { %v2619_v40 = vmul.f32 %v7394_v57, %v12702_v5  ;;  %v4577_v41 = vperm.slane %v2873_v11, %v7459_v37  ;;  %v4083_v2 = vperm.slane %v2618_v52, %v7511_v45  ;;  %v2662_v54 = vmul.f32 %v7394_v57, %v12703_v23 }
 0x587   : > { %v10181_v43 = vsel %vm12704_vm7, %v4699_v1, %v4698_v17  ;;  %v10185_v51 = vsel %vm3792_vm10, %v4672_v7, %v10075_v53  ;;  %v4166_v8 = vperm.slane %v2661_v49, %v7441_v18  ;;  %vm12705_vm1 = vcmask 195712   ;;  %4820 = vmatpush.msra.mxu0 %v3029_v9  ;;  %v2109_v50 = vpop.xlane.xlu1 %2108  ;;  %v12713_v49 = vld [vmem:[#allocation156_spill] sm:$0xff]  ;;  %v1962_v1 = vpop.xlane.xlu0 %1961 }
 0x588   : > { %v4163_v20 = vsel %vm12705_vm1, %v4162_v62, %v4161_v22  ;;  %v2663_v35 = vmul.f32 %v7394_v57, %v12706_v32  ;;  %vm12707_vm4 = vcmask 589312   ;;  %v4064_v53 = vperm.slane %v10141_v0, %v7668_v6  ;;  %v12714_v7 = vld [vmem:[#allocation164_spill] sm:$0xff]  ;;  %v3077_v0 = vld [vmem:[%s11983_s2 + $0x320] sm:$0xff] }
 0x589   : > { %v4578_v17 = vsel %vm12707_vm4, %v4577_v41, %v10079_v4  ;;  %v4062_v42 = vperm.slane %v10149_v3, %v7558_v36  ;;  %v4059_v56 = vsel %vm3804_vm13, %v4058_v48, %v4057_v21  ;;  %vm12708_vm5 = vcmask 261312   ;;  %v3025_v4 = vld [vmem:[%s11983_s2 + $0x180] sm:$0xff]  ;;  %vm12710_vm0 = vmmov %vm12707_vm4  ;;  %v2151_v48 = vpop.xlane.xlu2 %2150 }
 0x58a   : > { %v4165_v25 = vsel %vm12708_vm5, %v4164_v59, %v4163_v20  ;;  %v4061_v30 = vsel %vm3808_vm14, %v4060_v55, %v4059_v56  ;;  %v2620_v24 = vmul.f32 %v7394_v57, %v12709_v38  ;;  %v4085_v3 = vperm.slane %v2619_v40, %v12396_v44  ;;  %4821 = vmatpush.msra.mxu0 %v3025_v4  ;;  %v3021_v41 = vld [vmem:[%s11983_s2 + $0x160] sm:$0xff] }
 0x58b   : > { %v4082_v52 = vsel %vm12710_vm0, %v4081_v47, %v4080_v19  ;;  %v2621_v29 = vmul.f32 %v7394_v57, %v12711_v27  ;;  %v4168_v31 = vperm.slane %v2662_v54, %v7452_v58  ;;  %v2874_v62 = vmul.f32 %v7394_v57, %v2151_v48  ;;  %v12715_v47 = vld [vmem:[#allocation165_spill] sm:$0xff]  ;;  %v12716_v54 = vld [vmem:[#allocation114_spill] sm:$0xff]  ;;  %v12719_v38 = vld [vmem:[#allocation155_spill] sm:$0xff] }
 0x58c   : > { %v4084_v21 = vsel %vm3792_vm10, %v4083_v2, %v4082_v52  ;;  %vm12712_vm3 = vcmask 326912   ;;  %v2664_v11 = vmul.f32 %v7394_v57, %v12713_v49  ;;  %v4170_v22 = vperm.slane %v2663_v35, %v12548_v28  ;;  %4822 = vmatpush.msra.mxu0 %v3021_v41  ;;  %v3101_v20 = vld [vmem:[%s11983_s2 + $0x3e0] sm:$0xff]  ;;  %v12717_v35 = vld [vmem:[#allocation169_spill] sm:$0xff]  ;;  %v12726_v41 = vld [vmem:[#allocation160_spill] sm:$0xff] }
 0x58d   : > { %v4167_v55 = vsel %vm12712_vm3, %v4166_v8, %v4165_v25  ;;  %v2860_v59 = vmul.f32 %v7394_v57, %v2109_v50  ;;  %v2674_v10 = vmul.f32 %v7394_v57, %v12714_v7  ;;  %v2673_v19 = vmul.f32 %v7394_v57, %v12715_v47  ;;  %4838 = vmatpush.msra.mxu1 %v3101_v20  ;;  %v3017_v4 = vld [vmem:[%s11983_s2 + $0x140] sm:$0xff] }
 0x58e   : > { %v4579_v5 = vperm.slane %v2874_v62, %v7511_v45  ;;  %v2811_v40 = vmul.f32 %v7394_v57, %v1962_v1  ;;  %v4087_v2 = vperm.slane %v2620_v24, %v12420_v15  ;;  %v4086_v23 = vsel %vm3796_vm11, %v4085_v3, %v4084_v21  ;;  %4823 = vmatpush.msra.mxu0 %v3017_v4  ;;  %v3097_v48 = vld [vmem:[%s11983_s2 + $0x3c0] sm:$0xff] }
 0x58f   : > { %v10242_v46 = vmul.f32 %v7394_v57, %v12716_v54  ;;  %v4552_v8 = vperm.slane %v2860_v59, %v12420_v15  ;;  %v4089_v32 = vperm.slane %v2621_v29, %v12418_v60  ;;  %v2675_v56 = vmul.f32 %v7394_v57, %v12717_v35  ;;  %4839 = vmatpush.msra.mxu1 %v3097_v48  ;;  %v5143_v50 = vld [vmem:[%s11985_s4 + $0x20] sm:$0xff]  ;;  %v2298_v54 = vpop.xlane.xlu0 %2297 }
 0x590   : > { %v10252_v25 = vsel %vm3792_vm10, %v4579_v5, %v4578_v17  ;;  %v4457_v9 = vperm.slane %v2811_v40, %v12396_v44  ;;  %v10261_v24 = vmul.f32 %v7394_v57, %v12719_v38  ;;  %v4172_v3 = vperm.slane %v2664_v11, %v7487_v63  ;;  %v12723_v11 = vld [vmem:[#allocation168_spill] sm:$0xff]  ;;  %5175 = vmatpush.msra.mxu2 %v5143_v50  ;;  %v3009_v59 = vld [vmem:[%s11983_s2 + $0x100] sm:$0xff] }
 0x591   : > { %12718 = vst [vmem:[#allocation78_spill] sm:$0xff] %v10252_v25  ;;  %vm12720_vm9 = vcmask 392512   ;;  %v10267_v17 = vsel %vm3800_vm12, %v4552_v8, %v10126_v14  ;;  %vm12722_vm7 = vcmask 458112   ;;  %v4191_v27 = vperm.slane %v2674_v10, %v7412_v39  ;;  %v3013_v14 = vld [vmem:[%s11983_s2 + $0x120] sm:$0xff]  ;;  %v5144_v8 = vld [vmem:[%s11985_s4 + $0x28] sm:$0xff] }
 0x592   : > { %v4169_v52 = vsel %vm12720_vm9, %v4168_v31, %v4167_v55  ;;  %12721 = vst [vmem:[#allocation290_spill] sm:$0xff] %v10267_v17  ;;  %v4190_v29 = vperm.slane %v2673_v19, %v12536_v61  ;;  %v10277_v62 = vsel %vm3796_vm11, %v4457_v9, %v10130_v34  ;;  %v3093_v31 = vld [vmem:[%s11983_s2 + $0x3a0] sm:$0xff]  ;;  %v4063_v55 = vsel %vm3812_vm15, %v4062_v42, %v4061_v30  ;;  %v12724_v42 = vld [vmem:[#allocation113_spill] sm:$0xff]  ;;  %v2340_v19 = vpop.xlane.xlu1 %2339 }
 0x593   : > { %v4171_v21 = vsel %vm12722_vm7, %v4170_v22, %v4169_v52  ;;  %v4088_v49 = vsel %vm3800_vm12, %v4087_v2, %v4086_v23  ;;  %v2676_v34 = vmul.f32 %v7394_v57, %v12723_v11  ;;  %v10292_v22 = vpop.xlane.xlu2 %1922  ;;  %4824 = vmatpush.msra.mxu0 %v3013_v14  ;;  %v3089_v1 = vld [vmem:[%s11983_s2 + $0x380] sm:$0xff]  ;;  %v10307_v30 = vmul.f32 %v7394_v57, %v12724_v42  ;;  %vm12738_vm7 = vmmov %vm12710_vm0 }
 0x594   : > { %v4091_v7 = vperm.slane %v10242_v46, %v12424_v16  ;;  %v4090_v10 = vsel %vm3804_vm13, %v4089_v32, %v4088_v49  ;;  %v4193_v47 = vperm.slane %v2675_v56, %v12538_v33  ;;  %4840 = vmatpush.msra.mxu1 %v3093_v31  ;;  %v4174_v5 = vperm.slane %v10261_v24, %v7459_v37  ;;  %v5139_v46 = vld [vmem:[%s11985_s4] sm:$0xff]  ;;  %v12728_v24 = vld [vmem:[#allocation172_spill] sm:$0xff] }
 0x595   : > { %vm12725_vm1 = vcmask 523712   ;;  %v2666_v2 = vmul.f32 %v7394_v57, %v12726_v41  ;;  %v2937_v23 = vmul.f32 %v7394_v57, %v2340_v19  ;;  %4825 = vmatpush.msra.mxu0 %v3009_v59  ;;  %v4192_v20 = vsel %vm3760_vm2, %v4191_v27, %v4190_v29  ;;  %v12727_v32 = vld [vmem:[#allocation167_spill] sm:$0xff]  ;;  %5176 = vmatpush.msra.mxu2 %v5139_v46  ;;  %v12729_v27 = vld [vmem:[#allocation158_spill] sm:$0xff] }
 0x596   : > { %v4173_v40 = vsel %vm12725_vm1, %v4172_v3, %v4171_v21  ;;  %v2677_v35 = vmul.f32 %v7394_v57, %v12727_v32  ;;  %v2923_v56 = vmul.f32 %v7394_v57, %v2298_v54  ;;  %4841 = vmatpush.msra.mxu1 %v3089_v1  ;;  %v3005_v9 = vld [vmem:[%s11983_s2 + $0xe0] sm:$0xff]  ;;  %vm5157_vm4 = vcmask 130048   ;;  %5195 = vmatpush.msra.mxu3 %v5144_v8  ;;  %v5140_v21 = vld [vmem:[%s11985_s4 + $0x8] sm:$0xff] }
 0x597   : > { %v10332_v4 = vld [vmem:[%s404_s17] sm:$0xff]  ;;  %v4195_v38 = vperm.slane %v2676_v34, %v7435_v26  ;;  %v2678_v3 = vmul.f32 %v7394_v57, %v12728_v24  ;;  %v4701_v52 = vperm.slane %v2937_v23, %v7459_v37  ;;  %4826 = vmatpush.msra.mxu0 %v3005_v9  ;;  %v10346_v29 = vmul.f32 %v7394_v57, %v12729_v27  ;;  %v12768_v8 = vld [vmem:[#allocation280_spill] sm:$0xff] }
 0x598   : > { %v3085_v48 = vld [vmem:[%s11983_s2 + $0x360] sm:$0xff]  ;;  %vm12730_vm5 = vcmask 195712   ;;  %v4674_v31 = vperm.slane %v2923_v56, %v12396_v44  ;;  %5839 = vmatmul.msk.f32.vlgmr.msra.gmra.mxu2 %vm5157_vm4, %v10332_v4  ;;  %v4176_v34 = vperm.slane %v2666_v2, %v7511_v45  ;;  %5196 = vmatpush.msra.mxu3 %v5140_v21  ;;  %vm12733_vm3 = vcmask 1048512  }
 0x599   : > { %v4194_v14 = vsel %vm12730_vm5, %v4193_v47, %v4192_v20  ;;  %4842 = vmatpush.msra.mxu1 %v3085_v48  ;;  %v3001_v50 = vld [vmem:[%s11983_s2 + $0xc0] sm:$0xff]  ;;  %v10360_v59 = vsel %vm12710_vm0, %v4701_v52, %v10181_v43  ;;  %v10369_v42 = vsel %vm12733_vm3, %v4064_v53, %v4063_v55  ;;  %v4197_v47 = vperm.slane %v2677_v35, %v7441_v18  ;;  %v5145_v53 = vld [vmem:[%s11985_s4 + $0x30] sm:$0xff]  ;;  %vm12758_vm3 = vmmov %vm12738_vm7 }
 0x59a   : > { %v12731_v49 = vld [vmem:[#allocation159_spill] sm:$0xff]  ;;  %12732 = vst [vmem:[#allocation37_spill] sm:$0xff] %v10360_v59  ;;  %4827 = vmatpush.msra.mxu0 %v3001_v50  ;;  %v10374_v19 = vsel %vm3796_vm11, %v4674_v31, %v10185_v51  ;;  %5840 = vmatmul.msk.f32.vlgmr.msra.gmra.mxu3 %vm5157_vm4, %v10332_v4  ;;  %vm12735_vm9 = vcmask 261312   ;;  %v4199_v2 = vperm.slane %v2678_v3, %v7452_v58  ;;  %v12737_v32 = vld [vmem:[#allocation118_spill] sm:$0xff]  ;;  %v10409_v9 = vpop.xlane.xlu1 %2111  ;;  %vm12741_vm1 = vcmask 326912  }
 0x59b   : > { %v2667_v11 = vmul.f32 %v7394_v57, %v12731_v49  ;;  %v3081_v1 = vld [vmem:[%s11983_s2 + $0x340] sm:$0xff]  ;;  %12734 = vst [vmem:[#allocation294_spill] sm:$0xff] %v10374_v19  ;;  %v4196_v55 = vsel %vm12735_vm9, %v4195_v38, %v4194_v14  ;;  %v10391_v23 = vpop.xlane.xlu2 %2153  ;;  %5215 = vmatpush.msrb.mxu2 %v5145_v53  ;;  %v10402_v20 = vsel %vm3808_vm14, %v4091_v7, %v4090_v10  ;;  %v1965_v10 = vpop.xlane.xlu0 %1964  ;;  %vm12742_vm5 = vcmask 392512  }
 0x59c   : > { %4843 = vmatpush.msra.mxu1 %v3081_v1  ;;  %v2997_v43 = vld [vmem:[%s11983_s2 + $0xa0] sm:$0xff]  ;;  %v10406_v35 = vmul.f32 %v7394_v57, %v12737_v32  ;;  %v4175_v56 = vsel %vm12738_vm7, %v4174_v5, %v4173_v40  ;;  %v4180_v38 = vperm.slane %v10346_v29, %v12420_v15  ;;  %v5141_v5 = vld [vmem:[%s11985_s4 + $0x10] sm:$0xff]  ;;  %v5146_v40 = vld [vmem:[%s11985_s4 + $0x38] sm:$0xff]  ;;  %v4198_v27 = vsel %vm12741_vm1, %v4197_v47, %v4196_v55 }
 0x59d   : > { %v12736_v51 = vld [vmem:[#allocation171_spill] sm:$0xff]  ;;  %4828 = vmatpush.msra.mxu0 %v2997_v43  ;;  %v4178_v24 = vperm.slane %v2667_v11, %v12396_v44  ;;  %v4177_v3 = vsel %vm3792_vm10, %v4176_v34, %v4175_v56  ;;  %v12740_v48 = vld [vmem:[#allocation170_spill] sm:$0xff]  ;;  %v2812_v29 = vmul.f32 %v7394_v57, %v1965_v10  ;;  %5216 = vmatpush.msrb.mxu2 %v5141_v5  ;;  %v12744_v47 = vld [vmem:[#allocation212_spill] sm:$0xff]  ;;  %vm12749_vm0 = vcmask 458112  }
 0x59e   : > { %v2679_v41 = vmul.f32 %v7394_v57, %v12736_v51  ;;  %v2993_v54 = vld [vmem:[%s11983_s2 + $0x80] sm:$0xff]  ;;  %4844 = vmatpush.msra.mxu1 %v3077_v0  ;;  %v2680_v21 = vmul.f32 %v7394_v57, %v12740_v48  ;;  %v4200_v50 = vsel %vm12742_vm5, %v4199_v2, %v4198_v27  ;;  %5235 = vmatpush.msrb.mxu3 %v5146_v40  ;;  %v5142_v1 = vld [vmem:[%s11985_s4 + $0x18] sm:$0xff]  ;;  %vm12762_vm9 = vcmask 195712  }
 0x59f   : > { %v3073_v46 = vld [vmem:[%s11983_s2 + $0x300] sm:$0xff]  ;;  %4829 = vmatpush.msra.mxu0 %v2993_v54  ;;  %v2722_v43 = vmul.f32 %v7394_v57, %v12744_v47  ;;  %v12745_v0 = vld [vmem:[#allocation213_spill] sm:$0xff]  ;;  %v4459_v55 = vperm.slane %v2812_v29, %v12420_v15  ;;  %v4179_v2 = vsel %vm3796_vm11, %v4178_v24, %v4177_v3  ;;  %vm12765_vm7 = vcmask 261312   ;;  %vm12773_vm5 = vmmov %vm12762_vm9 }
 0x5a0   : > { %v12739_v52 = vld [vmem:[#allocation163_spill] sm:$0xff]  ;;  %4845 = vmatpush.msra.mxu1 %v3073_v46  ;;  %v4201_v31 = vperm.slane %v2679_v41, %v12548_v28  ;;  %v2721_v53 = vmul.f32 %v7394_v57, %v12745_v0  ;;  %5841 = vmatmul.msk.f32.vlgmr.msrb.gmra.mxu2 %vm5157_vm4, %v10332_v4  ;;  %v12746_v54 = vld [vmem:[#allocation162_spill] sm:$0xff]  ;;  %v4203_v56 = vperm.slane %v2680_v21, %v7487_v63  ;;  %v12752_v0 = vld [vmem:[#allocation216_spill] sm:$0xff] }
 0x5a1   : > { %v10417_v7 = vmul.f32 %v7394_v57, %v12739_v52  ;;  %v2989_v14 = vld [vmem:[%s11983_s2 + $0x60] sm:$0xff]  ;;  %v10457_v46 = vmul.f32 %v7394_v57, %v12746_v54  ;;  %5236 = vmatpush.msrb.mxu3 %v5142_v1  ;;  %v12747_v52 = vld [vmem:[#allocation217_spill] sm:$0xff]  ;;  %v10467_v5 = vsel %vm3800_vm12, %v4459_v55, %v10277_v62  ;;  %v2724_v55 = vmul.f32 %v7394_v57, %v12752_v0 }
 0x5a2   : > { %v12743_v49 = vld [vmem:[#allocation175_spill] sm:$0xff]  ;;  %4830 = vmatpush.msra.mxu0 %v2989_v14  ;;  %v2723_v10 = vmul.f32 %v7394_v57, %v12747_v52  ;;  %12748 = vst [vmem:[#allocation295_spill] sm:$0xff] %v10467_v5  ;;  %5842 = vmatmul.msk.f32.vlgmr.msrb.gmra.mxu3 %vm5157_vm4, %v10332_v4  ;;  %v4202_v48 = vsel %vm12749_vm0, %v4201_v31, %v4200_v50  ;;  %v12750_v21 = vld [vmem:[#allocation174_spill] sm:$0xff]  ;;  %v10501_v1 = vpop.xlane.xlu1 %2342  ;;  %vm12756_vm4 = vcmask 523712   ;;  %vm12775_vm0 = vcmask 392512  }
 0x5a3   : > { %v2681_v11 = vmul.f32 %v7394_v57, %v12743_v49  ;;  %v3069_v34 = vld [vmem:[%s11983_s2 + $0x2e0] sm:$0xff]  ;;  %v4182_v62 = vperm.slane %v10417_v7, %v12418_v60  ;;  %v2682_v4 = vmul.f32 %v7394_v57, %v12750_v21  ;;  %v10486_v29 = vpop.xlane.xlu2 %1925  ;;  %v3038_v49 = vld [vmem:[%s11983_s2 + $0x1e8] sm:$0xff]  ;;  %v4181_v31 = vsel %vm3800_vm12, %v4180_v38, %v4179_v2  ;;  %v10511_v38 = vpop.xlane.xlu0 %2300 }
 0x5a4   : > { %4846 = vmatpush.msra.mxu1 %v3069_v34  ;;  %v2985_v51 = vld [vmem:[%s11983_s2 + $0x40] sm:$0xff]  ;;  %v12751_v34 = vld [vmem:[#allocation161_spill] sm:$0xff]  ;;  %v4284_v50 = vperm.slane %v2722_v43, %v7412_v39  ;;  %v4184_v47 = vperm.slane %v10457_v46, %v12424_v16  ;;  %v4204_v2 = vsel %vm12756_vm4, %v4203_v56, %v4202_v48  ;;  %v3034_v56 = vld [vmem:[%s11983_s2 + $0x1c8] sm:$0xff] }
 0x5a5   : > { %4831 = vmatpush.msra.mxu0 %v2985_v51  ;;  %v3065_v32 = vld [vmem:[%s11983_s2 + $0x2c0] sm:$0xff]  ;;  %v4205_v27 = vperm.slane %v2681_v11, %v7459_v37  ;;  %v10496_v7 = vmul.f32 %v7394_v57, %v12751_v34  ;;  %v4283_v11 = vperm.slane %v2721_v53, %v12536_v61  ;;  %v12755_v43 = vld [vmem:[#allocation173_spill] sm:$0xff]  ;;  %v4183_v46 = vsel %vm3804_vm13, %v4182_v62, %v4181_v31  ;;  %vm12779_vm4 = vmmov %vm12765_vm7 }
 0x5a6   : > { %4847 = vmatpush.msra.mxu1 %v3065_v32  ;;  %v2981_v24 = vld [vmem:[%s11983_s2 + $0x20] sm:$0xff]  ;;  %v12754_v32 = vld [vmem:[#allocation232_spill] sm:$0xff]  ;;  %v2683_v53 = vmul.f32 %v7394_v57, %v12755_v43  ;;  %v4207_v34 = vperm.slane %v2682_v4, %v7511_v45  ;;  %v4288_v4 = vperm.slane %v2724_v55, %v7435_v26 }
 0x5a7   : > { %v3061_v3 = vld [vmem:[%s11983_s2 + $0x2a0] sm:$0xff]  ;;  %4832 = vmatpush.msra.mxu0 %v2981_v24  ;;  %v2738_v52 = vmul.f32 %v7394_v57, %v12754_v32  ;;  %v4286_v24 = vperm.slane %v2723_v10, %v12538_v33  ;;  %v4206_v0 = vsel %vm12758_vm3, %v4205_v27, %v4204_v2  ;;  %v4285_v10 = vsel %vm3760_vm2, %v4284_v50, %v4283_v11  ;;  %v12761_v27 = vld [vmem:[#allocation220_spill] sm:$0xff]  ;;  %vm12782_vm3 = vmmov %vm12741_vm1 }
 0x5a8   : > { %v2977_v40 = vld [vmem:[%s11983_s2] sm:$0xff]  ;;  %4848 = vmatpush.msra.mxu1 %v3061_v3  ;;  %v2726_v31 = vmul.f32 %v7394_v57, %v12761_v27  ;;  %v3030_v11 = vld [vmem:[%s11983_s2 + $0x1a8] sm:$0xff]  ;;  %v4209_v55 = vperm.slane %v2683_v53, %v12396_v44  ;;  %v4208_v53 = vsel %vm3792_vm10, %v4207_v34, %v4206_v0 }
 0x5a9   : > { %v3057_v14 = vld [vmem:[%s11983_s2 + $0x280] sm:$0xff]  ;;  %4833 = vmatpush.msra.mxu0 %v2977_v40  ;;  %v4315_v32 = vperm.slane %v2738_v52, %v7412_v39  ;;  %v4287_v2 = vsel %vm12762_vm9, %v4286_v24, %v4285_v10  ;;  %v3026_v52 = vld [vmem:[%s11983_s2 + $0x188] sm:$0xff]  ;;  %vm12784_vm9 = vcmask 458112  }
 0x5aa   : > { %v12753_v51 = vld [vmem:[#allocation227_spill] sm:$0xff]  ;;  %4849 = vmatpush.msra.mxu1 %v3057_v14  ;;  %v12757_v3 = vld [vmem:[#allocation166_spill] sm:$0xff]  ;;  %v10576_v0 = vpop.xlane.xlu1 %2114 }
 0x5ab   : > { %v2737_v54 = vmul.f32 %v7394_v57, %v12753_v51  ;;  %4898 = vmatpush.msrb.mxu0 %v3038_v49  ;;  %v10520_v21 = vmul.f32 %v7394_v57, %v12757_v3  ;;  %v3053_v40 = vld [vmem:[%s11983_s2 + $0x260] sm:$0xff]  ;;  %v10557_v3 = vsel %vm3808_vm14, %v4184_v47, %v4183_v46  ;;  %v10564_v10 = vpop.xlane.xlu2 %2156  ;;  %v10583_v43 = vpop.xlane.xlu0 %1967 }
 0x5ac   : > { %v12759_v48 = vld [vmem:[#allocation215_spill] sm:$0xff]  ;;  %4850 = vmatpush.msra.mxu1 %v3053_v40  ;;  %v4292_v40 = vperm.slane %v2726_v31, %v7452_v58 }
 0x5ad   : > { %v2725_v62 = vmul.f32 %v7394_v57, %v12759_v48  ;;  %v12760_v14 = vld [vmem:[#allocation231_spill] sm:$0xff]  ;;  %4899 = vmatpush.msrb.mxu0 %v3034_v56  ;;  %v4314_v51 = vperm.slane %v2737_v54, %v12536_v61  ;;  %v12763_v56 = vld [vmem:[#allocation230_spill] sm:$0xff] }
 0x5ae   : > { %v2739_v49 = vmul.f32 %v7394_v57, %v12760_v14  ;;  %v3049_v50 = vld [vmem:[%s11983_s2 + $0x240] sm:$0xff]  ;;  %v2740_v24 = vmul.f32 %v7394_v57, %v12763_v56  ;;  %v3022_v14 = vld [vmem:[%s11983_s2 + $0x168] sm:$0xff] }
 0x5af   : > { %4851 = vmatpush.msra.mxu1 %v3049_v50  ;;  %4900 = vmatpush.msrb.mxu0 %v3030_v11  ;;  %v3045_v54 = vld [vmem:[%s11983_s2 + $0x220] sm:$0xff]  ;;  %v4290_v47 = vperm.slane %v2725_v62, %v7441_v18  ;;  %v4289_v50 = vsel %vm12765_vm7, %v4288_v4, %v4287_v2  ;;  %v4316_v41 = vsel %vm3760_vm2, %v4315_v32, %v4314_v51  ;;  %v3102_v4 = vld [vmem:[%s11983_s2 + $0x3e8] sm:$0xff]  ;;  %vm12788_vm7 = vmmov %vm12775_vm0 }
 0x5b0   : > { %v3041_v48 = vld [vmem:[%s11983_s2 + $0x200] sm:$0xff]  ;;  %v4317_v46 = vperm.slane %v2739_v49, %v12538_v33  ;;  %v4210_v62 = vsel %vm3796_vm11, %v4209_v55, %v4208_v53  ;;  %v12769_v2 = vld [vmem:[#allocation176_spill] sm:$0xff]  ;;  %v4319_v55 = vperm.slane %v2740_v24, %v7435_v26 }
 0x5b1   : > { %v12764_v27 = vld [vmem:[#allocation235_spill] sm:$0xff]  ;;  %4852 = vmatpush.msra.mxu1 %v3045_v54  ;;  %4901 = vmatpush.msrb.mxu0 %v3026_v52  ;;  %v2786_v54 = vmul.f32 %v7394_v57, %v12768_v8  ;;  %v10595_v31 = vmul.f32 %v7394_v57, %v12769_v2  ;;  %v12770_v51 = vld [vmem:[#allocation178_spill] sm:$0xff] }
 0x5b2   : > { %v2741_v34 = vmul.f32 %v7394_v57, %v12764_v27  ;;  %v12766_v11 = vld [vmem:[#allocation219_spill] sm:$0xff]  ;;  %v2684_v32 = vmul.f32 %v7394_v57, %v12770_v51  ;;  %v12771_v52 = vld [vmem:[#allocation234_spill] sm:$0xff]  ;;  %v12774_v51 = vld [vmem:[#allocation177_spill] sm:$0xff] }
 0x5b3   : > { %v2727_v56 = vmul.f32 %v7394_v57, %v12766_v11  ;;  %v12767_v49 = vld [vmem:[#allocation275_spill] sm:$0xff]  ;;  %4853 = vmatpush.msra.mxu1 %v3041_v48  ;;  %4902 = vmatpush.msrb.mxu0 %v3022_v14  ;;  %v2742_v53 = vmul.f32 %v7394_v57, %v12771_v52  ;;  %v12772_v48 = vld [vmem:[#allocation218_spill] sm:$0xff]  ;;  %v4291_v11 = vsel %vm12741_vm1, %v4290_v47, %v4289_v50  ;;  %v12778_v50 = vld [vmem:[#allocation233_spill] sm:$0xff]  ;;  %v10663_v25 = vpop.xlane.xlu0 %2303 }
 0x5b4   : > { %v2785_v27 = vmul.f32 %v7394_v57, %v12767_v49  ;;  %v3018_v8 = vld [vmem:[%s11983_s2 + $0x148] sm:$0xff]  ;;  %v2728_v14 = vmul.f32 %v7394_v57, %v12772_v48  ;;  %v4318_v49 = vsel %vm12773_vm5, %v4317_v46, %v4316_v41  ;;  %v4321_v2 = vperm.slane %v2741_v34, %v7441_v18  ;;  %vm12793_vm1 = vmmov %vm12773_vm5 }
 0x5b5   : > { %4918 = vmatpush.msrb.mxu1 %v3102_v4  ;;  %4903 = vmatpush.msrb.mxu0 %v3018_v8  ;;  %v3098_v24 = vld [vmem:[%s11983_s2 + $0x3c8] sm:$0xff]  ;;  %v10615_v4 = vmul.f32 %v7394_v57, %v12774_v51  ;;  %v4294_v52 = vperm.slane %v2727_v56, %v12548_v28  ;;  %v4293_v59 = vsel %vm12775_vm0, %v4292_v40, %v4291_v11  ;;  %vm12794_vm5 = vcmask 589312   ;;  %vm12795_vm0 = vmmov %vm12784_vm9 }
 0x5b6   : > { %v12776_v48 = vld [vmem:[#allocation279_spill] sm:$0xff]  ;;  %v2743_v8 = vmul.f32 %v7394_v57, %v12778_v50  ;;  %v4407_v51 = vperm.slane %v2785_v27, %v12536_v61  ;;  %v4408_v56 = vperm.slane %v2786_v54, %v7412_v39  ;;  %v4320_v61 = vsel %vm12779_vm4, %v4319_v55, %v4318_v49  ;;  %v12780_v39 = vld [vmem:[#allocation238_spill] sm:$0xff]  ;;  %v10644_v54 = vpop.xlane.xlu2 %1928  ;;  %v10655_v49 = vpop.xlane.xlu1 %2345 }
 0x5b7   : > { %v2787_v47 = vmul.f32 %v7394_v57, %v12776_v48  ;;  %4919 = vmatpush.msrb.mxu1 %v3098_v24  ;;  %v3014_v41 = vld [vmem:[%s11983_s2 + $0x128] sm:$0xff]  ;;  %v4211_v48 = vperm.slane %v2684_v32, %v12420_v15  ;;  %v2744_v27 = vmul.f32 %v7394_v57, %v12780_v39  ;;  %12781 = vst [vmem:[#allocation116_spill] sm:$0xff] %v10644_v54 }
 0x5b8   : > { %v12777_v46 = vld [vmem:[#allocation223_spill] sm:$0xff]  ;;  %4904 = vmatpush.msrb.mxu0 %v3014_v41  ;;  %v4296_v5 = vperm.slane %v2728_v14, %v7487_v63  ;;  %v4322_v32 = vsel %vm12782_vm3, %v4321_v2, %v4320_v61  ;;  %v4295_v39 = vsel %vm12784_vm9, %v4294_v52, %v4293_v59  ;;  %v4325_v2 = vperm.slane %v2743_v8, %v12548_v28  ;;  %v12787_v61 = vld [vmem:[#allocation237_spill] sm:$0xff] }
 0x5b9   : > { %v2729_v34 = vmul.f32 %v7394_v57, %v12777_v46  ;;  %v3094_v40 = vld [vmem:[%s11983_s2 + $0x3a8] sm:$0xff]  ;;  %v4323_v46 = vperm.slane %v2742_v53, %v7452_v58  ;;  %v12783_v53 = vld [vmem:[#allocation278_spill] sm:$0xff]  ;;  %v4410_v54 = vperm.slane %v2787_v47, %v12538_v33  ;;  %v4409_v59 = vsel %vm3760_vm2, %v4408_v56, %v4407_v51  ;;  %v12789_v51 = vld [vmem:[#allocation221_spill] sm:$0xff] }
 0x5ba   : > { %v3010_v11 = vld [vmem:[%s11983_s2 + $0x108] sm:$0xff]  ;;  %4920 = vmatpush.msrb.mxu1 %v3094_v40  ;;  %v2788_v55 = vmul.f32 %v7394_v57, %v12783_v53  ;;  %v12785_v40 = vld [vmem:[#allocation222_spill] sm:$0xff]  ;;  %v4212_v52 = vsel %vm3800_vm12, %v4211_v48, %v4210_v62  ;;  %v2731_v56 = vmul.f32 %v7394_v57, %v12789_v51  ;;  %vm12790_vm2 = vcmask 523712  }
 0x5bb   : > { %v3090_v24 = vld [vmem:[%s11983_s2 + $0x388] sm:$0xff]  ;;  %4905 = vmatpush.msrb.mxu0 %v3010_v11  ;;  %v2730_v19 = vmul.f32 %v7394_v57, %v12785_v40  ;;  %v4298_v14 = vperm.slane %v2729_v34, %v7459_v37  ;;  %v2745_v11 = vmul.f32 %v7394_v57, %v12787_v61  ;;  %v4324_v47 = vsel %vm12788_vm7, %v4323_v46, %v4322_v32  ;;  %v12791_v53 = vld [vmem:[#allocation282_spill] sm:$0xff]  ;;  %v12796_v61 = vld [vmem:[#allocation241_spill] sm:$0xff] }
 0x5bc   : > { %v3006_v41 = vld [vmem:[%s11983_s2 + $0xe8] sm:$0xff]  ;;  %4921 = vmatpush.msrb.mxu1 %v3090_v24  ;;  %v4327_v34 = vperm.slane %v2744_v27, %v7487_v63  ;;  %v4297_v24 = vsel %vm12790_vm2, %v4296_v5, %v4295_v39  ;;  %v4411_v32 = vsel %vm12793_vm1, %v4410_v54, %v4409_v59  ;;  %v4326_v39 = vsel %vm12795_vm0, %v4325_v2, %v4324_v47  ;;  %v12797_v2 = vld [vmem:[#allocation226_spill] sm:$0xff]  ;;  %vm12798_vm4 = vmmov %vm12790_vm2 }
 0x5bd   : > { %v12786_v17 = vld [vmem:[#allocation283_spill] sm:$0xff]  ;;  %4906 = vmatpush.msrb.mxu0 %v3006_v41  ;;  %v4412_v41 = vperm.slane %v2788_v55, %v7435_v26  ;;  %v4300_v48 = vperm.slane %v2730_v19, %v7511_v45  ;;  %v12792_v46 = vld [vmem:[#allocation236_spill] sm:$0xff]  ;;  %v4299_v5 = vsel %vm12794_vm5, %v4298_v14, %v4297_v24  ;;  %v4329_v55 = vperm.slane %v2745_v11, %v7459_v37  ;;  %vm12806_vm7 = vmmov %vm12794_vm5 }
 0x5be   : > { %v2789_v50 = vmul.f32 %v7394_v57, %v12786_v17  ;;  %v3086_v33 = vld [vmem:[%s11983_s2 + $0x368] sm:$0xff]  ;;  %v4213_v17 = vperm.slane %v10615_v4, %v12418_v60  ;;  %v2790_v4 = vmul.f32 %v7394_v57, %v12791_v53  ;;  %v2746_v27 = vmul.f32 %v7394_v57, %v12792_v46  ;;  %v12801_v53 = vld [vmem:[#allocation286_spill] sm:$0xff]  ;;  %vm12815_vm1 = vmmov %vm12795_vm0 }
 0x5bf   : > { %4922 = vmatpush.msrb.mxu1 %v3086_v33  ;;  %v3002_v8 = vld [vmem:[%s11983_s2 + $0xc8] sm:$0xff]  ;;  %v2747_v19 = vmul.f32 %v7394_v57, %v12796_v61  ;;  %v2732_v11 = vmul.f32 %v7394_v57, %v12797_v2  ;;  %v4328_v59 = vsel %vm12798_vm4, %v4327_v34, %v4326_v39  ;;  %v12799_v33 = vld [vmem:[#allocation281_spill] sm:$0xff]  ;;  %v4302_v24 = vperm.slane %v2731_v56, %v12396_v44  ;;  %v10730_v34 = vpop.xlane.xlu1 %2117  ;;  %v10737_v56 = vpop.xlane.xlu0 %1970  ;;  %vm12818_vm5 = vmmov %vm12798_vm4 }
 0x5c0   : > { %4907 = vmatpush.msrb.mxu0 %v3002_v8  ;;  %v3082_v62 = vld [vmem:[%s11983_s2 + $0x348] sm:$0xff]  ;;  %v4414_v40 = vperm.slane %v2789_v50, %v7441_v18  ;;  %v10713_v14 = vsel %vm3804_vm13, %v4213_v17, %v4212_v52  ;;  %v2791_v47 = vmul.f32 %v7394_v57, %v12799_v33  ;;  %v10720_v8 = vpop.xlane.xlu2 %2159  ;;  %v4416_v17 = vperm.slane %v2790_v4, %v7452_v58  ;;  %v12805_v4 = vld [vmem:[#allocation225_spill] sm:$0xff]  ;;  %vm12823_vm0 = vmmov %vm12806_vm7 }
 0x5c1   : > { %4923 = vmatpush.msrb.mxu1 %v3082_v62  ;;  %v2998_v26 = vld [vmem:[%s11983_s2 + $0xa8] sm:$0xff]  ;;  %vm12800_vm3 = vcmask 261312   ;;  %v2792_v62 = vmul.f32 %v7394_v57, %v12801_v53  ;;  %v4301_v46 = vsel %vm3792_vm10, %v4300_v48, %v4299_v5  ;;  %vm12803_vm9 = vcmask 326912   ;;  %v12808_v33 = vld [vmem:[#allocation285_spill] sm:$0xff] }
 0x5c2   : > { %4908 = vmatpush.msrb.mxu0 %v2998_v26  ;;  %v3078_v54 = vld [vmem:[%s11983_s2 + $0x328] sm:$0xff]  ;;  %v4413_v52 = vsel %vm12800_vm3, %v4412_v41, %v4411_v32  ;;  %v4331_v26 = vperm.slane %v2746_v27, %v7511_v45  ;;  %v2733_v32 = vmul.f32 %v7394_v57, %v12805_v4  ;;  %v4333_v48 = vperm.slane %v2747_v19, %v12396_v44 }
 0x5c3   : > { %v2994_v18 = vld [vmem:[%s11983_s2 + $0x88] sm:$0xff]  ;;  %4924 = vmatpush.msrb.mxu1 %v3078_v54  ;;  %v4415_v54 = vsel %vm12803_vm9, %v4414_v40, %v4413_v52  ;;  %v12807_v40 = vld [vmem:[#allocation181_spill] sm:$0xff]  ;;  %v4418_v2 = vperm.slane %v2791_v47, %v12548_v28  ;;  %v2793_v52 = vmul.f32 %v7394_v57, %v12808_v33  ;;  %v4303_v19 = vsel %vm3796_vm11, %v4302_v24, %v4301_v46 }
 0x5c4   : > { %v3074_v50 = vld [vmem:[%s11983_s2 + $0x308] sm:$0xff]  ;;  %4909 = vmatpush.msrb.mxu0 %v2994_v18  ;;  %v4330_v18 = vsel %vm12806_vm7, %v4329_v55, %v4328_v59  ;;  %v2687_v5 = vmul.f32 %v7394_v57, %v12807_v40  ;;  %vm12810_vm2 = vcmask 392512   ;;  %vm12827_vm4 = vcmask 1042434  }
 0x5c5   : > { %v2990_v51 = vld [vmem:[%s11983_s2 + $0x68] sm:$0xff]  ;;  %4925 = vmatpush.msrb.mxu1 %v3074_v50  ;;  %v4304_v50 = vperm.slane %v2732_v11, %v12420_v15  ;;  %v4417_v53 = vsel %vm12810_vm2, %v4416_v17, %v4415_v54  ;;  %v4332_v4 = vsel %vm3792_vm10, %v4331_v26, %v4330_v18  ;;  %v12813_v54 = vld [vmem:[#allocation229_spill] sm:$0xff]  ;;  %vm12829_vm3 = vcmask 1048512  }
 0x5c6   : > { %v12802_v39 = vld [vmem:[#allocation240_spill] sm:$0xff]  ;;  %4910 = vmatpush.msrb.mxu0 %v2990_v51  ;;  %v12809_v59 = vld [vmem:[#allocation239_spill] sm:$0xff]  ;;  %v2735_v26 = vmul.f32 %v7394_v57, %v12813_v54  ;;  %v4334_v18 = vsel %vm3796_vm11, %v4333_v48, %v4332_v4  ;;  %vm12831_vm9 = vmmov %vm12829_vm3 }
 0x5c7   : > { %v2748_v61 = vmul.f32 %v7394_v57, %v12802_v39  ;;  %v12804_v58 = vld [vmem:[#allocation180_spill] sm:$0xff]  ;;  %v2749_v51 = vmul.f32 %v7394_v57, %v12809_v59  ;;  %v4420_v39 = vperm.slane %v2792_v62, %v7487_v63  ;;  %v4305_v33 = vsel %vm3800_vm12, %v4304_v50, %v4303_v19  ;;  %v12817_v4 = vld [vmem:[#allocation243_spill] sm:$0xff]  ;;  %v10800_v50 = vpop.xlane.xlu1 %2348  ;;  %vm12832_vm7 = vmmov %vm12829_vm3 }
 0x5c8   : > { %v10741_v41 = vmul.f32 %v7394_v57, %v12804_v58  ;;  %v3070_v27 = vld [vmem:[%s11983_s2 + $0x2e8] sm:$0xff]  ;;  %v4419_v59 = vsel %vm12815_vm1, %v4418_v2, %v4417_v53  ;;  %v2751_v54 = vmul.f32 %v7394_v57, %v12817_v4  ;;  %v10810_v53 = vpop.xlane.xlu0 %2306  ;;  %vm12833_vm2 = vmmov %vm12829_vm3 }
 0x5c9   : > { %4926 = vmatpush.msrb.mxu1 %v3070_v27  ;;  %v2986_v55 = vld [vmem:[%s11983_s2 + $0x48] sm:$0xff]  ;;  %v4335_v58 = vperm.slane %v2748_v61, %v12420_v15  ;;  %v4306_v61 = vperm.slane %v2733_v32, %v12418_v60  ;;  %v4217_v32 = vperm.slane %v2687_v5, %v7558_v36  ;;  %v4337_v48 = vperm.slane %v2749_v51, %v12418_v60  ;;  %vm12834_vm1 = vmmov %vm12833_vm2 }
 0x5ca   : > { %4911 = vmatpush.msrb.mxu0 %v2986_v55  ;;  %v3066_v28 = vld [vmem:[%s11983_s2 + $0x2c8] sm:$0xff]  ;;  %v4422_v55 = vperm.slane %v2793_v52, %v7459_v37  ;;  %v4341_v4 = vperm.slane %v2751_v54, %v7558_v36  ;;  %v2798_v54 = vmul.f32 %v7394_v57, %v10292_v22  ;;  %v12825_v22 = vperm.slane %v10307_v30, %v7558_v36 }
 0x5cb   : > { %v12811_v11 = vld [vmem:[#allocation224_spill] sm:$0xff]  ;;  %4927 = vmatpush.msrb.mxu1 %v3066_v28  ;;  %v12816_v28 = vld [vmem:[#allocation289_spill] sm:$0xff]  ;;  %v4336_v5 = vsel %vm3800_vm12, %v4335_v58, %v4334_v18  ;;  %v12821_v58 = vperm.slane %v10595_v31, %v12424_v16  ;;  %v12822_v18 = vld [vmem:[#allocation242_spill] sm:$0xff]  ;;  %v12828_v30 = vperm.slane %v10406_v35, %v7668_v6 }
 0x5cc   : > { %v2734_v47 = vmul.f32 %v7394_v57, %v12811_v11  ;;  %v12812_v24 = vld [vmem:[#allocation244_spill] sm:$0xff]  ;;  %v2795_v11 = vmul.f32 %v7394_v57, %v12816_v28 }
 0x5cd   : > { %v2750_v46 = vmul.f32 %v7394_v57, %v12812_v24  ;;  %v2982_v63 = vld [vmem:[%s11983_s2 + $0x28] sm:$0xff]  ;;  %v10793_v24 = vpop.xlane.xlu2 %1973 }
 0x5ce   : > { %v3062_v17 = vld [vmem:[%s11983_s2 + $0x2a8] sm:$0xff]  ;;  %4912 = vmatpush.msrb.mxu0 %v2982_v63  ;;  %v4421_v63 = vsel %vm12818_vm5, %v4420_v39, %v4419_v59  ;;  %v4308_v2 = vperm.slane %v2734_v47, %v12424_v16  ;;  %v4307_v39 = vsel %vm3804_vm13, %v4306_v61, %v4305_v33  ;;  %v2752_v61 = vmul.f32 %v7394_v57, %v12822_v18  ;;  %vm12835_vm5 = vmmov %vm12827_vm4 }
 0x5cf   : > { %v2978_v62 = vld [vmem:[%s11983_s2 + $0x8] sm:$0xff]  ;;  %4928 = vmatpush.msrb.mxu1 %v3062_v17  ;;  %v4339_v51 = vperm.slane %v2750_v46, %v12424_v16  ;;  %v4310_v17 = vperm.slane %v2735_v26, %v7558_v36  ;;  %v4216_v46 = vsel %vm3808_vm14, %v12821_v58, %v10713_v14  ;;  %v4423_v26 = vsel %vm12823_vm0, %v4422_v55, %v4421_v63  ;;  %vm12843_vm0 = vmmov %vm12834_vm1 }
 0x5d0   : > { %v12814_v27 = vld [vmem:[#allocation284_spill] sm:$0xff]  ;;  %4913 = vmatpush.msrb.mxu0 %v2978_v62  ;;  %v4219_v33 = vperm.slane %v10741_v41, %v7668_v6  ;;  %v4218_v28 = vsel %vm3812_vm15, %v4217_v32, %v4216_v46  ;;  %v4309_v55 = vsel %vm3808_vm14, %v4308_v2, %v4307_v39  ;;  %v12824_v63 = vld [vmem:[#allocation287_spill] sm:$0xff]  ;;  %v4343_v2 = vperm.slane %v2752_v61, %v7668_v6 }
 0x5d1   : > { %v2794_v40 = vmul.f32 %v7394_v57, %v12814_v27  ;;  %v3058_v37 = vld [vmem:[%s11983_s2 + $0x288] sm:$0xff]  ;;  %v4311_v41 = vsel %vm3812_vm15, %v4310_v17, %v4309_v55  ;;  %v2861_v39 = vmul.f32 %v7394_v57, %v10409_v9 }
 0x5d2   : > { %v12819_v52 = vld [vmem:[#allocation228_spill] sm:$0xff]  ;;  %4929 = vmatpush.msrb.mxu1 %v3058_v37  ;;  %v4338_v37 = vsel %vm3804_vm13, %v4337_v48, %v4336_v5  ;;  %v4220_v18 = vsel %vm12832_vm7, %v4219_v33, %v4218_v28  ;;  %v2924_v28 = vmul.f32 %v7394_v57, %v10511_v38  ;;  %v2813_v38 = vmul.f32 %v7394_v57, %v10583_v43 }
 0x5d3   : > { %v2736_v19 = vmul.f32 %v7394_v57, %v12819_v52  ;;  %v4424_v62 = vperm.slane %v2794_v40, %v7511_v45  ;;  %v12820_v27 = vld [vmem:[#allocation288_spill] sm:$0xff]  ;;  %v4426_v40 = vperm.slane %v2795_v11, %v12396_v44  ;;  %v4340_v11 = vsel %vm3808_vm14, %v4339_v51, %v4338_v37 }
 0x5d4   : > { %v2796_v59 = vmul.f32 %v7394_v57, %v12820_v27  ;;  %v3054_v47 = vld [vmem:[%s11983_s2 + $0x268] sm:$0xff]  ;;  %v2797_v52 = vmul.f32 %v7394_v57, %v12824_v63  ;;  %v2875_v51 = vmul.f32 %v7394_v57, %v10391_v23  ;;  %v12826_v27 = vperm.slane %v10496_v7, %v7558_v36 }
 0x5d5   : > { %4930 = vmatpush.msrb.mxu1 %v3054_v47  ;;  %v3050_v31 = vld [vmem:[%s11983_s2 + $0x248] sm:$0xff]  ;;  %v4312_v14 = vperm.slane %v2736_v19, %v7668_v6  ;;  %v4425_v48 = vsel %vm3792_vm10, %v4424_v62, %v4423_v26  ;;  %v10856_v17 = vpop.xlane.xlu2 %2309  ;;  %v4094_v62 = vsel %vm3812_vm15, %v12825_v22, %v10402_v20  ;;  %v4782_v23 = vsel %vm12827_vm4, %v10369_v42, %v10089_v13  ;;  %v2163_v47 = vpop.xlane.xlu1 %2162  ;;  %vm12844_vm4 = vmmov %vm12843_vm0 }
 0x5d6   : > { %v4428_v32 = vperm.slane %v2796_v59, %v12420_v15  ;;  %v3046_v19 = vld [vmem:[%s11983_s2 + $0x228] sm:$0xff]  ;;  %v4427_v5 = vsel %vm3796_vm11, %v4426_v40, %v4425_v48  ;;  %v4187_v59 = vsel %vm3812_vm15, %v12826_v27, %v10557_v3  ;;  %v4342_v9 = vsel %vm3812_vm15, %v4341_v4, %v4340_v11  ;;  %v2121_v42 = vpop.xlane.xlu0 %2120 }
 0x5d7   : > { %4931 = vmatpush.msrb.mxu1 %v3050_v31  ;;  %v3042_v58 = vld [vmem:[%s11983_s2 + $0x208] sm:$0xff]  ;;  %v4096_v20 = vsel %vm12829_vm3, %v12828_v30, %v4094_v62  ;;  %v12830_v7 = vperm.slane %v10520_v21, %v7668_v6  ;;  %v4430_v46 = vperm.slane %v2797_v52, %v12418_v60  ;;  %v2799_v13 = vmul.f32 %v7394_v57, %v10486_v29 }
 0x5d8   : > { %v4313_v61 = vsel %vm12833_vm2, %v4312_v14, %v4311_v41  ;;  %v4429_v35 = vsel %vm3800_vm12, %v4428_v32, %v4427_v5  ;;  %v4432_v26 = vperm.slane %v2798_v54, %v12424_v16  ;;  %v4581_v40 = vperm.slane %v2875_v51, %v12396_v44  ;;  %v12837_v32 = vld [vmem:[#allocation290_spill] sm:$0xff]  ;;  %v12838_v5 = vld [vmem:[#allocation116_spill] sm:$0xff]  ;;  %vm12848_vm2 = vmmov %vm12843_vm0 }
 0x5d9   : > { %4932 = vmatpush.msrb.mxu1 %v3046_v19  ;;  %v4189_v3 = vsel %vm12831_vm9, %v12830_v7, %v4187_v59  ;;  %v4554_v21 = vperm.slane %v2861_v39, %v12418_v60  ;;  %v10894_v4 = vmul.f32 %v7394_v57, %v10501_v1  ;;  %v4344_v29 = vsel %vm12834_vm1, %v4343_v2, %v4342_v9 }
 0x5da   : > { %v4794_v37 = vsel %vm12835_vm5, %v4096_v20, %v10092_v12  ;;  %v4784_v33 = vsel %vm4783_vm6, %v4189_v3, %v4782_v23  ;;  %v2876_v31 = vmul.f32 %v7394_v57, %v10564_v10  ;;  %v4431_v14 = vsel %vm3804_vm13, %v4430_v46, %v4429_v35  ;;  %v12836_v10 = vld [vmem:[#allocation78_spill] sm:$0xff] }
 0x5db   : > { %4933 = vmatpush.msrb.mxu1 %v3042_v58  ;;  %v4434_v55 = vperm.slane %v2799_v13, %v7558_v36  ;;  %v10907_v1 = vsel %vm4785_vm8, %v4313_v61, %v4784_v33  ;;  %v4795_v11 = vsel %vm4783_vm6, %v4220_v18, %v4794_v37  ;;  %v4433_v63 = vsel %vm3808_vm14, %v4432_v26, %v4431_v14  ;;  %v12839_v3 = vld [vmem:[#allocation294_spill] sm:$0xff]  ;;  %v12840_v26 = vld [vmem:[#allocation295_spill] sm:$0xff]  ;;  %vm12841_vm6 = vmmov %vm12834_vm1 }
 0x5dc   : > { %v2862_v12 = vmul.f32 %v7394_v57, %v10576_v0  ;;  %v10916_v52 = vsel %vm4785_vm8, %v4344_v29, %v4795_v11  ;;  %v4582_v41 = vsel %vm3796_vm11, %v4581_v40, %v12836_v10  ;;  %v4555_v48 = vsel %vm3804_vm13, %v4554_v21, %v12837_v32  ;;  %vm12842_vm8 = vmmov %vm12834_vm1 }
 0x5dd   : > { %v4703_v54 = vperm.slane %v10894_v4, %v7511_v45  ;;  %v2814_v19 = vmul.f32 %v7394_v57, %v10737_v56  ;;  %v2166_v2 = vpop.xlane.xlu2 %2165  ;;  %v4676_v0 = vperm.slane %v2924_v28, %v12420_v15  ;;  %v4583_v43 = vperm.slane %v2876_v31, %v12420_v15  ;;  %v1977_v22 = vpop.xlane.xlu1 %1976 }
 0x5de   : > { %v2800_v51 = vmul.f32 %v7394_v57, %v12838_v5  ;;  %v2815_v39 = vmul.f32 %v7394_v57, %v10793_v24  ;;  %v4435_v62 = vsel %vm3812_vm15, %v4434_v55, %v4433_v63  ;;  %v2925_v27 = vmul.f32 %v7394_v57, %v10663_v25  ;;  %v2352_v23 = vpop.xlane.xlu0 %2351 }
 0x5df   : > { %v2877_v56 = vmul.f32 %v7394_v57, %v10720_v8  ;;  %v2816_v59 = vmul.f32 %v7394_v57, %v1977_v22  ;;  %v4556_v9 = vperm.slane %v2862_v12, %v12424_v16  ;;  %v4461_v58 = vperm.slane %v2813_v38, %v12418_v60 }
 0x5e0   : > { %v2863_v30 = vmul.f32 %v7394_v57, %v10730_v34  ;;  %v2878_v24 = vmul.f32 %v7394_v57, %v2163_v47  ;;  %v4463_v20 = vperm.slane %v2814_v19, %v12424_v16  ;;  %v2926_v25 = vmul.f32 %v7394_v57, %v10810_v53 }
 0x5e1   : > { %v2864_v7 = vmul.f32 %v7394_v57, %v2121_v42  ;;  %v2879_v8 = vmul.f32 %v7394_v57, %v2166_v2  ;;  %v4677_v46 = vsel %vm3800_vm12, %v4676_v0, %v12839_v3  ;;  %v4584_v13 = vsel %vm3800_vm12, %v4583_v43, %v4582_v41 }
 0x5e2   : > { %v4436_v18 = vperm.slane %v2800_v51, %v7668_v6  ;;  %v4465_v34 = vperm.slane %v2815_v39, %v7558_v36  ;;  %v4678_v47 = vperm.slane %v2925_v27, %v12418_v60  ;;  %v4585_v61 = vperm.slane %v2877_v56, %v12418_v60 }
 0x5e3   : > { %v2927_v53 = vmul.f32 %v7394_v57, %v10856_v17  ;;  %v4467_v42 = vperm.slane %v2816_v59, %v7668_v6  ;;  %v4557_v35 = vsel %vm3808_vm14, %v4556_v9, %v4555_v48  ;;  %v4462_v40 = vsel %vm3804_vm13, %v4461_v58, %v12840_v26  ;;  %v3099_v26 = vld [vmem:[%s11983_s2 + $0x3d0] sm:$0xff] }
 0x5e4   : > { %v4558_v21 = vperm.slane %v2863_v30, %v7558_v36  ;;  %v4587_v29 = vperm.slane %v2878_v24, %v12424_v16  ;;  %v4464_v37 = vsel %vm3808_vm14, %v4463_v20, %v4462_v40  ;;  %v4680_v33 = vperm.slane %v2926_v25, %v12424_v16  ;;  %v3039_v20 = vld [vmem:[%s11983_s2 + $0x1f0] sm:$0xff] }
 0x5e5   : > { %v4560_v28 = vperm.slane %v2864_v7, %v7668_v6  ;;  %v4589_v31 = vperm.slane %v2879_v8, %v7558_v36  ;;  %v2169_v17 = vpop.xlane.xlu2 %2168  ;;  %v4437_v14 = vsel %vm12841_vm6, %v4436_v18, %v4435_v62  ;;  %v2939_v55 = vmul.f32 %v7394_v57, %v10655_v49  ;;  %v2355_v12 = vpop.xlane.xlu1 %2354  ;;  %v12851_v8 = vld [vmem:[#allocation37_spill] sm:$0xff] }
 0x5e6   : > { %v4466_v11 = vsel %vm3812_vm15, %v4465_v34, %v4464_v37  ;;  %v2880_v63 = vmul.f32 %v7394_v57, %v2169_v17  ;;  %v4679_v38 = vsel %vm3804_vm13, %v4678_v47, %v4677_v46  ;;  %v4586_v10 = vsel %vm3804_vm13, %v4585_v61, %v4584_v13  ;;  %v2313_v48 = vpop.xlane.xlu0 %2312  ;;  %v3031_v34 = vld [vmem:[%s11983_s2 + $0x1b0] sm:$0xff] }
 0x5e7   : > { %v4682_v41 = vperm.slane %v2927_v53, %v7558_v36  ;;  %v4468_v32 = vsel %vm12842_vm8, %v4467_v42, %v4466_v11  ;;  %v4559_v19 = vsel %vm3812_vm15, %v4558_v21, %v4557_v35  ;;  %v4588_v2 = vsel %vm3808_vm14, %v4587_v29, %v4586_v10  ;;  %v3023_v53 = vld [vmem:[%s11983_s2 + $0x170] sm:$0xff] }
 0x5e8   : > { %v4591_v49 = vperm.slane %v2880_v63, %v7668_v6  ;;  %v2928_v0 = vmul.f32 %v7394_v57, %v2313_v48  ;;  %v2940_v43 = vmul.f32 %v7394_v57, %v10800_v50  ;;  %v4681_v5 = vsel %vm3808_vm14, %v4680_v33, %v4679_v38  ;;  %v3019_v35 = vld [vmem:[%s11983_s2 + $0x150] sm:$0xff]  ;;  %v5337_v63 = vld [vmem:[%s11987_s6 + $0x2e0] sm:$0xff]  ;;  %v11089_v38 = vpop.f32.mrf.mxu2  ;;  %v11100_v48 = vpop.f32.mrf.mxu3 }
 0x5e9   : > { %v4561_v51 = vsel %vm12843_vm0, %v4560_v28, %v4559_v19  ;;  %v4590_v39 = vsel %vm3812_vm15, %v4589_v31, %v4588_v2  ;;  %v2941_v22 = vmul.f32 %v7394_v57, %v2352_v23  ;;  %vm12845_vm3 = vcmask 1045509   ;;  %v3015_v40 = vld [vmem:[%s11983_s2 + $0x130] sm:$0xff]  ;;  %v5333_v2 = vld [vmem:[%s11987_s6 + $0x2c0] sm:$0xff] }
 0x5ea   : > { %v4592_v62 = vsel %vm12844_vm4, %v4591_v49, %v4590_v39  ;;  %v4684_v27 = vperm.slane %v2928_v0, %v7668_v6  ;;  %v4797_v56 = vsel %vm12845_vm3, %v4468_v32, %v10916_v52  ;;  %v4683_v59 = vsel %vm3812_vm15, %v4682_v41, %v4681_v5  ;;  %vm12846_vm9 = vmmov %vm12845_vm3  ;;  %v3095_v21 = vld [vmem:[%s11983_s2 + $0x3b0] sm:$0xff] }
 0x5eb   : > { %v2942_v9 = vmul.f32 %v7394_v57, %v2355_v12  ;;  %v4788_v50 = vsel %vm12846_vm9, %v4437_v14, %v10907_v1  ;;  %vm12847_vm7 = vcmask 1046534   ;;  %v4705_v30 = vperm.slane %v2939_v55, %v12396_v44  ;;  %v3035_v44 = vld [vmem:[%s11983_s2 + $0x1d0] sm:$0xff] }
 0x5ec   : > { %v4798_v58 = vsel %vm12847_vm7, %v4592_v62, %v4797_v56  ;;  %v4685_v23 = vsel %vm12848_vm2, %v4684_v27, %v4683_v59  ;;  %vm12849_vm1 = vmmov %vm12847_vm7  ;;  %v4707_v52 = vperm.slane %v2940_v43, %v12420_v15  ;;  %vm12850_vm5 = vcmask 1047559   ;;  %v3011_v29 = vld [vmem:[%s11983_s2 + $0x110] sm:$0xff]  ;;  %v5369_v62 = vld [vmem:[%s11987_s6 + $0x3e0] sm:$0xff] }
 0x5ed   : > { %v4790_v24 = vsel %vm12849_vm1, %v4561_v51, %v4788_v50  ;;  %v4709_v7 = vperm.slane %v2941_v22, %v12418_v60  ;;  %v2361_v1 = vpop.xlane.xlu1 %2360  ;;  %v4704_v3 = vsel %vm3792_vm10, %v4703_v54, %v12851_v8  ;;  %v4711_v15 = vperm.slane %v2942_v9, %v12424_v16  ;;  %v3027_v54 = vld [vmem:[%s11983_s2 + $0x190] sm:$0xff]  ;;  %vm12852_vm10 = vmmov %vm12843_vm0  ;;  %v5329_v22 = vld [vmem:[%s11987_s6 + $0x2a0] sm:$0xff] }
 0x5ee   : > { %v11003_v25 = vsel %vm12850_vm5, %v4685_v23, %v4790_v24  ;;  %v2358_v46 = vpop.xlane.xlu0 %2357  ;;  %v2944_v13 = vmul.f32 %v7394_v57, %v2361_v1  ;;  %v4706_v60 = vsel %vm3796_vm11, %v4705_v30, %v4704_v3  ;;  %vm12853_vm11 = vmmov %vm12850_vm5  ;;  %v3091_v37 = vld [vmem:[%s11983_s2 + $0x390] sm:$0xff]  ;;  %v3040_v50 = vld [vmem:[%s11983_s2 + $0x1f8] sm:$0xff] }
 0x5ef   : > { %4834 = vmatmul.f32.vlgmr.msra.gmra.mxu0 %v11003_v25  ;;  %v2943_v18 = vmul.f32 %v7394_v57, %v2358_v46  ;;  %v4708_v47 = vsel %vm3800_vm12, %v4707_v52, %v4706_v60  ;;  %v3007_v33 = vld [vmem:[%s11983_s2 + $0xf0] sm:$0xff]  ;;  %v3036_v23 = vld [vmem:[%s11983_s2 + $0x1d8] sm:$0xff]  ;;  %v5325_v24 = vld [vmem:[%s11987_s6 + $0x280] sm:$0xff]  ;;  %vm5762_vm12 = vcmask 7168  }
 0x5f0   : > { %4978 = vmatpush.msra.mxu0 %v3039_v20  ;;  %v4715_v45 = vperm.slane %v2944_v13, %v7668_v6  ;;  %v4710_v4 = vsel %vm3804_vm13, %v4709_v7, %v4708_v47  ;;  %v3087_v28 = vld [vmem:[%s11983_s2 + $0x370] sm:$0xff]  ;;  %v5365_v20 = vld [vmem:[%s11987_s6 + $0x3c0] sm:$0xff]  ;;  %v11162_v52 = vpop.f32.mrf.mxu3  ;;  %v3032_v1 = vld [vmem:[%s11983_s2 + $0x1b8] sm:$0xff] }
 0x5f1   : > { %v4713_v16 = vperm.slane %v2943_v18, %v7558_v36  ;;  %v4712_v61 = vsel %vm3808_vm14, %v4711_v15, %v4710_v4  ;;  %v3103_v36 = vld [vmem:[%s11983_s2 + $0x3f0] sm:$0xff]  ;;  %v3028_v15 = vld [vmem:[%s11983_s2 + $0x198] sm:$0xff]  ;;  %v5321_v46 = vld [vmem:[%s11987_s6 + $0x260] sm:$0xff] }
 0x5f2   : > { %4979 = vmatpush.msra.mxu0 %v3035_v44  ;;  %v3003_v31 = vld [vmem:[%s11983_s2 + $0xd0] sm:$0xff]  ;;  %v5361_v13 = vld [vmem:[%s11987_s6 + $0x3a0] sm:$0xff]  ;;  %v3024_v18 = vld [vmem:[%s11983_s2 + $0x178] sm:$0xff] }
 0x5f3   : > { %v4714_v57 = vsel %vm3812_vm15, %v4713_v16, %v4712_v61  ;;  %v3083_v17 = vld [vmem:[%s11983_s2 + $0x350] sm:$0xff]  ;;  %v3104_v4 = vld [vmem:[%s11983_s2 + $0x3f8] sm:$0xff]  ;;  %v5357_v61 = vld [vmem:[%s11987_s6 + $0x380] sm:$0xff] }
 0x5f4   : > { %4980 = vmatpush.msra.mxu0 %v3031_v34  ;;  %v4716_v6 = vsel %vm12852_vm10, %v4715_v45, %v4714_v57  ;;  %v5339_v14 = vld [vmem:[%s11987_s6 + $0x2f0] sm:$0xff]  ;;  %v3020_v16 = vld [vmem:[%s11983_s2 + $0x158] sm:$0xff] }
 0x5f5   : > { %v11040_v42 = vsel %vm12853_vm11, %v4716_v6, %v4798_v58  ;;  %v2999_v55 = vld [vmem:[%s11983_s2 + $0xb0] sm:$0xff]  ;;  %5419 = vmatpush.msra.mxu2 %v5339_v14  ;;  %v11147_v58 = vpop.f32.mrf.mxu2  ;;  %v3016_v6 = vld [vmem:[%s11983_s2 + $0x138] sm:$0xff] }
 0x5f6   : > { %4981 = vmatpush.msra.mxu0 %v3027_v54  ;;  %4854 = vmatmul.f32.vlgmr.msra.gmra.mxu1 %v11040_v42  ;;  %v3079_v11 = vld [vmem:[%s11983_s2 + $0x330] sm:$0xff]  ;;  %v5317_v54 = vld [vmem:[%s11987_s6 + $0x240] sm:$0xff]  ;;  %v3088_v14 = vld [vmem:[%s11983_s2 + $0x378] sm:$0xff] }
 0x5f7   : > { %4914 = vmatmul.f32.vlgmr.msrb.gmra.mxu0 %v11003_v25  ;;  %4998 = vmatpush.msra.mxu1 %v3103_v36  ;;  %v2995_v12 = vld [vmem:[%s11983_s2 + $0x90] sm:$0xff] }
 0x5f8   : > { %4982 = vmatpush.msra.mxu0 %v3023_v53  ;;  %5420 = vmatpush.msra.mxu2 %v5337_v63  ;;  %v3075_v10 = vld [vmem:[%s11983_s2 + $0x310] sm:$0xff]  ;;  %v11214_v57 = vpop.f32.mrf.mxu3  ;;  %v3100_v53 = vld [vmem:[%s11983_s2 + $0x3d8] sm:$0xff]  ;;  %v5349_v63 = vld [vmem:[%s11987_s6 + $0x340] sm:$0xff] }
 0x5f9   : > { %4999 = vmatpush.msra.mxu1 %v3099_v26  ;;  %v5335_v41 = vld [vmem:[%s11987_s6 + $0x2d0] sm:$0xff]  ;;  %v3096_v26 = vld [vmem:[%s11983_s2 + $0x3b8] sm:$0xff] }
 0x5fa   : > { %4983 = vmatpush.msra.mxu0 %v3019_v35  ;;  %v2991_v32 = vld [vmem:[%s11983_s2 + $0x70] sm:$0xff]  ;;  %5421 = vmatpush.msra.mxu2 %v5335_v41  ;;  %v5340_v41 = vld [vmem:[%s11987_s6 + $0x2f8] sm:$0xff] }
 0x5fb   : > { %5000 = vmatpush.msra.mxu1 %v3095_v21  ;;  %v3071_v19 = vld [vmem:[%s11983_s2 + $0x2f0] sm:$0xff]  ;;  %v5313_v21 = vld [vmem:[%s11987_s6 + $0x220] sm:$0xff] }
 0x5fc   : > { %4984 = vmatpush.msra.mxu0 %v3015_v40  ;;  %v2987_v49 = vld [vmem:[%s11983_s2 + $0x50] sm:$0xff]  ;;  %5422 = vmatpush.msra.mxu2 %v5333_v2  ;;  %v3012_v40 = vld [vmem:[%s11983_s2 + $0x118] sm:$0xff] }
 0x5fd   : > { %5001 = vmatpush.msra.mxu1 %v3091_v37  ;;  %v3067_v0 = vld [vmem:[%s11983_s2 + $0x2d0] sm:$0xff]  ;;  %v11200_v45 = vpop.f32.mrf.mxu2  ;;  %v3092_v37 = vld [vmem:[%s11983_s2 + $0x398] sm:$0xff] }
 0x5fe   : > { %4985 = vmatpush.msra.mxu0 %v3011_v29  ;;  %4934 = vmatmul.f32.vlgmr.msrb.gmra.mxu1 %v11040_v42  ;;  %v5331_v43 = vld [vmem:[%s11987_s6 + $0x2b0] sm:$0xff]  ;;  %v5353_v29 = vld [vmem:[%s11987_s6 + $0x360] sm:$0xff]  ;;  %v3080_v2 = vld [vmem:[%s11983_s2 + $0x338] sm:$0xff] }
 0x5ff   : > { %5002 = vmatpush.msra.mxu1 %v3087_v28  ;;  %v5371_v5 = vld [vmem:[%s11987_s6 + $0x3f0] sm:$0xff]  ;;  %5423 = vmatpush.msra.mxu2 %v5331_v43  ;;  %v5345_v43 = vld [vmem:[%s11987_s6 + $0x320] sm:$0xff] }
 0x600   : > { %4986 = vmatpush.msra.mxu0 %v3007_v33  ;;  %v2983_v51 = vld [vmem:[%s11983_s2 + $0x30] sm:$0xff]  ;;  %5439 = vmatpush.msra.mxu3 %v5371_v5  ;;  %v3008_v33 = vld [vmem:[%s11983_s2 + $0xf8] sm:$0xff] }
 0x601   : > { %5003 = vmatpush.msra.mxu1 %v3083_v17  ;;  %v3063_v39 = vld [vmem:[%s11983_s2 + $0x2b0] sm:$0xff]  ;;  %5424 = vmatpush.msra.mxu2 %v5329_v22  ;;  %v3076_v5 = vld [vmem:[%s11983_s2 + $0x318] sm:$0xff] }
 0x602   : > { %4987 = vmatpush.msra.mxu0 %v3003_v31  ;;  %v2979_v27 = vld [vmem:[%s11983_s2 + $0x10] sm:$0xff]  ;;  %5440 = vmatpush.msra.mxu3 %v5369_v62  ;;  %v3072_v62 = vld [vmem:[%s11983_s2 + $0x2f8] sm:$0xff] }
 0x603   : > { %5004 = vmatpush.msra.mxu1 %v3079_v11  ;;  %v3059_v56 = vld [vmem:[%s11983_s2 + $0x290] sm:$0xff]  ;;  %v5309_v11 = vld [vmem:[%s11987_s6 + $0x200] sm:$0xff] }
 0x604   : > { %4988 = vmatpush.msra.mxu0 %v2999_v55  ;;  %v5327_v59 = vld [vmem:[%s11987_s6 + $0x290] sm:$0xff]  ;;  %v3004_v55 = vld [vmem:[%s11983_s2 + $0xd8] sm:$0xff] }
 0x605   : > { %5005 = vmatpush.msra.mxu1 %v3075_v10  ;;  %v5367_v9 = vld [vmem:[%s11987_s6 + $0x3d0] sm:$0xff]  ;;  %5425 = vmatpush.msra.mxu2 %v5327_v59  ;;  %v11253_v17 = vpop.f32.mrf.mxu2  ;;  %v3084_v10 = vld [vmem:[%s11983_s2 + $0x358] sm:$0xff] }
 0x606   : > { %4989 = vmatpush.msra.mxu0 %v2995_v12  ;;  %v3055_v30 = vld [vmem:[%s11983_s2 + $0x270] sm:$0xff]  ;;  %5441 = vmatpush.msra.mxu3 %v5367_v9  ;;  %v11267_v12 = vpop.f32.mrf.mxu3  ;;  %v2988_v59 = vld [vmem:[%s11983_s2 + $0x58] sm:$0xff]  ;;  %v5341_v9 = vld [vmem:[%s11987_s6 + $0x300] sm:$0xff] }
 0x607   : > { %5006 = vmatpush.msra.mxu1 %v3071_v19  ;;  %v3051_v7 = vld [vmem:[%s11983_s2 + $0x250] sm:$0xff]  ;;  %5426 = vmatpush.msra.mxu2 %v5325_v24  ;;  %v2984_v24 = vld [vmem:[%s11983_s2 + $0x38] sm:$0xff] }
 0x608   : > { %4990 = vmatpush.msra.mxu0 %v2991_v32  ;;  %5442 = vmatpush.msra.mxu3 %v5365_v20  ;;  %v5323_v44 = vld [vmem:[%s11987_s6 + $0x270] sm:$0xff]  ;;  %v3000_v32 = vld [vmem:[%s11983_s2 + $0xb8] sm:$0xff] }
 0x609   : > { %5007 = vmatpush.msra.mxu1 %v3067_v0  ;;  %v5363_v8 = vld [vmem:[%s11987_s6 + $0x3b0] sm:$0xff]  ;;  %5427 = vmatpush.msra.mxu2 %v5323_v44  ;;  %v2996_v0 = vld [vmem:[%s11983_s2 + $0x98] sm:$0xff] }
 0x60a   : > { %4991 = vmatpush.msra.mxu0 %v2987_v49  ;;  %v3047_v3 = vld [vmem:[%s11983_s2 + $0x230] sm:$0xff]  ;;  %5443 = vmatpush.msra.mxu3 %v5363_v8  ;;  %v5338_v49 = vld [vmem:[%s11987_s6 + $0x2e8] sm:$0xff]  ;;  %v5372_v20 = vld [vmem:[%s11987_s6 + $0x3f8] sm:$0xff] }
 0x60b   : > { %5008 = vmatpush.msra.mxu1 %v3063_v39  ;;  %v3043_v60 = vld [vmem:[%s11983_s2 + $0x210] sm:$0xff]  ;;  %5428 = vmatpush.msra.mxu2 %v5321_v46  ;;  %v2992_v39 = vld [vmem:[%s11983_s2 + $0x78] sm:$0xff]  ;;  %v11345_v8 = vld [vmem:[%s11986_s5] sm:$0xf] }
 0x60c   : > { %4992 = vmatpush.msra.mxu0 %v2983_v51  ;;  %5444 = vmatpush.msra.mxu3 %v5361_v13  ;;  %v5319_v34 = vld [vmem:[%s11987_s6 + $0x250] sm:$0xff]  ;;  %v5336_v51 = vld [vmem:[%s11987_s6 + $0x2d8] sm:$0xff] }
 0x60d   : > { %5009 = vmatpush.msra.mxu1 %v3059_v56  ;;  %v5359_v47 = vld [vmem:[%s11987_s6 + $0x390] sm:$0xff]  ;;  %5429 = vmatpush.msra.mxu2 %v5319_v34  ;;  %v5334_v56 = vld [vmem:[%s11987_s6 + $0x2c8] sm:$0xff]  ;;  %v2980_v44 = vld [vmem:[%s11983_s2 + $0x18] sm:$0xff]  ;;  %v5151_v34 = vperm.slane %v11345_v8, 2 }
 0x60e   : > { %4993 = vmatpush.msra.mxu0 %v2979_v27  ;;  %5445 = vmatpush.msra.mxu3 %v5359_v47  ;;  %v5315_v36 = vld [vmem:[%s11987_s6 + $0x230] sm:$0xff]  ;;  %v5328_v13 = vld [vmem:[%s11987_s6 + $0x298] sm:$0xff] }
 0x60f   : > { %4994 = vmatmul.f32.vlgmr.msra.gmra.mxu0 %v11003_v25  ;;  %5010 = vmatpush.msra.mxu1 %v3055_v30  ;;  %v5355_v35 = vld [vmem:[%s11987_s6 + $0x370] sm:$0xff] }
 0x610   : > { %5058 = vmatpush.msrb.mxu0 %v3040_v50  ;;  %5430 = vmatpush.msra.mxu2 %v5317_v54  ;;  %v5311_v28 = vld [vmem:[%s11987_s6 + $0x210] sm:$0xff]  ;;  %v3068_v50 = vld [vmem:[%s11983_s2 + $0x2d8] sm:$0xff] }
 0x611   : > { %5011 = vmatpush.msra.mxu1 %v3051_v7  ;;  %5446 = vmatpush.msra.mxu3 %v5357_v61  ;;  %v5351_v31 = vld [vmem:[%s11987_s6 + $0x350] sm:$0xff]  ;;  %v3064_v7 = vld [vmem:[%s11983_s2 + $0x2b8] sm:$0xff]  ;;  %v5366_v61 = vld [vmem:[%s11987_s6 + $0x3c8] sm:$0xff] }
 0x612   : > { %5059 = vmatpush.msrb.mxu0 %v3036_v23  ;;  %5431 = vmatpush.msra.mxu2 %v5315_v36  ;;  %v5347_v19 = vld [vmem:[%s11987_s6 + $0x330] sm:$0xff]  ;;  %v5332_v23 = vld [vmem:[%s11987_s6 + $0x2b8] sm:$0xff] }
 0x613   : > { %5012 = vmatpush.msra.mxu1 %v3047_v3  ;;  %5447 = vmatpush.msra.mxu3 %v5355_v35  ;;  %v5343_v22 = vld [vmem:[%s11987_s6 + $0x310] sm:$0xff]  ;;  %v5370_v3 = vld [vmem:[%s11987_s6 + $0x3e8] sm:$0xff]  ;;  %v3052_v54 = vld [vmem:[%s11983_s2 + $0x258] sm:$0xff] }
 0x614   : > { %5060 = vmatpush.msrb.mxu0 %v3032_v1  ;;  %5432 = vmatpush.msra.mxu2 %v5313_v21  ;;  %v5330_v1 = vld [vmem:[%s11987_s6 + $0x2a8] sm:$0xff]  ;;  %v5275_v46 = vld [vmem:[%s11987_s6 + $0xf0] sm:$0xff]  ;;  %v5324_v35 = vld [vmem:[%s11987_s6 + $0x278] sm:$0xff] }
 0x615   : > { %5013 = vmatpush.msra.mxu1 %v3043_v60  ;;  %5448 = vmatpush.msra.mxu3 %v5353_v29  ;;  %v3056_v60 = vld [vmem:[%s11983_s2 + $0x278] sm:$0xff]  ;;  %v5269_v21 = vld [vmem:[%s11987_s6 + $0xc0] sm:$0xff]  ;;  %v5322_v29 = vld [vmem:[%s11987_s6 + $0x268] sm:$0xff] }
 0x616   : > { %5061 = vmatpush.msrb.mxu0 %v3028_v15  ;;  %5014 = vmatmul.f32.vlgmr.msra.gmra.mxu1 %v11040_v42  ;;  %v3060_v15 = vld [vmem:[%s11983_s2 + $0x298] sm:$0xff] }
 0x617   : > { %5078 = vmatpush.msrb.mxu1 %v3104_v4  ;;  %5433 = vmatpush.msra.mxu2 %v5311_v28  ;;  %v5273_v4 = vld [vmem:[%s11987_s6 + $0xe0] sm:$0xff]  ;;  %v5362_v28 = vld [vmem:[%s11987_s6 + $0x3a8] sm:$0xff] }
 0x618   : > { %5062 = vmatpush.msrb.mxu0 %v3024_v18  ;;  %5449 = vmatpush.msra.mxu3 %v5351_v31  ;;  %v5368_v18 = vld [vmem:[%s11987_s6 + $0x3d8] sm:$0xff]  ;;  %v5267_v31 = vld [vmem:[%s11987_s6 + $0xb0] sm:$0xff] }
 0x619   : > { %5079 = vmatpush.msrb.mxu1 %v3100_v53  ;;  %5434 = vmatpush.msra.mxu2 %v5309_v11  ;;  %v5271_v53 = vld [vmem:[%s11987_s6 + $0xd0] sm:$0xff]  ;;  %v5265_v11 = vld [vmem:[%s11987_s6 + $0xa0] sm:$0xff] }
 0x61a   : > { %5063 = vmatpush.msrb.mxu0 %v3020_v16  ;;  %5450 = vmatpush.msra.mxu3 %v5349_v63  ;;  %v5326_v16 = vld [vmem:[%s11987_s6 + $0x288] sm:$0xff]  ;;  %v5320_v63 = vld [vmem:[%s11987_s6 + $0x258] sm:$0xff] }
 0x61b   : > { %5080 = vmatpush.msrb.mxu1 %v3096_v26  ;;  %5499 = vmatpush.msrb.mxu2 %v5340_v41  ;;  %v11308_v27 = vpop.f32.mrf.mxu2  ;;  %v3048_v26 = vld [vmem:[%s11983_s2 + $0x238] sm:$0xff] }
 0x61c   : > { %5064 = vmatpush.msrb.mxu0 %v3016_v6  ;;  %5451 = vmatpush.msra.mxu3 %v5347_v19  ;;  %v5263_v19 = vld [vmem:[%s11987_s6 + $0x90] sm:$0xff] }
 0x61d   : > { %5081 = vmatpush.msrb.mxu1 %v3092_v37  ;;  %5500 = vmatpush.msrb.mxu2 %v5338_v49  ;;  %v11322_v30 = vpop.f32.mrf.mxu3  ;;  %v3044_v37 = vld [vmem:[%s11983_s2 + $0x218] sm:$0xff]  ;;  %v5261_v49 = vld [vmem:[%s11987_s6 + $0x80] sm:$0xff] }
 0x61e   : > { %5065 = vmatpush.msrb.mxu0 %v3012_v40  ;;  %5452 = vmatpush.msra.mxu3 %v5345_v43  ;;  %v5364_v40 = vld [vmem:[%s11987_s6 + $0x3b8] sm:$0xff]  ;;  %v5301_v43 = vld [vmem:[%s11987_s6 + $0x1c0] sm:$0xff] }
 0x61f   : > { %5082 = vmatpush.msrb.mxu1 %v3088_v14  ;;  %5501 = vmatpush.msrb.mxu2 %v5336_v51  ;;  %v5259_v51 = vld [vmem:[%s11987_s6 + $0x70] sm:$0xff] }
 0x620   : > { %5066 = vmatpush.msrb.mxu0 %v3008_v33  ;;  %5453 = vmatpush.msra.mxu3 %v5343_v22  ;;  %v5299_v22 = vld [vmem:[%s11987_s6 + $0x1b0] sm:$0xff] }
 0x621   : > { %5083 = vmatpush.msrb.mxu1 %v3084_v10  ;;  %5502 = vmatpush.msrb.mxu2 %v5334_v56  ;;  %v5305_v10 = vld [vmem:[%s11987_s6 + $0x1e0] sm:$0xff] }
 0x622   : > { %5067 = vmatpush.msrb.mxu0 %v3004_v55  ;;  %5454 = vmatpush.msra.mxu3 %v5341_v9  ;;  %v5307_v55 = vld [vmem:[%s11987_s6 + $0x1f0] sm:$0xff]  ;;  %v5257_v56 = vld [vmem:[%s11987_s6 + $0x60] sm:$0xff] }
 0x623   : > { %5084 = vmatpush.msrb.mxu1 %v3080_v2  ;;  %5503 = vmatpush.msrb.mxu2 %v5332_v23  ;;  %v5218_v47 = vpop.f32.mrf.mxu2  ;;  %v5318_v2 = vld [vmem:[%s11987_s6 + $0x248] sm:$0xff]  ;;  %v5297_v9 = vld [vmem:[%s11987_s6 + $0x1a0] sm:$0xff]  ;;  %v5255_v23 = vld [vmem:[%s11987_s6 + $0x50] sm:$0xff] }
 0x624   : > { %5068 = vmatpush.msrb.mxu0 %v3000_v32  ;;  %5519 = vmatpush.msrb.mxu3 %v5372_v20  ;;  %v11383_v6 = vadd.f32 %v5218_v47, %v5151_v34  ;;  %v5360_v32 = vld [vmem:[%s11987_s6 + $0x398] sm:$0xff]  ;;  %v5295_v20 = vld [vmem:[%s11987_s6 + $0x190] sm:$0xff]  ;;  %v5249_v47 = vld [vmem:[%s11987_s6 + $0x20] sm:$0xff] }
 0x625   : > { %5085 = vmatpush.msrb.mxu1 %v3076_v5  ;;  %5504 = vmatpush.msrb.mxu2 %v5330_v1  ;;  %v5238_v36 = vpop.f32.mrf.mxu3  ;;  %v5316_v5 = vld [vmem:[%s11987_s6 + $0x238] sm:$0xff]  ;;  %v5253_v1 = vld [vmem:[%s11987_s6 + $0x40] sm:$0xff]  ;;  %v5555_v34 = vld [vmem:[%s11989_s8 + $0x70] sm:$0xff] }
 0x626   : > { %5069 = vmatpush.msrb.mxu0 %v2996_v0  ;;  %5520 = vmatpush.msrb.mxu3 %v5370_v3  ;;  %v5243_v14 = vmax.f32 %v11383_v6, 0.0  ;;  %v5358_v0 = vld [vmem:[%s11987_s6 + $0x388] sm:$0xff]  ;;  %v5149_v3 = vperm.slane %v11345_v8, 0  ;;  %v5569_v6 = vld [vmem:[%s11989_s8 + $0xe0] sm:$0xff] }
 0x627   : > { %5086 = vmatpush.msrb.mxu1 %v3072_v62  ;;  %5505 = vmatpush.msrb.mxu2 %v5328_v13  ;;  %v5314_v62 = vld [vmem:[%s11987_s6 + $0x228] sm:$0xff]  ;;  %v5251_v13 = vld [vmem:[%s11987_s6 + $0x30] sm:$0xff] }
 0x628   : > { %5070 = vmatpush.msrb.mxu0 %v2992_v39  ;;  %5521 = vmatpush.msrb.mxu3 %v5368_v18  ;;  %v5356_v39 = vld [vmem:[%s11987_s6 + $0x378] sm:$0xff]  ;;  %v5291_v18 = vld [vmem:[%s11987_s6 + $0x170] sm:$0xff] }
 0x629   : > { %5087 = vmatpush.msrb.mxu1 %v3068_v50  ;;  %5506 = vmatpush.msrb.mxu2 %v5326_v16  ;;  %v5312_v50 = vld [vmem:[%s11987_s6 + $0x218] sm:$0xff]  ;;  %v11522_v16 = vadd.f32 %v11308_v27, %v5149_v3  ;;  %v5545_v3 = vld [vmem:[%s11989_s8 + $0x20] sm:$0xff] }
 0x62a   : > { %5071 = vmatpush.msrb.mxu0 %v2988_v59  ;;  %5522 = vmatpush.msrb.mxu3 %v5366_v61  ;;  %v5354_v59 = vld [vmem:[%s11987_s6 + $0x368] sm:$0xff]  ;;  %v5344_v27 = vld [vmem:[%s11987_s6 + $0x318] sm:$0xff] }
 0x62b   : > { %5088 = vmatpush.msrb.mxu1 %v3064_v7  ;;  %5507 = vmatpush.msrb.mxu2 %v5324_v35  ;;  %v5310_v7 = vld [vmem:[%s11987_s6 + $0x208] sm:$0xff]  ;;  %v5245_v35 = vld [vmem:[%s11987_s6] sm:$0xff] }
 0x62c   : > { %5072 = vmatpush.msrb.mxu0 %v2984_v24  ;;  %5523 = vmatpush.msrb.mxu3 %v5364_v40  ;;  %v5352_v24 = vld [vmem:[%s11987_s6 + $0x358] sm:$0xff]  ;;  %v5554_v61 = vld [vmem:[%s11989_s8 + $0x68] sm:$0xff]  ;;  %v5241_v40 = vmax.f32 %v11522_v16, 0.0 }
 0x62d   : > { %5089 = vmatpush.msrb.mxu1 %v3060_v15  ;;  %5508 = vmatpush.msrb.mxu2 %v5322_v29  ;;  %v5293_v15 = vld [vmem:[%s11987_s6 + $0x180] sm:$0xff]  ;;  %v5280_v16 = vld [vmem:[%s11987_s6 + $0x118] sm:$0xff] }
 0x62e   : > { %5073 = vmatpush.msrb.mxu0 %v2980_v44  ;;  %5524 = vmatpush.msrb.mxu3 %v5362_v28  ;;  %v5350_v44 = vld [vmem:[%s11987_s6 + $0x348] sm:$0xff]  ;;  %v5285_v29 = vld [vmem:[%s11987_s6 + $0x140] sm:$0xff]  ;;  %v5552_v28 = vld [vmem:[%s11989_s8 + $0x58] sm:$0xff] }
 0x62f   : > { %5074 = vmatmul.f32.vlgmr.msrb.gmra.mxu0 %v11003_v25  ;;  %v5152_v25 = vperm.slane %v11345_v8, 3  ;;  %5090 = vmatpush.msrb.mxu1 %v3056_v60  ;;  %v5348_v60 = vld [vmem:[%s11987_s6 + $0x338] sm:$0xff] }
 0x630   : > { %5379 = vmatpush.msra.mxu0 %v5275_v46  ;;  %5435 = vmatmul.f32.vlgmr.msra.gmra.mxu2 %v5243_v14  ;;  %v5556_v46 = vld [vmem:[%s11989_s8 + $0x78] sm:$0xff] }
 0x631   : > { %5091 = vmatpush.msrb.mxu1 %v3052_v54  ;;  %v11403_v33 = vadd.f32 %v5238_v36, %v5152_v25  ;;  %5509 = vmatpush.msrb.mxu2 %v5320_v63  ;;  %v5289_v54 = vld [vmem:[%s11987_s6 + $0x160] sm:$0xff]  ;;  %v5247_v25 = vld [vmem:[%s11987_s6 + $0x10] sm:$0xff] }
 0x632   : > { %5380 = vmatpush.msra.mxu0 %v5273_v4  ;;  %5525 = vmatpush.msrb.mxu3 %v5360_v32  ;;  %v5346_v4 = vld [vmem:[%s11987_s6 + $0x328] sm:$0xff]  ;;  %v5553_v36 = vld [vmem:[%s11989_s8 + $0x60] sm:$0xff]  ;;  %v5272_v32 = vld [vmem:[%s11987_s6 + $0xd8] sm:$0xff] }
 0x633   : > { %5092 = vmatpush.msrb.mxu1 %v3048_v26  ;;  %v5244_v41 = vmax.f32 %v11403_v33, 0.0  ;;  %5510 = vmatpush.msrb.mxu2 %v5318_v2  ;;  %v5342_v26 = vld [vmem:[%s11987_s6 + $0x308] sm:$0xff]  ;;  %v5547_v33 = vld [vmem:[%s11989_s8 + $0x30] sm:$0xff] }
 0x634   : > { %5381 = vmatpush.msra.mxu0 %v5271_v53  ;;  %5526 = vmatpush.msrb.mxu3 %v5358_v0  ;;  %v5287_v53 = vld [vmem:[%s11987_s6 + $0x150] sm:$0xff]  ;;  %v5550_v2 = vld [vmem:[%s11989_s8 + $0x48] sm:$0xff] }
 0x635   : > { %5093 = vmatpush.msrb.mxu1 %v3044_v37  ;;  %5455 = vmatmul.f32.vlgmr.msra.gmra.mxu3 %v5244_v41  ;;  %v5276_v37 = vld [vmem:[%s11987_s6 + $0xf8] sm:$0xff] }
 0x636   : > { %5382 = vmatpush.msra.mxu0 %v5269_v21  ;;  %5094 = vmatmul.f32.vlgmr.msrb.gmra.mxu1 %v11040_v42  ;;  %v5303_v42 = vld [vmem:[%s11987_s6 + $0x1d0] sm:$0xff]  ;;  %v5150_v21 = vperm.slane %v11345_v8, 1 }
 0x637   : > { %5399 = vmatpush.msra.mxu1 %v5307_v55  ;;  %5511 = vmatpush.msrb.mxu2 %v5316_v5  ;;  %v5283_v8 = vld [vmem:[%s11987_s6 + $0x130] sm:$0xff]  ;;  %v5572_v55 = vld [vmem:[%s11989_s8 + $0xf8] sm:$0xff] }
 0x638   : > { %5383 = vmatpush.msra.mxu0 %v5267_v31  ;;  %5527 = vmatpush.msrb.mxu3 %v5356_v39  ;;  %v5274_v31 = vld [vmem:[%s11987_s6 + $0xe8] sm:$0xff]  ;;  %v11572_v63 = vadd.f32 %v11322_v30, %v5150_v21  ;;  %v5279_v30 = vld [vmem:[%s11987_s6 + $0x110] sm:$0xff]  ;;  %v5268_v5 = vld [vmem:[%s11987_s6 + $0xb8] sm:$0xff] }
 0x639   : > { %5400 = vmatpush.msra.mxu1 %v5305_v10  ;;  %5512 = vmatpush.msrb.mxu2 %v5314_v62  ;;  %v5281_v10 = vld [vmem:[%s11987_s6 + $0x120] sm:$0xff]  ;;  %v5266_v39 = vld [vmem:[%s11987_s6 + $0xa8] sm:$0xff]  ;;  %v5264_v62 = vld [vmem:[%s11987_s6 + $0x98] sm:$0xff] }
 0x63a   : > { %5384 = vmatpush.msra.mxu0 %v5265_v11  ;;  %5528 = vmatpush.msrb.mxu3 %v5354_v59  ;;  %v5551_v11 = vld [vmem:[%s11989_s8 + $0x50] sm:$0xff]  ;;  %v5242_v0 = vmax.f32 %v11572_v63, 0.0  ;;  %v5568_v59 = vld [vmem:[%s11989_s8 + $0xd8] sm:$0xff]  ;;  %v5561_v21 = vld [vmem:[%s11989_s8 + $0xa0] sm:$0xff] }
 0x63b   : > { %5401 = vmatpush.msra.mxu1 %v5303_v42  ;;  %5513 = vmatpush.msrb.mxu2 %v5312_v50  ;;  %v5270_v42 = vld [vmem:[%s11987_s6 + $0xc8] sm:$0xff] }
 0x63c   : > { %5385 = vmatpush.msra.mxu0 %v5263_v19  ;;  %5529 = vmatpush.msrb.mxu3 %v5352_v24  ;;  %v5571_v19 = vld [vmem:[%s11989_s8 + $0xf0] sm:$0xff]  ;;  %v5262_v50 = vld [vmem:[%s11987_s6 + $0x88] sm:$0xff]  ;;  %v5260_v24 = vld [vmem:[%s11987_s6 + $0x78] sm:$0xff] }
 0x63d   : > { %5402 = vmatpush.msra.mxu1 %v5301_v43  ;;  %5514 = vmatpush.msrb.mxu2 %v5310_v7  ;;  %v5277_v43 = vld [vmem:[%s11987_s6 + $0x100] sm:$0xff]  ;;  %v5566_v7 = vld [vmem:[%s11989_s8 + $0xc8] sm:$0xff] }
 0x63e   : > { %5386 = vmatpush.msra.mxu0 %v5261_v49  ;;  %5530 = vmatpush.msrb.mxu3 %v5350_v44  ;;  %v5570_v49 = vld [vmem:[%s11989_s8 + $0xe8] sm:$0xff] }
 0x63f   : > { %5403 = vmatpush.msra.mxu1 %v5299_v22  ;;  %5677 = vmatpush.msra.mxu2 %v5556_v46  ;;  %v5549_v22 = vld [vmem:[%s11989_s8 + $0x40] sm:$0xff]  ;;  %v5258_v44 = vld [vmem:[%s11987_s6 + $0x68] sm:$0xff] }
 0x640   : > { %5387 = vmatpush.msra.mxu0 %v5259_v51  ;;  %5531 = vmatpush.msrb.mxu3 %v5348_v60  ;;  %v5308_v51 = vld [vmem:[%s11987_s6 + $0x1f8] sm:$0xff]  ;;  %v5298_v46 = vld [vmem:[%s11987_s6 + $0x1a8] sm:$0xff] }
 0x641   : > { %5404 = vmatpush.msra.mxu1 %v5297_v9  ;;  %5678 = vmatpush.msra.mxu2 %v5555_v34  ;;  %v5304_v9 = vld [vmem:[%s11987_s6 + $0x1d8] sm:$0xff]  ;;  %v5618_v63 = vld [vmem:[%s11990_s9 + $0x68] sm:$0xff] }
 0x642   : > { %5388 = vmatpush.msra.mxu0 %v5257_v56  ;;  %5532 = vmatpush.msrb.mxu3 %v5346_v4  ;;  %v5548_v56 = vld [vmem:[%s11989_s8 + $0x38] sm:$0xff]  ;;  %v5543_v4 = vld [vmem:[%s11989_s8 + $0x10] sm:$0xff] }
 0x643   : > { %5405 = vmatpush.msra.mxu1 %v5295_v20  ;;  %5679 = vmatpush.msra.mxu2 %v5554_v61  ;;  %v5546_v20 = vld [vmem:[%s11989_s8 + $0x28] sm:$0xff]  ;;  %v5544_v60 = vld [vmem:[%s11989_s8 + $0x18] sm:$0xff] }
 0x644   : > { %5389 = vmatpush.msra.mxu0 %v5255_v23  ;;  %5533 = vmatpush.msrb.mxu3 %v5344_v27  ;;  %v5302_v23 = vld [vmem:[%s11987_s6 + $0x1c8] sm:$0xff]  ;;  %v5296_v34 = vld [vmem:[%s11987_s6 + $0x198] sm:$0xff] }
 0x645   : > { %5406 = vmatpush.msra.mxu1 %v5293_v15  ;;  %5680 = vmatpush.msra.mxu2 %v5553_v36  ;;  %v5565_v15 = vld [vmem:[%s11989_s8 + $0xc0] sm:$0xff]  ;;  %v5294_v61 = vld [vmem:[%s11987_s6 + $0x188] sm:$0xff]  ;;  %v5292_v36 = vld [vmem:[%s11987_s6 + $0x178] sm:$0xff] }
 0x646   : > { %5390 = vmatpush.msra.mxu0 %v5253_v1  ;;  %5534 = vmatpush.msrb.mxu3 %v5342_v26  ;;  %v5300_v1 = vld [vmem:[%s11987_s6 + $0x1b8] sm:$0xff]  ;;  %v5542_v27 = vld [vmem:[%s11989_s8 + $0x8] sm:$0xff]  ;;  %v5541_v26 = vld [vmem:[%s11989_s8] sm:$0xff] }
 0x647   : > { %5407 = vmatpush.msra.mxu1 %v5291_v18  ;;  %5681 = vmatpush.msra.mxu2 %v5552_v28  ;;  %v5564_v18 = vld [vmem:[%s11989_s8 + $0xb8] sm:$0xff] }
 0x648   : > { %5391 = vmatpush.msra.mxu0 %v5251_v13  ;;  %5697 = vmatpush.msra.mxu3 %v5572_v55  ;;  %v5256_v13 = vld [vmem:[%s11987_s6 + $0x58] sm:$0xff]  ;;  %v5559_v55 = vld [vmem:[%s11989_s8 + $0x90] sm:$0xff] }
 0x649   : > { %5408 = vmatpush.msra.mxu1 %v5289_v54  ;;  %5682 = vmatpush.msra.mxu2 %v5551_v11  ;;  %v5563_v54 = vld [vmem:[%s11989_s8 + $0xb0] sm:$0xff]  ;;  %v5560_v28 = vld [vmem:[%s11989_s8 + $0x98] sm:$0xff]  ;;  %v5286_v11 = vld [vmem:[%s11987_s6 + $0x148] sm:$0xff] }
 0x64a   : > { %5392 = vmatpush.msra.mxu0 %v5249_v47  ;;  %5698 = vmatpush.msra.mxu3 %v5571_v19  ;;  %v5254_v47 = vld [vmem:[%s11987_s6 + $0x48] sm:$0xff]  ;;  %v5284_v19 = vld [vmem:[%s11987_s6 + $0x138] sm:$0xff] }
 0x64b   : > { %5409 = vmatpush.msra.mxu1 %v5287_v53  ;;  %5515 = vmatmul.f32.vlgmr.msrb.gmra.mxu2 %v5243_v14  ;;  %v5306_v14 = vld [vmem:[%s11987_s6 + $0x1e8] sm:$0xff] }
 0x64c   : > { %5393 = vmatpush.msra.mxu0 %v5247_v25  ;;  %5683 = vmatpush.msra.mxu2 %v5550_v2  ;;  %v5252_v25 = vld [vmem:[%s11987_s6 + $0x38] sm:$0xff]  ;;  %v5562_v53 = vld [vmem:[%s11989_s8 + $0xa8] sm:$0xff] }
 0x64d   : > { %5410 = vmatpush.msra.mxu1 %v5285_v29  ;;  %5699 = vmatpush.msra.mxu3 %v5570_v49  ;;  %v5290_v29 = vld [vmem:[%s11987_s6 + $0x168] sm:$0xff] }
 0x64e   : > { %5394 = vmatpush.msra.mxu0 %v5245_v35  ;;  %5535 = vmatmul.f32.vlgmr.msrb.gmra.mxu3 %v5244_v41  ;;  %v5567_v41 = vld [vmem:[%s11989_s8 + $0xd0] sm:$0xff]  ;;  %v5250_v35 = vld [vmem:[%s11987_s6 + $0x28] sm:$0xff] }
 0x64f   : > { %5395 = vmatmul.f32.vlgmr.msra.gmra.mxu0 %v5241_v40  ;;  %5411 = vmatpush.msra.mxu1 %v5283_v8  ;;  %v5288_v8 = vld [vmem:[%s11987_s6 + $0x158] sm:$0xff]  ;;  %v5282_v49 = vld [vmem:[%s11987_s6 + $0x128] sm:$0xff] }
 0x650   : > { %5459 = vmatpush.msrb.mxu0 %v5276_v37  ;;  %5684 = vmatpush.msra.mxu2 %v5549_v22  ;;  %v5248_v37 = vld [vmem:[%s11987_s6 + $0x18] sm:$0xff] }
 0x651   : > { %5412 = vmatpush.msra.mxu1 %v5281_v10  ;;  %5700 = vmatpush.msra.mxu3 %v5569_v6  ;;  %v11742_v10 = vld [vmem:[%s11984_s3] sm:$0xf] }
 0x652   : > { %5460 = vmatpush.msrb.mxu0 %v5274_v31  ;;  %5685 = vmatpush.msra.mxu2 %v5548_v56  ;;  %v5246_v31 = vld [vmem:[%s11987_s6 + $0x8] sm:$0xff]  ;;  %v3235_v2 = vperm.slane %v11742_v10, 0  ;;  %v5619_v56 = vld [vmem:[%s11990_s9 + $0x70] sm:$0xff] }
 0x653   : > { %5413 = vmatpush.msra.mxu1 %v5279_v30  ;;  %5701 = vmatpush.msra.mxu3 %v5568_v59 }
 0x654   : > { %5461 = vmatpush.msrb.mxu0 %v5272_v32  ;;  %5686 = vmatpush.msra.mxu2 %v5547_v33  ;;  %v5558_v32 = vld [vmem:[%s11989_s8 + $0x88] sm:$0xff]  ;;  %v5616_v33 = vld [vmem:[%s11990_s9 + $0x58] sm:$0xff] }
 0x655   : > { %5414 = vmatpush.msra.mxu1 %v5277_v43  ;;  %5702 = vmatpush.msra.mxu3 %v5567_v41  ;;  %v5278_v43 = vld [vmem:[%s11987_s6 + $0x108] sm:$0xff]  ;;  %v5615_v41 = vld [vmem:[%s11990_s9 + $0x50] sm:$0xff] }
 0x656   : > { %5462 = vmatpush.msrb.mxu0 %v5270_v42  ;;  %5415 = vmatmul.f32.vlgmr.msra.gmra.mxu1 %v5242_v0  ;;  %v5557_v42 = vld [vmem:[%s11989_s8 + $0x80] sm:$0xff] }
 0x657   : > { %5479 = vmatpush.msrb.mxu1 %v5308_v51  ;;  %5687 = vmatpush.msra.mxu2 %v5546_v20  ;;  %v5610_v20 = vld [vmem:[%s11990_s9 + $0x28] sm:$0xff] }
 0x658   : > { %5463 = vmatpush.msrb.mxu0 %v5268_v5  ;;  %5703 = vmatpush.msra.mxu3 %v5566_v7  ;;  %v5609_v7 = vld [vmem:[%s11990_s9 + $0x20] sm:$0xff] }
 0x659   : > { %5480 = vmatpush.msrb.mxu1 %v5306_v14  ;;  %5688 = vmatpush.msra.mxu2 %v5545_v3  ;;  %v5608_v3 = vld [vmem:[%s11990_s9 + $0x18] sm:$0xff] }
 0x65a   : > { %5464 = vmatpush.msrb.mxu0 %v5266_v39  ;;  %5704 = vmatpush.msra.mxu3 %v5565_v15  ;;  %v3236_v39 = vperm.slane %v11742_v10, 1  ;;  %v5634_v15 = vld [vmem:[%s11990_s9 + $0xe8] sm:$0xff] }
 0x65b   : > { %5481 = vmatpush.msrb.mxu1 %v5304_v9  ;;  %5689 = vmatpush.msra.mxu2 %v5544_v60  ;;  %v5606_v60 = vld [vmem:[%s11990_s9 + $0x8] sm:$0xff] }
 0x65c   : > { %5465 = vmatpush.msrb.mxu0 %v5264_v62  ;;  %5705 = vmatpush.msra.mxu3 %v5564_v18  ;;  %v5620_v62 = vld [vmem:[%s11990_s9 + $0x78] sm:$0xff] }
 0x65d   : > { %5482 = vmatpush.msrb.mxu1 %v5302_v23  ;;  %5690 = vmatpush.msra.mxu2 %v5543_v4  ;;  %v5612_v23 = vld [vmem:[%s11990_s9 + $0x38] sm:$0xff] }
 0x65e   : > { %5466 = vmatpush.msrb.mxu0 %v5262_v50  ;;  %5706 = vmatpush.msra.mxu3 %v5563_v54  ;;  %v5617_v50 = vld [vmem:[%s11990_s9 + $0x60] sm:$0xff]  ;;  %v5632_v18 = vld [vmem:[%s11990_s9 + $0xd8] sm:$0xff]  ;;  %v5587_v54 = vld [vmem:[%s11989_s8 + $0x170] sm:$0xff] }
 0x65f   : > { %5483 = vmatpush.msrb.mxu1 %v5300_v1  ;;  %5691 = vmatpush.msra.mxu2 %v5542_v27  ;;  %v5636_v1 = vld [vmem:[%s11990_s9 + $0xf8] sm:$0xff] }
 0x660   : > { %5467 = vmatpush.msrb.mxu0 %v5260_v24  ;;  %5707 = vmatpush.msra.mxu3 %v5562_v53  ;;  %v5611_v24 = vld [vmem:[%s11990_s9 + $0x30] sm:$0xff]  ;;  %v5588_v4 = vld [vmem:[%s11989_s8 + $0x178] sm:$0xff]  ;;  %v5630_v53 = vld [vmem:[%s11990_s9 + $0xc8] sm:$0xff] }
 0x661   : > { %5484 = vmatpush.msrb.mxu1 %v5298_v46  ;;  %5692 = vmatpush.msra.mxu2 %v5541_v26  ;;  %v5607_v46 = vld [vmem:[%s11990_s9 + $0x10] sm:$0xff]  ;;  %v5584_v27 = vld [vmem:[%s11989_s8 + $0x158] sm:$0xff]  ;;  %v5629_v26 = vld [vmem:[%s11990_s9 + $0xc0] sm:$0xff] }
 0x662   : > { %5468 = vmatpush.msrb.mxu0 %v5258_v44  ;;  %5708 = vmatpush.msra.mxu3 %v5561_v21  ;;  %v5635_v44 = vld [vmem:[%s11990_s9 + $0xf0] sm:$0xff]  ;;  %v5581_v21 = vld [vmem:[%s11989_s8 + $0x140] sm:$0xff] }
 0x663   : > { %5485 = vmatpush.msrb.mxu1 %v5296_v34  ;;  %v5605_v34 = vld [vmem:[%s11990_s9] sm:$0xff] }
 0x664   : > { %5469 = vmatpush.msrb.mxu0 %v5256_v13  ;;  %5709 = vmatpush.msra.mxu3 %v5560_v28  ;;  %v5633_v13 = vld [vmem:[%s11990_s9 + $0xe0] sm:$0xff]  ;;  %v5627_v28 = vld [vmem:[%s11990_s9 + $0xb0] sm:$0xff] }
 0x665   : > { %5486 = vmatpush.msrb.mxu1 %v5294_v61  ;;  %v5586_v61 = vld [vmem:[%s11989_s8 + $0x168] sm:$0xff] }
 0x666   : > { %5470 = vmatpush.msrb.mxu0 %v5254_v47  ;;  %5710 = vmatpush.msra.mxu3 %v5559_v55  ;;  %v5631_v47 = vld [vmem:[%s11990_s9 + $0xd0] sm:$0xff]  ;;  %v5578_v55 = vld [vmem:[%s11989_s8 + $0x128] sm:$0xff] }
 0x667   : > { %5487 = vmatpush.msrb.mxu1 %v5292_v36  ;;  %v5583_v36 = vld [vmem:[%s11989_s8 + $0x150] sm:$0xff] }
 0x668   : > { %5471 = vmatpush.msrb.mxu0 %v5252_v25  ;;  %5711 = vmatpush.msra.mxu3 %v5558_v32  ;;  %v5585_v25 = vld [vmem:[%s11989_s8 + $0x160] sm:$0xff] }
 0x669   : > { %5488 = vmatpush.msrb.mxu1 %v5290_v29  ;;  %v5628_v29 = vld [vmem:[%s11990_s9 + $0xb8] sm:$0xff]  ;;  %v5577_v32 = vld [vmem:[%s11989_s8 + $0x120] sm:$0xff] }
 0x66a   : > { %5472 = vmatpush.msrb.mxu0 %v5250_v35  ;;  %5712 = vmatpush.msra.mxu3 %v5557_v42  ;;  %v5582_v35 = vld [vmem:[%s11989_s8 + $0x148] sm:$0xff] }
 0x66b   : > { %5489 = vmatpush.msrb.mxu1 %v5288_v8  ;;  %v5579_v8 = vld [vmem:[%s11989_s8 + $0x130] sm:$0xff] }
 0x66c   : > { %5473 = vmatpush.msrb.mxu0 %v5248_v37  ;;  %v4835_v30 = vpop.f32.mrf.mxu0  ;;  %v5580_v37 = vld [vmem:[%s11989_s8 + $0x138] sm:$0xff] }
 0x66d   : > { %5490 = vmatpush.msrb.mxu1 %v5286_v11  ;;  %v5625_v11 = vld [vmem:[%s11990_s9 + $0xa0] sm:$0xff] }
 0x66e   : > { %5474 = vmatpush.msrb.mxu0 %v5246_v31  ;;  %v5626_v31 = vld [vmem:[%s11990_s9 + $0xa8] sm:$0xff] }
 0x66f   : > { %5475 = vmatmul.f32.vlgmr.msrb.gmra.mxu0 %v5241_v40  ;;  %5491 = vmatpush.msrb.mxu1 %v5284_v19  ;;  %v4836_v40 = vadd.f32 %v4835_v30, %v3235_v2  ;;  %v5624_v19 = vld [vmem:[%s11990_s9 + $0x98] sm:$0xff]  ;;  %v5623_v2 = vld [vmem:[%s11990_s9 + $0x90] sm:$0xff] }
 0x670   : > { %5637 = vmatpush.msra.mxu0 %v5620_v62  ;;  %v5576_v30 = vld [vmem:[%s11989_s8 + $0x118] sm:$0xff]  ;;  %v5373_v62 = vld [vmem:[%s11988_s7] sm:$0x3] }
 0x671   : > { %5492 = vmatpush.msrb.mxu1 %v5282_v49  ;;  %v5575_v49 = vld [vmem:[%s11989_s8 + $0x110] sm:$0xff] }
 0x672   : > { %5638 = vmatpush.msra.mxu0 %v5619_v56  ;;  %v5601_v56 = vld [vmem:[%s11989_s8 + $0x1e0] sm:$0xff] }
 0x673   : > { %5493 = vmatpush.msrb.mxu1 %v5280_v16  ;;  %v4855_v5 = vpop.f32.mrf.mxu1  ;;  %v5622_v16 = vld [vmem:[%s11990_s9 + $0x88] sm:$0xff] }
 0x674   : > { %v4856_v51 = vadd.f32 %v4855_v5, %v4836_v40  ;;  %v4915_v6 = vpop.f32.mrf.mxu0  ;;  %5639 = vmatpush.msra.mxu0 %v5618_v63  ;;  %v5574_v40 = vld [vmem:[%s11989_s8 + $0x108] sm:$0xff]  ;;  %v5573_v5 = vld [vmem:[%s11989_s8 + $0x100] sm:$0xff] }
 0x675   : > { %5494 = vmatpush.msrb.mxu1 %v5278_v43  ;;  %v4916_v59 = vadd.f32 %v4915_v6, %v3236_v39  ;;  %v5621_v43 = vld [vmem:[%s11990_s9 + $0x80] sm:$0xff]  ;;  %v5604_v39 = vld [vmem:[%s11989_s8 + $0x1f8] sm:$0xff] }
 0x676   : > { %5495 = vmatmul.f32.vlgmr.msrb.gmra.mxu1 %v5242_v0  ;;  %v4876_v22 = vadd.f32 %v11089_v38, %v4856_v51  ;;  %5640 = vmatpush.msra.mxu0 %v5617_v50 }
 0x677   : > { %5657 = vmatpush.msra.mxu1 %v5636_v1  ;;  %v5595_v1 = vld [vmem:[%s11989_s8 + $0x1b0] sm:$0xff] }
 0x678   : > { %v4896_v14 = vadd.f32 %v11100_v48, %v4876_v22  ;;  %5641 = vmatpush.msra.mxu0 %v5616_v33  ;;  %v5603_v22 = vld [vmem:[%s11989_s8 + $0x1f0] sm:$0xff]  ;;  %v5597_v33 = vld [vmem:[%s11989_s8 + $0x1c0] sm:$0xff] }
 0x679   : > { %5658 = vmatpush.msra.mxu1 %v5635_v44 }
 0x67a   : > { %5693 = vmatmul.f32.vlgmr.msra.gmra.mxu2 %v4896_v14  ;;  %5642 = vmatpush.msra.mxu0 %v5615_v41  ;;  %v5602_v14 = vld [vmem:[%s11989_s8 + $0x1e8] sm:$0xff] }
 0x67b   : > { %v4935_v0 = vpop.f32.mrf.mxu1  ;;  %5659 = vmatpush.msra.mxu1 %v5634_v15  ;;  %v5594_v15 = vld [vmem:[%s11989_s8 + $0x1a8] sm:$0xff] }
 0x67c   : > { %v4936_v38 = vadd.f32 %v4935_v0, %v4916_v59  ;;  %v5600_v59 = vld [vmem:[%s11989_s8 + $0x1d8] sm:$0xff]  ;;  %v5375_v0 = vperm.slane %v5373_v62, 0 }
 0x67d   : > { %5660 = vmatpush.msra.mxu1 %v5633_v13 }
 0x67e   : > { %v4956_v48 = vadd.f32 %v11147_v58, %v4936_v38  ;;  %v5614_v58 = vld [vmem:[%s11990_s9 + $0x48] sm:$0xff]  ;;  %v5599_v38 = vld [vmem:[%s11989_s8 + $0x1d0] sm:$0xff] }
 0x67f   : > { %5643 = vmatpush.msra.mxu0 %v5614_v58  ;;  %5661 = vmatpush.msra.mxu1 %v5632_v18  ;;  %v5592_v18 = vld [vmem:[%s11989_s8 + $0x198] sm:$0xff] }
 0x680   : > { %v4976_v9 = vadd.f32 %v11162_v52, %v4956_v48  ;;  %v5613_v52 = vld [vmem:[%s11990_s9 + $0x40] sm:$0xff] }
 0x681   : > { %5644 = vmatpush.msra.mxu0 %v5613_v52  ;;  %5662 = vmatpush.msra.mxu1 %v5631_v47  ;;  %v3237_v52 = vperm.slane %v11742_v10, 2 }
 0x682   : > { %5713 = vmatmul.f32.vlgmr.msra.gmra.mxu3 %v4976_v9  ;;  %v5598_v9 = vld [vmem:[%s11989_s8 + $0x1c8] sm:$0xff] }
 0x683   : > { %5645 = vmatpush.msra.mxu0 %v5612_v23  ;;  %5663 = vmatpush.msra.mxu1 %v5630_v53 }
 0x685   : > { %5646 = vmatpush.msra.mxu0 %v5611_v24  ;;  %5664 = vmatpush.msra.mxu1 %v5629_v26  ;;  %v5596_v24 = vld [vmem:[%s11989_s8 + $0x1b8] sm:$0xff] }
 0x687   : > { %5647 = vmatpush.msra.mxu0 %v5610_v20  ;;  %5665 = vmatpush.msra.mxu1 %v5628_v29 }
 0x689   : > { %5648 = vmatpush.msra.mxu0 %v5609_v7  ;;  %5666 = vmatpush.msra.mxu1 %v5627_v28 }
 0x68b   : > { %5649 = vmatpush.msra.mxu0 %v5608_v3  ;;  %5667 = vmatpush.msra.mxu1 %v5626_v31 }
 0x68c   : > { %v4995_v42 = vpop.f32.mrf.mxu0 }
 0x68d   : > { %5650 = vmatpush.msra.mxu0 %v5607_v46  ;;  %5668 = vmatpush.msra.mxu1 %v5625_v11  ;;  %v4996_v44 = vadd.f32 %v4995_v42, %v3237_v52 }
 0x68f   : > { %5651 = vmatpush.msra.mxu0 %v5606_v60  ;;  %5669 = vmatpush.msra.mxu1 %v5624_v19  ;;  %v5593_v60 = vld [vmem:[%s11989_s8 + $0x1a0] sm:$0xff] }
 0x691   : > { %5652 = vmatpush.msra.mxu0 %v5605_v34  ;;  %5670 = vmatpush.msra.mxu1 %v5623_v2  ;;  %v5591_v34 = vld [vmem:[%s11989_s8 + $0x190] sm:$0xff] }
 0x693   : > { %5717 = vmatpush.msrb.mxu0 %v5588_v4  ;;  %5671 = vmatpush.msra.mxu1 %v5622_v16  ;;  %v5015_v51 = vpop.f32.mrf.mxu1  ;;  %v5590_v4 = vld [vmem:[%s11989_s8 + $0x188] sm:$0xff] }
 0x694   : > { %v5016_v46 = vadd.f32 %v5015_v51, %v4996_v44 }
 0x695   : > { %5718 = vmatpush.msrb.mxu0 %v5587_v54  ;;  %5672 = vmatpush.msra.mxu1 %v5621_v43  ;;  %v5589_v54 = vld [vmem:[%s11989_s8 + $0x180] sm:$0xff] }
 0x696   : > { %v5036_v47 = vadd.f32 %v11200_v45, %v5016_v46  ;;  %v3238_v45 = vperm.slane %v11742_v10, 3 }
 0x697   : > { %5719 = vmatpush.msrb.mxu0 %v5586_v61  ;;  %5737 = vmatpush.msrb.mxu1 %v5604_v39 }
 0x698   : > { %v5056_v61 = vadd.f32 %v11214_v57, %v5036_v47 }
 0x699   : > { %5720 = vmatpush.msrb.mxu0 %v5585_v25  ;;  %5738 = vmatpush.msrb.mxu1 %v5603_v22  ;;  %v5376_v25 = vperm.slane %v5373_v62, 1 }
 0x69b   : > { %5721 = vmatpush.msrb.mxu0 %v5584_v27  ;;  %5739 = vmatpush.msrb.mxu1 %v5602_v14 }
 0x69d   : > { %5722 = vmatpush.msrb.mxu0 %v5583_v36  ;;  %5740 = vmatpush.msrb.mxu1 %v5601_v56 }
 0x69f   : > { %5723 = vmatpush.msrb.mxu0 %v5582_v35  ;;  %5741 = vmatpush.msrb.mxu1 %v5600_v59 }
 0x6a1   : > { %5724 = vmatpush.msrb.mxu0 %v5581_v21  ;;  %5742 = vmatpush.msrb.mxu1 %v5599_v38 }
 0x6a3   : > { %5725 = vmatpush.msrb.mxu0 %v5580_v37  ;;  %5743 = vmatpush.msrb.mxu1 %v5598_v9 }
 0x6a5   : > { %5726 = vmatpush.msrb.mxu0 %v5579_v8  ;;  %5744 = vmatpush.msrb.mxu1 %v5597_v33 }
 0x6a7   : > { %5727 = vmatpush.msrb.mxu0 %v5578_v55  ;;  %5745 = vmatpush.msrb.mxu1 %v5596_v24 }
 0x6a9   : > { %5728 = vmatpush.msrb.mxu0 %v5577_v32  ;;  %5746 = vmatpush.msrb.mxu1 %v5595_v1 }
 0x6ab   : > { %5729 = vmatpush.msrb.mxu0 %v5576_v30  ;;  %5747 = vmatpush.msrb.mxu1 %v5594_v15 }
 0x6ac   : > { %v5075_v6 = vpop.f32.mrf.mxu0 }
 0x6ad   : > { %5730 = vmatpush.msrb.mxu0 %v5575_v49  ;;  %5748 = vmatpush.msrb.mxu1 %v5593_v60  ;;  %v5076_v37 = vadd.f32 %v5075_v6, %v3238_v45 }
 0x6af   : > { %5731 = vmatpush.msrb.mxu0 %v5574_v40  ;;  %5749 = vmatpush.msrb.mxu1 %v5592_v18  ;;  %v5855_v40 = vld [vmem:[#allocation2] ss:$0 sm:$0xff] }
 0x6b1   : > { %5732 = vmatpush.msrb.mxu0 %v5573_v5  ;;  %5750 = vmatpush.msrb.mxu1 %v5591_v34 }
 0x6b3   : > { %v5095_v63 = vpop.f32.mrf.mxu1  ;;  %v5436_v58 = vpop.f32.mrf.mxu2  ;;  %5751 = vmatpush.msrb.mxu1 %v5590_v4 }
 0x6b4   : > { %v5096_v8 = vadd.f32 %v5095_v63, %v5076_v37 }
 0x6b5   : > { %5752 = vmatpush.msrb.mxu1 %v5589_v54 }
 0x6b6   : > { %v5116_v57 = vadd.f32 %v11253_v17, %v5096_v8 }
 0x6b8   : > { %v5456_v20 = vpop.f32.mrf.mxu3  ;;  %v5136_v55 = vadd.f32 %v11267_v12, %v5116_v57 }
 0x6cc   : > { %v5396_v48 = vpop.f32.mrf.mxu0 }
 0x6cd   : > { %v5397_v50 = vadd.f32 %v5396_v48, %v5375_v0 }
 0x6ce   : > { %v5516_v26 = vpop.f32.mrf.mxu2 }
 0x6d1   : > { %v5536_v29 = vpop.f32.mrf.mxu3 }
 0x6d3   : > { %v5416_v41 = vpop.f32.mrf.mxu1 }
 0x6d4   : > { %v5417_v23 = vadd.f32 %v5416_v41, %v5397_v50 }
 0x6d6   : > { %v5437_v7 = vadd.f32 %v5436_v58, %v5417_v23 }
 0x6d8   : > { %v5457_v3 = vadd.f32 %v5456_v20, %v5437_v7 }
 0x6da   : > { %v5539_v13 = vmax.f32 %v5457_v3, 0.0 }
 0x6dc   : > { %5653 = vmatmul.f32.vlgmr.msra.gmra.mxu0 %v5539_v13 }
 0x6e4   : > { %5733 = vmatmul.f32.vlgmr.msrb.gmra.mxu0 %v5056_v61 }
 0x6ec   : > { %v5476_v27 = vpop.f32.mrf.mxu0 }
 0x6ed   : > { %v5477_v53 = vadd.f32 %v5476_v27, %v5376_v25 }
 0x6f3   : > { %v5496_v36 = vpop.f32.mrf.mxu1 }
 0x6f4   : > { %v5497_v35 = vadd.f32 %v5496_v36, %v5477_v53 }
 0x6f6   : > { %v5517_v21 = vadd.f32 %v5516_v26, %v5497_v35 }
 0x6f8   : > { %v5537_v28 = vadd.f32 %v5536_v29, %v5517_v21 }
 0x6fa   : > { %v5540_v31 = vmax.f32 %v5537_v28, 0.0 }
 0x6fc   : > { %5673 = vmatmul.f32.vlgmr.msra.gmra.mxu1 %v5540_v31 }
 0x6fd   : > { %v5694_v30 = vpop.f32.mrf.mxu2 }
 0x704   : > { %5753 = vmatmul.f32.vlgmr.msrb.gmra.mxu1 %v5136_v55 }
 0x705   : > { %v5714_v42 = vpop.f32.mrf.mxu3 }
 0x759   : > { %v5654_v11 = vpop.f32.mrf.mxu0 }
 0x761   : > { %v5734_v49 = vpop.f32.mrf.mxu0 }
 0x779   : > { %v5674_v32 = vpop.f32.mrf.mxu1 }
 0x77a   : > { %v5675_v19 = vadd.f32 %v5674_v32, %v5654_v11 }
 0x77c   : > { %v5695_v10 = vadd.f32 %v5694_v30, %v5675_v19 }
 0x77e   : > { %v5715_v2 = vadd.f32 %v5714_v42, %v5695_v10 }
 0x780   : > { %v5735_v16 = vadd.f32 %v5734_v49, %v5715_v2 }
 0x781   : > { %v5754_v43 = vpop.f32.mrf.mxu1 }
 0x782   : > { %v5755_v5 = vadd.f32 %v5754_v43, %v5735_v16 }
 0x784   : > { %v5761_v17 = vadd.f32 %v5855_v40, %v5755_v5 }
 0x786   : > { %5763 = vst.msk [vmem:[%s408_s24] sm:$0xff] %vm5762_vm12, %v5761_v17 }
 0x787 PF: > { %s23_s19 = sadd.s32 1, %s5864_s19  }
 0x788   : > { %p20_p5 = scmp.ge.s32.totalorder %s23_s19, 4  }
 0x78a   :  { %22 = sbr.rel (!%p20_p5) target bundleno = 3 (0x3), region = 97 }

</bundles_post_ra>
